<compile_context>
chip_gen: v7x
topology: tpu7x:2x2x1
jax: 0.10.0
libtpu: 0.0.40
codegen_flags: <defaults>
</compile_context>

<pallas_src>
import functools

import jax
import jax.numpy as jnp
from jax.experimental import pallas as pl
from jax.experimental.pallas import tpu as pltpu


IN, H1, H2, OUT = 6670, 1024, 256, 2
K_PAD = 6784  # 6670 rounded up to a multiple of 128


def _net_kernel(x_ref, w1_ref, s1_ref, b1_ref, w2_ref, b2_ref, w3_ref, b3_ref,
                o_ref, h1_ref, *, n_block):
    j = pl.program_id(0)

    # --- fc1 tile: relu((x @ dequant(w1[:, tile])) + b1[tile]) -> (B, n_block)
    # int8 -> bf16 cast is exact (|q| <= 127); dot accumulates in f32 on MXU;
    # per-output-column dequant scale is applied to the f32 accumulator.
    w1_bf16 = w1_ref[...].astype(jnp.bfloat16)
    acc = jnp.dot(x_ref[...], w1_bf16, preferred_element_type=jnp.float32)
    h1 = jnp.maximum(acc * s1_ref[...] + b1_ref[...], 0.0)
    start = pl.multiple_of(j * n_block, n_block)
    h1_ref[:, pl.ds(start, n_block)] = h1.astype(h1_ref.dtype)

    # --- epilogue on the last fc1 tile: fc2 -> relu -> fc3 -------------------
    @pl.when(j == pl.num_programs(0) - 1)
    def _():
        h2 = jnp.dot(h1_ref[...], w2_ref[...],
                     preferred_element_type=jnp.float32)
        h2 = jnp.maximum(h2 + b2_ref[...], 0.0)
        y = jnp.dot(h2, w3_ref[...], preferred_element_type=jnp.float32)
        o_ref[...] = (y + b3_ref[...]).astype(o_ref.dtype)


def net_forward(x, w1_q, w1_scale, b1, w2, b2, w3, b3, *, n_block=512):
    """Fused fc1->relu->fc2->relu->fc3 forward pass as one Pallas kernel."""
    B, K = x.shape
    Kp = w1_q.shape[0]
    assert Kp % 128 == 0 and Kp >= K, (Kp, K)
    assert H1 % n_block == 0, (H1, n_block)
    grid = (H1 // n_block,)

    # Zero-pad the fc1 contraction axis (padded x columns meet zero w1 rows)
    # and pre-cast to bf16 once in the wrapper (halves x DMA, drops the
    # per-grid-step in-kernel cast).
    if Kp > K:
        x = jnp.pad(x, ((0, 0), (0, Kp - K)))
    x = x.astype(jnp.bfloat16)

    kernel = functools.partial(_net_kernel, n_block=n_block)
    return pl.pallas_call(
        kernel,
        out_shape=jax.ShapeDtypeStruct((B, OUT), jnp.float32),
        grid_spec=pltpu.PrefetchScalarGridSpec(
            num_scalar_prefetch=0,
            grid=grid,
            in_specs=[
                pl.BlockSpec((B, Kp), lambda j: (0, 0)),         # x (bf16, padded)
                pl.BlockSpec((Kp, n_block), lambda j: (0, j)),   # w1 tile (int8)
                pl.BlockSpec((1, n_block), lambda j: (0, j)),    # w1 per-col scale
                pl.BlockSpec((1, n_block), lambda j: (0, j)),    # b1 tile
                pl.BlockSpec((H1, H2), lambda j: (0, 0)),        # w2 (bf16), DMA'd once
                pl.BlockSpec((1, H2), lambda j: (0, 0)),         # b2
                pl.BlockSpec((H2, OUT), lambda j: (0, 0)),       # w3 (f32)
                pl.BlockSpec((1, OUT), lambda j: (0, 0)),        # b3
            ],
            out_specs=pl.BlockSpec((B, OUT), lambda j: (0, 0)),
            scratch_shapes=[pltpu.VMEM((B, H1), jnp.bfloat16)],  # resident h1
        ),
        compiler_params=pltpu.CompilerParams(
            # h1 scratch carries data across grid steps and the epilogue reads
            # all of it -> this axis must stay sequential (no megacore split of
            # the fused grid).  See TODO(synk) above for the v7x dual-TC option.
            dimension_semantics=("arbitrary",),
            # ~15.5 MiB true footprint (see header); 24 MiB documents the budget
            # and still exceeds v5e's 16 MiB default scoped-VMEM limit.
            vmem_limit_bytes=24 << 20,
        ),
    )(x, w1_q, w1_scale.reshape(1, H1), b1.reshape(1, H1),
      w2, b2.reshape(1, H2), w3, b3.reshape(1, OUT))


class NetPallas:
    """Deterministically-initialized JAX/Pallas port of the PyTorch Net."""

    IN, H1, H2, OUT = IN, H1, H2, OUT

    def __init__(self, key):
        k1, k2, k3, k4, k5, k6 = jax.random.split(key, 6)

        def init_linear(kw, kb, fan_in, fan_out):
            # PyTorch nn.Linear default init: U(-1/sqrt(fan_in), 1/sqrt(fan_in))
            bound = 1.0 / float(fan_in) ** 0.5
            w = jax.random.uniform(kw, (fan_in, fan_out), jnp.float32,
                                   minval=-bound, maxval=bound)
            b = jax.random.uniform(kb, (fan_out,), jnp.float32,
                                   minval=-bound, maxval=bound)
            return w, b

        # f32 master parameters (kept for the spec-faithful reference).
        w1, b1 = init_linear(k1, k2, IN, H1)
        w2, b2 = init_linear(k3, k4, H1, H2)
        w3, b3 = init_linear(k5, k6, H2, OUT)
        self.params_f32 = dict(w1=w1, b1=b1, w2=w2, b2=b2, w3=w3, b3=b3)

        # Kernel parameters.
        # fc1: per-output-column symmetric int8 (halves the dominant HBM stream).
        scale = jnp.maximum(jnp.max(jnp.abs(w1), axis=0), 1e-12) / 127.0
        w1_q = jnp.clip(jnp.round(w1 / scale), -127, 127).astype(jnp.int8)
        # Pad the fc1 contraction axis 6670 -> 6784 with zeros, once, at init.
        self.w1_q = jnp.pad(w1_q, ((0, K_PAD - IN), (0, 0)))
        self.w1_scale = scale
        self.b1 = b1
        # fc2: bf16 weights (0.5 MB, negligible traffic); fc3: tiny, keep f32.
        self.w2 = w2.astype(jnp.bfloat16)
        self.b2 = b2
        self.w3 = w3
        self.b3 = b3

    def __call__(self, x):
        return net_forward(x, self.w1_q, self.w1_scale, self.b1,
                           self.w2, self.b2, self.w3, self.b3, n_block=512)


def reference_forward_f32(params, x):
    """Full-f32 reference matching the PyTorch spec (HIGHEST-precision dots)."""
    hp = jax.lax.Precision.HIGHEST
    h1 = jnp.maximum(
        jnp.dot(x, params["w1"], precision=hp) + params["b1"], 0.0)
    h2 = jnp.maximum(
        jnp.dot(h1, params["w2"], precision=hp) + params["b2"], 0.0)
    return jnp.dot(h2, params["w3"], precision=hp) + params["b3"]


if __name__ == "__main__":
    key = jax.random.PRNGKey(0)
    k_params, k_x = jax.random.split(key)

    net = NetPallas(k_params)

    batch = 2  # NOTE: larger batches amortize the weight stream for free.
    x = jax.random.normal(k_x, (batch, IN), jnp.float32)

    out = jax.block_until_ready(net(x))
    ref = reference_forward_f32(net.params_f32, x)

    assert out.shape == (batch, OUT), out.shape
    # Fidelity check against the f32 spec (not the kernel's own reduced
    # precision); tolerance covers bf16 activations + int8 w1 quantization
    # (estimated |err| ~1e-3 on outputs of magnitude ~0.1).
    assert jnp.allclose(out, ref, atol=2e-2, rtol=2e-2), (out, ref)

    print("KERNEL_OK")
</pallas_src>

<mosaic_0001>
module attributes {stable_mosaic.version = 11 : i64} {
  func.func @_net_kernel(%arg0: i32, %arg1: memref<2x6784xbf16, #tpu.memory_space<vmem>>, %arg2: memref<6784x512xi8, #tpu.memory_space<vmem>>, %arg3: memref<1x512xf32, #tpu.memory_space<vmem>>, %arg4: memref<1x512xf32, #tpu.memory_space<vmem>>, %arg5: memref<1024x256xbf16, #tpu.memory_space<vmem>>, %arg6: memref<1x256xf32, #tpu.memory_space<vmem>>, %arg7: memref<256x2xf32, #tpu.memory_space<vmem>>, %arg8: memref<1x2xf32, #tpu.memory_space<vmem>>, %arg9: memref<2x2xf32, #tpu.memory_space<vmem>>, %arg10: memref<2x1024xbf16, #tpu.memory_space<vmem>>) attributes {dimension_semantics = [#tpu.dimension_semantics<arbitrary>], iteration_bounds = array<i64: 2>, scalar_prefetch = 0 : i64, scratch_operands = 1 : i64, tpu.core_type = #tpu.core_type<tc>, window_params = [{pipeline_mode = #tpu.pipeline_mode<synchronous>, transform_indices = @transform_0, window_bounds = array<i64: 2, 6784>}, {transform_indices = @transform_1, window_bounds = array<i64: 6784, 512>}, {transform_indices = @transform_2, window_bounds = array<i64: 1, 512>}, {transform_indices = @transform_3, window_bounds = array<i64: 1, 512>}, {pipeline_mode = #tpu.pipeline_mode<synchronous>, transform_indices = @transform_4, window_bounds = array<i64: 1024, 256>}, {pipeline_mode = #tpu.pipeline_mode<synchronous>, transform_indices = @transform_5, window_bounds = array<i64: 1, 256>}, {pipeline_mode = #tpu.pipeline_mode<synchronous>, transform_indices = @transform_6, window_bounds = array<i64: 256, 2>}, {pipeline_mode = #tpu.pipeline_mode<synchronous>, transform_indices = @transform_7, window_bounds = array<i64: 1, 2>}, {pipeline_mode = #tpu.pipeline_mode<synchronous>, transform_indices = @transform_8, window_bounds = array<i64: 2, 2>}]} {
    %c0 = arith.constant 0 : index
    %c0_0 = arith.constant 0 : index
    %0 = vector.load %arg2[%c0, %c0_0] : memref<6784x512xi8, #tpu.memory_space<vmem>>, vector<6784x512xi8>
    %1 = arith.sitofp %0 : vector<6784x512xi8> to vector<6784x512xbf16>
    %c0_1 = arith.constant 0 : index
    %c0_2 = arith.constant 0 : index
    %2 = vector.load %arg1[%c0_1, %c0_2] : memref<2x6784xbf16, #tpu.memory_space<vmem>>, vector<2x6784xbf16>
    %cst = arith.constant dense<0.000000e+00> : vector<2x512xf32>
    %3 = tpu.matmul %2, %1, %cst {dimension_numbers = #tpu.dot_dimension_numbers<[1], [0], [0], [1], [0, 0, 1, 1], [], []>} : vector<2x6784xbf16>, vector<6784x512xbf16>, vector<2x512xf32> -> vector<2x512xf32>
    %c0_3 = arith.constant 0 : index
    %c0_4 = arith.constant 0 : index
    %4 = vector.load %arg3[%c0_3, %c0_4] : memref<1x512xf32, #tpu.memory_space<vmem>>, vector<1x512xf32>
    %5 = vector.broadcast %4 : vector<1x512xf32> to vector<2x512xf32>
    %6 = arith.mulf %3, %5 : vector<2x512xf32>
    %c0_5 = arith.constant 0 : index
    %c0_6 = arith.constant 0 : index
    %7 = vector.load %arg4[%c0_5, %c0_6] : memref<1x512xf32, #tpu.memory_space<vmem>>, vector<1x512xf32>
    %8 = vector.broadcast %7 : vector<1x512xf32> to vector<2x512xf32>
    %9 = arith.addf %6, %8 : vector<2x512xf32>
    %cst_7 = arith.constant 0.000000e+00 : f32
    %10 = vector.broadcast %cst_7 : f32 to vector<2x512xf32>
    %11 = arith.maximumf %9, %10 : vector<2x512xf32>
    %c512_i32 = arith.constant 512 : i32
    %12 = arith.muli %arg0, %c512_i32 : i32
    %13 = tpu.assume_multiple %12, 512 : i32
    %14 = arith.truncf %11 : vector<2x512xf32> to vector<2x512xbf16>
    %c0_8 = arith.constant 0 : index
    %15 = arith.index_cast %13 : i32 to index
    %16 = vector.load %arg10[%c0_8, %15] : memref<2x1024xbf16, #tpu.memory_space<vmem>>, vector<2x512xbf16>
    tpu.vector_store %arg10[%c0_8, %15], %14 {strides = array<i32>} : memref<2x1024xbf16, #tpu.memory_space<vmem>>, vector<2x512xbf16>,
    %c1_i32 = arith.constant 1 : i32
    %17 = arith.cmpi eq, %arg0, %c1_i32 : i32
    %18 = arith.extui %17 : i1 to i32
    %c0_i32 = arith.constant 0 : i32
    %19 = arith.cmpi ne, %18, %c0_i32 : i32
    scf.if %19 {
      %c0_9 = arith.constant 0 : index
      %c0_10 = arith.constant 0 : index
      %20 = vector.load %arg10[%c0_9, %c0_10] : memref<2x1024xbf16, #tpu.memory_space<vmem>>, vector<2x1024xbf16>
      %c0_11 = arith.constant 0 : index
      %c0_12 = arith.constant 0 : index
      %21 = vector.load %arg5[%c0_11, %c0_12] : memref<1024x256xbf16, #tpu.memory_space<vmem>>, vector<1024x256xbf16>
      %cst_13 = arith.constant dense<0.000000e+00> : vector<2x256xf32>
      %22 = tpu.matmul %20, %21, %cst_13 {dimension_numbers = #tpu.dot_dimension_numbers<[1], [0], [0], [1], [0, 0, 1, 1], [], []>} : vector<2x1024xbf16>, vector<1024x256xbf16>, vector<2x256xf32> -> vector<2x256xf32>
      %c0_14 = arith.constant 0 : index
      %c0_15 = arith.constant 0 : index
      %23 = vector.load %arg6[%c0_14, %c0_15] : memref<1x256xf32, #tpu.memory_space<vmem>>, vector<1x256xf32>
      %24 = vector.broadcast %23 : vector<1x256xf32> to vector<2x256xf32>
      %25 = arith.addf %22, %24 : vector<2x256xf32>
      %cst_16 = arith.constant 0.000000e+00 : f32
      %26 = vector.broadcast %cst_16 : f32 to vector<2x256xf32>
      %27 = arith.maximumf %25, %26 : vector<2x256xf32>
      %c0_17 = arith.constant 0 : index
      %c0_18 = arith.constant 0 : index
      %28 = vector.load %arg7[%c0_17, %c0_18] : memref<256x2xf32, #tpu.memory_space<vmem>>, vector<256x2xf32>
      %cst_19 = arith.constant dense<0.000000e+00> : vector<2x2xf32>
      %29 = tpu.matmul %27, %28, %cst_19 {dimension_numbers = #tpu.dot_dimension_numbers<[1], [0], [0], [1], [0, 0, 1, 1], [], []>} : vector<2x256xf32>, vector<256x2xf32>, vector<2x2xf32> -> vector<2x2xf32>
      %c0_20 = arith.constant 0 : index
      %c0_21 = arith.constant 0 : index
      %30 = vector.load %arg8[%c0_20, %c0_21] : memref<1x2xf32, #tpu.memory_space<vmem>>, vector<1x2xf32>
      %31 = vector.broadcast %30 : vector<1x2xf32> to vector<2x2xf32>
      %32 = arith.addf %29, %31 : vector<2x2xf32>
      %c0_22 = arith.constant 0 : index
      %c0_23 = arith.constant 0 : index
      %33 = vector.load %arg9[%c0_22, %c0_23] : memref<2x2xf32, #tpu.memory_space<vmem>>, vector<2x2xf32>
      tpu.vector_store %arg9[%c0_22, %c0_23], %32 {strides = array<i32>} : memref<2x2xf32, #tpu.memory_space<vmem>>, vector<2x2xf32>,
    } else {
    }
    return
  }
  func.func @transform_0(%arg0: i32) -> (i32, i32) {
    %c0_i32 = arith.constant 0 : i32
    %c0_i32_0 = arith.constant 0 : i32
    %c0_i32_1 = arith.constant 0 : i32
    return %c0_i32, %c0_i32_0 : i32, i32
  }
  func.func @transform_1(%arg0: i32) -> (i32, i32) {
    %c0_i32 = arith.constant 0 : i32
    %c0_i32_0 = arith.constant 0 : i32
    return %c0_i32, %arg0 : i32, i32
  }
  func.func @transform_2(%arg0: i32) -> (i32, i32) {
    %c0_i32 = arith.constant 0 : i32
    %c0_i32_0 = arith.constant 0 : i32
    return %c0_i32, %arg0 : i32, i32
  }
  func.func @transform_3(%arg0: i32) -> (i32, i32) {
    %c0_i32 = arith.constant 0 : i32
    %c0_i32_0 = arith.constant 0 : i32
    return %c0_i32, %arg0 : i32, i32
  }
  func.func @transform_4(%arg0: i32) -> (i32, i32) {
    %c0_i32 = arith.constant 0 : i32
    %c0_i32_0 = arith.constant 0 : i32
    %c0_i32_1 = arith.constant 0 : i32
    return %c0_i32, %c0_i32_0 : i32, i32
  }
  func.func @transform_5(%arg0: i32) -> (i32, i32) {
    %c0_i32 = arith.constant 0 : i32
    %c0_i32_0 = arith.constant 0 : i32
    %c0_i32_1 = arith.constant 0 : i32
    return %c0_i32, %c0_i32_0 : i32, i32
  }
  func.func @transform_6(%arg0: i32) -> (i32, i32) {
    %c0_i32 = arith.constant 0 : i32
    %c0_i32_0 = arith.constant 0 : i32
    %c0_i32_1 = arith.constant 0 : i32
    return %c0_i32, %c0_i32_0 : i32, i32
  }
  func.func @transform_7(%arg0: i32) -> (i32, i32) {
    %c0_i32 = arith.constant 0 : i32
    %c0_i32_0 = arith.constant 0 : i32
    %c0_i32_1 = arith.constant 0 : i32
    return %c0_i32, %c0_i32_0 : i32, i32
  }
  func.func @transform_8(%arg0: i32) -> (i32, i32) {
    %c0_i32 = arith.constant 0 : i32
    %c0_i32_0 = arith.constant 0 : i32
    %c0_i32_1 = arith.constant 0 : i32
    return %c0_i32, %c0_i32_0 : i32, i32
  }
}

</mosaic_0001>

<bundles_post_ra>
// kernel: tpu_custom_call.1
= control target key start
LH: loop header
LB: loop body
LE: loop exit
PB: predicated region body
PF: predicated region fallthrough
CT: control target
= control target key end

     0   :  { %s9659_s0 = inlined_call_operand.hbm [shape: bf16[2,6784], index: 0, kind: input, shape index: {}]   ;;  %s9660_s1 = inlined_call_operand.hbm [shape: s8[6784,1024], index: 1, kind: input, shape index: {}]   ;;  %s9661_s2 = inlined_call_operand.hbm [shape: f32[1,1024], index: 2, kind: input, shape index: {}]   ;;  %s9662_s3 = inlined_call_operand.hbm [shape: f32[1,1024], index: 3, kind: input, shape index: {}]   ;;  %s9663_s4 = inlined_call_operand.hbm [shape: bf16[1024,256], index: 4, kind: input, shape index: {}]   ;;  %s9664_s5 = inlined_call_operand.hbm [shape: f32[1,256], index: 5, kind: input, shape index: {}]   ;;  %s9665_s6 = inlined_call_operand.vmem [shape: f32[256,2], index: 6, kind: input, shape index: {}]   ;;  %s9666_s7 = inlined_call_operand.hbm [shape: f32[1,2], index: 7, kind: input, shape index: {}]   ;;  %s9667_s8 = inlined_call_operand.hbm [shape: f32[2,2], index: 8, kind: output, shape index: {}]  }
   0x1   :  { %9682 = sst [smem:[#allocation24_spill]] %s9660_s1 }
   0x2   :  { %9683 = sst [smem:[#allocation25_spill]] %s9663_s4 }
   0x3   :  { %9684 = sst [smem:[#allocation26_spill]] %s9664_s5 }
   0x4   :  { %9685 = sst [smem:[#allocation27_spill]] %s9667_s8 }
   0x5   :  { %13 = vsyncpa [#allocation4], 0 }
   0x6   :  { %14 = vsyncpa [#allocation7], 0 }
   0x7   :  { %16 = vsyncpa [#allocation7 + $0x1], 0 }
   0x8   :  { %17 = vsyncpa [#allocation10], 0 }
   0x9   :  { %19 = vsyncpa [#allocation10 + $0x1], 0 }
   0xa   :  { %20 = vsyncpa [#allocation13], 0 }
   0xb   :  { %21 = vsyncpa [#allocation5], 0  ;;  %s8054_s27 = smov 0   ;;  %s8056_s28 = smov 0  }
   0xc   :  { %s8058_s29 = smov 0   ;;  %s8060_s30 = smov 0  }
   0xd LB: > { %s8073_s9 = sadd.s32 4294967295, %s7992_s30   ;;  %p68_p0 = scmp.ne.s32.totalorder %s7984_s28, %s7980_s27  ;;  %s7992_s30 = sphi %s8060_s30, %s9712_s30   ;;  %s7988_s29 = sphi %s8058_s29, %s9716_s29   ;;  %s7984_s28 = sphi %s8056_s28, %s9715_s28   ;;  %s7980_s27 = sphi %s8054_s27, %s9714_s27  }
   0xe   : > { %p9668_p1 = scmp.eq.s32.totalorder %s8073_s9, 0  ;;  %p6955_p2 = scmp.ge.s32.totalorder %s7992_s30, 1 }
   0xf   : > { %p236_p3 = scmp.lt.s32.totalorder %s7992_s30, 3  ;;  %s7994_s12 = smov [#allocation11]  }
  0x10   : > { %p8081_p4 = por %p9668_p1, %p68_p0  ;;  %s259_s13 = sshll.u32 %s7994_s12, 4  ;;  %s260_s13 = int_to_ptr.vmem [resolvable:$true] %s259_s13 }
  0x11   : > { %p8085_p5 = pnand %p6955_p2, %p236_p3  ;;  %s7995_s15 = smov [#allocation12]  }
  0x12   : > { %s9686_s10 = scalar_select %p8081_p4, 1, 0 }
  0x13   : > { %s9687_s11 = scalar_select %p8085_p5, 1, 0 }
  0x14   : > { %p7432_p6 = pneg %p8085_p5  ;;  %s273_s16 = sshll.u32 %s7995_s15, 4  ;;  %s8097_s16 = int_to_ptr.vmem [resolvable:$true] %s273_s16 }
  0x15   : > { %s9689_s4 = sld [smem:[#allocation25_spill]] }
  0x16   : > { %p8093_p7 = pnand %p7432_p6, %p9668_p1 }
  0x18   : > { %s9688_s14 = scalar_select %p8093_p7, 1, 0 }
  0x19   : > { %p8107_p9 = pneg %p8093_p7 }
  0x1b   : > { %s7710_s19 = scalar_lea.hbm %s9689_s4, 16384 }
  0x1c   : > { %p7711_p8 = scmp.ne.s32.totalorder %s9689_s4, %s7710_s19  ;;  %p7717_p12 = scmp.lt.u32.totalorder %s7710_s19, %s9689_s4 }
  0x1d   : > { %s9690_s22 = scalar_select %p8107_p9, 1, 0 }
  0x1e   : > { %p7713_p10 = pnand %p8107_p9, %p7711_p8 }
  0x20   : > { %p7714_p11 = pneg %p7713_p10 }
  0x22   : > { %p7719_p13 = pnand %p7717_p12, %p7714_p11 }
  0x24   : > { %7722 = shalt.err (!%p7719_p13)
}
  0x25   : > { %s7723_s25 = scalar_lea.vmem %s260_s13, 16384  ;;  %p7731_p6 = scmp.lt.s32.totalorder %s260_s13, %s260_s13 }
  0x26   : > { %p7724_p0 = scmp.ne.s32.totalorder %s260_s13, %s7723_s25  ;;  %p7732_p1 = scmp.lt.s32.totalorder %s7723_s25, %s7723_s25 }
  0x28   : > { %p7726_p2 = pnand %p7724_p0, %p8107_p9  ;;  %p7733_p4 = por %p7732_p1, %p7731_p6 }
  0x2a   : > { %p7727_p3 = pneg %p7726_p2 }
  0x2c   : > { %p7734_p5 = pnand %p7733_p4, %p7727_p3 }
  0x2e   : > { %7737 = shalt.err (!%p7734_p5)
}
  0x2f   : > { %s7996_s26 = smov 128   ;;  %s7997_s27 = smov 8  }
  0x30   : > { %7438 = dma.hbm_to_vmem [thread:$0]  (!%p8093_p7), %s9689_s4, 16384, %s260_s13, [#allocation10], %s7996_s26, %s7996_s26, %s7997_s27  }
  0x31   : > { %s9691_s5 = sld [smem:[#allocation26_spill]] }
  0x37   : > { %s7738_s19 = scalar_lea.hbm %s9691_s5, 32 }
  0x38   : > { %p7739_p8 = scmp.ne.s32.totalorder %s9691_s5, %s7738_s19  ;;  %p7745_p5 = scmp.lt.u32.totalorder %s7738_s19, %s9691_s5 }
  0x3a   : > { %p7741_p1 = pnand %p7739_p8, %p8107_p9 }
  0x3c   : > { %p7742_p4 = pneg %p7741_p1 }
  0x3e   : > { %p7747_p10 = pnand %p7745_p5, %p7742_p4 }
  0x40   : > { %7750 = shalt.err (!%p7747_p10)
}
  0x41   : > { %s7751_s13 = scalar_lea.vmem %s8097_s16, 32  ;;  %p7759_p0 = scmp.lt.s32.totalorder %s8097_s16, %s8097_s16 }
  0x42   : > { %p7752_p11 = scmp.ne.s32.totalorder %s8097_s16, %s7751_s13  ;;  %p7760_p2 = scmp.lt.s32.totalorder %s7751_s13, %s7751_s13 }
  0x44   : > { %p7754_p12 = pnand %p7752_p11, %p8107_p9  ;;  %p7761_p3 = por %p7760_p2, %p7759_p0 }
  0x46   : > { %p7755_p13 = pneg %p7754_p12 }
  0x48   : > { %p7762_p6 = pnand %p7761_p3, %p7755_p13 }
  0x4a   : > { %7765 = shalt.err (!%p7762_p6)
}
  0x4b   : > { %7441 = dma.hbm_to_vmem [thread:$0]  (!%p8093_p7), %s9691_s5, 32, %s8097_s16, [#allocation13]  }
  0x4c   : > { %s8147_s27 = sadd.s32 1, %s7992_s30   ;;  %s55_s12 = sadd.s32 1, %s7988_s29 }
  0x4d   : > { %9692 = sst [smem:[#allocation22_spill]] %s8147_s27  ;;  %s52_s15 = ssub.s32 %s7992_s30, %s8147_s27 }
  0x4e   : > { %p62_p8 = scmp.ne.s32.totalorder %s7988_s29, %s7984_s28  ;;  %p53_p1 = scmp.eq.s32.totalorder %s52_s15, 0 }
  0x4f   : > { %p63_p4 = scmp.eq.s32.totalorder %s7992_s30, 0  ;;  %p7459_p5 = scmp.lt.s32.totalorder %s7992_s30, 2 }
  0x50   : > { %s9672_s17 = sand.u32 1, %s7992_s30   ;;  %s9671_s19 = sand.u32 1, %s7988_s29  }
  0x51   : > { %s8158_s18 = scalar_select %p53_p1, %s7988_s29, %s55_s12  }
  0x52   : > { %p64_p10 = por %p63_p4, %p62_p8  ;;  %s7114_s20 = sshll.u32 %s7992_s30, 9 }
  0x53   : > { %9693 = sst [smem:[#allocation23_spill]] %s8158_s18  ;;  %s7404_s21 = smul.u32 6784, %s9671_s19 }
  0x54   : > { %s9694_s1 = sld [smem:[#allocation24_spill]]  ;;  %p8169_p11 = pnand %p7459_p5, %p64_p10 }
  0x55   : > { %s302_s25 = scalar_lea.vmem [#allocation6], %s7404_s21  ;;  %s8177_s12 = scalar_lea.sflag [#allocation7], %s9672_s17 }
  0x56   : > { %s9695_s13 = scalar_select %p8169_p11, 1, 0 }
  0x57   : > { %s309_s26 = sshll.u32 %s302_s25, 4  ;;  %p8183_p13 = pneg %p8169_p11  ;;  %s8173_s26 = int_to_ptr.vmem [resolvable:$true] %s309_s26 }
  0x5a   : > { %s8167_s24 = scalar_lea.hbm %s9694_s1, %s7114_s20  ;;  %s7771_s21 = scalar_lea.hbm %s9694_s1, 217088 }
  0x5b   : > { %s7766_s15 = scalar_lea.hbm %s8167_s24, 108544  ;;  %p7772_p3 = scmp.lt.u32.totalorder %s8167_s24, %s9694_s1 }
  0x5c   : > { %p7767_p12 = scmp.ne.s32.totalorder %s8167_s24, %s7766_s15  ;;  %p7773_p6 = scmp.lt.u32.totalorder %s7771_s21, %s7766_s15 }
  0x5d   : > { %p7775_p1 = scmp.lt.u32.totalorder %s7766_s15, %s8167_s24 }
  0x5e   : > { %p7769_p0 = pnand %p8183_p13, %p7767_p12  ;;  %p7774_p8 = por %p7773_p6, %p7772_p3 }
  0x60   : > { %p7770_p2 = pneg %p7769_p0  ;;  %p7776_p4 = por %p7775_p1, %p7774_p8 }
  0x62   : > { %p7777_p5 = pnand %p7776_p4, %p7770_p2 }
  0x64   : > { %7780 = shalt.err (!%p7777_p5)
}
  0x65   : > { %s7781_s17 = scalar_lea.vmem %s8173_s26, 108544  ;;  %s7998_s23 = smov [#allocation6]  }
  0x66   : > { %p7782_p10 = scmp.ne.s32.totalorder %s8173_s26, %s7781_s17  ;;  %s7786_s16 = sshll.u32 %s7998_s23, 4  ;;  %s7787_s16 = int_to_ptr.vmem [resolvable:$false] %s7786_s16 }
  0x67   : > { %s7788_s19 = scalar_lea.vmem %s7787_s16, 217088  ;;  %p7789_p7 = scmp.lt.s32.totalorder %s8173_s26, %s7787_s16 }
  0x68   : > { %p7784_p12 = pnand %p7782_p10, %p8183_p13  ;;  %p7790_p9 = scmp.lt.s32.totalorder %s7788_s19, %s7781_s17 }
  0x6a   : > { %p7785_p0 = pneg %p7784_p12  ;;  %p7791_p3 = por %p7790_p9, %p7789_p7 }
  0x6c   : > { %p7792_p6 = pnand %p7791_p3, %p7785_p0 }
  0x6e   : > { %7795 = shalt.err (!%p7792_p6)
}
  0x6f   : > { %s7999_s15 = smov 1024   ;;  %s8000_s21 = smov 512  }
  0x70   : > { %s8001_s25 = smov 32   ;;  %s8002_s1 = smov [#allocation3]  }
  0x71   : > { %7448 = dma.hbm_to_vmem [thread:$0]  (!%p8169_p11), %s8167_s24, 108544, %s8173_s26, %s8177_s12, %s7999_s15, %s8000_s21, %s8001_s25  }
  0x72   : > { %s249_s4 = sshll.u32 %s8002_s1, 4  ;;  %s8003_s23 = smov [#allocation14]   ;;  %s250_s4 = int_to_ptr.vmem [resolvable:$true] %s249_s4 }
  0x73   : > { %s287_s5 = sshll.u32 %s8003_s23, 4  ;;  %s7796_s19 = scalar_lea.hbm %s9659_s0, 848  ;;  %s8207_s5 = int_to_ptr.vmem [resolvable:$true] %s287_s5 }
  0x74   : > { %p7797_p7 = scmp.ne.s32.totalorder %s9659_s0, %s7796_s19  ;;  %p9697_p9 = scmp.ne.s32.totalorder %s9690_s22, 0 }
  0x75   : > { %p7803_p1 = scmp.lt.u32.totalorder %s7796_s19, %s9659_s0 }
  0x76   : > { %p7799_p2 = pnand %p7797_p7, %p9697_p9 }
  0x78   : > { %p7800_p8 = pneg %p7799_p2 }
  0x7a   : > { %p7805_p4 = pnand %p7803_p1, %p7800_p8 }
  0x7c   : > { %7808 = shalt.err (!%p7805_p4)
}
  0x7d   : > { %s7809_s1 = scalar_lea.vmem %s250_s4, 848  ;;  %s7816_s26 = scalar_lea.vmem %s250_s4, 864 }
  0x7e   : > { %p7810_p5 = scmp.ne.s32.totalorder %s250_s4, %s7809_s1  ;;  %p7817_p0 = scmp.lt.s32.totalorder %s250_s4, %s250_s4 }
  0x7f   : > { %p7818_p3 = scmp.lt.s32.totalorder %s7816_s26, %s7809_s1 }
  0x80   : > { %p7812_p10 = pnand %p7810_p5, %p9697_p9 }
  0x81   : > { %p7819_p6 = por %p7818_p3, %p7817_p0 }
  0x82   : > { %p7813_p12 = pneg %p7812_p10 }
  0x84   : > { %p7820_p11 = pnand %p7819_p6, %p7813_p12 }
  0x86   : > { %7823 = shalt.err (!%p7820_p11)
}
  0x87   : > { %p9698_p7 = scmp.ne.s32.totalorder %s9688_s14, 0  ;;  %s7824_s21 = scalar_lea.hbm %s9666_s7, 16 }
  0x88   : > { %p7825_p2 = scmp.ne.s32.totalorder %s9666_s7, %s7824_s21  ;;  %p7831_p11 = scmp.lt.u32.totalorder %s7824_s21, %s9666_s7 }
  0x89   : > { %7435 = dma.hbm_to_vmem [thread:$0]  (!%p9698_p7), %s9659_s0, 848, %s250_s4, [#allocation4]  }
  0x8a   : > { %p7827_p8 = pnand %p7825_p2, %p9697_p9 }
  0x8c   : > { %p7828_p1 = pneg %p7827_p8 }
  0x8e   : > { %p7833_p4 = pnand %p7831_p11, %p7828_p1 }
  0x90   : > { %7836 = shalt.err (!%p7833_p4)
}
  0x91   : > { %s7837_s4 = scalar_lea.vmem %s8207_s5, 16  ;;  %s7844_s19 = scalar_lea.vmem %s8207_s5, 32 }
  0x92   : > { %p7838_p5 = scmp.ne.s32.totalorder %s8207_s5, %s7837_s4  ;;  %p7845_p0 = scmp.lt.s32.totalorder %s8207_s5, %s8207_s5 }
  0x93   : > { %p7846_p3 = scmp.lt.s32.totalorder %s7844_s19, %s7837_s4 }
  0x94   : > { %p7840_p10 = pnand %p7838_p5, %p9697_p9 }
  0x95   : > { %p7847_p6 = por %p7846_p3, %p7845_p0 }
  0x96   : > { %p7841_p12 = pneg %p7840_p10 }
  0x98   : > { %p7848_p2 = pnand %p7847_p6, %p7841_p12 }
  0x9a   : > { %7851 = shalt.err (!%p7848_p2)
}
  0x9b   : > { %7444 = dma.hbm_to_vmem [thread:$0]  (!%p9698_p7), %s9666_s7, 16, %s8207_s5, [#allocation13]  }
  0x9c   : > { %s9699_s22 = sand.u32 1, %s7988_s29   ;;  %s7115_s27 = sshll.u32 %s7992_s30, 6 }
  0x9d   : > { %s8253_s26 = sshll.u32 %s9699_s22, 2  ;;  %s8261_s15 = scalar_lea.hbm %s9661_s2, %s7115_s27 }
  0x9e   : > { %s323_s14 = scalar_lea.vmem [#allocation8], %s8253_s26  ;;  %s7852_s25 = scalar_lea.hbm %s8261_s15, 64 }
  0x9f   : > { %s331_s21 = sshll.u32 %s323_s14, 4  ;;  %p7853_p9 = scmp.ne.s32.totalorder %s8261_s15, %s7852_s25  ;;  %s332_s21 = int_to_ptr.vmem [resolvable:$true] %s331_s21 }
  0xa0   : > { %s7857_s17 = scalar_lea.hbm %s9661_s2, 128  ;;  %p7858_p1 = scmp.lt.u32.totalorder %s8261_s15, %s9661_s2 }
  0xa1   : > { %p7855_p7 = pnand %p7853_p9, %p8183_p13  ;;  %p7859_p11 = scmp.lt.u32.totalorder %s7857_s17, %s7852_s25 }
  0xa2   : > { %p7861_p5 = scmp.lt.u32.totalorder %s7852_s25, %s8261_s15 }
  0xa3   : > { %p7856_p8 = pneg %p7855_p7  ;;  %p7860_p4 = por %p7859_p11, %p7858_p1 }
  0xa5   : > { %p7862_p10 = por %p7861_p5, %p7860_p4 }
  0xa7   : > { %p7863_p12 = pnand %p7862_p10, %p7856_p8 }
  0xa9   : > { %7866 = shalt.err (!%p7863_p12)
}
  0xaa   : > { %s7867_s19 = scalar_lea.vmem %s332_s21, 64  ;;  %s8004_s24 = smov [#allocation8]  }
  0xab   : > { %p7868_p0 = scmp.ne.s32.totalorder %s332_s21, %s7867_s19  ;;  %s7872_s1 = sshll.u32 %s8004_s24, 4  ;;  %s7873_s1 = int_to_ptr.vmem [resolvable:$false] %s7872_s1 }
  0xac   : > { %s7874_s22 = scalar_lea.vmem %s7873_s1, 128  ;;  %p7875_p2 = scmp.lt.s32.totalorder %s332_s21, %s7873_s1 }
  0xad   : > { %p7870_p3 = pnand %p7868_p0, %p8183_p13  ;;  %p7876_p9 = scmp.lt.s32.totalorder %s7874_s22, %s7867_s19 }
  0xaf   : > { %p7871_p6 = pneg %p7870_p3  ;;  %p7877_p7 = por %p7876_p9, %p7875_p2 }
  0xb1   : > { %p7878_p1 = pnand %p7877_p7, %p7871_p6 }
  0xb3   : > { %7881 = shalt.err (!%p7878_p1)
}
  0xb4   : > { %p9700_p11 = scmp.ne.s32.totalorder %s9695_s13, 0  ;;  %s8287_s14 = scalar_lea.hbm %s9662_s3, %s7115_s27 }
  0xb5   : > { %s342_s25 = scalar_lea.vmem [#allocation9], %s8253_s26  ;;  %s9701_s23 = sand.u32 1, %s7992_s30  }
  0xb6   : > { %7451 = dma.hbm_to_vmem [thread:$0]  (!%p9700_p11), %s8261_s15, 64, %s332_s21, %s8177_s12  }
  0xb7   : > { %s350_s5 = sshll.u32 %s342_s25, 4  ;;  %s339_s17 = scalar_lea.sflag [#allocation10], %s9701_s23  ;;  %s351_s5 = int_to_ptr.vmem [resolvable:$true] %s350_s5 }
  0xb8   : > { %s7882_s16 = scalar_lea.hbm %s8287_s14, 64  ;;  %s7887_s21 = scalar_lea.hbm %s9662_s3, 128 }
  0xb9   : > { %p7883_p8 = scmp.ne.s32.totalorder %s8287_s14, %s7882_s16  ;;  %p7888_p10 = scmp.lt.u32.totalorder %s8287_s14, %s9662_s3 }
  0xba   : > { %p7889_p12 = scmp.lt.u32.totalorder %s7887_s21, %s7882_s16  ;;  %p7891_p3 = scmp.lt.u32.totalorder %s7882_s16, %s8287_s14 }
  0xbb   : > { %p7885_p4 = pnand %p7883_p8, %p8183_p13 }
  0xbc   : > { %p7890_p0 = por %p7889_p12, %p7888_p10 }
  0xbd   : > { %p7886_p5 = pneg %p7885_p4 }
  0xbe   : > { %p7892_p6 = por %p7891_p3, %p7890_p0 }
  0xc0   : > { %p7893_p2 = pnand %p7892_p6, %p7886_p5 }
  0xc2   : > { %7896 = shalt.err (!%p7893_p2)
}
  0xc3   : > { %s7897_s30 = scalar_lea.vmem %s351_s5, 64  ;;  %s8005_s26 = smov [#allocation9]  }
  0xc4   : > { %p7898_p9 = scmp.ne.s32.totalorder %s351_s5, %s7897_s30  ;;  %s7902_s19 = sshll.u32 %s8005_s26, 4  ;;  %s7903_s19 = int_to_ptr.vmem [resolvable:$false] %s7902_s19 }
  0xc5   : > { %s7904_s24 = scalar_lea.vmem %s7903_s19, 128  ;;  %p7905_p8 = scmp.lt.s32.totalorder %s351_s5, %s7903_s19 }
  0xc6   : > { %p7900_p7 = pnand %p7898_p9, %p8183_p13  ;;  %p7906_p4 = scmp.lt.s32.totalorder %s7904_s24, %s7897_s30 }
  0xc8   : > { %p7901_p1 = pneg %p7900_p7  ;;  %p7907_p11 = por %p7906_p4, %p7905_p8 }
  0xca   : > { %p7908_p10 = pnand %p7907_p11, %p7901_p1 }
  0xcc   : > { %7911 = shalt.err (!%p7908_p10)
}
  0xcd   : > { %p9702_p12 = scmp.ne.s32.totalorder %s9695_s13, 0  ;;  %p9703_p5 = scmp.ne.s32.totalorder %s9687_s11, 0 }
  0xce   : > { %p9704_p0 = scmp.eq.s32.totalorder (!%p9703_p5), %s8073_s9, 0 }
  0xcf   : > { %7454 = dma.hbm_to_vmem [thread:$0]  (!%p9702_p12), %s8287_s14, 64, %s351_s5, %s339_s17  }
  0xd0   : > { %359 = sbr.rel (%p9703_p5) target bundleno = 2711 (0xa97), region = 52 }
  0xd7   : > { %7955 = dma.done.wait (%p9704_p0), [#allocation4], 848   ;;  %p9705_p13 = pmov %p9704_p0 }
  0xd8   : > { %s365_s20 = sand.u32 1, %s8073_s9   ;;  %s367_s1 = sand.u32 1, %s7984_s28  }
  0xd9   : > { %7957 = vsyncadd (%p9705_p13), [#allocation4], 4294966448  ;;  %s7405_s22 = smul.u32 6784, %s367_s1  ;;  %s366_s18 = scalar_lea.sflag [#allocation7], %s365_s20 }
  0xda   : > { %p9706_p11 = scmp.ne.s32.totalorder %s9686_s10, 0 }
  0xdb   : > { %s8317_s8 = scalar_lea.vmem [#allocation6], %s7405_s22 }
  0xdc   : > { %7959 = dma.done.wait (%p9706_p11), %s366_s18, 108608  }
  0xdd   : > { %7961 = vsyncadd (%p9706_p11), %s366_s18, 4294858688  ;;  %s8323_s11 = sshll.u32 %s367_s1, 2  ;;  %s384_s14 = scalar_lea.sflag [#allocation10], %s365_s20 }
  0xde   : > { %s378_s13 = scalar_lea.vmem [#allocation8], %s8323_s11  ;;  %s387_s25 = scalar_lea.vmem [#allocation9], %s8323_s11 }
  0xdf   : > { %7963 = dma.done.wait (%p9706_p11), %s384_s14, 64  }
  0xe0   : > { %7965 = vsyncadd (%p9706_p11), %s384_s14, 4294967232  ;;  %p9707_p3 = pmov %p9704_p0 }
  0xe1   : > { %p9708_p6 = pmov %p9704_p0 }
  0xe2   : > { %7967 = dma.done.wait (%p9707_p3), [#allocation10], 16384  }
  0xe3   : > { %7969 = vsyncadd (%p9708_p6), [#allocation10], 4294950912  ;;  %p9709_p2 = pmov %p9704_p0 }
  0xe4   : > { %p9710_p9 = pmov %p9704_p0 }
  0xe5   : > { %7971 = dma.done.wait (%p9709_p2), [#allocation13], 48  }
  0xe6   : > { %7973 = vsyncadd (%p9710_p9), [#allocation13], 4294967248  ;;  %v442_v0 = vld [vmem:[%s8317_s8 + $0x8] sm:$0xff]  ;;  %v444_v1 = vld [vmem:[%s8317_s8 + $0x18] sm:$0xff]  ;;  %v8006_v18 = vmov 1966171168   ;;  %v3003_v20 = vlaneseq }
  0xe7   : > { %v441_v2 = vld [vmem:[%s8317_s8] sm:$0xff]  ;;  %v1290_v3 = vunpack.c.l.s8.bf16 %v442_v0  ;;  %v1294_v4 = vunpack.c.h.s8.bf16 %v442_v0  ;;  %v1292_v5 = vunpack.c.l.s8.bf16 %v444_v1  ;;  %v1296_v6 = vunpack.c.h.s8.bf16 %v444_v1  ;;  %v443_v7 = vld [vmem:[%s8317_s8 + $0x10] sm:$0xff]  ;;  %v446_v10 = vld [vmem:[%s8317_s8 + $0x28] sm:$0xff]  ;;  %s6976_s10 = sshll.u32 %s8073_s9, 9  ;;  %p6980_p7 = scmp.ne.s32.totalorder %s8073_s9, 1 }
  0xe8   : > { %v1289_v8 = vunpack.c.l.s8.bf16 %v441_v2  ;;  %v1291_v9 = vunpack.c.l.s8.bf16 %v443_v7  ;;  %v448_v11 = vld [vmem:[%s8317_s8 + $0x38] sm:$0xff]  ;;  %v1293_v12 = vunpack.c.h.s8.bf16 %v441_v2  ;;  %v1295_v13 = vunpack.c.h.s8.bf16 %v443_v7  ;;  %v445_v16 = vld [vmem:[%s8317_s8 + $0x20] sm:$0xff]  ;;  %v447_v17 = vld [vmem:[%s8317_s8 + $0x30] sm:$0xff]  ;;  %s5689_s5 = sshra.s32 %s6976_s10, 7 }
  0xe9   : > { %3385 = vmatprep.subr.bf16.mxu0 %v1290_v3  ;;  %4492 = vmatprep.subr.bf16.mxu1 %v1292_v5  ;;  %v1298_v14 = vunpack.c.l.s8.bf16 %v446_v10  ;;  %v1300_v15 = vunpack.c.l.s8.bf16 %v448_v11  ;;  %v3001_v19 = vunpack.c.l.s4 %v8006_v18  ;;  %v1297_v21 = vunpack.c.l.s8.bf16 %v445_v16  ;;  %v450_v27 = vld [vmem:[%s8317_s8 + $0x48] sm:$0xff]  ;;  %v452_v28 = vld [vmem:[%s8317_s8 + $0x58] sm:$0xff]  ;;  %v449_v33 = vld [vmem:[%s8317_s8 + $0x40] sm:$0xff]  ;;  %s5691_s23 = scalar_lea.vmem [#allocation2], %s5689_s5 }
  0xea   : > { %3386 = vmatpush1.bf16.msra.mxu0 %v1289_v8  ;;  %4493 = vmatpush1.bf16.msra.mxu1 %v1291_v9  ;;  %v1299_v22 = vunpack.c.l.s8.bf16 %v447_v17  ;;  %v1302_v23 = vunpack.c.h.s8.bf16 %v446_v10  ;;  %v1304_v24 = vunpack.c.h.s8.bf16 %v448_v11  ;;  %v8347_v26 = vshrl.u32 %v3003_v20, 7  ;;  %v451_v34 = vld [vmem:[%s8317_s8 + $0x50] sm:$0xff]  ;;  %v454_v42 = vld [vmem:[%s8317_s8 + $0x68] sm:$0xff]  ;;  %v456_v43 = vld [vmem:[%s8317_s8 + $0x78] sm:$0xff] }
  0xeb   : > { %3387 = vmatprep.subr.bf16.mxu0 %v1294_v4  ;;  %4494 = vmatprep.subr.bf16.mxu1 %v1296_v6  ;;  %v3002_v25 = vunpack.c.0.s8 %v3001_v19  ;;  %v1301_v29 = vunpack.c.h.s8.bf16 %v445_v16  ;;  %v1303_v30 = vunpack.c.h.s8.bf16 %v447_v17  ;;  %v1306_v31 = vunpack.c.l.s8.bf16 %v450_v27  ;;  %v8356_v36 = vld [vmem:[#allocation3] sm:$0xff]  ;;  %v453_v49 = vld [vmem:[%s8317_s8 + $0x60] sm:$0xff]  ;;  %v460_v57 = vld [vmem:[%s8317_s8 + $0x98] sm:$0xff] }
  0xec   : > { %v1308_v32 = vunpack.c.l.s8.bf16 %v452_v28  ;;  %v1305_v37 = vunpack.c.l.s8.bf16 %v449_v33  ;;  %v1307_v38 = vunpack.c.l.s8.bf16 %v451_v34  ;;  %v1310_v39 = vunpack.c.h.s8.bf16 %v450_v27  ;;  %v455_v50 = vld [vmem:[%s8317_s8 + $0x70] sm:$0xff]  ;;  %v458_v56 = vld [vmem:[%s8317_s8 + $0x88] sm:$0xff]  ;;  %v457_v62 = vld [vmem:[%s8317_s8 + $0x80] sm:$0xff] }
  0xed   : > { %v8354_v35 = vsub.s32 %v3002_v25, %v8347_v26  ;;  %v1312_v40 = vunpack.c.h.s8.bf16 %v452_v28  ;;  %v1309_v45 = vunpack.c.h.s8.bf16 %v449_v33  ;;  %v1311_v46 = vunpack.c.h.s8.bf16 %v451_v34  ;;  %v459_v63 = vld [vmem:[%s8317_s8 + $0x90] sm:$0xff]  ;;  %v462_v4 = vld [vmem:[%s8317_s8 + $0xa8] sm:$0xff]  ;;  %v464_v5 = vld [vmem:[%s8317_s8 + $0xb8] sm:$0xff] }
  0xee   : > { %3388 = vmatpush1.bf16.msra.mxu0 %v1293_v12  ;;  %4495 = vmatpush1.bf16.msra.mxu1 %v1295_v13  ;;  %v1314_v47 = vunpack.c.l.s8.bf16 %v454_v42  ;;  %v1316_v48 = vunpack.c.l.s8.bf16 %v456_v43  ;;  %v1313_v52 = vunpack.c.l.s8.bf16 %v453_v49  ;;  %v1315_v53 = vunpack.c.l.s8.bf16 %v455_v50  ;;  %v461_v10 = vld [vmem:[%s8317_s8 + $0xa0] sm:$0xff]  ;;  %v463_v11 = vld [vmem:[%s8317_s8 + $0xb0] sm:$0xff]  ;;  %v466_v16 = vld [vmem:[%s8317_s8 + $0xc8] sm:$0xff] }
  0xef   : > { %3389 = vmatprep.subr.bf16.mxu0 %v1298_v14  ;;  %4496 = vmatprep.subr.bf16.mxu1 %v1300_v15  ;;  %v8360_v41 = vrot.slane %v8356_v36, %v8354_v35  ;;  %v1318_v54 = vunpack.c.h.s8.bf16 %v454_v42  ;;  %v1320_v55 = vunpack.c.h.s8.bf16 %v456_v43  ;;  %v1317_v58 = vunpack.c.h.s8.bf16 %v453_v49  ;;  %v468_v17 = vld [vmem:[%s8317_s8 + $0xd8] sm:$0xff] }
  0xf0   : > { %v1319_v59 = vunpack.c.h.s8.bf16 %v455_v50  ;;  %v1322_v60 = vunpack.c.l.s8.bf16 %v458_v56  ;;  %v1324_v61 = vunpack.c.l.s8.bf16 %v460_v57  ;;  %v1321_v0 = vunpack.c.l.s8.bf16 %v457_v62  ;;  %v473_v50 = vld [vmem:[%s8317_s8 + $0x100] sm:$0xff] }
  0xf1   : > { %v3014_v44 = vcombine.high %v8360_v41, %v8360_v41  ;;  %v1323_v1 = vunpack.c.l.s8.bf16 %v459_v63  ;;  %v1326_v2 = vunpack.c.h.s8.bf16 %v458_v56  ;;  %v1328_v3 = vunpack.c.h.s8.bf16 %v460_v57 }
  0xf2   : > { %3390 = vmatpush1.bf16.msra.mxu0 %v1297_v21  ;;  %4497 = vmatpush1.bf16.msra.mxu1 %v1299_v22  ;;  %v1325_v6 = vunpack.c.h.s8.bf16 %v457_v62  ;;  %v1327_v7 = vunpack.c.h.s8.bf16 %v459_v63  ;;  %v1330_v8 = vunpack.c.l.s8.bf16 %v462_v4  ;;  %v1332_v9 = vunpack.c.l.s8.bf16 %v464_v5  ;;  %v465_v22 = vld [vmem:[%s8317_s8 + $0xc0] sm:$0xff] }
  0xf3   : > { %3391 = vmatprep.subr.bf16.mxu0 %v1302_v23  ;;  %4498 = vmatprep.subr.bf16.mxu1 %v1304_v24  ;;  %v8369_v51 = vrot.slane %v3014_v44, %v8354_v35  ;;  %v1329_v12 = vunpack.c.l.s8.bf16 %v461_v10  ;;  %v1331_v13 = vunpack.c.l.s8.bf16 %v463_v11  ;;  %v1334_v14 = vunpack.c.h.s8.bf16 %v462_v4  ;;  %v467_v23 = vld [vmem:[%s8317_s8 + $0xd0] sm:$0xff]  ;;  %v474_v44 = vld [vmem:[%s8317_s8 + $0x108] sm:$0xff] }
  0xf4   : > { %v1336_v15 = vunpack.c.h.s8.bf16 %v464_v5  ;;  %v1333_v18 = vunpack.c.h.s8.bf16 %v461_v10  ;;  %v1335_v19 = vunpack.c.h.s8.bf16 %v463_v11  ;;  %v1338_v20 = vunpack.c.l.s8.bf16 %v466_v16  ;;  %v482_v5 = vld [vmem:[%s8317_s8 + $0x148] sm:$0xff]  ;;  %v481_v11 = vld [vmem:[%s8317_s8 + $0x140] sm:$0xff] }
  0xf5   : > { %3417 = vmatprep.mubr.bf16.mxu0 %v8369_v51  ;;  %4524 = vmatprep.mubr.bf16.mxu1 %v8369_v51  ;;  %v1340_v21 = vunpack.c.l.s8.bf16 %v468_v17  ;;  %v1337_v24 = vunpack.c.l.s8.bf16 %v465_v22  ;;  %v1339_v25 = vunpack.c.l.s8.bf16 %v467_v23  ;;  %v1342_v27 = vunpack.c.h.s8.bf16 %v466_v16 }
  0xf6   : > { %3392 = vmatpush1.bf16.msra.mxu0 %v1301_v29  ;;  %4499 = vmatpush1.bf16.msra.mxu1 %v1303_v30  ;;  %v1344_v28 = vunpack.c.h.s8.bf16 %v468_v17  ;;  %v470_v29 = vld [vmem:[%s8317_s8 + $0xe8] sm:$0xff]  ;;  %v472_v30 = vld [vmem:[%s8317_s8 + $0xf8] sm:$0xff]  ;;  %v1358_v56 = vunpack.c.h.s8.bf16 %v474_v44  ;;  %vm6811_vm0 = vcmask (!%p6980_p7), 9216  }
  0xf7   : > { %3393 = vmatprep.subr.bf16.mxu0 %v1306_v31  ;;  %4500 = vmatprep.subr.bf16.mxu1 %v1308_v32  ;;  %v1341_v31 = vunpack.c.h.s8.bf16 %v465_v22  ;;  %v1343_v32 = vunpack.c.h.s8.bf16 %v467_v23  ;;  %v1346_v33 = vunpack.c.l.s8.bf16 %v470_v29  ;;  %v1348_v34 = vunpack.c.l.s8.bf16 %v472_v30  ;;  %v486_v17 = vld [vmem:[%s8317_s8 + $0x168] sm:$0xff]  ;;  %v485_v23 = vld [vmem:[%s8317_s8 + $0x160] sm:$0xff] }
  0xf8   : > { %v1350_v42 = vunpack.c.h.s8.bf16 %v470_v29  ;;  %v1352_v43 = vunpack.c.h.s8.bf16 %v472_v30  ;;  %v490_v30 = vld [vmem:[%s8317_s8 + $0x188] sm:$0xff] }
  0xfa   : > { %3394 = vmatpush1.bf16.msra.mxu0 %v1305_v37  ;;  %4501 = vmatpush1.bf16.msra.mxu1 %v1307_v38  ;;  %v469_v37 = vld [vmem:[%s8317_s8 + $0xe0] sm:$0xff]  ;;  %v471_v38 = vld [vmem:[%s8317_s8 + $0xf0] sm:$0xff] }
  0xfb   : > { %3395 = vmatprep.subr.bf16.mxu0 %v1310_v39  ;;  %4502 = vmatprep.subr.bf16.mxu1 %v1312_v40  ;;  %v1345_v39 = vunpack.c.l.s8.bf16 %v469_v37  ;;  %v1347_v40 = vunpack.c.l.s8.bf16 %v471_v38 }
  0xfe   : > { %3396 = vmatpush1.bf16.msra.mxu0 %v1309_v45  ;;  %4503 = vmatpush1.bf16.msra.mxu1 %v1311_v46  ;;  %v476_v45 = vld [vmem:[%s8317_s8 + $0x118] sm:$0xff]  ;;  %v1349_v46 = vunpack.c.h.s8.bf16 %v469_v37 }
  0xff   : > { %3397 = vmatprep.subr.bf16.mxu0 %v1314_v47  ;;  %4504 = vmatprep.subr.bf16.mxu1 %v1316_v48  ;;  %v1351_v47 = vunpack.c.h.s8.bf16 %v471_v38  ;;  %v1354_v48 = vunpack.c.l.s8.bf16 %v474_v44  ;;  %v1356_v49 = vunpack.c.l.s8.bf16 %v476_v45  ;;  %v1360_v57 = vunpack.c.h.s8.bf16 %v476_v45  ;;  %v489_v38 = vld [vmem:[%s8317_s8 + $0x180] sm:$0xff]  ;;  %v494_v45 = vld [vmem:[%s8317_s8 + $0x1a8] sm:$0xff] }
 0x102   : > { %3398 = vmatpush1.bf16.msra.mxu0 %v1313_v52  ;;  %4505 = vmatpush1.bf16.msra.mxu1 %v1315_v53  ;;  %v475_v52 = vld [vmem:[%s8317_s8 + $0x110] sm:$0xff]  ;;  %v8395_v53 = vrot.slane %v8360_v41, %v8354_v35  ;;  %v1357_v41 = vunpack.c.h.s8.bf16 %v473_v50 }
 0x103   : > { %3399 = vmatprep.subr.bf16.mxu0 %v1318_v54  ;;  %4506 = vmatprep.subr.bf16.mxu1 %v1320_v55  ;;  %v1353_v54 = vunpack.c.l.s8.bf16 %v473_v50  ;;  %v1355_v55 = vunpack.c.l.s8.bf16 %v475_v52 }
 0x106   : > { %3400 = vmatpush1.bf16.msra.mxu0 %v1317_v58  ;;  %4507 = vmatpush1.bf16.msra.mxu1 %v1319_v59  ;;  %v478_v58 = vld [vmem:[%s8317_s8 + $0x128] sm:$0xff]  ;;  %v480_v59 = vld [vmem:[%s8317_s8 + $0x138] sm:$0xff] }
 0x107   : > { %3401 = vmatprep.subr.bf16.mxu0 %v1322_v60  ;;  %4508 = vmatprep.subr.bf16.mxu1 %v1324_v61  ;;  %v3046_v60 = vcombine.high %v8369_v51, %v8369_v51  ;;  %v1359_v61 = vunpack.c.h.s8.bf16 %v475_v52  ;;  %v1362_v62 = vunpack.c.l.s8.bf16 %v478_v58  ;;  %v1364_v63 = vunpack.c.l.s8.bf16 %v480_v59  ;;  %v493_v52 = vld [vmem:[%s8317_s8 + $0x1a0] sm:$0xff] }
 0x108   : > { %v1368_v4 = vunpack.c.h.s8.bf16 %v480_v59  ;;  %v498_v59 = vld [vmem:[%s8317_s8 + $0x1c8] sm:$0xff] }
 0x10a   : > { %3402 = vmatpush1.bf16.msra.mxu0 %v1321_v0  ;;  %4509 = vmatpush1.bf16.msra.mxu1 %v1323_v1  ;;  %v477_v0 = vld [vmem:[%s8317_s8 + $0x120] sm:$0xff]  ;;  %v479_v1 = vld [vmem:[%s8317_s8 + $0x130] sm:$0xff] }
 0x10b   : > { %3403 = vmatprep.subr.bf16.mxu0 %v1326_v2  ;;  %4510 = vmatprep.subr.bf16.mxu1 %v1328_v3  ;;  %v1361_v51 = vunpack.c.l.s8.bf16 %v477_v0  ;;  %v1363_v2 = vunpack.c.l.s8.bf16 %v479_v1  ;;  %v1366_v3 = vunpack.c.h.s8.bf16 %v478_v58 }
 0x10e   : > { %3404 = vmatpush1.bf16.msra.mxu0 %v1325_v6  ;;  %4511 = vmatpush1.bf16.msra.mxu1 %v1327_v7  ;;  %v484_v6 = vld [vmem:[%s8317_s8 + $0x158] sm:$0xff]  ;;  %v1365_v7 = vunpack.c.h.s8.bf16 %v477_v0  ;;  %v497_v0 = vld [vmem:[%s8317_s8 + $0x1c0] sm:$0xff] }
 0x10f   : > { %3405 = vmatprep.subr.bf16.mxu0 %v1330_v8  ;;  %4512 = vmatprep.subr.bf16.mxu1 %v1332_v9  ;;  %v1367_v8 = vunpack.c.h.s8.bf16 %v479_v1  ;;  %v1370_v9 = vunpack.c.l.s8.bf16 %v482_v5  ;;  %v1372_v10 = vunpack.c.l.s8.bf16 %v484_v6  ;;  %v1376_v16 = vunpack.c.h.s8.bf16 %v484_v6  ;;  %v499_v1 = vld [vmem:[%s8317_s8 + $0x1d0] sm:$0xff]  ;;  %v504_v6 = vld [vmem:[%s8317_s8 + $0x1f8] sm:$0xff] }
 0x112   : > { %3406 = vmatpush1.bf16.msra.mxu0 %v1329_v12  ;;  %4513 = vmatpush1.bf16.msra.mxu1 %v1331_v13  ;;  %v483_v12 = vld [vmem:[%s8317_s8 + $0x150] sm:$0xff]  ;;  %v1369_v13 = vunpack.c.l.s8.bf16 %v481_v11 }
 0x113   : > { %3407 = vmatprep.subr.bf16.mxu0 %v1334_v14  ;;  %4514 = vmatprep.subr.bf16.mxu1 %v1336_v15  ;;  %v1371_v14 = vunpack.c.l.s8.bf16 %v483_v12  ;;  %v1374_v15 = vunpack.c.h.s8.bf16 %v482_v5  ;;  %v502_v5 = vld [vmem:[%s8317_s8 + $0x1e8] sm:$0xff] }
 0x116   : > { %3408 = vmatpush1.bf16.msra.mxu0 %v1333_v18  ;;  %4515 = vmatpush1.bf16.msra.mxu1 %v1335_v19  ;;  %v488_v18 = vld [vmem:[%s8317_s8 + $0x178] sm:$0xff]  ;;  %v1373_v19 = vunpack.c.h.s8.bf16 %v481_v11  ;;  %v501_v11 = vld [vmem:[%s8317_s8 + $0x1e0] sm:$0xff] }
 0x117   : > { %3409 = vmatprep.subr.bf16.mxu0 %v1338_v20  ;;  %4516 = vmatprep.subr.bf16.mxu1 %v1340_v21  ;;  %v1375_v20 = vunpack.c.h.s8.bf16 %v483_v12  ;;  %v1378_v21 = vunpack.c.l.s8.bf16 %v486_v17  ;;  %v1380_v22 = vunpack.c.l.s8.bf16 %v488_v18  ;;  %v1384_v29 = vunpack.c.h.s8.bf16 %v488_v18  ;;  %v503_v12 = vld [vmem:[%s8317_s8 + $0x1f0] sm:$0xff]  ;;  %v506_v18 = vld [vmem:[%s8317_s8 + $0x208] sm:$0xff] }
 0x11a   : > { %3410 = vmatpush1.bf16.msra.mxu0 %v1337_v24  ;;  %4517 = vmatpush1.bf16.msra.mxu1 %v1339_v25  ;;  %v487_v24 = vld [vmem:[%s8317_s8 + $0x170] sm:$0xff]  ;;  %v1377_v25 = vunpack.c.l.s8.bf16 %v485_v23 }
 0x11b   : > { %3411 = vmatprep.subr.bf16.mxu0 %v1342_v27  ;;  %4518 = vmatprep.subr.bf16.mxu1 %v1344_v28  ;;  %v1379_v27 = vunpack.c.l.s8.bf16 %v487_v24  ;;  %v1382_v28 = vunpack.c.h.s8.bf16 %v486_v17  ;;  %v1416_v17 = vunpack.c.h.s8.bf16 %v504_v6 }
 0x11e   : > { %3412 = vmatpush1.bf16.msra.mxu0 %v1341_v31  ;;  %4519 = vmatpush1.bf16.msra.mxu1 %v1343_v32  ;;  %v492_v31 = vld [vmem:[%s8317_s8 + $0x198] sm:$0xff]  ;;  %v1381_v32 = vunpack.c.h.s8.bf16 %v485_v23 }
 0x11f   : > { %3413 = vmatprep.subr.bf16.mxu0 %v1346_v33  ;;  %4520 = vmatprep.subr.bf16.mxu1 %v1348_v34  ;;  %v1383_v33 = vunpack.c.h.s8.bf16 %v487_v24  ;;  %v1386_v34 = vunpack.c.l.s8.bf16 %v490_v30  ;;  %v1388_v37 = vunpack.c.l.s8.bf16 %v492_v31  ;;  %v1392_v44 = vunpack.c.h.s8.bf16 %v492_v31  ;;  %v505_v24 = vld [vmem:[%s8317_s8 + $0x200] sm:$0xff] }
 0x120   : > { %v1422_v31 = vunpack.c.h.s8.bf16 %v506_v18 }
 0x122   : > { %3414 = vmatpush1.bf16.msra.mxu0 %v1345_v39  ;;  %4521 = vmatpush1.bf16.msra.mxu1 %v1347_v40  ;;  %v491_v39 = vld [vmem:[%s8317_s8 + $0x190] sm:$0xff]  ;;  %v1385_v40 = vunpack.c.l.s8.bf16 %v489_v38 }
 0x123   : > { %3415 = vmatprep.subr.bf16.mxu0 %v1350_v42  ;;  %4522 = vmatprep.subr.bf16.mxu1 %v1352_v43  ;;  %v1387_v42 = vunpack.c.l.s8.bf16 %v491_v39  ;;  %v1390_v43 = vunpack.c.h.s8.bf16 %v490_v30 }
 0x126   : > { %3416 = vmatpush1.bf16.msra.mxu0 %v1349_v46  ;;  %4523 = vmatpush1.bf16.msra.mxu1 %v1351_v47  ;;  %v496_v46 = vld [vmem:[%s8317_s8 + $0x1b8] sm:$0xff]  ;;  %v1389_v47 = vunpack.c.h.s8.bf16 %v489_v38 }
 0x127   : > { %3426 = vmatprep.subr.bf16.mxu0 %v1354_v48  ;;  %4533 = vmatprep.subr.bf16.mxu1 %v1356_v49  ;;  %v1391_v48 = vunpack.c.h.s8.bf16 %v491_v39  ;;  %v1394_v49 = vunpack.c.l.s8.bf16 %v494_v45  ;;  %v1396_v50 = vunpack.c.l.s8.bf16 %v496_v46  ;;  %v1400_v58 = vunpack.c.h.s8.bf16 %v496_v46 }
 0x129   : > { %3418 = vmatmul.mubr.bf16.vlgmr.msra.gmra.mrb[0].mxu0 %v8395_v53  ;;  %4525 = vmatmul.mubr.bf16.vlgmr.msra.gmra.mrb[0].mxu1 %v8395_v53 }
 0x12a   : > { %3427 = vmatpush1.bf16.msra.mxu0 %v1353_v54  ;;  %4534 = vmatpush1.bf16.msra.mxu1 %v1355_v55  ;;  %v495_v54 = vld [vmem:[%s8317_s8 + $0x1b0] sm:$0xff]  ;;  %v1393_v55 = vunpack.c.l.s8.bf16 %v493_v52 }
 0x12b   : > { %3428 = vmatprep.subr.bf16.mxu0 %v1358_v56  ;;  %4535 = vmatprep.subr.bf16.mxu1 %v1360_v57  ;;  %v1395_v56 = vunpack.c.l.s8.bf16 %v495_v54  ;;  %v1398_v57 = vunpack.c.h.s8.bf16 %v494_v45 }
 0x12c   : > { %3458 = vmatprep.mubr.bf16.mxu0 %v3046_v60  ;;  %4565 = vmatprep.mubr.bf16.mxu1 %v3046_v60  ;;  %v500_v60 = vld [vmem:[%s8317_s8 + $0x1d8] sm:$0xff] }
 0x12e   : > { %3429 = vmatpush1.bf16.msra.mxu0 %v1357_v41  ;;  %4536 = vmatpush1.bf16.msra.mxu1 %v1359_v61  ;;  %v1397_v41 = vunpack.c.h.s8.bf16 %v493_v52  ;;  %v1399_v61 = vunpack.c.h.s8.bf16 %v495_v54 }
 0x12f   : > { %3430 = vmatprep.subr.bf16.mxu0 %v1362_v62  ;;  %4537 = vmatprep.subr.bf16.mxu1 %v1364_v63  ;;  %v1402_v62 = vunpack.c.l.s8.bf16 %v498_v59  ;;  %v1404_v63 = vunpack.c.l.s8.bf16 %v500_v60 }
 0x132   : > { %3431 = vmatpush1.bf16.msra.mxu0 %v1361_v51  ;;  %4538 = vmatpush1.bf16.msra.mxu1 %v1363_v2  ;;  %v1401_v51 = vunpack.c.l.s8.bf16 %v497_v0  ;;  %v1403_v2 = vunpack.c.l.s8.bf16 %v499_v1 }
 0x133   : > { %3432 = vmatprep.subr.bf16.mxu0 %v1366_v3  ;;  %4539 = vmatprep.subr.bf16.mxu1 %v1368_v4  ;;  %v1406_v3 = vunpack.c.h.s8.bf16 %v498_v59  ;;  %v1408_v4 = vunpack.c.h.s8.bf16 %v500_v60 }
 0x136   : > { %3433 = vmatpush1.bf16.msra.mxu0 %v1365_v7  ;;  %4540 = vmatpush1.bf16.msra.mxu1 %v1367_v8  ;;  %v1405_v7 = vunpack.c.h.s8.bf16 %v497_v0  ;;  %v1407_v8 = vunpack.c.h.s8.bf16 %v499_v1 }
 0x137   : > { %3434 = vmatprep.subr.bf16.mxu0 %v1370_v9  ;;  %4541 = vmatprep.subr.bf16.mxu1 %v1372_v10  ;;  %v1410_v9 = vunpack.c.l.s8.bf16 %v502_v5  ;;  %v1412_v10 = vunpack.c.l.s8.bf16 %v504_v6 }
 0x13a   : > { %3435 = vmatpush1.bf16.msra.mxu0 %v1369_v13  ;;  %4542 = vmatpush1.bf16.msra.mxu1 %v1371_v14  ;;  %v2999_v13 = vcombine.high %v8356_v36, %v8356_v36  ;;  %v1409_v14 = vunpack.c.l.s8.bf16 %v501_v11  ;;  %v1418_v36 = vunpack.c.l.s8.bf16 %v506_v18 }
 0x13b   : > { %3436 = vmatprep.subr.bf16.mxu0 %v1374_v15  ;;  %4543 = vmatprep.subr.bf16.mxu1 %v1376_v16  ;;  %v1411_v15 = vunpack.c.l.s8.bf16 %v503_v12  ;;  %v1414_v16 = vunpack.c.h.s8.bf16 %v502_v5 }
 0x13e   : > { %3437 = vmatpush1.bf16.msra.mxu0 %v1373_v19  ;;  %4544 = vmatpush1.bf16.msra.mxu1 %v1375_v20  ;;  %v508_v19 = vld [vmem:[%s8317_s8 + $0x218] sm:$0xff]  ;;  %v8434_v20 = vrot.slane %v2999_v13, %v8354_v35 }
 0x13f   : > { %3438 = vmatprep.subr.bf16.mxu0 %v1378_v21  ;;  %4545 = vmatprep.subr.bf16.mxu1 %v1380_v22  ;;  %v1413_v21 = vunpack.c.h.s8.bf16 %v501_v11  ;;  %v1415_v22 = vunpack.c.h.s8.bf16 %v503_v12  ;;  %v1420_v23 = vunpack.c.l.s8.bf16 %v508_v19 }
 0x142   : > { %3439 = vmatpush1.bf16.msra.mxu0 %v1377_v25  ;;  %4546 = vmatpush1.bf16.msra.mxu1 %v1379_v27  ;;  %v507_v25 = vld [vmem:[%s8317_s8 + $0x210] sm:$0xff]  ;;  %v3015_v27 = vcombine.high %v8434_v20, %v8434_v20 }
 0x143   : > { %3440 = vmatprep.subr.bf16.mxu0 %v1382_v28  ;;  %4547 = vmatprep.subr.bf16.mxu1 %v1384_v29  ;;  %v3044_v28 = vcombine.high %v8395_v53, %v8395_v53  ;;  %v1417_v29 = vunpack.c.l.s8.bf16 %v505_v24  ;;  %v1419_v30 = vunpack.c.l.s8.bf16 %v507_v25  ;;  %v1421_v53 = vunpack.c.h.s8.bf16 %v505_v24 }
 0x144   : > { %v1423_v38 = vunpack.c.h.s8.bf16 %v507_v25 }
 0x146   : > { %3441 = vmatpush1.bf16.msra.mxu0 %v1381_v32  ;;  %4548 = vmatpush1.bf16.msra.mxu1 %v1383_v33  ;;  %v1424_v32 = vunpack.c.h.s8.bf16 %v508_v19  ;;  %v510_v33 = vld [vmem:[%s8317_s8 + $0x228] sm:$0xff] }
 0x147   : > { %3442 = vmatprep.subr.bf16.mxu0 %v1386_v34  ;;  %4549 = vmatprep.subr.bf16.mxu1 %v1388_v37  ;;  %v512_v34 = vld [vmem:[%s8317_s8 + $0x238] sm:$0xff]  ;;  %v8445_v37 = vrot.slane %v3015_v27, %v8354_v35  ;;  %v1426_v39 = vunpack.c.l.s8.bf16 %v510_v33  ;;  %v1430_v46 = vunpack.c.h.s8.bf16 %v510_v33  ;;  %v525_v27 = vld [vmem:[%s8317_s8 + $0x2a0] sm:$0xff]  ;;  %v530_v33 = vld [vmem:[%s8317_s8 + $0x2c8] sm:$0xff] }
 0x14a   : > { %3443 = vmatpush1.bf16.msra.mxu0 %v1385_v40  ;;  %4550 = vmatpush1.bf16.msra.mxu1 %v1387_v42  ;;  %v1428_v40 = vunpack.c.l.s8.bf16 %v512_v34  ;;  %v509_v42 = vld [vmem:[%s8317_s8 + $0x220] sm:$0xff] }
 0x14b   : > { %3444 = vmatprep.subr.bf16.mxu0 %v1390_v43  ;;  %4551 = vmatprep.subr.bf16.mxu1 %v1392_v44  ;;  %v511_v43 = vld [vmem:[%s8317_s8 + $0x230] sm:$0xff]  ;;  %v1425_v44 = vunpack.c.l.s8.bf16 %v509_v42 }
 0x14c   : > { %v1427_v45 = vunpack.c.l.s8.bf16 %v511_v43  ;;  %v1431_v52 = vunpack.c.h.s8.bf16 %v511_v43  ;;  %v531_v43 = vld [vmem:[%s8317_s8 + $0x2d0] sm:$0xff] }
 0x14e   : > { %3445 = vmatpush1.bf16.msra.mxu0 %v1389_v47  ;;  %4552 = vmatpush1.bf16.msra.mxu1 %v1391_v48  ;;  %v1432_v47 = vunpack.c.h.s8.bf16 %v512_v34  ;;  %v514_v48 = vld [vmem:[%s8317_s8 + $0x248] sm:$0xff]  ;;  %v532_v34 = vld [vmem:[%s8317_s8 + $0x2d8] sm:$0xff] }
 0x14f   : > { %3446 = vmatprep.subr.bf16.mxu0 %v1394_v49  ;;  %4553 = vmatprep.subr.bf16.mxu1 %v1396_v50  ;;  %v516_v49 = vld [vmem:[%s8317_s8 + $0x258] sm:$0xff]  ;;  %v1429_v50 = vunpack.c.h.s8.bf16 %v509_v42  ;;  %v1434_v54 = vunpack.c.l.s8.bf16 %v514_v48  ;;  %v1438_v60 = vunpack.c.h.s8.bf16 %v514_v48  ;;  %v529_v42 = vld [vmem:[%s8317_s8 + $0x2c0] sm:$0xff]  ;;  %v534_v48 = vld [vmem:[%s8317_s8 + $0x2e8] sm:$0xff] }
 0x152   : > { %3447 = vmatpush1.bf16.msra.mxu0 %v1393_v55  ;;  %4554 = vmatpush1.bf16.msra.mxu1 %v1395_v56  ;;  %v1436_v55 = vunpack.c.l.s8.bf16 %v516_v49  ;;  %v513_v56 = vld [vmem:[%s8317_s8 + $0x240] sm:$0xff] }
 0x153   : > { %3448 = vmatprep.subr.bf16.mxu0 %v1398_v57  ;;  %4555 = vmatprep.subr.bf16.mxu1 %v1400_v58  ;;  %v515_v57 = vld [vmem:[%s8317_s8 + $0x250] sm:$0xff]  ;;  %v1433_v58 = vunpack.c.l.s8.bf16 %v513_v56 }
 0x154   : > { %v1435_v59 = vunpack.c.l.s8.bf16 %v515_v57  ;;  %v1439_v0 = vunpack.c.h.s8.bf16 %v515_v57  ;;  %v535_v57 = vld [vmem:[%s8317_s8 + $0x2f0] sm:$0xff] }
 0x156   : > { %3449 = vmatpush1.bf16.msra.mxu0 %v1397_v41  ;;  %4556 = vmatpush1.bf16.msra.mxu1 %v1399_v61  ;;  %v1440_v41 = vunpack.c.h.s8.bf16 %v516_v49  ;;  %v518_v61 = vld [vmem:[%s8317_s8 + $0x268] sm:$0xff]  ;;  %v536_v49 = vld [vmem:[%s8317_s8 + $0x2f8] sm:$0xff] }
 0x157   : > { %3450 = vmatprep.subr.bf16.mxu0 %v1402_v62  ;;  %4557 = vmatprep.subr.bf16.mxu1 %v1404_v63  ;;  %v520_v62 = vld [vmem:[%s8317_s8 + $0x278] sm:$0xff]  ;;  %v1437_v63 = vunpack.c.h.s8.bf16 %v513_v56  ;;  %v1442_v1 = vunpack.c.l.s8.bf16 %v518_v61  ;;  %v1446_v6 = vunpack.c.h.s8.bf16 %v518_v61  ;;  %v533_v56 = vld [vmem:[%s8317_s8 + $0x2e0] sm:$0xff]  ;;  %v538_v61 = vld [vmem:[%s8317_s8 + $0x308] sm:$0xff] }
 0x15a   : > { %3451 = vmatpush1.bf16.msra.mxu0 %v1401_v51  ;;  %4558 = vmatpush1.bf16.msra.mxu1 %v1403_v2  ;;  %v1444_v51 = vunpack.c.l.s8.bf16 %v520_v62  ;;  %v517_v2 = vld [vmem:[%s8317_s8 + $0x260] sm:$0xff] }
 0x15b   : > { %3452 = vmatprep.subr.bf16.mxu0 %v1406_v3  ;;  %4559 = vmatprep.subr.bf16.mxu1 %v1408_v4  ;;  %v519_v3 = vld [vmem:[%s8317_s8 + $0x270] sm:$0xff]  ;;  %v1441_v4 = vunpack.c.l.s8.bf16 %v517_v2 }
 0x15c   : > { %v1443_v5 = vunpack.c.l.s8.bf16 %v519_v3  ;;  %v1447_v11 = vunpack.c.h.s8.bf16 %v519_v3  ;;  %v539_v3 = vld [vmem:[%s8317_s8 + $0x310] sm:$0xff] }
 0x15e   : > { %3453 = vmatpush1.bf16.msra.mxu0 %v1405_v7  ;;  %4560 = vmatpush1.bf16.msra.mxu1 %v1407_v8  ;;  %v1448_v7 = vunpack.c.h.s8.bf16 %v520_v62  ;;  %v522_v8 = vld [vmem:[%s8317_s8 + $0x288] sm:$0xff]  ;;  %v540_v62 = vld [vmem:[%s8317_s8 + $0x318] sm:$0xff] }
 0x15f   : > { %3454 = vmatprep.subr.bf16.mxu0 %v1410_v9  ;;  %4561 = vmatprep.subr.bf16.mxu1 %v1412_v10  ;;  %v524_v9 = vld [vmem:[%s8317_s8 + $0x298] sm:$0xff]  ;;  %v1445_v10 = vunpack.c.h.s8.bf16 %v517_v2  ;;  %v1450_v12 = vunpack.c.l.s8.bf16 %v522_v8  ;;  %v1454_v18 = vunpack.c.h.s8.bf16 %v522_v8  ;;  %v537_v2 = vld [vmem:[%s8317_s8 + $0x300] sm:$0xff]  ;;  %v1488_v8 = vunpack.c.h.s8.bf16 %v540_v62 }
 0x160   : > { %v1452_v13 = vunpack.c.l.s8.bf16 %v524_v9  ;;  %v1456_v19 = vunpack.c.h.s8.bf16 %v524_v9  ;;  %v542_v9 = vld [vmem:[%s8317_s8 + $0x328] sm:$0xff] }
 0x162   : > { %3455 = vmatpush1.bf16.msra.mxu0 %v1409_v14  ;;  %4562 = vmatpush1.bf16.msra.mxu1 %v1411_v15  ;;  %v521_v14 = vld [vmem:[%s8317_s8 + $0x280] sm:$0xff]  ;;  %v523_v15 = vld [vmem:[%s8317_s8 + $0x290] sm:$0xff] }
 0x163   : > { %3456 = vmatprep.subr.bf16.mxu0 %v1414_v16  ;;  %4563 = vmatprep.subr.bf16.mxu1 %v1416_v17  ;;  %v1449_v16 = vunpack.c.l.s8.bf16 %v521_v14  ;;  %v1451_v17 = vunpack.c.l.s8.bf16 %v523_v15 }
 0x166   : > { %3457 = vmatpush1.bf16.msra.mxu0 %v1413_v21  ;;  %4564 = vmatpush1.bf16.msra.mxu1 %v1415_v22  ;;  %v526_v21 = vld [vmem:[%s8317_s8 + $0x2a8] sm:$0xff]  ;;  %v528_v22 = vld [vmem:[%s8317_s8 + $0x2b8] sm:$0xff] }
 0x167   : > { %3467 = vmatprep.subr.bf16.mxu0 %v1418_v36  ;;  %4574 = vmatprep.subr.bf16.mxu1 %v1420_v23  ;;  %v1453_v36 = vunpack.c.h.s8.bf16 %v521_v14  ;;  %v1455_v23 = vunpack.c.h.s8.bf16 %v523_v15  ;;  %v1458_v24 = vunpack.c.l.s8.bf16 %v526_v21  ;;  %v1460_v25 = vunpack.c.l.s8.bf16 %v528_v22  ;;  %v541_v15 = vld [vmem:[%s8317_s8 + $0x320] sm:$0xff] }
 0x169   : > { %3459 = vmatmul.mubr.bf16.vlgmr.msra.gmra.mrb[0].mxu0 %v3044_v28  ;;  %4566 = vmatmul.mubr.bf16.vlgmr.msra.gmra.mrb[0].mxu1 %v3044_v28  ;;  %v527_v28 = vld [vmem:[%s8317_s8 + $0x2b0] sm:$0xff] }
 0x16a   : > { %3468 = vmatpush1.bf16.msra.mxu0 %v1417_v29  ;;  %4575 = vmatpush1.bf16.msra.mxu1 %v1419_v30  ;;  %v1457_v29 = vunpack.c.l.s8.bf16 %v525_v27  ;;  %v1459_v30 = vunpack.c.l.s8.bf16 %v527_v28 }
 0x16b   : > { %3469 = vmatprep.subr.bf16.mxu0 %v1422_v31  ;;  %4576 = vmatprep.subr.bf16.mxu1 %v1424_v32  ;;  %v1462_v31 = vunpack.c.h.s8.bf16 %v526_v21  ;;  %v1464_v32 = vunpack.c.h.s8.bf16 %v528_v22  ;;  %v546_v21 = vld [vmem:[%s8317_s8 + $0x348] sm:$0xff]  ;;  %v548_v22 = vld [vmem:[%s8317_s8 + $0x358] sm:$0xff] }
 0x16c   : > { %3499 = vmatprep.mubr.bf16.mxu0 %v8445_v37  ;;  %4606 = vmatprep.mubr.bf16.mxu1 %v8445_v37 }
 0x16e   : > { %3470 = vmatpush1.bf16.msra.mxu0 %v1421_v53  ;;  %4577 = vmatpush1.bf16.msra.mxu1 %v1423_v38  ;;  %v1461_v53 = vunpack.c.h.s8.bf16 %v525_v27  ;;  %v1463_v38 = vunpack.c.h.s8.bf16 %v527_v28  ;;  %v545_v27 = vld [vmem:[%s8317_s8 + $0x340] sm:$0xff]  ;;  %v547_v28 = vld [vmem:[%s8317_s8 + $0x350] sm:$0xff] }
 0x16f   : > { %3471 = vmatprep.subr.bf16.mxu0 %v1426_v39  ;;  %4578 = vmatprep.subr.bf16.mxu1 %v1428_v40  ;;  %v1466_v39 = vunpack.c.l.s8.bf16 %v530_v33  ;;  %v1468_v40 = vunpack.c.l.s8.bf16 %v532_v34 }
 0x172   : > { %3472 = vmatpush1.bf16.msra.mxu0 %v1425_v44  ;;  %4579 = vmatpush1.bf16.msra.mxu1 %v1427_v45  ;;  %v1465_v44 = vunpack.c.l.s8.bf16 %v529_v42  ;;  %v1467_v45 = vunpack.c.l.s8.bf16 %v531_v43 }
 0x173   : > { %3473 = vmatprep.subr.bf16.mxu0 %v1430_v46  ;;  %4580 = vmatprep.subr.bf16.mxu1 %v1432_v47  ;;  %v1470_v46 = vunpack.c.h.s8.bf16 %v530_v33  ;;  %v1472_v47 = vunpack.c.h.s8.bf16 %v532_v34  ;;  %v550_v33 = vld [vmem:[%s8317_s8 + $0x368] sm:$0xff]  ;;  %v552_v34 = vld [vmem:[%s8317_s8 + $0x378] sm:$0xff] }
 0x176   : > { %3474 = vmatpush1.bf16.msra.mxu0 %v1429_v50  ;;  %4581 = vmatpush1.bf16.msra.mxu1 %v1431_v52  ;;  %v1469_v50 = vunpack.c.h.s8.bf16 %v529_v42  ;;  %v1471_v52 = vunpack.c.h.s8.bf16 %v531_v43  ;;  %v549_v42 = vld [vmem:[%s8317_s8 + $0x360] sm:$0xff]  ;;  %v551_v43 = vld [vmem:[%s8317_s8 + $0x370] sm:$0xff] }
 0x177   : > { %3475 = vmatprep.subr.bf16.mxu0 %v1434_v54  ;;  %4582 = vmatprep.subr.bf16.mxu1 %v1436_v55  ;;  %v1474_v54 = vunpack.c.l.s8.bf16 %v534_v48  ;;  %v1476_v55 = vunpack.c.l.s8.bf16 %v536_v49 }
 0x17a   : > { %3476 = vmatpush1.bf16.msra.mxu0 %v1433_v58  ;;  %4583 = vmatpush1.bf16.msra.mxu1 %v1435_v59  ;;  %v1473_v58 = vunpack.c.l.s8.bf16 %v533_v56  ;;  %v1475_v59 = vunpack.c.l.s8.bf16 %v535_v57 }
 0x17b   : > { %3477 = vmatprep.subr.bf16.mxu0 %v1438_v60  ;;  %4584 = vmatprep.subr.bf16.mxu1 %v1440_v41  ;;  %v1478_v60 = vunpack.c.h.s8.bf16 %v534_v48  ;;  %v1480_v41 = vunpack.c.h.s8.bf16 %v536_v49  ;;  %v554_v48 = vld [vmem:[%s8317_s8 + $0x388] sm:$0xff]  ;;  %v556_v49 = vld [vmem:[%s8317_s8 + $0x398] sm:$0xff] }
 0x17e   : > { %3478 = vmatpush1.bf16.msra.mxu0 %v1437_v63  ;;  %4585 = vmatpush1.bf16.msra.mxu1 %v1439_v0  ;;  %v1477_v63 = vunpack.c.h.s8.bf16 %v533_v56  ;;  %v1479_v0 = vunpack.c.h.s8.bf16 %v535_v57  ;;  %v553_v56 = vld [vmem:[%s8317_s8 + $0x380] sm:$0xff]  ;;  %v555_v57 = vld [vmem:[%s8317_s8 + $0x390] sm:$0xff] }
 0x17f   : > { %3479 = vmatprep.subr.bf16.mxu0 %v1442_v1  ;;  %4586 = vmatprep.subr.bf16.mxu1 %v1444_v51  ;;  %v1482_v1 = vunpack.c.l.s8.bf16 %v538_v61  ;;  %v1484_v51 = vunpack.c.l.s8.bf16 %v540_v62  ;;  %v560_v62 = vld [vmem:[%s8317_s8 + $0x3b8] sm:$0xff] }
 0x182   : > { %3480 = vmatpush1.bf16.msra.mxu0 %v1441_v4  ;;  %4587 = vmatpush1.bf16.msra.mxu1 %v1443_v5  ;;  %v8481_v4 = vrot.slane %v8434_v20, %v8354_v35  ;;  %v1481_v5 = vunpack.c.l.s8.bf16 %v537_v2  ;;  %v1485_v20 = vunpack.c.h.s8.bf16 %v537_v2  ;;  %v557_v2 = vld [vmem:[%s8317_s8 + $0x3a0] sm:$0xff] }
 0x183   : > { %3481 = vmatprep.subr.bf16.mxu0 %v1446_v6  ;;  %4588 = vmatprep.subr.bf16.mxu1 %v1448_v7  ;;  %v1483_v6 = vunpack.c.l.s8.bf16 %v539_v3  ;;  %v1486_v7 = vunpack.c.h.s8.bf16 %v538_v61  ;;  %v558_v61 = vld [vmem:[%s8317_s8 + $0x3a8] sm:$0xff] }
 0x186   : > { %3482 = vmatpush1.bf16.msra.mxu0 %v1445_v10  ;;  %4589 = vmatpush1.bf16.msra.mxu1 %v1447_v11  ;;  %v544_v10 = vld [vmem:[%s8317_s8 + $0x338] sm:$0xff]  ;;  %v3047_v11 = vcombine.high %v8445_v37, %v8445_v37  ;;  %v1489_v37 = vunpack.c.l.s8.bf16 %v541_v15 }
 0x187   : > { %3483 = vmatprep.subr.bf16.mxu0 %v1450_v12  ;;  %4590 = vmatprep.subr.bf16.mxu1 %v1452_v13  ;;  %v1487_v12 = vunpack.c.h.s8.bf16 %v539_v3  ;;  %v1490_v13 = vunpack.c.l.s8.bf16 %v542_v9  ;;  %v1492_v14 = vunpack.c.l.s8.bf16 %v544_v10  ;;  %v559_v3 = vld [vmem:[%s8317_s8 + $0x3b0] sm:$0xff] }
 0x18a   : > { %3484 = vmatpush1.bf16.msra.mxu0 %v1449_v16  ;;  %4591 = vmatpush1.bf16.msra.mxu1 %v1451_v17  ;;  %v543_v16 = vld [vmem:[%s8317_s8 + $0x330] sm:$0xff] }
 0x18b   : > { %3485 = vmatprep.subr.bf16.mxu0 %v1454_v18  ;;  %4592 = vmatprep.subr.bf16.mxu1 %v1456_v19  ;;  %v1491_v17 = vunpack.c.l.s8.bf16 %v543_v16  ;;  %v1494_v18 = vunpack.c.h.s8.bf16 %v542_v9  ;;  %v1496_v19 = vunpack.c.h.s8.bf16 %v544_v10  ;;  %v562_v9 = vld [vmem:[%s8317_s8 + $0x3c8] sm:$0xff]  ;;  %v564_v10 = vld [vmem:[%s8317_s8 + $0x3d8] sm:$0xff] }
 0x18e   : > { %3486 = vmatpush1.bf16.msra.mxu0 %v1453_v36  ;;  %4593 = vmatpush1.bf16.msra.mxu1 %v1455_v23  ;;  %v1493_v36 = vunpack.c.h.s8.bf16 %v541_v15  ;;  %v1495_v23 = vunpack.c.h.s8.bf16 %v543_v16  ;;  %v563_v15 = vld [vmem:[%s8317_s8 + $0x3d0] sm:$0xff] }
 0x18f   : > { %3487 = vmatprep.subr.bf16.mxu0 %v1458_v24  ;;  %4594 = vmatprep.subr.bf16.mxu1 %v1460_v25  ;;  %v1498_v24 = vunpack.c.l.s8.bf16 %v546_v21  ;;  %v1500_v25 = vunpack.c.l.s8.bf16 %v548_v22 }
 0x192   : > { %3488 = vmatpush1.bf16.msra.mxu0 %v1457_v29  ;;  %4595 = vmatpush1.bf16.msra.mxu1 %v1459_v30  ;;  %v1497_v29 = vunpack.c.l.s8.bf16 %v545_v27  ;;  %v1499_v30 = vunpack.c.l.s8.bf16 %v547_v28 }
 0x193   : > { %3489 = vmatprep.subr.bf16.mxu0 %v1462_v31  ;;  %4596 = vmatprep.subr.bf16.mxu1 %v1464_v32  ;;  %v1502_v31 = vunpack.c.h.s8.bf16 %v546_v21  ;;  %v1504_v32 = vunpack.c.h.s8.bf16 %v548_v22  ;;  %v568_v21 = vld [vmem:[%s8317_s8 + $0x3f8] sm:$0xff] }
 0x196   : > { %3490 = vmatpush1.bf16.msra.mxu0 %v1461_v53  ;;  %4597 = vmatpush1.bf16.msra.mxu1 %v1463_v38  ;;  %v1501_v53 = vunpack.c.h.s8.bf16 %v545_v27  ;;  %v1503_v38 = vunpack.c.h.s8.bf16 %v547_v28  ;;  %v567_v27 = vld [vmem:[%s8317_s8 + $0x3f0] sm:$0xff] }
 0x197   : > { %3491 = vmatprep.subr.bf16.mxu0 %v1466_v39  ;;  %4598 = vmatprep.subr.bf16.mxu1 %v1468_v40  ;;  %v1506_v39 = vunpack.c.l.s8.bf16 %v550_v33  ;;  %v1508_v40 = vunpack.c.l.s8.bf16 %v552_v34  ;;  %v8515_v28 = vld [vmem:[#allocation3 + $0x8] sm:$0xff] }
 0x19a   : > { %3492 = vmatpush1.bf16.msra.mxu0 %v1465_v44  ;;  %4599 = vmatpush1.bf16.msra.mxu1 %v1467_v45  ;;  %v1505_v44 = vunpack.c.l.s8.bf16 %v549_v42  ;;  %v1507_v45 = vunpack.c.l.s8.bf16 %v551_v43 }
 0x19b   : > { %3493 = vmatprep.subr.bf16.mxu0 %v1470_v46  ;;  %4600 = vmatprep.subr.bf16.mxu1 %v1472_v47  ;;  %v1510_v46 = vunpack.c.h.s8.bf16 %v550_v33  ;;  %v1512_v47 = vunpack.c.h.s8.bf16 %v552_v34  ;;  %v570_v33 = vld [vmem:[%s8317_s8 + $0x408] sm:$0xff]  ;;  %v572_v34 = vld [vmem:[%s8317_s8 + $0x418] sm:$0xff] }
 0x19e   : > { %3494 = vmatpush1.bf16.msra.mxu0 %v1469_v50  ;;  %4601 = vmatpush1.bf16.msra.mxu1 %v1471_v52  ;;  %v1509_v50 = vunpack.c.h.s8.bf16 %v549_v42  ;;  %v1511_v52 = vunpack.c.h.s8.bf16 %v551_v43  ;;  %v1548_v42 = vunpack.c.l.s8.bf16 %v572_v34  ;;  %v569_v43 = vld [vmem:[%s8317_s8 + $0x400] sm:$0xff] }
 0x19f   : > { %3495 = vmatprep.subr.bf16.mxu0 %v1474_v54  ;;  %4602 = vmatprep.subr.bf16.mxu1 %v1476_v55  ;;  %v1514_v54 = vunpack.c.l.s8.bf16 %v554_v48  ;;  %v1516_v55 = vunpack.c.l.s8.bf16 %v556_v49 }
 0x1a2   : > { %3496 = vmatpush1.bf16.msra.mxu0 %v1473_v58  ;;  %4603 = vmatpush1.bf16.msra.mxu1 %v1475_v59  ;;  %v1513_v58 = vunpack.c.l.s8.bf16 %v553_v56  ;;  %v1515_v59 = vunpack.c.l.s8.bf16 %v555_v57 }
 0x1a3   : > { %3497 = vmatprep.subr.bf16.mxu0 %v1478_v60  ;;  %4604 = vmatprep.subr.bf16.mxu1 %v1480_v41  ;;  %v1518_v60 = vunpack.c.h.s8.bf16 %v554_v48  ;;  %v1520_v41 = vunpack.c.h.s8.bf16 %v556_v49  ;;  %v1550_v49 = vunpack.c.h.s8.bf16 %v570_v33 }
 0x1a6   : > { %3498 = vmatpush1.bf16.msra.mxu0 %v1477_v63  ;;  %4605 = vmatpush1.bf16.msra.mxu1 %v1479_v0  ;;  %v1517_v63 = vunpack.c.h.s8.bf16 %v553_v56  ;;  %v1519_v0 = vunpack.c.h.s8.bf16 %v555_v57 }
 0x1a7   : > { %3508 = vmatprep.subr.bf16.mxu0 %v1482_v1  ;;  %4615 = vmatprep.subr.bf16.mxu1 %v1484_v51  ;;  %v1522_v1 = vunpack.c.l.s8.bf16 %v558_v61  ;;  %v1524_v51 = vunpack.c.l.s8.bf16 %v560_v62 }
 0x1a9   : > { %3500 = vmatmul.mubr.bf16.vlgmr.msra.gmra.mrb[0].mxu0 %v8481_v4  ;;  %4607 = vmatmul.mubr.bf16.vlgmr.msra.gmra.mrb[0].mxu1 %v8481_v4 }
 0x1aa   : > { %3509 = vmatpush1.bf16.msra.mxu0 %v1481_v5  ;;  %4616 = vmatpush1.bf16.msra.mxu1 %v1483_v6  ;;  %v1521_v5 = vunpack.c.l.s8.bf16 %v557_v2  ;;  %v1523_v6 = vunpack.c.l.s8.bf16 %v559_v3 }
 0x1ab   : > { %3510 = vmatprep.subr.bf16.mxu0 %v1486_v7  ;;  %4617 = vmatprep.subr.bf16.mxu1 %v1488_v8  ;;  %v1526_v7 = vunpack.c.h.s8.bf16 %v558_v61  ;;  %v1528_v8 = vunpack.c.h.s8.bf16 %v560_v62 }
 0x1ac   : > { %3540 = vmatprep.mubr.bf16.mxu0 %v3047_v11  ;;  %4647 = vmatprep.mubr.bf16.mxu1 %v3047_v11  ;;  %v1525_v11 = vunpack.c.h.s8.bf16 %v557_v2 }
 0x1ae   : > { %3511 = vmatpush1.bf16.msra.mxu0 %v1485_v20  ;;  %4618 = vmatpush1.bf16.msra.mxu1 %v1487_v12  ;;  %v1527_v20 = vunpack.c.h.s8.bf16 %v559_v3  ;;  %v1530_v12 = vunpack.c.l.s8.bf16 %v562_v9 }
 0x1af   : > { %3512 = vmatprep.subr.bf16.mxu0 %v1490_v13  ;;  %4619 = vmatprep.subr.bf16.mxu1 %v1492_v14  ;;  %v1532_v13 = vunpack.c.l.s8.bf16 %v564_v10  ;;  %v561_v14 = vld [vmem:[%s8317_s8 + $0x3c0] sm:$0xff] }
 0x1b0   : > { %v1529_v16 = vunpack.c.l.s8.bf16 %v561_v14  ;;  %v1533_v22 = vunpack.c.h.s8.bf16 %v561_v14 }
 0x1b2   : > { %3513 = vmatpush1.bf16.msra.mxu0 %v1489_v37  ;;  %4620 = vmatpush1.bf16.msra.mxu1 %v1491_v17  ;;  %v1531_v37 = vunpack.c.l.s8.bf16 %v563_v15  ;;  %v1534_v17 = vunpack.c.h.s8.bf16 %v562_v9 }
 0x1b3   : > { %3514 = vmatprep.subr.bf16.mxu0 %v1494_v18  ;;  %4621 = vmatprep.subr.bf16.mxu1 %v1496_v19  ;;  %v1536_v18 = vunpack.c.h.s8.bf16 %v564_v10  ;;  %v566_v19 = vld [vmem:[%s8317_s8 + $0x3e8] sm:$0xff] }
 0x1b6   : > { %3515 = vmatpush1.bf16.msra.mxu0 %v1493_v36  ;;  %4622 = vmatpush1.bf16.msra.mxu1 %v1495_v23  ;;  %v1535_v36 = vunpack.c.h.s8.bf16 %v563_v15  ;;  %v1538_v23 = vunpack.c.l.s8.bf16 %v566_v19 }
 0x1b7   : > { %3516 = vmatprep.subr.bf16.mxu0 %v1498_v24  ;;  %4623 = vmatprep.subr.bf16.mxu1 %v1500_v25  ;;  %v1540_v24 = vunpack.c.l.s8.bf16 %v568_v21  ;;  %v565_v25 = vld [vmem:[%s8317_s8 + $0x3e0] sm:$0xff] }
 0x1ba   : > { %3517 = vmatpush1.bf16.msra.mxu0 %v1497_v29  ;;  %4624 = vmatpush1.bf16.msra.mxu1 %v1499_v30  ;;  %v1537_v29 = vunpack.c.l.s8.bf16 %v565_v25  ;;  %v1539_v30 = vunpack.c.l.s8.bf16 %v567_v27 }
 0x1bb   : > { %3518 = vmatprep.subr.bf16.mxu0 %v1502_v31  ;;  %4625 = vmatprep.subr.bf16.mxu1 %v1504_v32  ;;  %v1542_v31 = vunpack.c.h.s8.bf16 %v566_v19  ;;  %v1544_v32 = vunpack.c.h.s8.bf16 %v568_v21 }
 0x1be   : > { %3519 = vmatpush1.bf16.msra.mxu0 %v1501_v53  ;;  %4626 = vmatpush1.bf16.msra.mxu1 %v1503_v38  ;;  %v8521_v53 = vrot.slane %v8515_v28, %v8354_v35  ;;  %v1541_v38 = vunpack.c.h.s8.bf16 %v565_v25 }
 0x1bf   : > { %3520 = vmatprep.subr.bf16.mxu0 %v1506_v39  ;;  %4627 = vmatprep.subr.bf16.mxu1 %v1508_v40  ;;  %v1543_v39 = vunpack.c.h.s8.bf16 %v567_v27  ;;  %v1546_v40 = vunpack.c.l.s8.bf16 %v570_v33 }
 0x1c2   : > { %3521 = vmatpush1.bf16.msra.mxu0 %v1505_v44  ;;  %4628 = vmatpush1.bf16.msra.mxu1 %v1507_v45  ;;  %v571_v44 = vld [vmem:[%s8317_s8 + $0x410] sm:$0xff]  ;;  %v3063_v45 = vcombine.high %v8521_v53, %v8521_v53 }
 0x1c3   : > { %3522 = vmatprep.subr.bf16.mxu0 %v1510_v46  ;;  %4629 = vmatprep.subr.bf16.mxu1 %v1512_v47  ;;  %v3045_v46 = vcombine.high %v8481_v4, %v8481_v4  ;;  %v1545_v47 = vunpack.c.l.s8.bf16 %v569_v43  ;;  %v1547_v48 = vunpack.c.l.s8.bf16 %v571_v44  ;;  %v1549_v4 = vunpack.c.h.s8.bf16 %v569_v43 }
 0x1c4   : > { %v1551_v56 = vunpack.c.h.s8.bf16 %v571_v44 }
 0x1c6   : > { %3523 = vmatpush1.bf16.msra.mxu0 %v1509_v50  ;;  %4630 = vmatpush1.bf16.msra.mxu1 %v1511_v52  ;;  %v1552_v50 = vunpack.c.h.s8.bf16 %v572_v34  ;;  %v574_v52 = vld [vmem:[%s8317_s8 + $0x428] sm:$0xff] }
 0x1c7   : > { %3524 = vmatprep.subr.bf16.mxu0 %v1514_v54  ;;  %4631 = vmatprep.subr.bf16.mxu1 %v1516_v55  ;;  %v576_v54 = vld [vmem:[%s8317_s8 + $0x438] sm:$0xff]  ;;  %v8532_v55 = vrot.slane %v3063_v45, %v8354_v35  ;;  %v1554_v57 = vunpack.c.l.s8.bf16 %v574_v52  ;;  %v1558_v62 = vunpack.c.h.s8.bf16 %v574_v52 }
 0x1ca   : > { %3525 = vmatpush1.bf16.msra.mxu0 %v1513_v58  ;;  %4632 = vmatpush1.bf16.msra.mxu1 %v1515_v59  ;;  %v1556_v58 = vunpack.c.l.s8.bf16 %v576_v54  ;;  %v573_v59 = vld [vmem:[%s8317_s8 + $0x420] sm:$0xff] }
 0x1cb   : > { %3526 = vmatprep.subr.bf16.mxu0 %v1518_v60  ;;  %4633 = vmatprep.subr.bf16.mxu1 %v1520_v41  ;;  %v575_v60 = vld [vmem:[%s8317_s8 + $0x430] sm:$0xff]  ;;  %v1553_v41 = vunpack.c.l.s8.bf16 %v573_v59 }
 0x1cc   : > { %v1555_v61 = vunpack.c.l.s8.bf16 %v575_v60  ;;  %v1559_v2 = vunpack.c.h.s8.bf16 %v575_v60  ;;  %v593_v60 = vld [vmem:[%s8317_s8 + $0x4c0] sm:$0xff] }
 0x1ce   : > { %3527 = vmatpush1.bf16.msra.mxu0 %v1517_v63  ;;  %4634 = vmatpush1.bf16.msra.mxu1 %v1519_v0  ;;  %v1560_v63 = vunpack.c.h.s8.bf16 %v576_v54  ;;  %v578_v0 = vld [vmem:[%s8317_s8 + $0x448] sm:$0xff] }
 0x1cf   : > { %3528 = vmatprep.subr.bf16.mxu0 %v1522_v1  ;;  %4635 = vmatprep.subr.bf16.mxu1 %v1524_v51  ;;  %v580_v1 = vld [vmem:[%s8317_s8 + $0x458] sm:$0xff]  ;;  %v1557_v51 = vunpack.c.h.s8.bf16 %v573_v59  ;;  %v1562_v3 = vunpack.c.l.s8.bf16 %v578_v0  ;;  %v1566_v10 = vunpack.c.h.s8.bf16 %v578_v0  ;;  %v594_v54 = vld [vmem:[%s8317_s8 + $0x4c8] sm:$0xff] }
 0x1d2   : > { %3529 = vmatpush1.bf16.msra.mxu0 %v1521_v5  ;;  %4636 = vmatpush1.bf16.msra.mxu1 %v1523_v6  ;;  %v1564_v5 = vunpack.c.l.s8.bf16 %v580_v1  ;;  %v577_v6 = vld [vmem:[%s8317_s8 + $0x440] sm:$0xff] }
 0x1d3   : > { %3530 = vmatprep.subr.bf16.mxu0 %v1526_v7  ;;  %4637 = vmatprep.subr.bf16.mxu1 %v1528_v8  ;;  %v579_v7 = vld [vmem:[%s8317_s8 + $0x450] sm:$0xff]  ;;  %v1561_v8 = vunpack.c.l.s8.bf16 %v577_v6 }
 0x1d4   : > { %v1563_v9 = vunpack.c.l.s8.bf16 %v579_v7  ;;  %v1567_v14 = vunpack.c.h.s8.bf16 %v579_v7  ;;  %v597_v7 = vld [vmem:[%s8317_s8 + $0x4e0] sm:$0xff] }
 0x1d6   : > { %3531 = vmatpush1.bf16.msra.mxu0 %v1525_v11  ;;  %4638 = vmatpush1.bf16.msra.mxu1 %v1527_v20  ;;  %v1568_v11 = vunpack.c.h.s8.bf16 %v580_v1  ;;  %v582_v20 = vld [vmem:[%s8317_s8 + $0x468] sm:$0xff] }
 0x1d7   : > { %3532 = vmatprep.subr.bf16.mxu0 %v1530_v12  ;;  %4639 = vmatprep.subr.bf16.mxu1 %v1532_v13  ;;  %v584_v12 = vld [vmem:[%s8317_s8 + $0x478] sm:$0xff]  ;;  %v1565_v13 = vunpack.c.h.s8.bf16 %v577_v6  ;;  %v1570_v15 = vunpack.c.l.s8.bf16 %v582_v20  ;;  %v1574_v21 = vunpack.c.h.s8.bf16 %v582_v20  ;;  %v598_v1 = vld [vmem:[%s8317_s8 + $0x4e8] sm:$0xff] }
 0x1da   : > { %3533 = vmatpush1.bf16.msra.mxu0 %v1529_v16  ;;  %4640 = vmatpush1.bf16.msra.mxu1 %v1531_v37  ;;  %v1572_v16 = vunpack.c.l.s8.bf16 %v584_v12  ;;  %v581_v37 = vld [vmem:[%s8317_s8 + $0x460] sm:$0xff] }
 0x1db   : > { %3534 = vmatprep.subr.bf16.mxu0 %v1534_v17  ;;  %4641 = vmatprep.subr.bf16.mxu1 %v1536_v18  ;;  %v583_v17 = vld [vmem:[%s8317_s8 + $0x470] sm:$0xff]  ;;  %v1569_v18 = vunpack.c.l.s8.bf16 %v581_v37 }
 0x1dc   : > { %v1571_v19 = vunpack.c.l.s8.bf16 %v583_v17  ;;  %v1575_v25 = vunpack.c.h.s8.bf16 %v583_v17  ;;  %v601_v17 = vld [vmem:[%s8317_s8 + $0x500] sm:$0xff] }
 0x1de   : > { %3535 = vmatpush1.bf16.msra.mxu0 %v1533_v22  ;;  %4642 = vmatpush1.bf16.msra.mxu1 %v1535_v36  ;;  %v1576_v22 = vunpack.c.h.s8.bf16 %v584_v12  ;;  %v586_v36 = vld [vmem:[%s8317_s8 + $0x488] sm:$0xff] }
 0x1df   : > { %3536 = vmatprep.subr.bf16.mxu0 %v1538_v23  ;;  %4643 = vmatprep.subr.bf16.mxu1 %v1540_v24  ;;  %v588_v23 = vld [vmem:[%s8317_s8 + $0x498] sm:$0xff]  ;;  %v1573_v24 = vunpack.c.h.s8.bf16 %v581_v37  ;;  %v1578_v27 = vunpack.c.l.s8.bf16 %v586_v36  ;;  %v1582_v34 = vunpack.c.h.s8.bf16 %v586_v36  ;;  %v602_v12 = vld [vmem:[%s8317_s8 + $0x508] sm:$0xff] }
 0x1e0   : > { %v1614_v36 = vunpack.c.h.s8.bf16 %v602_v12 }
 0x1e2   : > { %3537 = vmatpush1.bf16.msra.mxu0 %v1537_v29  ;;  %4644 = vmatpush1.bf16.msra.mxu1 %v1539_v30  ;;  %v1580_v29 = vunpack.c.l.s8.bf16 %v588_v23  ;;  %v585_v30 = vld [vmem:[%s8317_s8 + $0x480] sm:$0xff] }
 0x1e3   : > { %3538 = vmatprep.subr.bf16.mxu0 %v1542_v31  ;;  %4645 = vmatprep.subr.bf16.mxu1 %v1544_v32  ;;  %v587_v31 = vld [vmem:[%s8317_s8 + $0x490] sm:$0xff]  ;;  %v1577_v32 = vunpack.c.l.s8.bf16 %v585_v30 }
 0x1e4   : > { %v1579_v33 = vunpack.c.l.s8.bf16 %v587_v31  ;;  %v1583_v43 = vunpack.c.h.s8.bf16 %v587_v31 }
 0x1e6   : > { %3539 = vmatpush1.bf16.msra.mxu0 %v1541_v38  ;;  %4646 = vmatpush1.bf16.msra.mxu1 %v1543_v39  ;;  %v1584_v38 = vunpack.c.h.s8.bf16 %v588_v23  ;;  %v590_v39 = vld [vmem:[%s8317_s8 + $0x4a8] sm:$0xff] }
 0x1e7   : > { %3549 = vmatprep.subr.bf16.mxu0 %v1546_v40  ;;  %4656 = vmatprep.subr.bf16.mxu1 %v1548_v42  ;;  %v592_v40 = vld [vmem:[%s8317_s8 + $0x4b8] sm:$0xff]  ;;  %v1581_v42 = vunpack.c.h.s8.bf16 %v585_v30  ;;  %v1586_v44 = vunpack.c.l.s8.bf16 %v590_v39 }
 0x1e8   : > { %v1588_v45 = vunpack.c.l.s8.bf16 %v592_v40  ;;  %v1592_v52 = vunpack.c.h.s8.bf16 %v592_v40  ;;  %v610_v40 = vld [vmem:[%s8317_s8 + $0x548] sm:$0xff] }
 0x1e9   : > { %3541 = vmatmul.mubr.bf16.vlgmr.msra.gmra.mrb[0].mxu0 %v3045_v46  ;;  %4648 = vmatmul.mubr.bf16.vlgmr.msra.gmra.mrb[0].mxu1 %v3045_v46  ;;  %v589_v46 = vld [vmem:[%s8317_s8 + $0x4a0] sm:$0xff] }
 0x1ea   : > { %3550 = vmatpush1.bf16.msra.mxu0 %v1545_v47  ;;  %4657 = vmatpush1.bf16.msra.mxu1 %v1547_v48  ;;  %v591_v47 = vld [vmem:[%s8317_s8 + $0x4b0] sm:$0xff]  ;;  %v1585_v48 = vunpack.c.l.s8.bf16 %v589_v46 }
 0x1eb   : > { %3551 = vmatprep.subr.bf16.mxu0 %v1550_v49  ;;  %4658 = vmatprep.subr.bf16.mxu1 %v1552_v50  ;;  %v1587_v49 = vunpack.c.l.s8.bf16 %v591_v47  ;;  %v1590_v50 = vunpack.c.h.s8.bf16 %v590_v39 }
 0x1ec   : > { %3581 = vmatprep.mubr.bf16.mxu0 %v8532_v55  ;;  %4688 = vmatprep.mubr.bf16.mxu1 %v8532_v55 }
 0x1ee   : > { %3552 = vmatpush1.bf16.msra.mxu0 %v1549_v4  ;;  %4659 = vmatpush1.bf16.msra.mxu1 %v1551_v56  ;;  %v596_v4 = vld [vmem:[%s8317_s8 + $0x4d8] sm:$0xff]  ;;  %v1589_v56 = vunpack.c.h.s8.bf16 %v589_v46 }
 0x1ef   : > { %3553 = vmatprep.subr.bf16.mxu0 %v1554_v57  ;;  %4660 = vmatprep.subr.bf16.mxu1 %v1556_v58  ;;  %v1591_v57 = vunpack.c.h.s8.bf16 %v591_v47  ;;  %v1594_v58 = vunpack.c.l.s8.bf16 %v594_v54  ;;  %v1596_v59 = vunpack.c.l.s8.bf16 %v596_v4  ;;  %v1600_v0 = vunpack.c.h.s8.bf16 %v596_v4  ;;  %v609_v47 = vld [vmem:[%s8317_s8 + $0x540] sm:$0xff]  ;;  %v614_v4 = vld [vmem:[%s8317_s8 + $0x568] sm:$0xff] }
 0x1f2   : > { %3554 = vmatpush1.bf16.msra.mxu0 %v1553_v41  ;;  %4661 = vmatpush1.bf16.msra.mxu1 %v1555_v61  ;;  %v595_v41 = vld [vmem:[%s8317_s8 + $0x4d0] sm:$0xff]  ;;  %v1593_v61 = vunpack.c.l.s8.bf16 %v593_v60 }
 0x1f3   : > { %3555 = vmatprep.subr.bf16.mxu0 %v1558_v62  ;;  %4662 = vmatprep.subr.bf16.mxu1 %v1560_v63  ;;  %v1595_v62 = vunpack.c.l.s8.bf16 %v595_v41  ;;  %v1598_v63 = vunpack.c.h.s8.bf16 %v594_v54 }
 0x1f6   : > { %3556 = vmatpush1.bf16.msra.mxu0 %v1557_v51  ;;  %4663 = vmatpush1.bf16.msra.mxu1 %v1559_v2  ;;  %v600_v51 = vld [vmem:[%s8317_s8 + $0x4f8] sm:$0xff]  ;;  %v1597_v2 = vunpack.c.h.s8.bf16 %v593_v60 }
 0x1f7   : > { %3557 = vmatprep.subr.bf16.mxu0 %v1562_v3  ;;  %4664 = vmatprep.subr.bf16.mxu1 %v1564_v5  ;;  %v1599_v3 = vunpack.c.h.s8.bf16 %v595_v41  ;;  %v1602_v5 = vunpack.c.l.s8.bf16 %v598_v1  ;;  %v1604_v6 = vunpack.c.l.s8.bf16 %v600_v51  ;;  %v1608_v20 = vunpack.c.h.s8.bf16 %v600_v51  ;;  %v613_v41 = vld [vmem:[%s8317_s8 + $0x560] sm:$0xff]  ;;  %v618_v51 = vld [vmem:[%s8317_s8 + $0x588] sm:$0xff] }
 0x1fa   : > { %3558 = vmatpush1.bf16.msra.mxu0 %v1561_v8  ;;  %4665 = vmatpush1.bf16.msra.mxu1 %v1563_v9  ;;  %v599_v8 = vld [vmem:[%s8317_s8 + $0x4f0] sm:$0xff]  ;;  %v1601_v9 = vunpack.c.l.s8.bf16 %v597_v7 }
 0x1fb   : > { %3559 = vmatprep.subr.bf16.mxu0 %v1566_v10  ;;  %4666 = vmatprep.subr.bf16.mxu1 %v1568_v11  ;;  %v1603_v10 = vunpack.c.l.s8.bf16 %v599_v8  ;;  %v1606_v11 = vunpack.c.h.s8.bf16 %v598_v1 }
 0x1fe   : > { %3560 = vmatpush1.bf16.msra.mxu0 %v1565_v13  ;;  %4667 = vmatpush1.bf16.msra.mxu1 %v1567_v14  ;;  %v604_v13 = vld [vmem:[%s8317_s8 + $0x518] sm:$0xff]  ;;  %v1605_v14 = vunpack.c.h.s8.bf16 %v597_v7 }
 0x1ff   : > { %3561 = vmatprep.subr.bf16.mxu0 %v1570_v15  ;;  %4668 = vmatprep.subr.bf16.mxu1 %v1572_v16  ;;  %v1607_v15 = vunpack.c.h.s8.bf16 %v599_v8  ;;  %v1610_v16 = vunpack.c.l.s8.bf16 %v602_v12  ;;  %v1612_v37 = vunpack.c.l.s8.bf16 %v604_v13  ;;  %v1616_v23 = vunpack.c.h.s8.bf16 %v604_v13  ;;  %v617_v8 = vld [vmem:[%s8317_s8 + $0x580] sm:$0xff]  ;;  %v622_v13 = vld [vmem:[%s8317_s8 + $0x5a8] sm:$0xff] }
 0x202   : > { %3562 = vmatpush1.bf16.msra.mxu0 %v1569_v18  ;;  %4669 = vmatpush1.bf16.msra.mxu1 %v1571_v19  ;;  %v603_v18 = vld [vmem:[%s8317_s8 + $0x510] sm:$0xff]  ;;  %v8568_v19 = vrot.slane %v8521_v53, %v8354_v35  ;;  %v1613_v53 = vunpack.c.h.s8.bf16 %v601_v17 }
 0x203   : > { %3563 = vmatprep.subr.bf16.mxu0 %v1574_v21  ;;  %4670 = vmatprep.subr.bf16.mxu1 %v1576_v22  ;;  %v1609_v21 = vunpack.c.l.s8.bf16 %v601_v17  ;;  %v1611_v22 = vunpack.c.l.s8.bf16 %v603_v18 }
 0x206   : > { %3564 = vmatpush1.bf16.msra.mxu0 %v1573_v24  ;;  %4671 = vmatpush1.bf16.msra.mxu1 %v1575_v25  ;;  %v606_v24 = vld [vmem:[%s8317_s8 + $0x528] sm:$0xff]  ;;  %v608_v25 = vld [vmem:[%s8317_s8 + $0x538] sm:$0xff] }
 0x207   : > { %3565 = vmatprep.subr.bf16.mxu0 %v1578_v27  ;;  %4672 = vmatprep.subr.bf16.mxu1 %v1580_v29  ;;  %v3095_v27 = vcombine.high %v8532_v55, %v8532_v55  ;;  %v1615_v29 = vunpack.c.h.s8.bf16 %v603_v18  ;;  %v1618_v30 = vunpack.c.l.s8.bf16 %v606_v24  ;;  %v1620_v31 = vunpack.c.l.s8.bf16 %v608_v25  ;;  %v621_v18 = vld [vmem:[%s8317_s8 + $0x5a0] sm:$0xff] }
 0x208   : > { %v1624_v39 = vunpack.c.h.s8.bf16 %v608_v25  ;;  %v626_v25 = vld [vmem:[%s8317_s8 + $0x5c8] sm:$0xff] }
 0x20a   : > { %3566 = vmatpush1.bf16.msra.mxu0 %v1577_v32  ;;  %4673 = vmatpush1.bf16.msra.mxu1 %v1579_v33  ;;  %v605_v32 = vld [vmem:[%s8317_s8 + $0x520] sm:$0xff]  ;;  %v607_v33 = vld [vmem:[%s8317_s8 + $0x530] sm:$0xff] }
 0x20b   : > { %3567 = vmatprep.subr.bf16.mxu0 %v1582_v34  ;;  %4674 = vmatprep.subr.bf16.mxu1 %v1584_v38  ;;  %v1617_v55 = vunpack.c.l.s8.bf16 %v605_v32  ;;  %v1619_v34 = vunpack.c.l.s8.bf16 %v607_v33  ;;  %v1622_v38 = vunpack.c.h.s8.bf16 %v606_v24 }
 0x20e   : > { %3568 = vmatpush1.bf16.msra.mxu0 %v1581_v42  ;;  %4675 = vmatpush1.bf16.msra.mxu1 %v1583_v43  ;;  %v612_v42 = vld [vmem:[%s8317_s8 + $0x558] sm:$0xff]  ;;  %v1621_v43 = vunpack.c.h.s8.bf16 %v605_v32  ;;  %v625_v32 = vld [vmem:[%s8317_s8 + $0x5c0] sm:$0xff] }
 0x20f   : > { %3569 = vmatprep.subr.bf16.mxu0 %v1586_v44  ;;  %4676 = vmatprep.subr.bf16.mxu1 %v1588_v45  ;;  %v1623_v44 = vunpack.c.h.s8.bf16 %v607_v33  ;;  %v1626_v45 = vunpack.c.l.s8.bf16 %v610_v40  ;;  %v1628_v46 = vunpack.c.l.s8.bf16 %v612_v42  ;;  %v1632_v54 = vunpack.c.h.s8.bf16 %v612_v42  ;;  %v627_v33 = vld [vmem:[%s8317_s8 + $0x5d0] sm:$0xff]  ;;  %v632_v42 = vld [vmem:[%s8317_s8 + $0x5f8] sm:$0xff] }
 0x212   : > { %3570 = vmatpush1.bf16.msra.mxu0 %v1585_v48  ;;  %4677 = vmatpush1.bf16.msra.mxu1 %v1587_v49  ;;  %v611_v48 = vld [vmem:[%s8317_s8 + $0x550] sm:$0xff]  ;;  %v1625_v49 = vunpack.c.l.s8.bf16 %v609_v47 }
 0x213   : > { %3571 = vmatprep.subr.bf16.mxu0 %v1590_v50  ;;  %4678 = vmatprep.subr.bf16.mxu1 %v1592_v52  ;;  %v1627_v50 = vunpack.c.l.s8.bf16 %v611_v48  ;;  %v1630_v52 = vunpack.c.h.s8.bf16 %v610_v40  ;;  %v630_v40 = vld [vmem:[%s8317_s8 + $0x5e8] sm:$0xff] }
 0x216   : > { %3572 = vmatpush1.bf16.msra.mxu0 %v1589_v56  ;;  %4679 = vmatpush1.bf16.msra.mxu1 %v1591_v57  ;;  %v616_v56 = vld [vmem:[%s8317_s8 + $0x578] sm:$0xff]  ;;  %v1629_v57 = vunpack.c.h.s8.bf16 %v609_v47  ;;  %v629_v47 = vld [vmem:[%s8317_s8 + $0x5e0] sm:$0xff] }
 0x217   : > { %3573 = vmatprep.subr.bf16.mxu0 %v1594_v58  ;;  %4680 = vmatprep.subr.bf16.mxu1 %v1596_v59  ;;  %v1631_v58 = vunpack.c.h.s8.bf16 %v611_v48  ;;  %v1634_v59 = vunpack.c.l.s8.bf16 %v614_v4  ;;  %v1636_v60 = vunpack.c.l.s8.bf16 %v616_v56  ;;  %v1640_v1 = vunpack.c.h.s8.bf16 %v616_v56  ;;  %v631_v48 = vld [vmem:[%s8317_s8 + $0x5f0] sm:$0xff]  ;;  %v634_v56 = vld [vmem:[%s8317_s8 + $0x608] sm:$0xff] }
 0x21a   : > { %3574 = vmatpush1.bf16.msra.mxu0 %v1593_v61  ;;  %4681 = vmatpush1.bf16.msra.mxu1 %v1595_v62  ;;  %v615_v61 = vld [vmem:[%s8317_s8 + $0x570] sm:$0xff]  ;;  %v1633_v62 = vunpack.c.l.s8.bf16 %v613_v41 }
 0x21b   : > { %3575 = vmatprep.subr.bf16.mxu0 %v1598_v63  ;;  %4682 = vmatprep.subr.bf16.mxu1 %v1600_v0  ;;  %v1635_v63 = vunpack.c.l.s8.bf16 %v615_v61  ;;  %v1638_v0 = vunpack.c.h.s8.bf16 %v614_v4  ;;  %v1672_v4 = vunpack.c.h.s8.bf16 %v632_v42 }
 0x21e   : > { %3576 = vmatpush1.bf16.msra.mxu0 %v1597_v2  ;;  %4683 = vmatpush1.bf16.msra.mxu1 %v1599_v3  ;;  %v620_v2 = vld [vmem:[%s8317_s8 + $0x598] sm:$0xff]  ;;  %v1637_v3 = vunpack.c.h.s8.bf16 %v613_v41 }
 0x21f   : > { %3577 = vmatprep.subr.bf16.mxu0 %v1602_v5  ;;  %4684 = vmatprep.subr.bf16.mxu1 %v1604_v6  ;;  %v1639_v5 = vunpack.c.h.s8.bf16 %v615_v61  ;;  %v1642_v6 = vunpack.c.l.s8.bf16 %v618_v51  ;;  %v1644_v7 = vunpack.c.l.s8.bf16 %v620_v2  ;;  %v1648_v12 = vunpack.c.h.s8.bf16 %v620_v2  ;;  %v633_v61 = vld [vmem:[%s8317_s8 + $0x600] sm:$0xff] }
 0x220   : > { %v1678_v2 = vunpack.c.h.s8.bf16 %v634_v56 }
 0x222   : > { %3578 = vmatpush1.bf16.msra.mxu0 %v1601_v9  ;;  %4685 = vmatpush1.bf16.msra.mxu1 %v1603_v10  ;;  %v619_v9 = vld [vmem:[%s8317_s8 + $0x590] sm:$0xff]  ;;  %v1641_v10 = vunpack.c.l.s8.bf16 %v617_v8 }
 0x223   : > { %3579 = vmatprep.subr.bf16.mxu0 %v1606_v11  ;;  %4686 = vmatprep.subr.bf16.mxu1 %v1608_v20  ;;  %v1643_v11 = vunpack.c.l.s8.bf16 %v619_v9  ;;  %v1646_v20 = vunpack.c.h.s8.bf16 %v618_v51 }
 0x226   : > { %3580 = vmatpush1.bf16.msra.mxu0 %v1605_v14  ;;  %4687 = vmatpush1.bf16.msra.mxu1 %v1607_v15  ;;  %v624_v14 = vld [vmem:[%s8317_s8 + $0x5b8] sm:$0xff]  ;;  %v1645_v15 = vunpack.c.h.s8.bf16 %v617_v8 }
 0x227   : > { %3590 = vmatprep.subr.bf16.mxu0 %v1610_v16  ;;  %4697 = vmatprep.subr.bf16.mxu1 %v1612_v37  ;;  %v1647_v16 = vunpack.c.h.s8.bf16 %v619_v9  ;;  %v1650_v37 = vunpack.c.l.s8.bf16 %v622_v13  ;;  %v1652_v17 = vunpack.c.l.s8.bf16 %v624_v14  ;;  %v1656_v24 = vunpack.c.h.s8.bf16 %v624_v14 }
 0x229   : > { %3582 = vmatmul.mubr.bf16.vlgmr.msra.gmra.mrb[0].mxu0 %v8568_v19  ;;  %4689 = vmatmul.mubr.bf16.vlgmr.msra.gmra.mrb[0].mxu1 %v8568_v19 }
 0x22a   : > { %3591 = vmatpush1.bf16.msra.mxu0 %v1609_v21  ;;  %4698 = vmatpush1.bf16.msra.mxu1 %v1611_v22  ;;  %v623_v21 = vld [vmem:[%s8317_s8 + $0x5b0] sm:$0xff]  ;;  %v1649_v22 = vunpack.c.l.s8.bf16 %v621_v18 }
 0x22b   : > { %3592 = vmatprep.subr.bf16.mxu0 %v1614_v36  ;;  %4699 = vmatprep.subr.bf16.mxu1 %v1616_v23  ;;  %v1651_v36 = vunpack.c.l.s8.bf16 %v623_v21  ;;  %v1654_v23 = vunpack.c.h.s8.bf16 %v622_v13 }
 0x22c   : > { %3622 = vmatprep.mubr.bf16.mxu0 %v3095_v27  ;;  %4729 = vmatprep.mubr.bf16.mxu1 %v3095_v27  ;;  %v628_v27 = vld [vmem:[%s8317_s8 + $0x5d8] sm:$0xff] }
 0x22e   : > { %3593 = vmatpush1.bf16.msra.mxu0 %v1613_v53  ;;  %4700 = vmatpush1.bf16.msra.mxu1 %v1615_v29  ;;  %v1653_v53 = vunpack.c.h.s8.bf16 %v621_v18  ;;  %v1655_v29 = vunpack.c.h.s8.bf16 %v623_v21 }
 0x22f   : > { %3594 = vmatprep.subr.bf16.mxu0 %v1618_v30  ;;  %4701 = vmatprep.subr.bf16.mxu1 %v1620_v31  ;;  %v1658_v30 = vunpack.c.l.s8.bf16 %v626_v25  ;;  %v1660_v31 = vunpack.c.l.s8.bf16 %v628_v27 }
 0x232   : > { %3595 = vmatpush1.bf16.msra.mxu0 %v1617_v55  ;;  %4702 = vmatpush1.bf16.msra.mxu1 %v1619_v34  ;;  %v1657_v55 = vunpack.c.l.s8.bf16 %v625_v32  ;;  %v1659_v34 = vunpack.c.l.s8.bf16 %v627_v33 }
 0x233   : > { %3596 = vmatprep.subr.bf16.mxu0 %v1622_v38  ;;  %4703 = vmatprep.subr.bf16.mxu1 %v1624_v39  ;;  %v1662_v38 = vunpack.c.h.s8.bf16 %v626_v25  ;;  %v1664_v39 = vunpack.c.h.s8.bf16 %v628_v27 }
 0x236   : > { %3597 = vmatpush1.bf16.msra.mxu0 %v1621_v43  ;;  %4704 = vmatpush1.bf16.msra.mxu1 %v1623_v44  ;;  %v1661_v43 = vunpack.c.h.s8.bf16 %v625_v32  ;;  %v1663_v44 = vunpack.c.h.s8.bf16 %v627_v33 }
 0x237   : > { %3598 = vmatprep.subr.bf16.mxu0 %v1626_v45  ;;  %4705 = vmatprep.subr.bf16.mxu1 %v1628_v46  ;;  %v1666_v45 = vunpack.c.l.s8.bf16 %v630_v40  ;;  %v1668_v46 = vunpack.c.l.s8.bf16 %v632_v42 }
 0x23a   : > { %3599 = vmatpush1.bf16.msra.mxu0 %v1625_v49  ;;  %4706 = vmatpush1.bf16.msra.mxu1 %v1627_v50  ;;  %v3048_v49 = vcombine.high %v8515_v28, %v8515_v28  ;;  %v1665_v50 = vunpack.c.l.s8.bf16 %v629_v47  ;;  %v1674_v28 = vunpack.c.l.s8.bf16 %v634_v56 }
 0x23b   : > { %3600 = vmatprep.subr.bf16.mxu0 %v1630_v52  ;;  %4707 = vmatprep.subr.bf16.mxu1 %v1632_v54  ;;  %v1667_v52 = vunpack.c.l.s8.bf16 %v631_v48  ;;  %v1670_v54 = vunpack.c.h.s8.bf16 %v630_v40 }
 0x23e   : > { %3601 = vmatpush1.bf16.msra.mxu0 %v1629_v57  ;;  %4708 = vmatpush1.bf16.msra.mxu1 %v1631_v58  ;;  %v636_v57 = vld [vmem:[%s8317_s8 + $0x618] sm:$0xff]  ;;  %v8607_v58 = vrot.slane %v3048_v49, %v8354_v35 }
 0x23f   : > { %3602 = vmatprep.subr.bf16.mxu0 %v1634_v59  ;;  %4709 = vmatprep.subr.bf16.mxu1 %v1636_v60  ;;  %v1669_v59 = vunpack.c.h.s8.bf16 %v629_v47  ;;  %v1671_v60 = vunpack.c.h.s8.bf16 %v631_v48  ;;  %v1676_v41 = vunpack.c.l.s8.bf16 %v636_v57 }
 0x242   : > { %3603 = vmatpush1.bf16.msra.mxu0 %v1633_v62  ;;  %4710 = vmatpush1.bf16.msra.mxu1 %v1635_v63  ;;  %v635_v62 = vld [vmem:[%s8317_s8 + $0x610] sm:$0xff]  ;;  %v3064_v63 = vcombine.high %v8607_v58, %v8607_v58 }
 0x243   : > { %3604 = vmatprep.subr.bf16.mxu0 %v1638_v0  ;;  %4711 = vmatprep.subr.bf16.mxu1 %v1640_v1  ;;  %v3093_v0 = vcombine.high %v8568_v19, %v8568_v19  ;;  %v1673_v1 = vunpack.c.l.s8.bf16 %v633_v61  ;;  %v1675_v51 = vunpack.c.l.s8.bf16 %v635_v62  ;;  %v1677_v19 = vunpack.c.h.s8.bf16 %v633_v61 }
 0x244   : > { %v1679_v8 = vunpack.c.h.s8.bf16 %v635_v62 }
 0x246   : > { %3605 = vmatpush1.bf16.msra.mxu0 %v1637_v3  ;;  %4712 = vmatpush1.bf16.msra.mxu1 %v1639_v5  ;;  %v1680_v3 = vunpack.c.h.s8.bf16 %v636_v57  ;;  %v638_v5 = vld [vmem:[%s8317_s8 + $0x628] sm:$0xff] }
 0x247   : > { %3606 = vmatprep.subr.bf16.mxu0 %v1642_v6  ;;  %4713 = vmatprep.subr.bf16.mxu1 %v1644_v7  ;;  %v640_v6 = vld [vmem:[%s8317_s8 + $0x638] sm:$0xff]  ;;  %v8618_v7 = vrot.slane %v3064_v63, %v8354_v35  ;;  %v1682_v9 = vunpack.c.l.s8.bf16 %v638_v5  ;;  %v1686_v14 = vunpack.c.h.s8.bf16 %v638_v5  ;;  %v653_v63 = vld [vmem:[%s8317_s8 + $0x6a0] sm:$0xff]  ;;  %v658_v5 = vld [vmem:[%s8317_s8 + $0x6c8] sm:$0xff] }
 0x24a   : > { %3607 = vmatpush1.bf16.msra.mxu0 %v1641_v10  ;;  %4714 = vmatpush1.bf16.msra.mxu1 %v1643_v11  ;;  %v1684_v10 = vunpack.c.l.s8.bf16 %v640_v6  ;;  %v637_v11 = vld [vmem:[%s8317_s8 + $0x620] sm:$0xff] }
 0x24b   : > { %3608 = vmatprep.subr.bf16.mxu0 %v1646_v20  ;;  %4715 = vmatprep.subr.bf16.mxu1 %v1648_v12  ;;  %v639_v20 = vld [vmem:[%s8317_s8 + $0x630] sm:$0xff]  ;;  %v1681_v12 = vunpack.c.l.s8.bf16 %v637_v11 }
 0x24c   : > { %v1683_v13 = vunpack.c.l.s8.bf16 %v639_v20  ;;  %v1687_v18 = vunpack.c.h.s8.bf16 %v639_v20  ;;  %v659_v20 = vld [vmem:[%s8317_s8 + $0x6d0] sm:$0xff] }
 0x24e   : > { %3609 = vmatpush1.bf16.msra.mxu0 %v1645_v15  ;;  %4716 = vmatpush1.bf16.msra.mxu1 %v1647_v16  ;;  %v1688_v15 = vunpack.c.h.s8.bf16 %v640_v6  ;;  %v642_v16 = vld [vmem:[%s8317_s8 + $0x648] sm:$0xff]  ;;  %v660_v6 = vld [vmem:[%s8317_s8 + $0x6d8] sm:$0xff] }
 0x24f   : > { %3610 = vmatprep.subr.bf16.mxu0 %v1650_v37  ;;  %4717 = vmatprep.subr.bf16.mxu1 %v1652_v17  ;;  %v644_v37 = vld [vmem:[%s8317_s8 + $0x658] sm:$0xff]  ;;  %v1685_v17 = vunpack.c.h.s8.bf16 %v637_v11  ;;  %v1690_v21 = vunpack.c.l.s8.bf16 %v642_v16  ;;  %v1694_v27 = vunpack.c.h.s8.bf16 %v642_v16  ;;  %v657_v11 = vld [vmem:[%s8317_s8 + $0x6c0] sm:$0xff]  ;;  %v662_v16 = vld [vmem:[%s8317_s8 + $0x6e8] sm:$0xff] }
 0x252   : > { %3611 = vmatpush1.bf16.msra.mxu0 %v1649_v22  ;;  %4718 = vmatpush1.bf16.msra.mxu1 %v1651_v36  ;;  %v1692_v22 = vunpack.c.l.s8.bf16 %v644_v37  ;;  %v641_v36 = vld [vmem:[%s8317_s8 + $0x640] sm:$0xff] }
 0x253   : > { %3612 = vmatprep.subr.bf16.mxu0 %v1654_v23  ;;  %4719 = vmatprep.subr.bf16.mxu1 %v1656_v24  ;;  %v643_v23 = vld [vmem:[%s8317_s8 + $0x650] sm:$0xff]  ;;  %v1689_v24 = vunpack.c.l.s8.bf16 %v641_v36 }
 0x254   : > { %v1691_v25 = vunpack.c.l.s8.bf16 %v643_v23  ;;  %v1695_v32 = vunpack.c.h.s8.bf16 %v643_v23  ;;  %v663_v23 = vld [vmem:[%s8317_s8 + $0x6f0] sm:$0xff] }
 0x256   : > { %3613 = vmatpush1.bf16.msra.mxu0 %v1653_v53  ;;  %4720 = vmatpush1.bf16.msra.mxu1 %v1655_v29  ;;  %v1696_v53 = vunpack.c.h.s8.bf16 %v644_v37  ;;  %v646_v29 = vld [vmem:[%s8317_s8 + $0x668] sm:$0xff]  ;;  %v664_v37 = vld [vmem:[%s8317_s8 + $0x6f8] sm:$0xff] }
 0x257   : > { %3614 = vmatprep.subr.bf16.mxu0 %v1658_v30  ;;  %4721 = vmatprep.subr.bf16.mxu1 %v1660_v31  ;;  %v648_v30 = vld [vmem:[%s8317_s8 + $0x678] sm:$0xff]  ;;  %v1693_v31 = vunpack.c.h.s8.bf16 %v641_v36  ;;  %v1698_v33 = vunpack.c.l.s8.bf16 %v646_v29  ;;  %v1702_v42 = vunpack.c.h.s8.bf16 %v646_v29  ;;  %v661_v36 = vld [vmem:[%s8317_s8 + $0x6e0] sm:$0xff]  ;;  %v666_v29 = vld [vmem:[%s8317_s8 + $0x708] sm:$0xff] }
 0x25a   : > { %3615 = vmatpush1.bf16.msra.mxu0 %v1657_v55  ;;  %4722 = vmatpush1.bf16.msra.mxu1 %v1659_v34  ;;  %v1700_v55 = vunpack.c.l.s8.bf16 %v648_v30  ;;  %v645_v34 = vld [vmem:[%s8317_s8 + $0x660] sm:$0xff] }
 0x25b   : > { %3616 = vmatprep.subr.bf16.mxu0 %v1662_v38  ;;  %4723 = vmatprep.subr.bf16.mxu1 %v1664_v39  ;;  %v647_v38 = vld [vmem:[%s8317_s8 + $0x670] sm:$0xff]  ;;  %v1697_v39 = vunpack.c.l.s8.bf16 %v645_v34 }
 0x25c   : > { %v1699_v40 = vunpack.c.l.s8.bf16 %v647_v38  ;;  %v1703_v47 = vunpack.c.h.s8.bf16 %v647_v38  ;;  %v667_v38 = vld [vmem:[%s8317_s8 + $0x710] sm:$0xff] }
 0x25e   : > { %3617 = vmatpush1.bf16.msra.mxu0 %v1661_v43  ;;  %4724 = vmatpush1.bf16.msra.mxu1 %v1663_v44  ;;  %v1704_v43 = vunpack.c.h.s8.bf16 %v648_v30  ;;  %v650_v44 = vld [vmem:[%s8317_s8 + $0x688] sm:$0xff]  ;;  %v668_v30 = vld [vmem:[%s8317_s8 + $0x718] sm:$0xff] }
 0x25f   : > { %3618 = vmatprep.subr.bf16.mxu0 %v1666_v45  ;;  %4725 = vmatprep.subr.bf16.mxu1 %v1668_v46  ;;  %v652_v45 = vld [vmem:[%s8317_s8 + $0x698] sm:$0xff]  ;;  %v1701_v46 = vunpack.c.h.s8.bf16 %v645_v34  ;;  %v1706_v48 = vunpack.c.l.s8.bf16 %v650_v44  ;;  %v1710_v56 = vunpack.c.h.s8.bf16 %v650_v44  ;;  %v665_v34 = vld [vmem:[%s8317_s8 + $0x700] sm:$0xff]  ;;  %v1744_v44 = vunpack.c.h.s8.bf16 %v668_v30 }
 0x260   : > { %v1708_v49 = vunpack.c.l.s8.bf16 %v652_v45  ;;  %v1712_v57 = vunpack.c.h.s8.bf16 %v652_v45  ;;  %v670_v45 = vld [vmem:[%s8317_s8 + $0x728] sm:$0xff] }
 0x262   : > { %3619 = vmatpush1.bf16.msra.mxu0 %v1665_v50  ;;  %4726 = vmatpush1.bf16.msra.mxu1 %v1667_v52  ;;  %v649_v50 = vld [vmem:[%s8317_s8 + $0x680] sm:$0xff]  ;;  %v651_v52 = vld [vmem:[%s8317_s8 + $0x690] sm:$0xff] }
 0x263   : > { %3620 = vmatprep.subr.bf16.mxu0 %v1670_v54  ;;  %4727 = vmatprep.subr.bf16.mxu1 %v1672_v4  ;;  %v1705_v54 = vunpack.c.l.s8.bf16 %v649_v50  ;;  %v1707_v4 = vunpack.c.l.s8.bf16 %v651_v52 }
 0x266   : > { %3621 = vmatpush1.bf16.msra.mxu0 %v1669_v59  ;;  %4728 = vmatpush1.bf16.msra.mxu1 %v1671_v60  ;;  %v654_v59 = vld [vmem:[%s8317_s8 + $0x6a8] sm:$0xff]  ;;  %v656_v60 = vld [vmem:[%s8317_s8 + $0x6b8] sm:$0xff] }
 0x267   : > { %3631 = vmatprep.subr.bf16.mxu0 %v1674_v28  ;;  %4738 = vmatprep.subr.bf16.mxu1 %v1676_v41  ;;  %v1709_v28 = vunpack.c.h.s8.bf16 %v649_v50  ;;  %v1711_v41 = vunpack.c.h.s8.bf16 %v651_v52  ;;  %v1714_v61 = vunpack.c.l.s8.bf16 %v654_v59  ;;  %v1716_v62 = vunpack.c.l.s8.bf16 %v656_v60  ;;  %v669_v52 = vld [vmem:[%s8317_s8 + $0x720] sm:$0xff] }
 0x269   : > { %3623 = vmatmul.mubr.bf16.vlgmr.msra.gmra.mrb[0].mxu0 %v3093_v0  ;;  %4730 = vmatmul.mubr.bf16.vlgmr.msra.gmra.mrb[0].mxu1 %v3093_v0  ;;  %v655_v0 = vld [vmem:[%s8317_s8 + $0x6b0] sm:$0xff] }
 0x26a   : > { %3632 = vmatpush1.bf16.msra.mxu0 %v1673_v1  ;;  %4739 = vmatpush1.bf16.msra.mxu1 %v1675_v51  ;;  %v1713_v1 = vunpack.c.l.s8.bf16 %v653_v63  ;;  %v1715_v51 = vunpack.c.l.s8.bf16 %v655_v0 }
 0x26b   : > { %3633 = vmatprep.subr.bf16.mxu0 %v1678_v2  ;;  %4740 = vmatprep.subr.bf16.mxu1 %v1680_v3  ;;  %v1718_v2 = vunpack.c.h.s8.bf16 %v654_v59  ;;  %v1720_v3 = vunpack.c.h.s8.bf16 %v656_v60  ;;  %v674_v59 = vld [vmem:[%s8317_s8 + $0x748] sm:$0xff]  ;;  %v676_v60 = vld [vmem:[%s8317_s8 + $0x758] sm:$0xff] }
 0x26c   : > { %3663 = vmatprep.mubr.bf16.mxu0 %v8618_v7  ;;  %4770 = vmatprep.mubr.bf16.mxu1 %v8618_v7 }
 0x26e   : > { %3634 = vmatpush1.bf16.msra.mxu0 %v1677_v19  ;;  %4741 = vmatpush1.bf16.msra.mxu1 %v1679_v8  ;;  %v1717_v19 = vunpack.c.h.s8.bf16 %v653_v63  ;;  %v1719_v8 = vunpack.c.h.s8.bf16 %v655_v0  ;;  %v673_v63 = vld [vmem:[%s8317_s8 + $0x740] sm:$0xff]  ;;  %v675_v0 = vld [vmem:[%s8317_s8 + $0x750] sm:$0xff] }
 0x26f   : > { %3635 = vmatprep.subr.bf16.mxu0 %v1682_v9  ;;  %4742 = vmatprep.subr.bf16.mxu1 %v1684_v10  ;;  %v1722_v9 = vunpack.c.l.s8.bf16 %v658_v5  ;;  %v1724_v10 = vunpack.c.l.s8.bf16 %v660_v6 }
 0x272   : > { %3636 = vmatpush1.bf16.msra.mxu0 %v1681_v12  ;;  %4743 = vmatpush1.bf16.msra.mxu1 %v1683_v13  ;;  %v1721_v12 = vunpack.c.l.s8.bf16 %v657_v11  ;;  %v1723_v13 = vunpack.c.l.s8.bf16 %v659_v20 }
 0x273   : > { %3637 = vmatprep.subr.bf16.mxu0 %v1686_v14  ;;  %4744 = vmatprep.subr.bf16.mxu1 %v1688_v15  ;;  %v1726_v14 = vunpack.c.h.s8.bf16 %v658_v5  ;;  %v1728_v15 = vunpack.c.h.s8.bf16 %v660_v6  ;;  %v678_v5 = vld [vmem:[%s8317_s8 + $0x768] sm:$0xff]  ;;  %v680_v6 = vld [vmem:[%s8317_s8 + $0x778] sm:$0xff] }
 0x276   : > { %3638 = vmatpush1.bf16.msra.mxu0 %v1685_v17  ;;  %4745 = vmatpush1.bf16.msra.mxu1 %v1687_v18  ;;  %v1725_v17 = vunpack.c.h.s8.bf16 %v657_v11  ;;  %v1727_v18 = vunpack.c.h.s8.bf16 %v659_v20  ;;  %v677_v11 = vld [vmem:[%s8317_s8 + $0x760] sm:$0xff]  ;;  %v679_v20 = vld [vmem:[%s8317_s8 + $0x770] sm:$0xff] }
 0x277   : > { %3639 = vmatprep.subr.bf16.mxu0 %v1690_v21  ;;  %4746 = vmatprep.subr.bf16.mxu1 %v1692_v22  ;;  %v1730_v21 = vunpack.c.l.s8.bf16 %v662_v16  ;;  %v1732_v22 = vunpack.c.l.s8.bf16 %v664_v37 }
 0x27a   : > { %3640 = vmatpush1.bf16.msra.mxu0 %v1689_v24  ;;  %4747 = vmatpush1.bf16.msra.mxu1 %v1691_v25  ;;  %v1729_v24 = vunpack.c.l.s8.bf16 %v661_v36  ;;  %v1731_v25 = vunpack.c.l.s8.bf16 %v663_v23 }
 0x27b   : > { %3641 = vmatprep.subr.bf16.mxu0 %v1694_v27  ;;  %4748 = vmatprep.subr.bf16.mxu1 %v1696_v53  ;;  %v1734_v27 = vunpack.c.h.s8.bf16 %v662_v16  ;;  %v1736_v53 = vunpack.c.h.s8.bf16 %v664_v37  ;;  %v682_v16 = vld [vmem:[%s8317_s8 + $0x788] sm:$0xff]  ;;  %v684_v37 = vld [vmem:[%s8317_s8 + $0x798] sm:$0xff] }
 0x27e   : > { %3642 = vmatpush1.bf16.msra.mxu0 %v1693_v31  ;;  %4749 = vmatpush1.bf16.msra.mxu1 %v1695_v32  ;;  %v1733_v31 = vunpack.c.h.s8.bf16 %v661_v36  ;;  %v1735_v32 = vunpack.c.h.s8.bf16 %v663_v23  ;;  %v681_v36 = vld [vmem:[%s8317_s8 + $0x780] sm:$0xff]  ;;  %v683_v23 = vld [vmem:[%s8317_s8 + $0x790] sm:$0xff] }
 0x27f   : > { %3643 = vmatprep.subr.bf16.mxu0 %v1698_v33  ;;  %4750 = vmatprep.subr.bf16.mxu1 %v1700_v55  ;;  %v1738_v33 = vunpack.c.l.s8.bf16 %v666_v29  ;;  %v1740_v55 = vunpack.c.l.s8.bf16 %v668_v30  ;;  %v688_v30 = vld [vmem:[%s8317_s8 + $0x7b8] sm:$0xff] }
 0x282   : > { %3644 = vmatpush1.bf16.msra.mxu0 %v1697_v39  ;;  %4751 = vmatpush1.bf16.msra.mxu1 %v1699_v40  ;;  %v8654_v39 = vrot.slane %v8607_v58, %v8354_v35  ;;  %v1737_v40 = vunpack.c.l.s8.bf16 %v665_v34  ;;  %v1741_v58 = vunpack.c.h.s8.bf16 %v665_v34  ;;  %v685_v34 = vld [vmem:[%s8317_s8 + $0x7a0] sm:$0xff] }
 0x283   : > { %3645 = vmatprep.subr.bf16.mxu0 %v1702_v42  ;;  %4752 = vmatprep.subr.bf16.mxu1 %v1704_v43  ;;  %v1739_v42 = vunpack.c.l.s8.bf16 %v667_v38  ;;  %v1742_v43 = vunpack.c.h.s8.bf16 %v666_v29  ;;  %v686_v29 = vld [vmem:[%s8317_s8 + $0x7a8] sm:$0xff] }
 0x286   : > { %3646 = vmatpush1.bf16.msra.mxu0 %v1701_v46  ;;  %4753 = vmatpush1.bf16.msra.mxu1 %v1703_v47  ;;  %v672_v46 = vld [vmem:[%s8317_s8 + $0x738] sm:$0xff]  ;;  %v3096_v47 = vcombine.high %v8618_v7, %v8618_v7  ;;  %v1745_v7 = vunpack.c.l.s8.bf16 %v669_v52 }
 0x287   : > { %3647 = vmatprep.subr.bf16.mxu0 %v1706_v48  ;;  %4754 = vmatprep.subr.bf16.mxu1 %v1708_v49  ;;  %v1743_v48 = vunpack.c.h.s8.bf16 %v667_v38  ;;  %v1746_v49 = vunpack.c.l.s8.bf16 %v670_v45  ;;  %v1748_v50 = vunpack.c.l.s8.bf16 %v672_v46  ;;  %v687_v38 = vld [vmem:[%s8317_s8 + $0x7b0] sm:$0xff] }
 0x28a   : > { %3648 = vmatpush1.bf16.msra.mxu0 %v1705_v54  ;;  %4755 = vmatpush1.bf16.msra.mxu1 %v1707_v4  ;;  %v671_v54 = vld [vmem:[%s8317_s8 + $0x730] sm:$0xff] }
 0x28b   : > { %3649 = vmatprep.subr.bf16.mxu0 %v1710_v56  ;;  %4756 = vmatprep.subr.bf16.mxu1 %v1712_v57  ;;  %v1747_v4 = vunpack.c.l.s8.bf16 %v671_v54  ;;  %v1750_v56 = vunpack.c.h.s8.bf16 %v670_v45  ;;  %v1752_v57 = vunpack.c.h.s8.bf16 %v672_v46  ;;  %v690_v45 = vld [vmem:[%s8317_s8 + $0x7c8] sm:$0xff]  ;;  %v692_v46 = vld [vmem:[%s8317_s8 + $0x7d8] sm:$0xff] }
 0x28e   : > { %3650 = vmatpush1.bf16.msra.mxu0 %v1709_v28  ;;  %4757 = vmatpush1.bf16.msra.mxu1 %v1711_v41  ;;  %v1749_v28 = vunpack.c.h.s8.bf16 %v669_v52  ;;  %v1751_v41 = vunpack.c.h.s8.bf16 %v671_v54  ;;  %v691_v52 = vld [vmem:[%s8317_s8 + $0x7d0] sm:$0xff] }
 0x28f   : > { %3651 = vmatprep.subr.bf16.mxu0 %v1714_v61  ;;  %4758 = vmatprep.subr.bf16.mxu1 %v1716_v62  ;;  %v1754_v61 = vunpack.c.l.s8.bf16 %v674_v59  ;;  %v1756_v62 = vunpack.c.l.s8.bf16 %v676_v60 }
 0x292   : > { %3652 = vmatpush1.bf16.msra.mxu0 %v1713_v1  ;;  %4759 = vmatpush1.bf16.msra.mxu1 %v1715_v51  ;;  %v1753_v1 = vunpack.c.l.s8.bf16 %v673_v63  ;;  %v1755_v51 = vunpack.c.l.s8.bf16 %v675_v0 }
 0x293   : > { %3653 = vmatprep.subr.bf16.mxu0 %v1718_v2  ;;  %4760 = vmatprep.subr.bf16.mxu1 %v1720_v3  ;;  %v1758_v2 = vunpack.c.h.s8.bf16 %v674_v59  ;;  %v1760_v3 = vunpack.c.h.s8.bf16 %v676_v60  ;;  %v696_v59 = vld [vmem:[%s8317_s8 + $0x7f8] sm:$0xff] }
 0x296   : > { %3654 = vmatpush1.bf16.msra.mxu0 %v1717_v19  ;;  %4761 = vmatpush1.bf16.msra.mxu1 %v1719_v8  ;;  %v1757_v19 = vunpack.c.h.s8.bf16 %v673_v63  ;;  %v1759_v8 = vunpack.c.h.s8.bf16 %v675_v0  ;;  %v695_v63 = vld [vmem:[%s8317_s8 + $0x7f0] sm:$0xff]  ;;  %v8688_v0 = vld [vmem:[#allocation3 + $0x10] sm:$0xff] }
 0x297   : > { %3655 = vmatprep.subr.bf16.mxu0 %v1722_v9  ;;  %4762 = vmatprep.subr.bf16.mxu1 %v1724_v10  ;;  %v1762_v9 = vunpack.c.l.s8.bf16 %v678_v5  ;;  %v1764_v10 = vunpack.c.l.s8.bf16 %v680_v6 }
 0x29a   : > { %3656 = vmatpush1.bf16.msra.mxu0 %v1721_v12  ;;  %4763 = vmatpush1.bf16.msra.mxu1 %v1723_v13  ;;  %v1761_v12 = vunpack.c.l.s8.bf16 %v677_v11  ;;  %v1763_v13 = vunpack.c.l.s8.bf16 %v679_v20 }
 0x29b   : > { %3657 = vmatprep.subr.bf16.mxu0 %v1726_v14  ;;  %4764 = vmatprep.subr.bf16.mxu1 %v1728_v15  ;;  %v1766_v14 = vunpack.c.h.s8.bf16 %v678_v5  ;;  %v1768_v15 = vunpack.c.h.s8.bf16 %v680_v6  ;;  %v698_v5 = vld [vmem:[%s8317_s8 + $0x808] sm:$0xff]  ;;  %v700_v6 = vld [vmem:[%s8317_s8 + $0x818] sm:$0xff] }
 0x29e   : > { %3658 = vmatpush1.bf16.msra.mxu0 %v1725_v17  ;;  %4765 = vmatpush1.bf16.msra.mxu1 %v1727_v18  ;;  %v1765_v17 = vunpack.c.h.s8.bf16 %v677_v11  ;;  %v1767_v18 = vunpack.c.h.s8.bf16 %v679_v20  ;;  %v1804_v11 = vunpack.c.l.s8.bf16 %v700_v6  ;;  %v697_v20 = vld [vmem:[%s8317_s8 + $0x800] sm:$0xff] }
 0x29f   : > { %3659 = vmatprep.subr.bf16.mxu0 %v1730_v21  ;;  %4766 = vmatprep.subr.bf16.mxu1 %v1732_v22  ;;  %v1770_v21 = vunpack.c.l.s8.bf16 %v682_v16  ;;  %v1772_v22 = vunpack.c.l.s8.bf16 %v684_v37 }
 0x2a2   : > { %3660 = vmatpush1.bf16.msra.mxu0 %v1729_v24  ;;  %4767 = vmatpush1.bf16.msra.mxu1 %v1731_v25  ;;  %v1769_v24 = vunpack.c.l.s8.bf16 %v681_v36  ;;  %v1771_v25 = vunpack.c.l.s8.bf16 %v683_v23 }
 0x2a3   : > { %3661 = vmatprep.subr.bf16.mxu0 %v1734_v27  ;;  %4768 = vmatprep.subr.bf16.mxu1 %v1736_v53  ;;  %v1774_v27 = vunpack.c.h.s8.bf16 %v682_v16  ;;  %v1776_v53 = vunpack.c.h.s8.bf16 %v684_v37  ;;  %v1806_v37 = vunpack.c.h.s8.bf16 %v698_v5 }
 0x2a6   : > { %3662 = vmatpush1.bf16.msra.mxu0 %v1733_v31  ;;  %4769 = vmatpush1.bf16.msra.mxu1 %v1735_v32  ;;  %v1773_v31 = vunpack.c.h.s8.bf16 %v681_v36  ;;  %v1775_v32 = vunpack.c.h.s8.bf16 %v683_v23 }
 0x2a7   : > { %3672 = vmatprep.subr.bf16.mxu0 %v1738_v33  ;;  %4779 = vmatprep.subr.bf16.mxu1 %v1740_v55  ;;  %v1778_v33 = vunpack.c.l.s8.bf16 %v686_v29  ;;  %v1780_v55 = vunpack.c.l.s8.bf16 %v688_v30 }
 0x2a9   : > { %3664 = vmatmul.mubr.bf16.vlgmr.msra.gmra.mrb[0].mxu0 %v8654_v39  ;;  %4771 = vmatmul.mubr.bf16.vlgmr.msra.gmra.mrb[0].mxu1 %v8654_v39 }
 0x2aa   : > { %3673 = vmatpush1.bf16.msra.mxu0 %v1737_v40  ;;  %4780 = vmatpush1.bf16.msra.mxu1 %v1739_v42  ;;  %v1777_v40 = vunpack.c.l.s8.bf16 %v685_v34  ;;  %v1779_v42 = vunpack.c.l.s8.bf16 %v687_v38 }
 0x2ab   : > { %3674 = vmatprep.subr.bf16.mxu0 %v1742_v43  ;;  %4781 = vmatprep.subr.bf16.mxu1 %v1744_v44  ;;  %v1782_v43 = vunpack.c.h.s8.bf16 %v686_v29  ;;  %v1784_v44 = vunpack.c.h.s8.bf16 %v688_v30 }
 0x2ac   : > { %3704 = vmatprep.mubr.bf16.mxu0 %v3096_v47  ;;  %4811 = vmatprep.mubr.bf16.mxu1 %v3096_v47  ;;  %v1781_v47 = vunpack.c.h.s8.bf16 %v685_v34 }
 0x2ae   : > { %3675 = vmatpush1.bf16.msra.mxu0 %v1741_v58  ;;  %4782 = vmatpush1.bf16.msra.mxu1 %v1743_v48  ;;  %v1783_v58 = vunpack.c.h.s8.bf16 %v687_v38  ;;  %v1786_v48 = vunpack.c.l.s8.bf16 %v690_v45 }
 0x2af   : > { %3676 = vmatprep.subr.bf16.mxu0 %v1746_v49  ;;  %4783 = vmatprep.subr.bf16.mxu1 %v1748_v50  ;;  %v1788_v49 = vunpack.c.l.s8.bf16 %v692_v46  ;;  %v689_v50 = vld [vmem:[%s8317_s8 + $0x7c0] sm:$0xff] }
 0x2b0   : > { %v1785_v54 = vunpack.c.l.s8.bf16 %v689_v50  ;;  %v1789_v60 = vunpack.c.h.s8.bf16 %v689_v50 }
 0x2b2   : > { %3677 = vmatpush1.bf16.msra.mxu0 %v1745_v7  ;;  %4784 = vmatpush1.bf16.msra.mxu1 %v1747_v4  ;;  %v1787_v7 = vunpack.c.l.s8.bf16 %v691_v52  ;;  %v1790_v4 = vunpack.c.h.s8.bf16 %v690_v45 }
 0x2b3   : > { %3678 = vmatprep.subr.bf16.mxu0 %v1750_v56  ;;  %4785 = vmatprep.subr.bf16.mxu1 %v1752_v57  ;;  %v1792_v56 = vunpack.c.h.s8.bf16 %v692_v46  ;;  %v694_v57 = vld [vmem:[%s8317_s8 + $0x7e8] sm:$0xff] }
 0x2b6   : > { %3679 = vmatpush1.bf16.msra.mxu0 %v1749_v28  ;;  %4786 = vmatpush1.bf16.msra.mxu1 %v1751_v41  ;;  %v1791_v28 = vunpack.c.h.s8.bf16 %v691_v52  ;;  %v1794_v41 = vunpack.c.l.s8.bf16 %v694_v57 }
 0x2b7   : > { %3680 = vmatprep.subr.bf16.mxu0 %v1754_v61  ;;  %4787 = vmatprep.subr.bf16.mxu1 %v1756_v62  ;;  %v1796_v61 = vunpack.c.l.s8.bf16 %v696_v59  ;;  %v693_v62 = vld [vmem:[%s8317_s8 + $0x7e0] sm:$0xff] }
 0x2ba   : > { %3681 = vmatpush1.bf16.msra.mxu0 %v1753_v1  ;;  %4788 = vmatpush1.bf16.msra.mxu1 %v1755_v51  ;;  %v1793_v1 = vunpack.c.l.s8.bf16 %v693_v62  ;;  %v1795_v51 = vunpack.c.l.s8.bf16 %v695_v63 }
 0x2bb   : > { %3682 = vmatprep.subr.bf16.mxu0 %v1758_v2  ;;  %4789 = vmatprep.subr.bf16.mxu1 %v1760_v3  ;;  %v1798_v2 = vunpack.c.h.s8.bf16 %v694_v57  ;;  %v1800_v3 = vunpack.c.h.s8.bf16 %v696_v59 }
 0x2be   : > { %3683 = vmatpush1.bf16.msra.mxu0 %v1757_v19  ;;  %4790 = vmatpush1.bf16.msra.mxu1 %v1759_v8  ;;  %v8694_v19 = vrot.slane %v8688_v0, %v8354_v35  ;;  %v1797_v8 = vunpack.c.h.s8.bf16 %v693_v62 }
 0x2bf   : > { %3684 = vmatprep.subr.bf16.mxu0 %v1762_v9  ;;  %4791 = vmatprep.subr.bf16.mxu1 %v1764_v10  ;;  %v1799_v9 = vunpack.c.h.s8.bf16 %v695_v63  ;;  %v1802_v10 = vunpack.c.l.s8.bf16 %v698_v5 }
 0x2c2   : > { %3685 = vmatpush1.bf16.msra.mxu0 %v1761_v12  ;;  %4792 = vmatpush1.bf16.msra.mxu1 %v1763_v13  ;;  %v699_v12 = vld [vmem:[%s8317_s8 + $0x810] sm:$0xff]  ;;  %v3112_v13 = vcombine.high %v8694_v19, %v8694_v19 }
 0x2c3   : > { %3686 = vmatprep.subr.bf16.mxu0 %v1766_v14  ;;  %4793 = vmatprep.subr.bf16.mxu1 %v1768_v15  ;;  %v3094_v14 = vcombine.high %v8654_v39, %v8654_v39  ;;  %v1801_v15 = vunpack.c.l.s8.bf16 %v697_v20  ;;  %v1803_v16 = vunpack.c.l.s8.bf16 %v699_v12  ;;  %v1805_v39 = vunpack.c.h.s8.bf16 %v697_v20 }
 0x2c4   : > { %v1807_v36 = vunpack.c.h.s8.bf16 %v699_v12 }
 0x2c6   : > { %3687 = vmatpush1.bf16.msra.mxu0 %v1765_v17  ;;  %4794 = vmatpush1.bf16.msra.mxu1 %v1767_v18  ;;  %v1808_v17 = vunpack.c.h.s8.bf16 %v700_v6  ;;  %v702_v18 = vld [vmem:[%s8317_s8 + $0x828] sm:$0xff] }
 0x2c7   : > { %3688 = vmatprep.subr.bf16.mxu0 %v1770_v21  ;;  %4795 = vmatprep.subr.bf16.mxu1 %v1772_v22  ;;  %v704_v21 = vld [vmem:[%s8317_s8 + $0x838] sm:$0xff]  ;;  %v8705_v22 = vrot.slane %v3112_v13, %v8354_v35  ;;  %v1810_v23 = vunpack.c.l.s8.bf16 %v702_v18  ;;  %v1814_v30 = vunpack.c.h.s8.bf16 %v702_v18 }
 0x2ca   : > { %3689 = vmatpush1.bf16.msra.mxu0 %v1769_v24  ;;  %4796 = vmatpush1.bf16.msra.mxu1 %v1771_v25  ;;  %v1812_v24 = vunpack.c.l.s8.bf16 %v704_v21  ;;  %v701_v25 = vld [vmem:[%s8317_s8 + $0x820] sm:$0xff] }
 0x2cb   : > { %3690 = vmatprep.subr.bf16.mxu0 %v1774_v27  ;;  %4797 = vmatprep.subr.bf16.mxu1 %v1776_v53  ;;  %v703_v27 = vld [vmem:[%s8317_s8 + $0x830] sm:$0xff]  ;;  %v1809_v53 = vunpack.c.l.s8.bf16 %v701_v25 }
 0x2cc   : > { %v1811_v29 = vunpack.c.l.s8.bf16 %v703_v27  ;;  %v1815_v34 = vunpack.c.h.s8.bf16 %v703_v27  ;;  %v721_v27 = vld [vmem:[%s8317_s8 + $0x8c0] sm:$0xff] }
 0x2ce   : > { %3691 = vmatpush1.bf16.msra.mxu0 %v1773_v31  ;;  %4798 = vmatpush1.bf16.msra.mxu1 %v1775_v32  ;;  %v1816_v31 = vunpack.c.h.s8.bf16 %v704_v21  ;;  %v706_v32 = vld [vmem:[%s8317_s8 + $0x848] sm:$0xff] }
 0x2cf   : > { %3692 = vmatprep.subr.bf16.mxu0 %v1778_v33  ;;  %4799 = vmatprep.subr.bf16.mxu1 %v1780_v55  ;;  %v708_v33 = vld [vmem:[%s8317_s8 + $0x858] sm:$0xff]  ;;  %v1813_v55 = vunpack.c.h.s8.bf16 %v701_v25  ;;  %v1818_v38 = vunpack.c.l.s8.bf16 %v706_v32  ;;  %v1822_v46 = vunpack.c.h.s8.bf16 %v706_v32  ;;  %v722_v21 = vld [vmem:[%s8317_s8 + $0x8c8] sm:$0xff] }
 0x2d2   : > { %3693 = vmatpush1.bf16.msra.mxu0 %v1777_v40  ;;  %4800 = vmatpush1.bf16.msra.mxu1 %v1779_v42  ;;  %v1820_v40 = vunpack.c.l.s8.bf16 %v708_v33  ;;  %v705_v42 = vld [vmem:[%s8317_s8 + $0x840] sm:$0xff] }
 0x2d3   : > { %3694 = vmatprep.subr.bf16.mxu0 %v1782_v43  ;;  %4801 = vmatprep.subr.bf16.mxu1 %v1784_v44  ;;  %v707_v43 = vld [vmem:[%s8317_s8 + $0x850] sm:$0xff]  ;;  %v1817_v44 = vunpack.c.l.s8.bf16 %v705_v42 }
 0x2d4   : > { %v1819_v45 = vunpack.c.l.s8.bf16 %v707_v43  ;;  %v1823_v50 = vunpack.c.h.s8.bf16 %v707_v43  ;;  %v725_v43 = vld [vmem:[%s8317_s8 + $0x8e0] sm:$0xff] }
 0x2d6   : > { %3695 = vmatpush1.bf16.msra.mxu0 %v1781_v47  ;;  %4802 = vmatpush1.bf16.msra.mxu1 %v1783_v58  ;;  %v1824_v47 = vunpack.c.h.s8.bf16 %v708_v33  ;;  %v710_v58 = vld [vmem:[%s8317_s8 + $0x868] sm:$0xff] }
 0x2d7   : > { %3696 = vmatprep.subr.bf16.mxu0 %v1786_v48  ;;  %4803 = vmatprep.subr.bf16.mxu1 %v1788_v49  ;;  %v712_v48 = vld [vmem:[%s8317_s8 + $0x878] sm:$0xff]  ;;  %v1821_v49 = vunpack.c.h.s8.bf16 %v705_v42  ;;  %v1826_v52 = vunpack.c.l.s8.bf16 %v710_v58  ;;  %v1830_v59 = vunpack.c.h.s8.bf16 %v710_v58  ;;  %v726_v33 = vld [vmem:[%s8317_s8 + $0x8e8] sm:$0xff] }
 0x2da   : > { %3697 = vmatpush1.bf16.msra.mxu0 %v1785_v54  ;;  %4804 = vmatpush1.bf16.msra.mxu1 %v1787_v7  ;;  %v1828_v54 = vunpack.c.l.s8.bf16 %v712_v48  ;;  %v709_v7 = vld [vmem:[%s8317_s8 + $0x860] sm:$0xff] }
 0x2db   : > { %3698 = vmatprep.subr.bf16.mxu0 %v1790_v4  ;;  %4805 = vmatprep.subr.bf16.mxu1 %v1792_v56  ;;  %v711_v4 = vld [vmem:[%s8317_s8 + $0x870] sm:$0xff]  ;;  %v1825_v56 = vunpack.c.l.s8.bf16 %v709_v7 }
 0x2dc   : > { %v1827_v57 = vunpack.c.l.s8.bf16 %v711_v4  ;;  %v1831_v62 = vunpack.c.h.s8.bf16 %v711_v4  ;;  %v729_v4 = vld [vmem:[%s8317_s8 + $0x900] sm:$0xff] }
 0x2de   : > { %3699 = vmatpush1.bf16.msra.mxu0 %v1789_v60  ;;  %4806 = vmatpush1.bf16.msra.mxu1 %v1791_v28  ;;  %v1832_v60 = vunpack.c.h.s8.bf16 %v712_v48  ;;  %v714_v28 = vld [vmem:[%s8317_s8 + $0x888] sm:$0xff] }
 0x2df   : > { %3700 = vmatprep.subr.bf16.mxu0 %v1794_v41  ;;  %4807 = vmatprep.subr.bf16.mxu1 %v1796_v61  ;;  %v716_v41 = vld [vmem:[%s8317_s8 + $0x898] sm:$0xff]  ;;  %v1829_v61 = vunpack.c.h.s8.bf16 %v709_v7  ;;  %v1834_v63 = vunpack.c.l.s8.bf16 %v714_v28  ;;  %v1838_v6 = vunpack.c.h.s8.bf16 %v714_v28  ;;  %v730_v48 = vld [vmem:[%s8317_s8 + $0x908] sm:$0xff] }
 0x2e0   : > { %v1870_v28 = vunpack.c.h.s8.bf16 %v730_v48 }
 0x2e2   : > { %3701 = vmatpush1.bf16.msra.mxu0 %v1793_v1  ;;  %4808 = vmatpush1.bf16.msra.mxu1 %v1795_v51  ;;  %v1836_v1 = vunpack.c.l.s8.bf16 %v716_v41  ;;  %v713_v51 = vld [vmem:[%s8317_s8 + $0x880] sm:$0xff] }
 0x2e3   : > { %3702 = vmatprep.subr.bf16.mxu0 %v1798_v2  ;;  %4809 = vmatprep.subr.bf16.mxu1 %v1800_v3  ;;  %v715_v2 = vld [vmem:[%s8317_s8 + $0x890] sm:$0xff]  ;;  %v1833_v3 = vunpack.c.l.s8.bf16 %v713_v51 }
 0x2e4   : > { %v1835_v5 = vunpack.c.l.s8.bf16 %v715_v2  ;;  %v1839_v20 = vunpack.c.h.s8.bf16 %v715_v2 }
 0x2e6   : > { %3703 = vmatpush1.bf16.msra.mxu0 %v1797_v8  ;;  %4810 = vmatpush1.bf16.msra.mxu1 %v1799_v9  ;;  %v1840_v8 = vunpack.c.h.s8.bf16 %v716_v41  ;;  %v718_v9 = vld [vmem:[%s8317_s8 + $0x8a8] sm:$0xff] }
 0x2e7   : > { %3713 = vmatprep.subr.bf16.mxu0 %v1802_v10  ;;  %4820 = vmatprep.subr.bf16.mxu1 %v1804_v11  ;;  %v720_v10 = vld [vmem:[%s8317_s8 + $0x8b8] sm:$0xff]  ;;  %v1837_v11 = vunpack.c.h.s8.bf16 %v713_v51  ;;  %v1842_v12 = vunpack.c.l.s8.bf16 %v718_v9 }
 0x2e8   : > { %v1844_v13 = vunpack.c.l.s8.bf16 %v720_v10  ;;  %v1848_v18 = vunpack.c.h.s8.bf16 %v720_v10  ;;  %v738_v10 = vld [vmem:[%s8317_s8 + $0x948] sm:$0xff] }
 0x2e9   : > { %3705 = vmatmul.mubr.bf16.vlgmr.msra.gmra.mrb[0].mxu0 %v3094_v14  ;;  %4812 = vmatmul.mubr.bf16.vlgmr.msra.gmra.mrb[0].mxu1 %v3094_v14  ;;  %v717_v14 = vld [vmem:[%s8317_s8 + $0x8a0] sm:$0xff] }
 0x2ea   : > { %3714 = vmatpush1.bf16.msra.mxu0 %v1801_v15  ;;  %4821 = vmatpush1.bf16.msra.mxu1 %v1803_v16  ;;  %v719_v15 = vld [vmem:[%s8317_s8 + $0x8b0] sm:$0xff]  ;;  %v1841_v16 = vunpack.c.l.s8.bf16 %v717_v14 }
 0x2eb   : > { %3715 = vmatprep.subr.bf16.mxu0 %v1806_v37  ;;  %4822 = vmatprep.subr.bf16.mxu1 %v1808_v17  ;;  %v1843_v37 = vunpack.c.l.s8.bf16 %v719_v15  ;;  %v1846_v17 = vunpack.c.h.s8.bf16 %v718_v9 }
 0x2ec   : > { %3745 = vmatprep.mubr.bf16.mxu0 %v8705_v22  ;;  %4852 = vmatprep.mubr.bf16.mxu1 %v8705_v22 }
 0x2ee   : > { %3716 = vmatpush1.bf16.msra.mxu0 %v1805_v39  ;;  %4823 = vmatpush1.bf16.msra.mxu1 %v1807_v36  ;;  %v724_v39 = vld [vmem:[%s8317_s8 + $0x8d8] sm:$0xff]  ;;  %v1845_v36 = vunpack.c.h.s8.bf16 %v717_v14 }
 0x2ef   : > { %3717 = vmatprep.subr.bf16.mxu0 %v1810_v23  ;;  %4824 = vmatprep.subr.bf16.mxu1 %v1812_v24  ;;  %v1847_v23 = vunpack.c.h.s8.bf16 %v719_v15  ;;  %v1850_v24 = vunpack.c.l.s8.bf16 %v722_v21  ;;  %v1852_v25 = vunpack.c.l.s8.bf16 %v724_v39  ;;  %v1856_v32 = vunpack.c.h.s8.bf16 %v724_v39  ;;  %v737_v15 = vld [vmem:[%s8317_s8 + $0x940] sm:$0xff]  ;;  %v742_v39 = vld [vmem:[%s8317_s8 + $0x968] sm:$0xff] }
 0x2f2   : > { %3718 = vmatpush1.bf16.msra.mxu0 %v1809_v53  ;;  %4825 = vmatpush1.bf16.msra.mxu1 %v1811_v29  ;;  %v723_v53 = vld [vmem:[%s8317_s8 + $0x8d0] sm:$0xff]  ;;  %v1849_v29 = vunpack.c.l.s8.bf16 %v721_v27 }
 0x2f3   : > { %3719 = vmatprep.subr.bf16.mxu0 %v1814_v30  ;;  %4826 = vmatprep.subr.bf16.mxu1 %v1816_v31  ;;  %v1851_v30 = vunpack.c.l.s8.bf16 %v723_v53  ;;  %v1854_v31 = vunpack.c.h.s8.bf16 %v722_v21 }
 0x2f6   : > { %3720 = vmatpush1.bf16.msra.mxu0 %v1813_v55  ;;  %4827 = vmatpush1.bf16.msra.mxu1 %v1815_v34  ;;  %v728_v55 = vld [vmem:[%s8317_s8 + $0x8f8] sm:$0xff]  ;;  %v1853_v34 = vunpack.c.h.s8.bf16 %v721_v27 }
 0x2f7   : > { %3721 = vmatprep.subr.bf16.mxu0 %v1818_v38  ;;  %4828 = vmatprep.subr.bf16.mxu1 %v1820_v40  ;;  %v1855_v38 = vunpack.c.h.s8.bf16 %v723_v53  ;;  %v1858_v40 = vunpack.c.l.s8.bf16 %v726_v33  ;;  %v1860_v42 = vunpack.c.l.s8.bf16 %v728_v55  ;;  %v1864_v58 = vunpack.c.h.s8.bf16 %v728_v55  ;;  %v741_v53 = vld [vmem:[%s8317_s8 + $0x960] sm:$0xff]  ;;  %v746_v55 = vld [vmem:[%s8317_s8 + $0x988] sm:$0xff] }
 0x2fa   : > { %3722 = vmatpush1.bf16.msra.mxu0 %v1817_v44  ;;  %4829 = vmatpush1.bf16.msra.mxu1 %v1819_v45  ;;  %v727_v44 = vld [vmem:[%s8317_s8 + $0x8f0] sm:$0xff]  ;;  %v1857_v45 = vunpack.c.l.s8.bf16 %v725_v43 }
 0x2fb   : > { %3723 = vmatprep.subr.bf16.mxu0 %v1822_v46  ;;  %4830 = vmatprep.subr.bf16.mxu1 %v1824_v47  ;;  %v1859_v46 = vunpack.c.l.s8.bf16 %v727_v44  ;;  %v1862_v47 = vunpack.c.h.s8.bf16 %v726_v33 }
 0x2fe   : > { %3724 = vmatpush1.bf16.msra.mxu0 %v1821_v49  ;;  %4831 = vmatpush1.bf16.msra.mxu1 %v1823_v50  ;;  %v732_v49 = vld [vmem:[%s8317_s8 + $0x918] sm:$0xff]  ;;  %v1861_v50 = vunpack.c.h.s8.bf16 %v725_v43 }
 0x2ff   : > { %3725 = vmatprep.subr.bf16.mxu0 %v1826_v52  ;;  %4832 = vmatprep.subr.bf16.mxu1 %v1828_v54  ;;  %v1863_v52 = vunpack.c.h.s8.bf16 %v727_v44  ;;  %v1866_v54 = vunpack.c.l.s8.bf16 %v730_v48  ;;  %v1868_v7 = vunpack.c.l.s8.bf16 %v732_v49  ;;  %v1872_v41 = vunpack.c.h.s8.bf16 %v732_v49  ;;  %v745_v44 = vld [vmem:[%s8317_s8 + $0x980] sm:$0xff]  ;;  %v750_v49 = vld [vmem:[%s8317_s8 + $0x9a8] sm:$0xff] }
 0x302   : > { %3726 = vmatpush1.bf16.msra.mxu0 %v1825_v56  ;;  %4833 = vmatpush1.bf16.msra.mxu1 %v1827_v57  ;;  %v731_v56 = vld [vmem:[%s8317_s8 + $0x910] sm:$0xff]  ;;  %v8741_v57 = vrot.slane %v8694_v19, %v8354_v35  ;;  %v1869_v19 = vunpack.c.h.s8.bf16 %v729_v4 }
 0x303   : > { %3727 = vmatprep.subr.bf16.mxu0 %v1830_v59  ;;  %4834 = vmatprep.subr.bf16.mxu1 %v1832_v60  ;;  %v1865_v59 = vunpack.c.l.s8.bf16 %v729_v4  ;;  %v1867_v60 = vunpack.c.l.s8.bf16 %v731_v56 }
 0x306   : > { %3728 = vmatpush1.bf16.msra.mxu0 %v1829_v61  ;;  %4835 = vmatpush1.bf16.msra.mxu1 %v1831_v62  ;;  %v734_v61 = vld [vmem:[%s8317_s8 + $0x928] sm:$0xff]  ;;  %v736_v62 = vld [vmem:[%s8317_s8 + $0x938] sm:$0xff] }
 0x307   : > { %3729 = vmatprep.subr.bf16.mxu0 %v1834_v63  ;;  %4836 = vmatprep.subr.bf16.mxu1 %v1836_v1  ;;  %v3144_v63 = vcombine.high %v8705_v22, %v8705_v22  ;;  %v1871_v1 = vunpack.c.h.s8.bf16 %v731_v56  ;;  %v1874_v51 = vunpack.c.l.s8.bf16 %v734_v61  ;;  %v1876_v2 = vunpack.c.l.s8.bf16 %v736_v62  ;;  %v749_v56 = vld [vmem:[%s8317_s8 + $0x9a0] sm:$0xff] }
 0x308   : > { %v1880_v9 = vunpack.c.h.s8.bf16 %v736_v62  ;;  %v754_v62 = vld [vmem:[%s8317_s8 + $0x9c8] sm:$0xff] }
 0x30a   : > { %3730 = vmatpush1.bf16.msra.mxu0 %v1833_v3  ;;  %4837 = vmatpush1.bf16.msra.mxu1 %v1835_v5  ;;  %v733_v3 = vld [vmem:[%s8317_s8 + $0x920] sm:$0xff]  ;;  %v735_v5 = vld [vmem:[%s8317_s8 + $0x930] sm:$0xff] }
 0x30b   : > { %3731 = vmatprep.subr.bf16.mxu0 %v1838_v6  ;;  %4838 = vmatprep.subr.bf16.mxu1 %v1840_v8  ;;  %v1873_v22 = vunpack.c.l.s8.bf16 %v733_v3  ;;  %v1875_v6 = vunpack.c.l.s8.bf16 %v735_v5  ;;  %v1878_v8 = vunpack.c.h.s8.bf16 %v734_v61 }
 0x30e   : > { %3732 = vmatpush1.bf16.msra.mxu0 %v1837_v11  ;;  %4839 = vmatpush1.bf16.msra.mxu1 %v1839_v20  ;;  %v740_v11 = vld [vmem:[%s8317_s8 + $0x958] sm:$0xff]  ;;  %v1877_v20 = vunpack.c.h.s8.bf16 %v733_v3  ;;  %v753_v3 = vld [vmem:[%s8317_s8 + $0x9c0] sm:$0xff] }
 0x30f   : > { %3733 = vmatprep.subr.bf16.mxu0 %v1842_v12  ;;  %4840 = vmatprep.subr.bf16.mxu1 %v1844_v13  ;;  %v1879_v12 = vunpack.c.h.s8.bf16 %v735_v5  ;;  %v1882_v13 = vunpack.c.l.s8.bf16 %v738_v10  ;;  %v1884_v14 = vunpack.c.l.s8.bf16 %v740_v11  ;;  %v1888_v21 = vunpack.c.h.s8.bf16 %v740_v11  ;;  %v755_v5 = vld [vmem:[%s8317_s8 + $0x9d0] sm:$0xff]  ;;  %v760_v11 = vld [vmem:[%s8317_s8 + $0x9f8] sm:$0xff] }
 0x312   : > { %3734 = vmatpush1.bf16.msra.mxu0 %v1841_v16  ;;  %4841 = vmatpush1.bf16.msra.mxu1 %v1843_v37  ;;  %v739_v16 = vld [vmem:[%s8317_s8 + $0x950] sm:$0xff]  ;;  %v1881_v37 = vunpack.c.l.s8.bf16 %v737_v15 }
 0x313   : > { %3735 = vmatprep.subr.bf16.mxu0 %v1846_v17  ;;  %4842 = vmatprep.subr.bf16.mxu1 %v1848_v18  ;;  %v1883_v17 = vunpack.c.l.s8.bf16 %v739_v16  ;;  %v1886_v18 = vunpack.c.h.s8.bf16 %v738_v10  ;;  %v758_v10 = vld [vmem:[%s8317_s8 + $0x9e8] sm:$0xff] }
 0x316   : > { %3736 = vmatpush1.bf16.msra.mxu0 %v1845_v36  ;;  %4843 = vmatpush1.bf16.msra.mxu1 %v1847_v23  ;;  %v744_v36 = vld [vmem:[%s8317_s8 + $0x978] sm:$0xff]  ;;  %v1885_v23 = vunpack.c.h.s8.bf16 %v737_v15  ;;  %v757_v15 = vld [vmem:[%s8317_s8 + $0x9e0] sm:$0xff] }
 0x317   : > { %3737 = vmatprep.subr.bf16.mxu0 %v1850_v24  ;;  %4844 = vmatprep.subr.bf16.mxu1 %v1852_v25  ;;  %v1887_v24 = vunpack.c.h.s8.bf16 %v739_v16  ;;  %v1890_v25 = vunpack.c.l.s8.bf16 %v742_v39  ;;  %v1892_v27 = vunpack.c.l.s8.bf16 %v744_v36  ;;  %v1896_v33 = vunpack.c.h.s8.bf16 %v744_v36  ;;  %v759_v16 = vld [vmem:[%s8317_s8 + $0x9f0] sm:$0xff]  ;;  %v762_v36 = vld [vmem:[%s8317_s8 + $0xa08] sm:$0xff] }
 0x31a   : > { %3738 = vmatpush1.bf16.msra.mxu0 %v1849_v29  ;;  %4845 = vmatpush1.bf16.msra.mxu1 %v1851_v30  ;;  %v743_v29 = vld [vmem:[%s8317_s8 + $0x970] sm:$0xff]  ;;  %v1889_v30 = vunpack.c.l.s8.bf16 %v741_v53 }
 0x31b   : > { %3739 = vmatprep.subr.bf16.mxu0 %v1854_v31  ;;  %4846 = vmatprep.subr.bf16.mxu1 %v1856_v32  ;;  %v1891_v31 = vunpack.c.l.s8.bf16 %v743_v29  ;;  %v1894_v32 = vunpack.c.h.s8.bf16 %v742_v39  ;;  %v1928_v39 = vunpack.c.h.s8.bf16 %v760_v11 }
 0x31e   : > { %3740 = vmatpush1.bf16.msra.mxu0 %v1853_v34  ;;  %4847 = vmatpush1.bf16.msra.mxu1 %v1855_v38  ;;  %v748_v34 = vld [vmem:[%s8317_s8 + $0x998] sm:$0xff]  ;;  %v1893_v38 = vunpack.c.h.s8.bf16 %v741_v53 }
 0x31f   : > { %3741 = vmatprep.subr.bf16.mxu0 %v1858_v40  ;;  %4848 = vmatprep.subr.bf16.mxu1 %v1860_v42  ;;  %v1895_v40 = vunpack.c.h.s8.bf16 %v743_v29  ;;  %v1898_v42 = vunpack.c.l.s8.bf16 %v746_v55  ;;  %v1900_v43 = vunpack.c.l.s8.bf16 %v748_v34  ;;  %v1904_v48 = vunpack.c.h.s8.bf16 %v748_v34  ;;  %v761_v29 = vld [vmem:[%s8317_s8 + $0xa00] sm:$0xff] }
 0x320   : > { %v1934_v34 = vunpack.c.h.s8.bf16 %v762_v36 }
 0x322   : > { %3742 = vmatpush1.bf16.msra.mxu0 %v1857_v45  ;;  %4849 = vmatpush1.bf16.msra.mxu1 %v1859_v46  ;;  %v747_v45 = vld [vmem:[%s8317_s8 + $0x990] sm:$0xff]  ;;  %v1897_v46 = vunpack.c.l.s8.bf16 %v745_v44 }
 0x323   : > { %3743 = vmatprep.subr.bf16.mxu0 %v1862_v47  ;;  %4850 = vmatprep.subr.bf16.mxu1 %v1864_v58  ;;  %v1899_v47 = vunpack.c.l.s8.bf16 %v747_v45  ;;  %v1902_v58 = vunpack.c.h.s8.bf16 %v746_v55 }
 0x326   : > { %3744 = vmatpush1.bf16.msra.mxu0 %v1861_v50  ;;  %4851 = vmatpush1.bf16.msra.mxu1 %v1863_v52  ;;  %v752_v50 = vld [vmem:[%s8317_s8 + $0x9b8] sm:$0xff]  ;;  %v1901_v52 = vunpack.c.h.s8.bf16 %v745_v44 }
 0x327   : > { %3754 = vmatprep.subr.bf16.mxu0 %v1866_v54  ;;  %4861 = vmatprep.subr.bf16.mxu1 %v1868_v7  ;;  %v1903_v54 = vunpack.c.h.s8.bf16 %v747_v45  ;;  %v1906_v7 = vunpack.c.l.s8.bf16 %v750_v49  ;;  %v1908_v4 = vunpack.c.l.s8.bf16 %v752_v50  ;;  %v1912_v61 = vunpack.c.h.s8.bf16 %v752_v50 }
 0x329   : > { %3746 = vmatmul.mubr.bf16.vlgmr.msra.gmra.mrb[0].mxu0 %v8741_v57  ;;  %4853 = vmatmul.mubr.bf16.vlgmr.msra.gmra.mrb[0].mxu1 %v8741_v57 }
 0x32a   : > { %3755 = vmatpush1.bf16.msra.mxu0 %v1865_v59  ;;  %4862 = vmatpush1.bf16.msra.mxu1 %v1867_v60  ;;  %v751_v59 = vld [vmem:[%s8317_s8 + $0x9b0] sm:$0xff]  ;;  %v1905_v60 = vunpack.c.l.s8.bf16 %v749_v56 }
 0x32b   : > { %3756 = vmatprep.subr.bf16.mxu0 %v1870_v28  ;;  %4863 = vmatprep.subr.bf16.mxu1 %v1872_v41  ;;  %v1907_v28 = vunpack.c.l.s8.bf16 %v751_v59  ;;  %v1910_v41 = vunpack.c.h.s8.bf16 %v750_v49 }
 0x32c   : > { %3786 = vmatprep.mubr.bf16.mxu0 %v3144_v63  ;;  %4893 = vmatprep.mubr.bf16.mxu1 %v3144_v63  ;;  %v756_v63 = vld [vmem:[%s8317_s8 + $0x9d8] sm:$0xff] }
 0x32e   : > { %3757 = vmatpush1.bf16.msra.mxu0 %v1869_v19  ;;  %4864 = vmatpush1.bf16.msra.mxu1 %v1871_v1  ;;  %v1909_v19 = vunpack.c.h.s8.bf16 %v749_v56  ;;  %v1911_v1 = vunpack.c.h.s8.bf16 %v751_v59 }
 0x32f   : > { %3758 = vmatprep.subr.bf16.mxu0 %v1874_v51  ;;  %4865 = vmatprep.subr.bf16.mxu1 %v1876_v2  ;;  %v1914_v51 = vunpack.c.l.s8.bf16 %v754_v62  ;;  %v1916_v2 = vunpack.c.l.s8.bf16 %v756_v63 }
 0x332   : > { %3759 = vmatpush1.bf16.msra.mxu0 %v1873_v22  ;;  %4866 = vmatpush1.bf16.msra.mxu1 %v1875_v6  ;;  %v1913_v22 = vunpack.c.l.s8.bf16 %v753_v3  ;;  %v1915_v6 = vunpack.c.l.s8.bf16 %v755_v5 }
 0x333   : > { %3760 = vmatprep.subr.bf16.mxu0 %v1878_v8  ;;  %4867 = vmatprep.subr.bf16.mxu1 %v1880_v9  ;;  %v1918_v8 = vunpack.c.h.s8.bf16 %v754_v62  ;;  %v1920_v9 = vunpack.c.h.s8.bf16 %v756_v63 }
 0x336   : > { %3761 = vmatpush1.bf16.msra.mxu0 %v1877_v20  ;;  %4868 = vmatpush1.bf16.msra.mxu1 %v1879_v12  ;;  %v1917_v20 = vunpack.c.h.s8.bf16 %v753_v3  ;;  %v1919_v12 = vunpack.c.h.s8.bf16 %v755_v5 }
 0x337   : > { %3762 = vmatprep.subr.bf16.mxu0 %v1882_v13  ;;  %4869 = vmatprep.subr.bf16.mxu1 %v1884_v14  ;;  %v1922_v13 = vunpack.c.l.s8.bf16 %v758_v10  ;;  %v1924_v14 = vunpack.c.l.s8.bf16 %v760_v11 }
 0x33a   : > { %3763 = vmatpush1.bf16.msra.mxu0 %v1881_v37  ;;  %4870 = vmatpush1.bf16.msra.mxu1 %v1883_v17  ;;  %v3097_v37 = vcombine.high %v8688_v0, %v8688_v0  ;;  %v1921_v17 = vunpack.c.l.s8.bf16 %v757_v15  ;;  %v1930_v0 = vunpack.c.l.s8.bf16 %v762_v36 }
 0x33b   : > { %3764 = vmatprep.subr.bf16.mxu0 %v1886_v18  ;;  %4871 = vmatprep.subr.bf16.mxu1 %v1888_v21  ;;  %v1923_v18 = vunpack.c.l.s8.bf16 %v759_v16  ;;  %v1926_v21 = vunpack.c.h.s8.bf16 %v758_v10 }
 0x33e   : > { %3765 = vmatpush1.bf16.msra.mxu0 %v1885_v23  ;;  %4872 = vmatpush1.bf16.msra.mxu1 %v1887_v24  ;;  %v764_v23 = vld [vmem:[%s8317_s8 + $0xa18] sm:$0xff]  ;;  %v8780_v24 = vrot.slane %v3097_v37, %v8354_v35 }
 0x33f   : > { %3766 = vmatprep.subr.bf16.mxu0 %v1890_v25  ;;  %4873 = vmatprep.subr.bf16.mxu1 %v1892_v27  ;;  %v1925_v25 = vunpack.c.h.s8.bf16 %v757_v15  ;;  %v1927_v27 = vunpack.c.h.s8.bf16 %v759_v16  ;;  %v1932_v53 = vunpack.c.l.s8.bf16 %v764_v23 }
 0x342   : > { %3767 = vmatpush1.bf16.msra.mxu0 %v1889_v30  ;;  %4874 = vmatpush1.bf16.msra.mxu1 %v1891_v31  ;;  %v763_v30 = vld [vmem:[%s8317_s8 + $0xa10] sm:$0xff]  ;;  %v3113_v31 = vcombine.high %v8780_v24, %v8780_v24 }
 0x343   : > { %3768 = vmatprep.subr.bf16.mxu0 %v1894_v32  ;;  %4875 = vmatprep.subr.bf16.mxu1 %v1896_v33  ;;  %v3142_v32 = vcombine.high %v8741_v57, %v8741_v57  ;;  %v1929_v33 = vunpack.c.l.s8.bf16 %v761_v29  ;;  %v1931_v55 = vunpack.c.l.s8.bf16 %v763_v30  ;;  %v1933_v57 = vunpack.c.h.s8.bf16 %v761_v29 }
 0x344   : > { %v1935_v44 = vunpack.c.h.s8.bf16 %v763_v30 }
 0x346   : > { %3769 = vmatpush1.bf16.msra.mxu0 %v1893_v38  ;;  %4876 = vmatpush1.bf16.msra.mxu1 %v1895_v40  ;;  %v1936_v38 = vunpack.c.h.s8.bf16 %v764_v23  ;;  %v766_v40 = vld [vmem:[%s8317_s8 + $0xa28] sm:$0xff] }
 0x347   : > { %3770 = vmatprep.subr.bf16.mxu0 %v1898_v42  ;;  %4877 = vmatprep.subr.bf16.mxu1 %v1900_v43  ;;  %v768_v42 = vld [vmem:[%s8317_s8 + $0xa38] sm:$0xff]  ;;  %v8791_v43 = vrot.slane %v3113_v31, %v8354_v35  ;;  %v1938_v45 = vunpack.c.l.s8.bf16 %v766_v40  ;;  %v1942_v50 = vunpack.c.h.s8.bf16 %v766_v40  ;;  %v781_v31 = vld [vmem:[%s8317_s8 + $0xaa0] sm:$0xff]  ;;  %v786_v40 = vld [vmem:[%s8317_s8 + $0xac8] sm:$0xff] }
 0x34a   : > { %3771 = vmatpush1.bf16.msra.mxu0 %v1897_v46  ;;  %4878 = vmatpush1.bf16.msra.mxu1 %v1899_v47  ;;  %v1940_v46 = vunpack.c.l.s8.bf16 %v768_v42  ;;  %v765_v47 = vld [vmem:[%s8317_s8 + $0xa20] sm:$0xff] }
 0x34b   : > { %3772 = vmatprep.subr.bf16.mxu0 %v1902_v58  ;;  %4879 = vmatprep.subr.bf16.mxu1 %v1904_v48  ;;  %v767_v58 = vld [vmem:[%s8317_s8 + $0xa30] sm:$0xff]  ;;  %v1937_v48 = vunpack.c.l.s8.bf16 %v765_v47 }
 0x34c   : > { %v1939_v49 = vunpack.c.l.s8.bf16 %v767_v58  ;;  %v1943_v56 = vunpack.c.h.s8.bf16 %v767_v58  ;;  %v787_v58 = vld [vmem:[%s8317_s8 + $0xad0] sm:$0xff] }
 0x34e   : > { %3773 = vmatpush1.bf16.msra.mxu0 %v1901_v52  ;;  %4880 = vmatpush1.bf16.msra.mxu1 %v1903_v54  ;;  %v1944_v52 = vunpack.c.h.s8.bf16 %v768_v42  ;;  %v770_v54 = vld [vmem:[%s8317_s8 + $0xa48] sm:$0xff]  ;;  %v788_v42 = vld [vmem:[%s8317_s8 + $0xad8] sm:$0xff] }
 0x34f   : > { %3774 = vmatprep.subr.bf16.mxu0 %v1906_v7  ;;  %4881 = vmatprep.subr.bf16.mxu1 %v1908_v4  ;;  %v772_v7 = vld [vmem:[%s8317_s8 + $0xa58] sm:$0xff]  ;;  %v1941_v4 = vunpack.c.h.s8.bf16 %v765_v47  ;;  %v1946_v59 = vunpack.c.l.s8.bf16 %v770_v54  ;;  %v1950_v63 = vunpack.c.h.s8.bf16 %v770_v54  ;;  %v785_v47 = vld [vmem:[%s8317_s8 + $0xac0] sm:$0xff]  ;;  %v790_v54 = vld [vmem:[%s8317_s8 + $0xae8] sm:$0xff] }
 0x352   : > { %3775 = vmatpush1.bf16.msra.mxu0 %v1905_v60  ;;  %4882 = vmatpush1.bf16.msra.mxu1 %v1907_v28  ;;  %v1948_v60 = vunpack.c.l.s8.bf16 %v772_v7  ;;  %v769_v28 = vld [vmem:[%s8317_s8 + $0xa40] sm:$0xff] }
 0x353   : > { %3776 = vmatprep.subr.bf16.mxu0 %v1910_v41  ;;  %4883 = vmatprep.subr.bf16.mxu1 %v1912_v61  ;;  %v771_v41 = vld [vmem:[%s8317_s8 + $0xa50] sm:$0xff]  ;;  %v1945_v61 = vunpack.c.l.s8.bf16 %v769_v28 }
 0x354   : > { %v1947_v62 = vunpack.c.l.s8.bf16 %v771_v41  ;;  %v1951_v3 = vunpack.c.h.s8.bf16 %v771_v41  ;;  %v791_v41 = vld [vmem:[%s8317_s8 + $0xaf0] sm:$0xff] }
 0x356   : > { %3777 = vmatpush1.bf16.msra.mxu0 %v1909_v19  ;;  %4884 = vmatpush1.bf16.msra.mxu1 %v1911_v1  ;;  %v1952_v19 = vunpack.c.h.s8.bf16 %v772_v7  ;;  %v774_v1 = vld [vmem:[%s8317_s8 + $0xa68] sm:$0xff]  ;;  %v792_v7 = vld [vmem:[%s8317_s8 + $0xaf8] sm:$0xff] }
 0x357   : > { %3778 = vmatprep.subr.bf16.mxu0 %v1914_v51  ;;  %4885 = vmatprep.subr.bf16.mxu1 %v1916_v2  ;;  %v776_v51 = vld [vmem:[%s8317_s8 + $0xa78] sm:$0xff]  ;;  %v1949_v2 = vunpack.c.h.s8.bf16 %v769_v28  ;;  %v1954_v5 = vunpack.c.l.s8.bf16 %v774_v1  ;;  %v1958_v11 = vunpack.c.h.s8.bf16 %v774_v1  ;;  %v789_v28 = vld [vmem:[%s8317_s8 + $0xae0] sm:$0xff]  ;;  %v794_v1 = vld [vmem:[%s8317_s8 + $0xb08] sm:$0xff] }
 0x35a   : > { %3779 = vmatpush1.bf16.msra.mxu0 %v1913_v22  ;;  %4886 = vmatpush1.bf16.msra.mxu1 %v1915_v6  ;;  %v1956_v22 = vunpack.c.l.s8.bf16 %v776_v51  ;;  %v773_v6 = vld [vmem:[%s8317_s8 + $0xa60] sm:$0xff] }
 0x35b   : > { %3780 = vmatprep.subr.bf16.mxu0 %v1918_v8  ;;  %4887 = vmatprep.subr.bf16.mxu1 %v1920_v9  ;;  %v775_v8 = vld [vmem:[%s8317_s8 + $0xa70] sm:$0xff]  ;;  %v1953_v9 = vunpack.c.l.s8.bf16 %v773_v6 }
 0x35c   : > { %v1955_v10 = vunpack.c.l.s8.bf16 %v775_v8  ;;  %v1959_v15 = vunpack.c.h.s8.bf16 %v775_v8  ;;  %v795_v8 = vld [vmem:[%s8317_s8 + $0xb10] sm:$0xff] }
 0x35e   : > { %3781 = vmatpush1.bf16.msra.mxu0 %v1917_v20  ;;  %4888 = vmatpush1.bf16.msra.mxu1 %v1919_v12  ;;  %v1960_v20 = vunpack.c.h.s8.bf16 %v776_v51  ;;  %v778_v12 = vld [vmem:[%s8317_s8 + $0xa88] sm:$0xff]  ;;  %v796_v51 = vld [vmem:[%s8317_s8 + $0xb18] sm:$0xff] }
 0x35f   : > { %3782 = vmatprep.subr.bf16.mxu0 %v1922_v13  ;;  %4889 = vmatprep.subr.bf16.mxu1 %v1924_v14  ;;  %v780_v13 = vld [vmem:[%s8317_s8 + $0xa98] sm:$0xff]  ;;  %v1957_v14 = vunpack.c.h.s8.bf16 %v773_v6  ;;  %v1962_v16 = vunpack.c.l.s8.bf16 %v778_v12  ;;  %v1966_v36 = vunpack.c.h.s8.bf16 %v778_v12  ;;  %v793_v6 = vld [vmem:[%s8317_s8 + $0xb00] sm:$0xff]  ;;  %v2000_v12 = vunpack.c.h.s8.bf16 %v796_v51 }
 0x360   : > { %v1964_v37 = vunpack.c.l.s8.bf16 %v780_v13  ;;  %v1968_v23 = vunpack.c.h.s8.bf16 %v780_v13  ;;  %v798_v13 = vld [vmem:[%s8317_s8 + $0xb28] sm:$0xff] }
 0x362   : > { %3783 = vmatpush1.bf16.msra.mxu0 %v1921_v17  ;;  %4890 = vmatpush1.bf16.msra.mxu1 %v1923_v18  ;;  %v777_v17 = vld [vmem:[%s8317_s8 + $0xa80] sm:$0xff]  ;;  %v779_v18 = vld [vmem:[%s8317_s8 + $0xa90] sm:$0xff] }
 0x363   : > { %3784 = vmatprep.subr.bf16.mxu0 %v1926_v21  ;;  %4891 = vmatprep.subr.bf16.mxu1 %v1928_v39  ;;  %v1961_v21 = vunpack.c.l.s8.bf16 %v777_v17  ;;  %v1963_v39 = vunpack.c.l.s8.bf16 %v779_v18 }
 0x366   : > { %3785 = vmatpush1.bf16.msra.mxu0 %v1925_v25  ;;  %4892 = vmatpush1.bf16.msra.mxu1 %v1927_v27  ;;  %v782_v25 = vld [vmem:[%s8317_s8 + $0xaa8] sm:$0xff]  ;;  %v784_v27 = vld [vmem:[%s8317_s8 + $0xab8] sm:$0xff] }
 0x367   : > { %3795 = vmatprep.subr.bf16.mxu0 %v1930_v0  ;;  %4902 = vmatprep.subr.bf16.mxu1 %v1932_v53  ;;  %v1965_v0 = vunpack.c.h.s8.bf16 %v777_v17  ;;  %v1967_v53 = vunpack.c.h.s8.bf16 %v779_v18  ;;  %v1970_v29 = vunpack.c.l.s8.bf16 %v782_v25  ;;  %v1972_v30 = vunpack.c.l.s8.bf16 %v784_v27  ;;  %v797_v18 = vld [vmem:[%s8317_s8 + $0xb20] sm:$0xff] }
 0x369   : > { %3787 = vmatmul.mubr.bf16.vlgmr.msra.gmra.mrb[0].mxu0 %v3142_v32  ;;  %4894 = vmatmul.mubr.bf16.vlgmr.msra.gmra.mrb[0].mxu1 %v3142_v32  ;;  %v783_v32 = vld [vmem:[%s8317_s8 + $0xab0] sm:$0xff] }
 0x36a   : > { %3796 = vmatpush1.bf16.msra.mxu0 %v1929_v33  ;;  %4903 = vmatpush1.bf16.msra.mxu1 %v1931_v55  ;;  %v1969_v33 = vunpack.c.l.s8.bf16 %v781_v31  ;;  %v1971_v55 = vunpack.c.l.s8.bf16 %v783_v32 }
 0x36b   : > { %3797 = vmatprep.subr.bf16.mxu0 %v1934_v34  ;;  %4904 = vmatprep.subr.bf16.mxu1 %v1936_v38  ;;  %v1974_v34 = vunpack.c.h.s8.bf16 %v782_v25  ;;  %v1976_v38 = vunpack.c.h.s8.bf16 %v784_v27  ;;  %v802_v25 = vld [vmem:[%s8317_s8 + $0xb48] sm:$0xff]  ;;  %v804_v27 = vld [vmem:[%s8317_s8 + $0xb58] sm:$0xff] }
 0x36c   : > { %3827 = vmatprep.mubr.bf16.mxu0 %v8791_v43  ;;  %4934 = vmatprep.mubr.bf16.mxu1 %v8791_v43 }
 0x36e   : > { %3798 = vmatpush1.bf16.msra.mxu0 %v1933_v57  ;;  %4905 = vmatpush1.bf16.msra.mxu1 %v1935_v44  ;;  %v1973_v57 = vunpack.c.h.s8.bf16 %v781_v31  ;;  %v1975_v44 = vunpack.c.h.s8.bf16 %v783_v32  ;;  %v801_v31 = vld [vmem:[%s8317_s8 + $0xb40] sm:$0xff]  ;;  %v803_v32 = vld [vmem:[%s8317_s8 + $0xb50] sm:$0xff] }
 0x36f   : > { %3799 = vmatprep.subr.bf16.mxu0 %v1938_v45  ;;  %4906 = vmatprep.subr.bf16.mxu1 %v1940_v46  ;;  %v1978_v45 = vunpack.c.l.s8.bf16 %v786_v40  ;;  %v1980_v46 = vunpack.c.l.s8.bf16 %v788_v42 }
 0x372   : > { %3800 = vmatpush1.bf16.msra.mxu0 %v1937_v48  ;;  %4907 = vmatpush1.bf16.msra.mxu1 %v1939_v49  ;;  %v1977_v48 = vunpack.c.l.s8.bf16 %v785_v47  ;;  %v1979_v49 = vunpack.c.l.s8.bf16 %v787_v58 }
 0x373   : > { %3801 = vmatprep.subr.bf16.mxu0 %v1942_v50  ;;  %4908 = vmatprep.subr.bf16.mxu1 %v1944_v52  ;;  %v1982_v50 = vunpack.c.h.s8.bf16 %v786_v40  ;;  %v1984_v52 = vunpack.c.h.s8.bf16 %v788_v42  ;;  %v806_v40 = vld [vmem:[%s8317_s8 + $0xb68] sm:$0xff]  ;;  %v808_v42 = vld [vmem:[%s8317_s8 + $0xb78] sm:$0xff] }
 0x376   : > { %3802 = vmatpush1.bf16.msra.mxu0 %v1941_v4  ;;  %4909 = vmatpush1.bf16.msra.mxu1 %v1943_v56  ;;  %v1981_v4 = vunpack.c.h.s8.bf16 %v785_v47  ;;  %v1983_v56 = vunpack.c.h.s8.bf16 %v787_v58  ;;  %v805_v47 = vld [vmem:[%s8317_s8 + $0xb60] sm:$0xff]  ;;  %v807_v58 = vld [vmem:[%s8317_s8 + $0xb70] sm:$0xff] }
 0x377   : > { %3803 = vmatprep.subr.bf16.mxu0 %v1946_v59  ;;  %4910 = vmatprep.subr.bf16.mxu1 %v1948_v60  ;;  %v1986_v59 = vunpack.c.l.s8.bf16 %v790_v54  ;;  %v1988_v60 = vunpack.c.l.s8.bf16 %v792_v7 }
 0x37a   : > { %3804 = vmatpush1.bf16.msra.mxu0 %v1945_v61  ;;  %4911 = vmatpush1.bf16.msra.mxu1 %v1947_v62  ;;  %v1985_v61 = vunpack.c.l.s8.bf16 %v789_v28  ;;  %v1987_v62 = vunpack.c.l.s8.bf16 %v791_v41 }
 0x37b   : > { %3805 = vmatprep.subr.bf16.mxu0 %v1950_v63  ;;  %4912 = vmatprep.subr.bf16.mxu1 %v1952_v19  ;;  %v1990_v63 = vunpack.c.h.s8.bf16 %v790_v54  ;;  %v1992_v19 = vunpack.c.h.s8.bf16 %v792_v7  ;;  %v810_v54 = vld [vmem:[%s8317_s8 + $0xb88] sm:$0xff]  ;;  %v812_v7 = vld [vmem:[%s8317_s8 + $0xb98] sm:$0xff] }
 0x37e   : > { %3806 = vmatpush1.bf16.msra.mxu0 %v1949_v2  ;;  %4913 = vmatpush1.bf16.msra.mxu1 %v1951_v3  ;;  %v1989_v2 = vunpack.c.h.s8.bf16 %v789_v28  ;;  %v1991_v3 = vunpack.c.h.s8.bf16 %v791_v41  ;;  %v809_v28 = vld [vmem:[%s8317_s8 + $0xb80] sm:$0xff]  ;;  %v811_v41 = vld [vmem:[%s8317_s8 + $0xb90] sm:$0xff] }
 0x37f   : > { %3807 = vmatprep.subr.bf16.mxu0 %v1954_v5  ;;  %4914 = vmatprep.subr.bf16.mxu1 %v1956_v22  ;;  %v1994_v5 = vunpack.c.l.s8.bf16 %v794_v1  ;;  %v1996_v22 = vunpack.c.l.s8.bf16 %v796_v51  ;;  %v816_v51 = vld [vmem:[%s8317_s8 + $0xbb8] sm:$0xff] }
 0x382   : > { %3808 = vmatpush1.bf16.msra.mxu0 %v1953_v9  ;;  %4915 = vmatpush1.bf16.msra.mxu1 %v1955_v10  ;;  %v8827_v9 = vrot.slane %v8780_v24, %v8354_v35  ;;  %v1993_v10 = vunpack.c.l.s8.bf16 %v793_v6  ;;  %v1997_v24 = vunpack.c.h.s8.bf16 %v793_v6  ;;  %v813_v6 = vld [vmem:[%s8317_s8 + $0xba0] sm:$0xff] }
 0x383   : > { %3809 = vmatprep.subr.bf16.mxu0 %v1958_v11  ;;  %4916 = vmatprep.subr.bf16.mxu1 %v1960_v20  ;;  %v1995_v11 = vunpack.c.l.s8.bf16 %v795_v8  ;;  %v1998_v20 = vunpack.c.h.s8.bf16 %v794_v1  ;;  %v814_v1 = vld [vmem:[%s8317_s8 + $0xba8] sm:$0xff] }
 0x386   : > { %3810 = vmatpush1.bf16.msra.mxu0 %v1957_v14  ;;  %4917 = vmatpush1.bf16.msra.mxu1 %v1959_v15  ;;  %v800_v14 = vld [vmem:[%s8317_s8 + $0xb38] sm:$0xff]  ;;  %v3145_v15 = vcombine.high %v8791_v43, %v8791_v43  ;;  %v2001_v43 = vunpack.c.l.s8.bf16 %v797_v18 }
 0x387   : > { %3811 = vmatprep.subr.bf16.mxu0 %v1962_v16  ;;  %4918 = vmatprep.subr.bf16.mxu1 %v1964_v37  ;;  %v1999_v16 = vunpack.c.h.s8.bf16 %v795_v8  ;;  %v2002_v37 = vunpack.c.l.s8.bf16 %v798_v13  ;;  %v2004_v17 = vunpack.c.l.s8.bf16 %v800_v14  ;;  %v815_v8 = vld [vmem:[%s8317_s8 + $0xbb0] sm:$0xff] }
 0x38a   : > { %3812 = vmatpush1.bf16.msra.mxu0 %v1961_v21  ;;  %4919 = vmatpush1.bf16.msra.mxu1 %v1963_v39  ;;  %v799_v21 = vld [vmem:[%s8317_s8 + $0xb30] sm:$0xff] }
 0x38b   : > { %3813 = vmatprep.subr.bf16.mxu0 %v1966_v36  ;;  %4920 = vmatprep.subr.bf16.mxu1 %v1968_v23  ;;  %v2003_v39 = vunpack.c.l.s8.bf16 %v799_v21  ;;  %v2006_v36 = vunpack.c.h.s8.bf16 %v798_v13  ;;  %v2008_v23 = vunpack.c.h.s8.bf16 %v800_v14  ;;  %v818_v13 = vld [vmem:[%s8317_s8 + $0xbc8] sm:$0xff]  ;;  %v820_v14 = vld [vmem:[%s8317_s8 + $0xbd8] sm:$0xff] }
 0x38e   : > { %3814 = vmatpush1.bf16.msra.mxu0 %v1965_v0  ;;  %4921 = vmatpush1.bf16.msra.mxu1 %v1967_v53  ;;  %v2005_v0 = vunpack.c.h.s8.bf16 %v797_v18  ;;  %v2007_v53 = vunpack.c.h.s8.bf16 %v799_v21  ;;  %v819_v18 = vld [vmem:[%s8317_s8 + $0xbd0] sm:$0xff] }
 0x38f   : > { %3815 = vmatprep.subr.bf16.mxu0 %v1970_v29  ;;  %4922 = vmatprep.subr.bf16.mxu1 %v1972_v30  ;;  %v2010_v29 = vunpack.c.l.s8.bf16 %v802_v25  ;;  %v2012_v30 = vunpack.c.l.s8.bf16 %v804_v27 }
 0x392   : > { %3816 = vmatpush1.bf16.msra.mxu0 %v1969_v33  ;;  %4923 = vmatpush1.bf16.msra.mxu1 %v1971_v55  ;;  %v2009_v33 = vunpack.c.l.s8.bf16 %v801_v31  ;;  %v2011_v55 = vunpack.c.l.s8.bf16 %v803_v32 }
 0x393   : > { %3817 = vmatprep.subr.bf16.mxu0 %v1974_v34  ;;  %4924 = vmatprep.subr.bf16.mxu1 %v1976_v38  ;;  %v2014_v34 = vunpack.c.h.s8.bf16 %v802_v25  ;;  %v2016_v38 = vunpack.c.h.s8.bf16 %v804_v27  ;;  %v824_v25 = vld [vmem:[%s8317_s8 + $0xbf8] sm:$0xff] }
 0x396   : > { %3818 = vmatpush1.bf16.msra.mxu0 %v1973_v57  ;;  %4925 = vmatpush1.bf16.msra.mxu1 %v1975_v44  ;;  %v2013_v57 = vunpack.c.h.s8.bf16 %v801_v31  ;;  %v2015_v44 = vunpack.c.h.s8.bf16 %v803_v32  ;;  %v823_v31 = vld [vmem:[%s8317_s8 + $0xbf0] sm:$0xff]  ;;  %v8861_v32 = vld [vmem:[#allocation3 + $0x18] sm:$0xff] }
 0x397   : > { %3819 = vmatprep.subr.bf16.mxu0 %v1978_v45  ;;  %4926 = vmatprep.subr.bf16.mxu1 %v1980_v46  ;;  %v2018_v45 = vunpack.c.l.s8.bf16 %v806_v40  ;;  %v2020_v46 = vunpack.c.l.s8.bf16 %v808_v42 }
 0x39a   : > { %3820 = vmatpush1.bf16.msra.mxu0 %v1977_v48  ;;  %4927 = vmatpush1.bf16.msra.mxu1 %v1979_v49  ;;  %v2017_v48 = vunpack.c.l.s8.bf16 %v805_v47  ;;  %v2019_v49 = vunpack.c.l.s8.bf16 %v807_v58 }
 0x39b   : > { %3821 = vmatprep.subr.bf16.mxu0 %v1982_v50  ;;  %4928 = vmatprep.subr.bf16.mxu1 %v1984_v52  ;;  %v2022_v50 = vunpack.c.h.s8.bf16 %v806_v40  ;;  %v2024_v52 = vunpack.c.h.s8.bf16 %v808_v42  ;;  %v826_v40 = vld [vmem:[%s8317_s8 + $0xc08] sm:$0xff]  ;;  %v828_v42 = vld [vmem:[%s8317_s8 + $0xc18] sm:$0xff] }
 0x39e   : > { %3822 = vmatpush1.bf16.msra.mxu0 %v1981_v4  ;;  %4929 = vmatpush1.bf16.msra.mxu1 %v1983_v56  ;;  %v2021_v4 = vunpack.c.h.s8.bf16 %v805_v47  ;;  %v2023_v56 = vunpack.c.h.s8.bf16 %v807_v58  ;;  %v2060_v47 = vunpack.c.l.s8.bf16 %v828_v42  ;;  %v825_v58 = vld [vmem:[%s8317_s8 + $0xc00] sm:$0xff] }
 0x39f   : > { %3823 = vmatprep.subr.bf16.mxu0 %v1986_v59  ;;  %4930 = vmatprep.subr.bf16.mxu1 %v1988_v60  ;;  %v2026_v59 = vunpack.c.l.s8.bf16 %v810_v54  ;;  %v2028_v60 = vunpack.c.l.s8.bf16 %v812_v7 }
 0x3a2   : > { %3824 = vmatpush1.bf16.msra.mxu0 %v1985_v61  ;;  %4931 = vmatpush1.bf16.msra.mxu1 %v1987_v62  ;;  %v2025_v61 = vunpack.c.l.s8.bf16 %v809_v28  ;;  %v2027_v62 = vunpack.c.l.s8.bf16 %v811_v41 }
 0x3a3   : > { %3825 = vmatprep.subr.bf16.mxu0 %v1990_v63  ;;  %4932 = vmatprep.subr.bf16.mxu1 %v1992_v19  ;;  %v2030_v63 = vunpack.c.h.s8.bf16 %v810_v54  ;;  %v2032_v19 = vunpack.c.h.s8.bf16 %v812_v7  ;;  %v2062_v7 = vunpack.c.h.s8.bf16 %v826_v40 }
 0x3a6   : > { %3826 = vmatpush1.bf16.msra.mxu0 %v1989_v2  ;;  %4933 = vmatpush1.bf16.msra.mxu1 %v1991_v3  ;;  %v2029_v2 = vunpack.c.h.s8.bf16 %v809_v28  ;;  %v2031_v3 = vunpack.c.h.s8.bf16 %v811_v41 }
 0x3a7   : > { %3836 = vmatprep.subr.bf16.mxu0 %v1994_v5  ;;  %4943 = vmatprep.subr.bf16.mxu1 %v1996_v22  ;;  %v2034_v5 = vunpack.c.l.s8.bf16 %v814_v1  ;;  %v2036_v22 = vunpack.c.l.s8.bf16 %v816_v51 }
 0x3a9   : > { %3828 = vmatmul.mubr.bf16.vlgmr.msra.gmra.mrb[0].mxu0 %v8827_v9  ;;  %4935 = vmatmul.mubr.bf16.vlgmr.msra.gmra.mrb[0].mxu1 %v8827_v9 }
 0x3aa   : > { %3837 = vmatpush1.bf16.msra.mxu0 %v1993_v10  ;;  %4944 = vmatpush1.bf16.msra.mxu1 %v1995_v11  ;;  %v2033_v10 = vunpack.c.l.s8.bf16 %v813_v6  ;;  %v2035_v11 = vunpack.c.l.s8.bf16 %v815_v8 }
 0x3ab   : > { %3838 = vmatprep.subr.bf16.mxu0 %v1998_v20  ;;  %4945 = vmatprep.subr.bf16.mxu1 %v2000_v12  ;;  %v2038_v20 = vunpack.c.h.s8.bf16 %v814_v1  ;;  %v2040_v12 = vunpack.c.h.s8.bf16 %v816_v51 }
 0x3ac   : > { %3868 = vmatprep.mubr.bf16.mxu0 %v3145_v15  ;;  %4975 = vmatprep.mubr.bf16.mxu1 %v3145_v15  ;;  %v2037_v15 = vunpack.c.h.s8.bf16 %v813_v6 }
 0x3ae   : > { %3839 = vmatpush1.bf16.msra.mxu0 %v1997_v24  ;;  %4946 = vmatpush1.bf16.msra.mxu1 %v1999_v16  ;;  %v2039_v24 = vunpack.c.h.s8.bf16 %v815_v8  ;;  %v2042_v16 = vunpack.c.l.s8.bf16 %v818_v13 }
 0x3af   : > { %3840 = vmatprep.subr.bf16.mxu0 %v2002_v37  ;;  %4947 = vmatprep.subr.bf16.mxu1 %v2004_v17  ;;  %v2044_v37 = vunpack.c.l.s8.bf16 %v820_v14  ;;  %v817_v17 = vld [vmem:[%s8317_s8 + $0xbc0] sm:$0xff] }
 0x3b0   : > { %v2041_v21 = vunpack.c.l.s8.bf16 %v817_v17  ;;  %v2045_v27 = vunpack.c.h.s8.bf16 %v817_v17 }
 0x3b2   : > { %3841 = vmatpush1.bf16.msra.mxu0 %v2001_v43  ;;  %4948 = vmatpush1.bf16.msra.mxu1 %v2003_v39  ;;  %v2043_v43 = vunpack.c.l.s8.bf16 %v819_v18  ;;  %v2046_v39 = vunpack.c.h.s8.bf16 %v818_v13 }
 0x3b3   : > { %3842 = vmatprep.subr.bf16.mxu0 %v2006_v36  ;;  %4949 = vmatprep.subr.bf16.mxu1 %v2008_v23  ;;  %v2048_v36 = vunpack.c.h.s8.bf16 %v820_v14  ;;  %v822_v23 = vld [vmem:[%s8317_s8 + $0xbe8] sm:$0xff] }
 0x3b6   : > { %3843 = vmatpush1.bf16.msra.mxu0 %v2005_v0  ;;  %4950 = vmatpush1.bf16.msra.mxu1 %v2007_v53  ;;  %v2047_v0 = vunpack.c.h.s8.bf16 %v819_v18  ;;  %v2050_v53 = vunpack.c.l.s8.bf16 %v822_v23 }
 0x3b7   : > { %3844 = vmatprep.subr.bf16.mxu0 %v2010_v29  ;;  %4951 = vmatprep.subr.bf16.mxu1 %v2012_v30  ;;  %v2052_v29 = vunpack.c.l.s8.bf16 %v824_v25  ;;  %v821_v30 = vld [vmem:[%s8317_s8 + $0xbe0] sm:$0xff] }
 0x3ba   : > { %3845 = vmatpush1.bf16.msra.mxu0 %v2009_v33  ;;  %4952 = vmatpush1.bf16.msra.mxu1 %v2011_v55  ;;  %v2049_v33 = vunpack.c.l.s8.bf16 %v821_v30  ;;  %v2051_v55 = vunpack.c.l.s8.bf16 %v823_v31 }
 0x3bb   : > { %3846 = vmatprep.subr.bf16.mxu0 %v2014_v34  ;;  %4953 = vmatprep.subr.bf16.mxu1 %v2016_v38  ;;  %v2054_v34 = vunpack.c.h.s8.bf16 %v822_v23  ;;  %v2056_v38 = vunpack.c.h.s8.bf16 %v824_v25 }
 0x3be   : > { %3847 = vmatpush1.bf16.msra.mxu0 %v2013_v57  ;;  %4954 = vmatpush1.bf16.msra.mxu1 %v2015_v44  ;;  %v8867_v57 = vrot.slane %v8861_v32, %v8354_v35  ;;  %v2053_v44 = vunpack.c.h.s8.bf16 %v821_v30 }
 0x3bf   : > { %3848 = vmatprep.subr.bf16.mxu0 %v2018_v45  ;;  %4955 = vmatprep.subr.bf16.mxu1 %v2020_v46  ;;  %v2055_v45 = vunpack.c.h.s8.bf16 %v823_v31  ;;  %v2058_v46 = vunpack.c.l.s8.bf16 %v826_v40 }
 0x3c2   : > { %3849 = vmatpush1.bf16.msra.mxu0 %v2017_v48  ;;  %4956 = vmatpush1.bf16.msra.mxu1 %v2019_v49  ;;  %v827_v48 = vld [vmem:[%s8317_s8 + $0xc10] sm:$0xff]  ;;  %v3161_v49 = vcombine.high %v8867_v57, %v8867_v57 }
 0x3c3   : > { %3850 = vmatprep.subr.bf16.mxu0 %v2022_v50  ;;  %4957 = vmatprep.subr.bf16.mxu1 %v2024_v52  ;;  %v3143_v50 = vcombine.high %v8827_v9, %v8827_v9  ;;  %v2057_v52 = vunpack.c.l.s8.bf16 %v825_v58  ;;  %v2059_v54 = vunpack.c.l.s8.bf16 %v827_v48  ;;  %v2061_v9 = vunpack.c.h.s8.bf16 %v825_v58 }
 0x3c4   : > { %v2063_v28 = vunpack.c.h.s8.bf16 %v827_v48 }
 0x3c6   : > { %3851 = vmatpush1.bf16.msra.mxu0 %v2021_v4  ;;  %4958 = vmatpush1.bf16.msra.mxu1 %v2023_v56  ;;  %v2064_v4 = vunpack.c.h.s8.bf16 %v828_v42  ;;  %v830_v56 = vld [vmem:[%s8317_s8 + $0xc28] sm:$0xff] }
 0x3c7   : > { %3852 = vmatprep.subr.bf16.mxu0 %v2026_v59  ;;  %4959 = vmatprep.subr.bf16.mxu1 %v2028_v60  ;;  %v832_v59 = vld [vmem:[%s8317_s8 + $0xc38] sm:$0xff]  ;;  %v8878_v60 = vrot.slane %v3161_v49, %v8354_v35  ;;  %v2066_v41 = vunpack.c.l.s8.bf16 %v830_v56  ;;  %v2070_v51 = vunpack.c.h.s8.bf16 %v830_v56 }
 0x3ca   : > { %3853 = vmatpush1.bf16.msra.mxu0 %v2025_v61  ;;  %4960 = vmatpush1.bf16.msra.mxu1 %v2027_v62  ;;  %v2068_v61 = vunpack.c.l.s8.bf16 %v832_v59  ;;  %v829_v62 = vld [vmem:[%s8317_s8 + $0xc20] sm:$0xff] }
 0x3cb   : > { %3854 = vmatprep.subr.bf16.mxu0 %v2030_v63  ;;  %4961 = vmatprep.subr.bf16.mxu1 %v2032_v19  ;;  %v831_v63 = vld [vmem:[%s8317_s8 + $0xc30] sm:$0xff]  ;;  %v2065_v19 = vunpack.c.l.s8.bf16 %v829_v62 }
 0x3cc   : > { %v2067_v1 = vunpack.c.l.s8.bf16 %v831_v63  ;;  %v2071_v6 = vunpack.c.h.s8.bf16 %v831_v63  ;;  %v849_v63 = vld [vmem:[%s8317_s8 + $0xcc0] sm:$0xff] }
 0x3ce   : > { %3855 = vmatpush1.bf16.msra.mxu0 %v2029_v2  ;;  %4962 = vmatpush1.bf16.msra.mxu1 %v2031_v3  ;;  %v2072_v2 = vunpack.c.h.s8.bf16 %v832_v59  ;;  %v834_v3 = vld [vmem:[%s8317_s8 + $0xc48] sm:$0xff] }
 0x3cf   : > { %3856 = vmatprep.subr.bf16.mxu0 %v2034_v5  ;;  %4963 = vmatprep.subr.bf16.mxu1 %v2036_v22  ;;  %v836_v5 = vld [vmem:[%s8317_s8 + $0xc58] sm:$0xff]  ;;  %v2069_v22 = vunpack.c.h.s8.bf16 %v829_v62  ;;  %v2074_v8 = vunpack.c.l.s8.bf16 %v834_v3  ;;  %v2078_v14 = vunpack.c.h.s8.bf16 %v834_v3  ;;  %v850_v59 = vld [vmem:[%s8317_s8 + $0xcc8] sm:$0xff] }
 0x3d2   : > { %3857 = vmatpush1.bf16.msra.mxu0 %v2033_v10  ;;  %4964 = vmatpush1.bf16.msra.mxu1 %v2035_v11  ;;  %v2076_v10 = vunpack.c.l.s8.bf16 %v836_v5  ;;  %v833_v11 = vld [vmem:[%s8317_s8 + $0xc40] sm:$0xff] }
 0x3d3   : > { %3858 = vmatprep.subr.bf16.mxu0 %v2038_v20  ;;  %4965 = vmatprep.subr.bf16.mxu1 %v2040_v12  ;;  %v835_v20 = vld [vmem:[%s8317_s8 + $0xc50] sm:$0xff]  ;;  %v2073_v12 = vunpack.c.l.s8.bf16 %v833_v11 }
 0x3d4   : > { %v2075_v13 = vunpack.c.l.s8.bf16 %v835_v20  ;;  %v2079_v17 = vunpack.c.h.s8.bf16 %v835_v20  ;;  %v853_v20 = vld [vmem:[%s8317_s8 + $0xce0] sm:$0xff] }
 0x3d6   : > { %3859 = vmatpush1.bf16.msra.mxu0 %v2037_v15  ;;  %4966 = vmatpush1.bf16.msra.mxu1 %v2039_v24  ;;  %v2080_v15 = vunpack.c.h.s8.bf16 %v836_v5  ;;  %v838_v24 = vld [vmem:[%s8317_s8 + $0xc68] sm:$0xff] }
 0x3d7   : > { %3860 = vmatprep.subr.bf16.mxu0 %v2042_v16  ;;  %4967 = vmatprep.subr.bf16.mxu1 %v2044_v37  ;;  %v840_v16 = vld [vmem:[%s8317_s8 + $0xc78] sm:$0xff]  ;;  %v2077_v37 = vunpack.c.h.s8.bf16 %v833_v11  ;;  %v2082_v18 = vunpack.c.l.s8.bf16 %v838_v24  ;;  %v2086_v25 = vunpack.c.h.s8.bf16 %v838_v24  ;;  %v854_v5 = vld [vmem:[%s8317_s8 + $0xce8] sm:$0xff] }
 0x3da   : > { %3861 = vmatpush1.bf16.msra.mxu0 %v2041_v21  ;;  %4968 = vmatpush1.bf16.msra.mxu1 %v2043_v43  ;;  %v2084_v21 = vunpack.c.l.s8.bf16 %v840_v16  ;;  %v837_v43 = vld [vmem:[%s8317_s8 + $0xc60] sm:$0xff] }
 0x3db   : > { %3862 = vmatprep.subr.bf16.mxu0 %v2046_v39  ;;  %4969 = vmatprep.subr.bf16.mxu1 %v2048_v36  ;;  %v839_v39 = vld [vmem:[%s8317_s8 + $0xc70] sm:$0xff]  ;;  %v2081_v36 = vunpack.c.l.s8.bf16 %v837_v43 }
 0x3dc   : > { %v2083_v23 = vunpack.c.l.s8.bf16 %v839_v39  ;;  %v2087_v30 = vunpack.c.h.s8.bf16 %v839_v39  ;;  %v857_v39 = vld [vmem:[%s8317_s8 + $0xd00] sm:$0xff] }
 0x3de   : > { %3863 = vmatpush1.bf16.msra.mxu0 %v2045_v27  ;;  %4970 = vmatpush1.bf16.msra.mxu1 %v2047_v0  ;;  %v2088_v27 = vunpack.c.h.s8.bf16 %v840_v16  ;;  %v842_v0 = vld [vmem:[%s8317_s8 + $0xc88] sm:$0xff] }
 0x3df   : > { %3864 = vmatprep.subr.bf16.mxu0 %v2050_v53  ;;  %4971 = vmatprep.subr.bf16.mxu1 %v2052_v29  ;;  %v844_v53 = vld [vmem:[%s8317_s8 + $0xc98] sm:$0xff]  ;;  %v2085_v29 = vunpack.c.h.s8.bf16 %v837_v43  ;;  %v2090_v31 = vunpack.c.l.s8.bf16 %v842_v0  ;;  %v2094_v42 = vunpack.c.h.s8.bf16 %v842_v0  ;;  %v858_v16 = vld [vmem:[%s8317_s8 + $0xd08] sm:$0xff] }
 0x3e0   : > { %v2126_v0 = vunpack.c.h.s8.bf16 %v858_v16 }
 0x3e2   : > { %3865 = vmatpush1.bf16.msra.mxu0 %v2049_v33  ;;  %4972 = vmatpush1.bf16.msra.mxu1 %v2051_v55  ;;  %v2092_v33 = vunpack.c.l.s8.bf16 %v844_v53  ;;  %v841_v55 = vld [vmem:[%s8317_s8 + $0xc80] sm:$0xff] }
 0x3e3   : > { %3866 = vmatprep.subr.bf16.mxu0 %v2054_v34  ;;  %4973 = vmatprep.subr.bf16.mxu1 %v2056_v38  ;;  %v843_v34 = vld [vmem:[%s8317_s8 + $0xc90] sm:$0xff]  ;;  %v2089_v38 = vunpack.c.l.s8.bf16 %v841_v55 }
 0x3e4   : > { %v2091_v40 = vunpack.c.l.s8.bf16 %v843_v34  ;;  %v2095_v58 = vunpack.c.h.s8.bf16 %v843_v34 }
 0x3e6   : > { %3867 = vmatpush1.bf16.msra.mxu0 %v2053_v44  ;;  %4974 = vmatpush1.bf16.msra.mxu1 %v2055_v45  ;;  %v2096_v44 = vunpack.c.h.s8.bf16 %v844_v53  ;;  %v846_v45 = vld [vmem:[%s8317_s8 + $0xca8] sm:$0xff] }
 0x3e7   : > { %3877 = vmatprep.subr.bf16.mxu0 %v2058_v46  ;;  %4984 = vmatprep.subr.bf16.mxu1 %v2060_v47  ;;  %v848_v46 = vld [vmem:[%s8317_s8 + $0xcb8] sm:$0xff]  ;;  %v2093_v47 = vunpack.c.h.s8.bf16 %v841_v55  ;;  %v2098_v48 = vunpack.c.l.s8.bf16 %v846_v45 }
 0x3e8   : > { %v2100_v49 = vunpack.c.l.s8.bf16 %v848_v46  ;;  %v2104_v56 = vunpack.c.h.s8.bf16 %v848_v46  ;;  %v866_v46 = vld [vmem:[%s8317_s8 + $0xd48] sm:$0xff] }
 0x3e9   : > { %3869 = vmatmul.mubr.bf16.vlgmr.msra.gmra.mrb[0].mxu0 %v3143_v50  ;;  %4976 = vmatmul.mubr.bf16.vlgmr.msra.gmra.mrb[0].mxu1 %v3143_v50  ;;  %v845_v50 = vld [vmem:[%s8317_s8 + $0xca0] sm:$0xff] }
 0x3ea   : > { %3878 = vmatpush1.bf16.msra.mxu0 %v2057_v52  ;;  %4985 = vmatpush1.bf16.msra.mxu1 %v2059_v54  ;;  %v847_v52 = vld [vmem:[%s8317_s8 + $0xcb0] sm:$0xff]  ;;  %v2097_v54 = vunpack.c.l.s8.bf16 %v845_v50 }
 0x3eb   : > { %3879 = vmatprep.subr.bf16.mxu0 %v2062_v7  ;;  %4986 = vmatprep.subr.bf16.mxu1 %v2064_v4  ;;  %v2099_v7 = vunpack.c.l.s8.bf16 %v847_v52  ;;  %v2102_v4 = vunpack.c.h.s8.bf16 %v846_v45 }
 0x3ec   : > { %3909 = vmatprep.mubr.bf16.mxu0 %v8878_v60  ;;  %5016 = vmatprep.mubr.bf16.mxu1 %v8878_v60 }
 0x3ee   : > { %3880 = vmatpush1.bf16.msra.mxu0 %v2061_v9  ;;  %4987 = vmatpush1.bf16.msra.mxu1 %v2063_v28  ;;  %v852_v9 = vld [vmem:[%s8317_s8 + $0xcd8] sm:$0xff]  ;;  %v2101_v28 = vunpack.c.h.s8.bf16 %v845_v50 }
 0x3ef   : > { %3881 = vmatprep.subr.bf16.mxu0 %v2066_v41  ;;  %4988 = vmatprep.subr.bf16.mxu1 %v2068_v61  ;;  %v2103_v41 = vunpack.c.h.s8.bf16 %v847_v52  ;;  %v2106_v61 = vunpack.c.l.s8.bf16 %v850_v59  ;;  %v2108_v62 = vunpack.c.l.s8.bf16 %v852_v9  ;;  %v2112_v3 = vunpack.c.h.s8.bf16 %v852_v9  ;;  %v865_v52 = vld [vmem:[%s8317_s8 + $0xd40] sm:$0xff]  ;;  %v870_v9 = vld [vmem:[%s8317_s8 + $0xd68] sm:$0xff] }
 0x3f2   : > { %3882 = vmatpush1.bf16.msra.mxu0 %v2065_v19  ;;  %4989 = vmatpush1.bf16.msra.mxu1 %v2067_v1  ;;  %v851_v19 = vld [vmem:[%s8317_s8 + $0xcd0] sm:$0xff]  ;;  %v2105_v1 = vunpack.c.l.s8.bf16 %v849_v63 }
 0x3f3   : > { %3883 = vmatprep.subr.bf16.mxu0 %v2070_v51  ;;  %4990 = vmatprep.subr.bf16.mxu1 %v2072_v2  ;;  %v2107_v51 = vunpack.c.l.s8.bf16 %v851_v19  ;;  %v2110_v2 = vunpack.c.h.s8.bf16 %v850_v59 }
 0x3f6   : > { %3884 = vmatpush1.bf16.msra.mxu0 %v2069_v22  ;;  %4991 = vmatpush1.bf16.msra.mxu1 %v2071_v6  ;;  %v856_v22 = vld [vmem:[%s8317_s8 + $0xcf8] sm:$0xff]  ;;  %v2109_v6 = vunpack.c.h.s8.bf16 %v849_v63 }
 0x3f7   : > { %3885 = vmatprep.subr.bf16.mxu0 %v2074_v8  ;;  %4992 = vmatprep.subr.bf16.mxu1 %v2076_v10  ;;  %v2111_v8 = vunpack.c.h.s8.bf16 %v851_v19  ;;  %v2114_v10 = vunpack.c.l.s8.bf16 %v854_v5  ;;  %v2116_v11 = vunpack.c.l.s8.bf16 %v856_v22  ;;  %v2120_v24 = vunpack.c.h.s8.bf16 %v856_v22  ;;  %v869_v19 = vld [vmem:[%s8317_s8 + $0xd60] sm:$0xff]  ;;  %v874_v22 = vld [vmem:[%s8317_s8 + $0xd88] sm:$0xff] }
 0x3fa   : > { %3886 = vmatpush1.bf16.msra.mxu0 %v2073_v12  ;;  %4993 = vmatpush1.bf16.msra.mxu1 %v2075_v13  ;;  %v855_v12 = vld [vmem:[%s8317_s8 + $0xcf0] sm:$0xff]  ;;  %v2113_v13 = vunpack.c.l.s8.bf16 %v853_v20 }
 0x3fb   : > { %3887 = vmatprep.subr.bf16.mxu0 %v2078_v14  ;;  %4994 = vmatprep.subr.bf16.mxu1 %v2080_v15  ;;  %v2115_v14 = vunpack.c.l.s8.bf16 %v855_v12  ;;  %v2118_v15 = vunpack.c.h.s8.bf16 %v854_v5 }
 0x3fe   : > { %3888 = vmatpush1.bf16.msra.mxu0 %v2077_v37  ;;  %4995 = vmatpush1.bf16.msra.mxu1 %v2079_v17  ;;  %v860_v37 = vld [vmem:[%s8317_s8 + $0xd18] sm:$0xff]  ;;  %v2117_v17 = vunpack.c.h.s8.bf16 %v853_v20 }
 0x3ff   : > { %3889 = vmatprep.subr.bf16.mxu0 %v2082_v18  ;;  %4996 = vmatprep.subr.bf16.mxu1 %v2084_v21  ;;  %v2119_v18 = vunpack.c.h.s8.bf16 %v855_v12  ;;  %v2122_v21 = vunpack.c.l.s8.bf16 %v858_v16  ;;  %v2124_v43 = vunpack.c.l.s8.bf16 %v860_v37  ;;  %v2128_v53 = vunpack.c.h.s8.bf16 %v860_v37  ;;  %v873_v12 = vld [vmem:[%s8317_s8 + $0xd80] sm:$0xff]  ;;  %v878_v37 = vld [vmem:[%s8317_s8 + $0xda8] sm:$0xff] }
 0x402   : > { %3890 = vmatpush1.bf16.msra.mxu0 %v2081_v36  ;;  %4997 = vmatpush1.bf16.msra.mxu1 %v2083_v23  ;;  %v859_v36 = vld [vmem:[%s8317_s8 + $0xd10] sm:$0xff]  ;;  %v8914_v23 = vrot.slane %v8867_v57, %v8354_v35  ;;  %v2125_v57 = vunpack.c.h.s8.bf16 %v857_v39 }
 0x403   : > { %3891 = vmatprep.subr.bf16.mxu0 %v2086_v25  ;;  %4998 = vmatprep.subr.bf16.mxu1 %v2088_v27  ;;  %v2121_v25 = vunpack.c.l.s8.bf16 %v857_v39  ;;  %v2123_v27 = vunpack.c.l.s8.bf16 %v859_v36 }
 0x406   : > { %3892 = vmatpush1.bf16.msra.mxu0 %v2085_v29  ;;  %4999 = vmatpush1.bf16.msra.mxu1 %v2087_v30  ;;  %v862_v29 = vld [vmem:[%s8317_s8 + $0xd28] sm:$0xff]  ;;  %v864_v30 = vld [vmem:[%s8317_s8 + $0xd38] sm:$0xff] }
 0x407   : > { %3893 = vmatprep.subr.bf16.mxu0 %v2090_v31  ;;  %5000 = vmatprep.subr.bf16.mxu1 %v2092_v33  ;;  %v3193_v31 = vcombine.high %v8878_v60, %v8878_v60  ;;  %v2127_v33 = vunpack.c.h.s8.bf16 %v859_v36  ;;  %v2130_v55 = vunpack.c.l.s8.bf16 %v862_v29  ;;  %v2132_v34 = vunpack.c.l.s8.bf16 %v864_v30  ;;  %v877_v36 = vld [vmem:[%s8317_s8 + $0xda0] sm:$0xff] }
 0x408   : > { %v2136_v45 = vunpack.c.h.s8.bf16 %v864_v30  ;;  %v882_v30 = vld [vmem:[%s8317_s8 + $0xdc8] sm:$0xff] }
 0x40a   : > { %3894 = vmatpush1.bf16.msra.mxu0 %v2089_v38  ;;  %5001 = vmatpush1.bf16.msra.mxu1 %v2091_v40  ;;  %v861_v38 = vld [vmem:[%s8317_s8 + $0xd20] sm:$0xff]  ;;  %v863_v40 = vld [vmem:[%s8317_s8 + $0xd30] sm:$0xff] }
 0x40b   : > { %3895 = vmatprep.subr.bf16.mxu0 %v2094_v42  ;;  %5002 = vmatprep.subr.bf16.mxu1 %v2096_v44  ;;  %v2129_v60 = vunpack.c.l.s8.bf16 %v861_v38  ;;  %v2131_v42 = vunpack.c.l.s8.bf16 %v863_v40  ;;  %v2134_v44 = vunpack.c.h.s8.bf16 %v862_v29 }
 0x40e   : > { %3896 = vmatpush1.bf16.msra.mxu0 %v2093_v47  ;;  %5003 = vmatpush1.bf16.msra.mxu1 %v2095_v58  ;;  %v868_v47 = vld [vmem:[%s8317_s8 + $0xd58] sm:$0xff]  ;;  %v2133_v58 = vunpack.c.h.s8.bf16 %v861_v38  ;;  %v881_v38 = vld [vmem:[%s8317_s8 + $0xdc0] sm:$0xff] }
 0x40f   : > { %3897 = vmatprep.subr.bf16.mxu0 %v2098_v48  ;;  %5004 = vmatprep.subr.bf16.mxu1 %v2100_v49  ;;  %v2135_v48 = vunpack.c.h.s8.bf16 %v863_v40  ;;  %v2138_v49 = vunpack.c.l.s8.bf16 %v866_v46  ;;  %v2140_v50 = vunpack.c.l.s8.bf16 %v868_v47  ;;  %v2144_v59 = vunpack.c.h.s8.bf16 %v868_v47  ;;  %v883_v40 = vld [vmem:[%s8317_s8 + $0xdd0] sm:$0xff]  ;;  %v888_v47 = vld [vmem:[%s8317_s8 + $0xdf8] sm:$0xff] }
 0x412   : > { %3898 = vmatpush1.bf16.msra.mxu0 %v2097_v54  ;;  %5005 = vmatpush1.bf16.msra.mxu1 %v2099_v7  ;;  %v867_v54 = vld [vmem:[%s8317_s8 + $0xd50] sm:$0xff]  ;;  %v2137_v7 = vunpack.c.l.s8.bf16 %v865_v52 }
 0x413   : > { %3899 = vmatprep.subr.bf16.mxu0 %v2102_v4  ;;  %5006 = vmatprep.subr.bf16.mxu1 %v2104_v56  ;;  %v2139_v4 = vunpack.c.l.s8.bf16 %v867_v54  ;;  %v2142_v56 = vunpack.c.h.s8.bf16 %v866_v46  ;;  %v886_v46 = vld [vmem:[%s8317_s8 + $0xde8] sm:$0xff] }
 0x416   : > { %3900 = vmatpush1.bf16.msra.mxu0 %v2101_v28  ;;  %5007 = vmatpush1.bf16.msra.mxu1 %v2103_v41  ;;  %v872_v28 = vld [vmem:[%s8317_s8 + $0xd78] sm:$0xff]  ;;  %v2141_v41 = vunpack.c.h.s8.bf16 %v865_v52  ;;  %v885_v52 = vld [vmem:[%s8317_s8 + $0xde0] sm:$0xff] }
 0x417   : > { %3901 = vmatprep.subr.bf16.mxu0 %v2106_v61  ;;  %5008 = vmatprep.subr.bf16.mxu1 %v2108_v62  ;;  %v2143_v61 = vunpack.c.h.s8.bf16 %v867_v54  ;;  %v2146_v62 = vunpack.c.l.s8.bf16 %v870_v9  ;;  %v2148_v63 = vunpack.c.l.s8.bf16 %v872_v28  ;;  %v2152_v5 = vunpack.c.h.s8.bf16 %v872_v28  ;;  %v887_v54 = vld [vmem:[%s8317_s8 + $0xdf0] sm:$0xff]  ;;  %v890_v28 = vld [vmem:[%s8317_s8 + $0xe08] sm:$0xff] }
 0x41a   : > { %3902 = vmatpush1.bf16.msra.mxu0 %v2105_v1  ;;  %5009 = vmatpush1.bf16.msra.mxu1 %v2107_v51  ;;  %v871_v1 = vld [vmem:[%s8317_s8 + $0xd70] sm:$0xff]  ;;  %v2145_v51 = vunpack.c.l.s8.bf16 %v869_v19 }
 0x41b   : > { %3903 = vmatprep.subr.bf16.mxu0 %v2110_v2  ;;  %5010 = vmatprep.subr.bf16.mxu1 %v2112_v3  ;;  %v2147_v2 = vunpack.c.l.s8.bf16 %v871_v1  ;;  %v2150_v3 = vunpack.c.h.s8.bf16 %v870_v9  ;;  %v2184_v9 = vunpack.c.h.s8.bf16 %v888_v47 }
 0x41e   : > { %3904 = vmatpush1.bf16.msra.mxu0 %v2109_v6  ;;  %5011 = vmatpush1.bf16.msra.mxu1 %v2111_v8  ;;  %v876_v6 = vld [vmem:[%s8317_s8 + $0xd98] sm:$0xff]  ;;  %v2149_v8 = vunpack.c.h.s8.bf16 %v869_v19 }
 0x41f   : > { %3905 = vmatprep.subr.bf16.mxu0 %v2114_v10  ;;  %5012 = vmatprep.subr.bf16.mxu1 %v2116_v11  ;;  %v2151_v10 = vunpack.c.h.s8.bf16 %v871_v1  ;;  %v2154_v11 = vunpack.c.l.s8.bf16 %v874_v22  ;;  %v2156_v20 = vunpack.c.l.s8.bf16 %v876_v6  ;;  %v2160_v16 = vunpack.c.h.s8.bf16 %v876_v6  ;;  %v889_v1 = vld [vmem:[%s8317_s8 + $0xe00] sm:$0xff] }
 0x420   : > { %v2190_v6 = vunpack.c.h.s8.bf16 %v890_v28 }
 0x422   : > { %3906 = vmatpush1.bf16.msra.mxu0 %v2113_v13  ;;  %5013 = vmatpush1.bf16.msra.mxu1 %v2115_v14  ;;  %v875_v13 = vld [vmem:[%s8317_s8 + $0xd90] sm:$0xff]  ;;  %v2153_v14 = vunpack.c.l.s8.bf16 %v873_v12 }
 0x423   : > { %3907 = vmatprep.subr.bf16.mxu0 %v2118_v15  ;;  %5014 = vmatprep.subr.bf16.mxu1 %v2120_v24  ;;  %v2155_v15 = vunpack.c.l.s8.bf16 %v875_v13  ;;  %v2158_v24 = vunpack.c.h.s8.bf16 %v874_v22 }
 0x426   : > { %3908 = vmatpush1.bf16.msra.mxu0 %v2117_v17  ;;  %5015 = vmatpush1.bf16.msra.mxu1 %v2119_v18  ;;  %v880_v17 = vld [vmem:[%s8317_s8 + $0xdb8] sm:$0xff]  ;;  %v2157_v18 = vunpack.c.h.s8.bf16 %v873_v12 }
 0x427   : > { %3918 = vmatprep.subr.bf16.mxu0 %v2122_v21  ;;  %5025 = vmatprep.subr.bf16.mxu1 %v2124_v43  ;;  %v2159_v21 = vunpack.c.h.s8.bf16 %v875_v13  ;;  %v2162_v43 = vunpack.c.l.s8.bf16 %v878_v37  ;;  %v2164_v39 = vunpack.c.l.s8.bf16 %v880_v17  ;;  %v2168_v29 = vunpack.c.h.s8.bf16 %v880_v17 }
 0x429   : > { %3910 = vmatmul.mubr.bf16.vlgmr.msra.gmra.mrb[0].mxu0 %v8914_v23  ;;  %5017 = vmatmul.mubr.bf16.vlgmr.msra.gmra.mrb[0].mxu1 %v8914_v23 }
 0x42a   : > { %3919 = vmatpush1.bf16.msra.mxu0 %v2121_v25  ;;  %5026 = vmatpush1.bf16.msra.mxu1 %v2123_v27  ;;  %v879_v25 = vld [vmem:[%s8317_s8 + $0xdb0] sm:$0xff]  ;;  %v2161_v27 = vunpack.c.l.s8.bf16 %v877_v36 }
 0x42b   : > { %3920 = vmatprep.subr.bf16.mxu0 %v2126_v0  ;;  %5027 = vmatprep.subr.bf16.mxu1 %v2128_v53  ;;  %v2163_v0 = vunpack.c.l.s8.bf16 %v879_v25  ;;  %v2166_v53 = vunpack.c.h.s8.bf16 %v878_v37 }
 0x42c   : > { %3950 = vmatprep.mubr.bf16.mxu0 %v3193_v31  ;;  %5057 = vmatprep.mubr.bf16.mxu1 %v3193_v31  ;;  %v884_v31 = vld [vmem:[%s8317_s8 + $0xdd8] sm:$0xff] }
 0x42e   : > { %3921 = vmatpush1.bf16.msra.mxu0 %v2125_v57  ;;  %5028 = vmatpush1.bf16.msra.mxu1 %v2127_v33  ;;  %v2165_v57 = vunpack.c.h.s8.bf16 %v877_v36  ;;  %v2167_v33 = vunpack.c.h.s8.bf16 %v879_v25 }
 0x42f   : > { %3922 = vmatprep.subr.bf16.mxu0 %v2130_v55  ;;  %5029 = vmatprep.subr.bf16.mxu1 %v2132_v34  ;;  %v2170_v55 = vunpack.c.l.s8.bf16 %v882_v30  ;;  %v2172_v34 = vunpack.c.l.s8.bf16 %v884_v31 }
 0x432   : > { %3923 = vmatpush1.bf16.msra.mxu0 %v2129_v60  ;;  %5030 = vmatpush1.bf16.msra.mxu1 %v2131_v42  ;;  %v2169_v60 = vunpack.c.l.s8.bf16 %v881_v38  ;;  %v2171_v42 = vunpack.c.l.s8.bf16 %v883_v40 }
 0x433   : > { %3924 = vmatprep.subr.bf16.mxu0 %v2134_v44  ;;  %5031 = vmatprep.subr.bf16.mxu1 %v2136_v45  ;;  %v2174_v44 = vunpack.c.h.s8.bf16 %v882_v30  ;;  %v2176_v45 = vunpack.c.h.s8.bf16 %v884_v31 }
 0x436   : > { %3925 = vmatpush1.bf16.msra.mxu0 %v2133_v58  ;;  %5032 = vmatpush1.bf16.msra.mxu1 %v2135_v48  ;;  %v2173_v58 = vunpack.c.h.s8.bf16 %v881_v38  ;;  %v2175_v48 = vunpack.c.h.s8.bf16 %v883_v40 }
 0x437   : > { %3926 = vmatprep.subr.bf16.mxu0 %v2138_v49  ;;  %5033 = vmatprep.subr.bf16.mxu1 %v2140_v50  ;;  %v2178_v49 = vunpack.c.l.s8.bf16 %v886_v46  ;;  %v2180_v50 = vunpack.c.l.s8.bf16 %v888_v47 }
 0x43a   : > { %3927 = vmatpush1.bf16.msra.mxu0 %v2137_v7  ;;  %5034 = vmatpush1.bf16.msra.mxu1 %v2139_v4  ;;  %v3146_v7 = vcombine.high %v8861_v32, %v8861_v32  ;;  %v2177_v4 = vunpack.c.l.s8.bf16 %v885_v52  ;;  %v2186_v32 = vunpack.c.l.s8.bf16 %v890_v28 }
 0x43b   : > { %3928 = vmatprep.subr.bf16.mxu0 %v2142_v56  ;;  %5035 = vmatprep.subr.bf16.mxu1 %v2144_v59  ;;  %v2179_v56 = vunpack.c.l.s8.bf16 %v887_v54  ;;  %v2182_v59 = vunpack.c.h.s8.bf16 %v886_v46 }
 0x43e   : > { %3929 = vmatpush1.bf16.msra.mxu0 %v2141_v41  ;;  %5036 = vmatpush1.bf16.msra.mxu1 %v2143_v61  ;;  %v892_v41 = vld [vmem:[%s8317_s8 + $0xe18] sm:$0xff]  ;;  %v8953_v61 = vrot.slane %v3146_v7, %v8354_v35 }
 0x43f   : > { %3930 = vmatprep.subr.bf16.mxu0 %v2146_v62  ;;  %5037 = vmatprep.subr.bf16.mxu1 %v2148_v63  ;;  %v2181_v62 = vunpack.c.h.s8.bf16 %v885_v52  ;;  %v2183_v63 = vunpack.c.h.s8.bf16 %v887_v54  ;;  %v2188_v19 = vunpack.c.l.s8.bf16 %v892_v41 }
 0x442   : > { %3931 = vmatpush1.bf16.msra.mxu0 %v2145_v51  ;;  %5038 = vmatpush1.bf16.msra.mxu1 %v2147_v2  ;;  %v891_v51 = vld [vmem:[%s8317_s8 + $0xe10] sm:$0xff]  ;;  %v3162_v2 = vcombine.high %v8953_v61, %v8953_v61 }
 0x443   : > { %3932 = vmatprep.subr.bf16.mxu0 %v2150_v3  ;;  %5039 = vmatprep.subr.bf16.mxu1 %v2152_v5  ;;  %v3191_v3 = vcombine.high %v8914_v23, %v8914_v23  ;;  %v2185_v5 = vunpack.c.l.s8.bf16 %v889_v1  ;;  %v2187_v22 = vunpack.c.l.s8.bf16 %v891_v51  ;;  %v2189_v23 = vunpack.c.h.s8.bf16 %v889_v1 }
 0x444   : > { %v2191_v12 = vunpack.c.h.s8.bf16 %v891_v51 }
 0x446   : > { %3933 = vmatpush1.bf16.msra.mxu0 %v2149_v8  ;;  %5040 = vmatpush1.bf16.msra.mxu1 %v2151_v10  ;;  %v2192_v8 = vunpack.c.h.s8.bf16 %v892_v41  ;;  %v894_v10 = vld [vmem:[%s8317_s8 + $0xe28] sm:$0xff] }
 0x447   : > { %3934 = vmatprep.subr.bf16.mxu0 %v2154_v11  ;;  %5041 = vmatprep.subr.bf16.mxu1 %v2156_v20  ;;  %v896_v11 = vld [vmem:[%s8317_s8 + $0xe38] sm:$0xff]  ;;  %v8964_v20 = vrot.slane %v3162_v2, %v8354_v35  ;;  %v2194_v13 = vunpack.c.l.s8.bf16 %v894_v10  ;;  %v2198_v17 = vunpack.c.h.s8.bf16 %v894_v10  ;;  %v909_v2 = vld [vmem:[%s8317_s8 + $0xea0] sm:$0xff]  ;;  %v914_v10 = vld [vmem:[%s8317_s8 + $0xec8] sm:$0xff] }
 0x44a   : > { %3935 = vmatpush1.bf16.msra.mxu0 %v2153_v14  ;;  %5042 = vmatpush1.bf16.msra.mxu1 %v2155_v15  ;;  %v2196_v14 = vunpack.c.l.s8.bf16 %v896_v11  ;;  %v893_v15 = vld [vmem:[%s8317_s8 + $0xe20] sm:$0xff] }
 0x44b   : > { %3936 = vmatprep.subr.bf16.mxu0 %v2158_v24  ;;  %5043 = vmatprep.subr.bf16.mxu1 %v2160_v16  ;;  %v895_v24 = vld [vmem:[%s8317_s8 + $0xe30] sm:$0xff]  ;;  %v2193_v16 = vunpack.c.l.s8.bf16 %v893_v15 }
 0x44c   : > { %v2195_v37 = vunpack.c.l.s8.bf16 %v895_v24  ;;  %v2199_v36 = vunpack.c.h.s8.bf16 %v895_v24  ;;  %v915_v24 = vld [vmem:[%s8317_s8 + $0xed0] sm:$0xff] }
 0x44e   : > { %3937 = vmatpush1.bf16.msra.mxu0 %v2157_v18  ;;  %5044 = vmatpush1.bf16.msra.mxu1 %v2159_v21  ;;  %v2200_v18 = vunpack.c.h.s8.bf16 %v896_v11  ;;  %v898_v21 = vld [vmem:[%s8317_s8 + $0xe48] sm:$0xff]  ;;  %v916_v11 = vld [vmem:[%s8317_s8 + $0xed8] sm:$0xff] }
 0x44f   : > { %3938 = vmatprep.subr.bf16.mxu0 %v2162_v43  ;;  %5045 = vmatprep.subr.bf16.mxu1 %v2164_v39  ;;  %v900_v43 = vld [vmem:[%s8317_s8 + $0xe58] sm:$0xff]  ;;  %v2197_v39 = vunpack.c.h.s8.bf16 %v893_v15  ;;  %v2202_v25 = vunpack.c.l.s8.bf16 %v898_v21  ;;  %v2206_v31 = vunpack.c.h.s8.bf16 %v898_v21  ;;  %v913_v15 = vld [vmem:[%s8317_s8 + $0xec0] sm:$0xff]  ;;  %v918_v21 = vld [vmem:[%s8317_s8 + $0xee8] sm:$0xff] }
 0x452   : > { %3939 = vmatpush1.bf16.msra.mxu0 %v2161_v27  ;;  %5046 = vmatpush1.bf16.msra.mxu1 %v2163_v0  ;;  %v2204_v27 = vunpack.c.l.s8.bf16 %v900_v43  ;;  %v897_v0 = vld [vmem:[%s8317_s8 + $0xe40] sm:$0xff] }
 0x453   : > { %3940 = vmatprep.subr.bf16.mxu0 %v2166_v53  ;;  %5047 = vmatprep.subr.bf16.mxu1 %v2168_v29  ;;  %v899_v53 = vld [vmem:[%s8317_s8 + $0xe50] sm:$0xff]  ;;  %v2201_v29 = vunpack.c.l.s8.bf16 %v897_v0 }
 0x454   : > { %v2203_v30 = vunpack.c.l.s8.bf16 %v899_v53  ;;  %v2207_v38 = vunpack.c.h.s8.bf16 %v899_v53  ;;  %v919_v53 = vld [vmem:[%s8317_s8 + $0xef0] sm:$0xff] }
 0x456   : > { %3941 = vmatpush1.bf16.msra.mxu0 %v2165_v57  ;;  %5048 = vmatpush1.bf16.msra.mxu1 %v2167_v33  ;;  %v2208_v57 = vunpack.c.h.s8.bf16 %v900_v43  ;;  %v902_v33 = vld [vmem:[%s8317_s8 + $0xe68] sm:$0xff]  ;;  %v920_v43 = vld [vmem:[%s8317_s8 + $0xef8] sm:$0xff] }
 0x457   : > { %3942 = vmatprep.subr.bf16.mxu0 %v2170_v55  ;;  %5049 = vmatprep.subr.bf16.mxu1 %v2172_v34  ;;  %v904_v55 = vld [vmem:[%s8317_s8 + $0xe78] sm:$0xff]  ;;  %v2205_v34 = vunpack.c.h.s8.bf16 %v897_v0  ;;  %v2210_v40 = vunpack.c.l.s8.bf16 %v902_v33  ;;  %v2214_v47 = vunpack.c.h.s8.bf16 %v902_v33  ;;  %v917_v0 = vld [vmem:[%s8317_s8 + $0xee0] sm:$0xff]  ;;  %v922_v33 = vld [vmem:[%s8317_s8 + $0xf08] sm:$0xff] }
 0x45a   : > { %3943 = vmatpush1.bf16.msra.mxu0 %v2169_v60  ;;  %5050 = vmatpush1.bf16.msra.mxu1 %v2171_v42  ;;  %v2212_v60 = vunpack.c.l.s8.bf16 %v904_v55  ;;  %v901_v42 = vld [vmem:[%s8317_s8 + $0xe60] sm:$0xff] }
 0x45b   : > { %3944 = vmatprep.subr.bf16.mxu0 %v2174_v44  ;;  %5051 = vmatprep.subr.bf16.mxu1 %v2176_v45  ;;  %v903_v44 = vld [vmem:[%s8317_s8 + $0xe70] sm:$0xff]  ;;  %v2209_v45 = vunpack.c.l.s8.bf16 %v901_v42 }
 0x45c   : > { %v2211_v46 = vunpack.c.l.s8.bf16 %v903_v44  ;;  %v2215_v52 = vunpack.c.h.s8.bf16 %v903_v44  ;;  %v923_v44 = vld [vmem:[%s8317_s8 + $0xf10] sm:$0xff] }
 0x45e   : > { %3945 = vmatpush1.bf16.msra.mxu0 %v2173_v58  ;;  %5052 = vmatpush1.bf16.msra.mxu1 %v2175_v48  ;;  %v2216_v58 = vunpack.c.h.s8.bf16 %v904_v55  ;;  %v906_v48 = vld [vmem:[%s8317_s8 + $0xe88] sm:$0xff]  ;;  %v924_v55 = vld [vmem:[%s8317_s8 + $0xf18] sm:$0xff] }
 0x45f   : > { %3946 = vmatprep.subr.bf16.mxu0 %v2178_v49  ;;  %5053 = vmatprep.subr.bf16.mxu1 %v2180_v50  ;;  %v908_v49 = vld [vmem:[%s8317_s8 + $0xe98] sm:$0xff]  ;;  %v2213_v50 = vunpack.c.h.s8.bf16 %v901_v42  ;;  %v2218_v54 = vunpack.c.l.s8.bf16 %v906_v48  ;;  %v2222_v28 = vunpack.c.h.s8.bf16 %v906_v48  ;;  %v921_v42 = vld [vmem:[%s8317_s8 + $0xf00] sm:$0xff]  ;;  %v2256_v48 = vunpack.c.h.s8.bf16 %v924_v55 }
 0x460   : > { %v2220_v7 = vunpack.c.l.s8.bf16 %v908_v49  ;;  %v2224_v41 = vunpack.c.h.s8.bf16 %v908_v49  ;;  %v926_v49 = vld [vmem:[%s8317_s8 + $0xf28] sm:$0xff] }
 0x462   : > { %3947 = vmatpush1.bf16.msra.mxu0 %v2177_v4  ;;  %5054 = vmatpush1.bf16.msra.mxu1 %v2179_v56  ;;  %v905_v4 = vld [vmem:[%s8317_s8 + $0xe80] sm:$0xff]  ;;  %v907_v56 = vld [vmem:[%s8317_s8 + $0xe90] sm:$0xff] }
 0x463   : > { %3948 = vmatprep.subr.bf16.mxu0 %v2182_v59  ;;  %5055 = vmatprep.subr.bf16.mxu1 %v2184_v9  ;;  %v2217_v59 = vunpack.c.l.s8.bf16 %v905_v4  ;;  %v2219_v9 = vunpack.c.l.s8.bf16 %v907_v56 }
 0x466   : > { %3949 = vmatpush1.bf16.msra.mxu0 %v2181_v62  ;;  %5056 = vmatpush1.bf16.msra.mxu1 %v2183_v63  ;;  %v910_v62 = vld [vmem:[%s8317_s8 + $0xea8] sm:$0xff]  ;;  %v912_v63 = vld [vmem:[%s8317_s8 + $0xeb8] sm:$0xff] }
 0x467   : > { %3959 = vmatprep.subr.bf16.mxu0 %v2186_v32  ;;  %5066 = vmatprep.subr.bf16.mxu1 %v2188_v19  ;;  %v2221_v32 = vunpack.c.h.s8.bf16 %v905_v4  ;;  %v2223_v19 = vunpack.c.h.s8.bf16 %v907_v56  ;;  %v2226_v1 = vunpack.c.l.s8.bf16 %v910_v62  ;;  %v2228_v51 = vunpack.c.l.s8.bf16 %v912_v63  ;;  %v925_v56 = vld [vmem:[%s8317_s8 + $0xf20] sm:$0xff] }
 0x469   : > { %3951 = vmatmul.mubr.bf16.vlgmr.msra.gmra.mrb[0].mxu0 %v3191_v3  ;;  %5058 = vmatmul.mubr.bf16.vlgmr.msra.gmra.mrb[0].mxu1 %v3191_v3  ;;  %v911_v3 = vld [vmem:[%s8317_s8 + $0xeb0] sm:$0xff] }
 0x46a   : > { %3960 = vmatpush1.bf16.msra.mxu0 %v2185_v5  ;;  %5067 = vmatpush1.bf16.msra.mxu1 %v2187_v22  ;;  %v2225_v5 = vunpack.c.l.s8.bf16 %v909_v2  ;;  %v2227_v22 = vunpack.c.l.s8.bf16 %v911_v3 }
 0x46b   : > { %3961 = vmatprep.subr.bf16.mxu0 %v2190_v6  ;;  %5068 = vmatprep.subr.bf16.mxu1 %v2192_v8  ;;  %v2230_v6 = vunpack.c.h.s8.bf16 %v910_v62  ;;  %v2232_v8 = vunpack.c.h.s8.bf16 %v912_v63  ;;  %v930_v62 = vld [vmem:[%s8317_s8 + $0xf48] sm:$0xff]  ;;  %v932_v63 = vld [vmem:[%s8317_s8 + $0xf58] sm:$0xff] }
 0x46c   : > { %3991 = vmatprep.mubr.bf16.mxu0 %v8964_v20  ;;  %5098 = vmatprep.mubr.bf16.mxu1 %v8964_v20 }
 0x46e   : > { %3962 = vmatpush1.bf16.msra.mxu0 %v2189_v23  ;;  %5069 = vmatpush1.bf16.msra.mxu1 %v2191_v12  ;;  %v2229_v23 = vunpack.c.h.s8.bf16 %v909_v2  ;;  %v2231_v12 = vunpack.c.h.s8.bf16 %v911_v3  ;;  %v929_v2 = vld [vmem:[%s8317_s8 + $0xf40] sm:$0xff]  ;;  %v931_v3 = vld [vmem:[%s8317_s8 + $0xf50] sm:$0xff] }
 0x46f   : > { %3963 = vmatprep.subr.bf16.mxu0 %v2194_v13  ;;  %5070 = vmatprep.subr.bf16.mxu1 %v2196_v14  ;;  %v2234_v13 = vunpack.c.l.s8.bf16 %v914_v10  ;;  %v2236_v14 = vunpack.c.l.s8.bf16 %v916_v11 }
 0x472   : > { %3964 = vmatpush1.bf16.msra.mxu0 %v2193_v16  ;;  %5071 = vmatpush1.bf16.msra.mxu1 %v2195_v37  ;;  %v2233_v16 = vunpack.c.l.s8.bf16 %v913_v15  ;;  %v2235_v37 = vunpack.c.l.s8.bf16 %v915_v24 }
 0x473   : > { %3965 = vmatprep.subr.bf16.mxu0 %v2198_v17  ;;  %5072 = vmatprep.subr.bf16.mxu1 %v2200_v18  ;;  %v2238_v17 = vunpack.c.h.s8.bf16 %v914_v10  ;;  %v2240_v18 = vunpack.c.h.s8.bf16 %v916_v11  ;;  %v934_v10 = vld [vmem:[%s8317_s8 + $0xf68] sm:$0xff]  ;;  %v936_v11 = vld [vmem:[%s8317_s8 + $0xf78] sm:$0xff] }
 0x476   : > { %3966 = vmatpush1.bf16.msra.mxu0 %v2197_v39  ;;  %5073 = vmatpush1.bf16.msra.mxu1 %v2199_v36  ;;  %v2237_v39 = vunpack.c.h.s8.bf16 %v913_v15  ;;  %v2239_v36 = vunpack.c.h.s8.bf16 %v915_v24  ;;  %v933_v15 = vld [vmem:[%s8317_s8 + $0xf60] sm:$0xff]  ;;  %v935_v24 = vld [vmem:[%s8317_s8 + $0xf70] sm:$0xff] }
 0x477   : > { %3967 = vmatprep.subr.bf16.mxu0 %v2202_v25  ;;  %5074 = vmatprep.subr.bf16.mxu1 %v2204_v27  ;;  %v2242_v25 = vunpack.c.l.s8.bf16 %v918_v21  ;;  %v2244_v27 = vunpack.c.l.s8.bf16 %v920_v43 }
 0x47a   : > { %3968 = vmatpush1.bf16.msra.mxu0 %v2201_v29  ;;  %5075 = vmatpush1.bf16.msra.mxu1 %v2203_v30  ;;  %v2241_v29 = vunpack.c.l.s8.bf16 %v917_v0  ;;  %v2243_v30 = vunpack.c.l.s8.bf16 %v919_v53 }
 0x47b   : > { %3969 = vmatprep.subr.bf16.mxu0 %v2206_v31  ;;  %5076 = vmatprep.subr.bf16.mxu1 %v2208_v57  ;;  %v2246_v31 = vunpack.c.h.s8.bf16 %v918_v21  ;;  %v2248_v57 = vunpack.c.h.s8.bf16 %v920_v43  ;;  %v938_v21 = vld [vmem:[%s8317_s8 + $0xf88] sm:$0xff]  ;;  %v940_v43 = vld [vmem:[%s8317_s8 + $0xf98] sm:$0xff] }
 0x47e   : > { %3970 = vmatpush1.bf16.msra.mxu0 %v2205_v34  ;;  %5077 = vmatpush1.bf16.msra.mxu1 %v2207_v38  ;;  %v2245_v34 = vunpack.c.h.s8.bf16 %v917_v0  ;;  %v2247_v38 = vunpack.c.h.s8.bf16 %v919_v53  ;;  %v937_v0 = vld [vmem:[%s8317_s8 + $0xf80] sm:$0xff]  ;;  %v939_v53 = vld [vmem:[%s8317_s8 + $0xf90] sm:$0xff] }
 0x47f   : > { %3971 = vmatprep.subr.bf16.mxu0 %v2210_v40  ;;  %5078 = vmatprep.subr.bf16.mxu1 %v2212_v60  ;;  %v2250_v40 = vunpack.c.l.s8.bf16 %v922_v33  ;;  %v2252_v60 = vunpack.c.l.s8.bf16 %v924_v55  ;;  %v944_v55 = vld [vmem:[%s8317_s8 + $0xfb8] sm:$0xff] }
 0x482   : > { %3972 = vmatpush1.bf16.msra.mxu0 %v2209_v45  ;;  %5079 = vmatpush1.bf16.msra.mxu1 %v2211_v46  ;;  %v9000_v45 = vrot.slane %v8953_v61, %v8354_v35  ;;  %v2249_v46 = vunpack.c.l.s8.bf16 %v921_v42  ;;  %v2253_v61 = vunpack.c.h.s8.bf16 %v921_v42  ;;  %v941_v42 = vld [vmem:[%s8317_s8 + $0xfa0] sm:$0xff] }
 0x483   : > { %3973 = vmatprep.subr.bf16.mxu0 %v2214_v47  ;;  %5080 = vmatprep.subr.bf16.mxu1 %v2216_v58  ;;  %v2251_v47 = vunpack.c.l.s8.bf16 %v923_v44  ;;  %v2254_v58 = vunpack.c.h.s8.bf16 %v922_v33  ;;  %v942_v33 = vld [vmem:[%s8317_s8 + $0xfa8] sm:$0xff] }
 0x486   : > { %3974 = vmatpush1.bf16.msra.mxu0 %v2213_v50  ;;  %5081 = vmatpush1.bf16.msra.mxu1 %v2215_v52  ;;  %v928_v50 = vld [vmem:[%s8317_s8 + $0xf38] sm:$0xff]  ;;  %v3194_v52 = vcombine.high %v8964_v20, %v8964_v20  ;;  %v2257_v20 = vunpack.c.l.s8.bf16 %v925_v56 }
 0x487   : > { %3975 = vmatprep.subr.bf16.mxu0 %v2218_v54  ;;  %5082 = vmatprep.subr.bf16.mxu1 %v2220_v7  ;;  %v2255_v54 = vunpack.c.h.s8.bf16 %v923_v44  ;;  %v2258_v7 = vunpack.c.l.s8.bf16 %v926_v49  ;;  %v2260_v4 = vunpack.c.l.s8.bf16 %v928_v50  ;;  %v943_v44 = vld [vmem:[%s8317_s8 + $0xfb0] sm:$0xff] }
 0x48a   : > { %3976 = vmatpush1.bf16.msra.mxu0 %v2217_v59  ;;  %5083 = vmatpush1.bf16.msra.mxu1 %v2219_v9  ;;  %v927_v59 = vld [vmem:[%s8317_s8 + $0xf30] sm:$0xff] }
 0x48b   : > { %3977 = vmatprep.subr.bf16.mxu0 %v2222_v28  ;;  %5084 = vmatprep.subr.bf16.mxu1 %v2224_v41  ;;  %v2259_v9 = vunpack.c.l.s8.bf16 %v927_v59  ;;  %v2262_v28 = vunpack.c.h.s8.bf16 %v926_v49  ;;  %v2264_v41 = vunpack.c.h.s8.bf16 %v928_v50  ;;  %v946_v49 = vld [vmem:[%s8317_s8 + $0xfc8] sm:$0xff]  ;;  %v948_v50 = vld [vmem:[%s8317_s8 + $0xfd8] sm:$0xff] }
 0x48e   : > { %3978 = vmatpush1.bf16.msra.mxu0 %v2221_v32  ;;  %5085 = vmatpush1.bf16.msra.mxu1 %v2223_v19  ;;  %v2261_v32 = vunpack.c.h.s8.bf16 %v925_v56  ;;  %v2263_v19 = vunpack.c.h.s8.bf16 %v927_v59  ;;  %v947_v56 = vld [vmem:[%s8317_s8 + $0xfd0] sm:$0xff] }
 0x48f   : > { %3979 = vmatprep.subr.bf16.mxu0 %v2226_v1  ;;  %5086 = vmatprep.subr.bf16.mxu1 %v2228_v51  ;;  %v2266_v1 = vunpack.c.l.s8.bf16 %v930_v62  ;;  %v2268_v51 = vunpack.c.l.s8.bf16 %v932_v63 }
 0x492   : > { %3980 = vmatpush1.bf16.msra.mxu0 %v2225_v5  ;;  %5087 = vmatpush1.bf16.msra.mxu1 %v2227_v22  ;;  %v2265_v5 = vunpack.c.l.s8.bf16 %v929_v2  ;;  %v2267_v22 = vunpack.c.l.s8.bf16 %v931_v3 }
 0x493   : > { %3981 = vmatprep.subr.bf16.mxu0 %v2230_v6  ;;  %5088 = vmatprep.subr.bf16.mxu1 %v2232_v8  ;;  %v2270_v6 = vunpack.c.h.s8.bf16 %v930_v62  ;;  %v2272_v8 = vunpack.c.h.s8.bf16 %v932_v63  ;;  %v952_v62 = vld [vmem:[%s8317_s8 + $0xff8] sm:$0xff] }
 0x496   : > { %3982 = vmatpush1.bf16.msra.mxu0 %v2229_v23  ;;  %5089 = vmatpush1.bf16.msra.mxu1 %v2231_v12  ;;  %v2269_v23 = vunpack.c.h.s8.bf16 %v929_v2  ;;  %v2271_v12 = vunpack.c.h.s8.bf16 %v931_v3  ;;  %v951_v2 = vld [vmem:[%s8317_s8 + $0xff0] sm:$0xff] }
 0x497   : > { %3983 = vmatprep.subr.bf16.mxu0 %v2234_v13  ;;  %5090 = vmatprep.subr.bf16.mxu1 %v2236_v14  ;;  %v2274_v13 = vunpack.c.l.s8.bf16 %v934_v10  ;;  %v2276_v14 = vunpack.c.l.s8.bf16 %v936_v11  ;;  %v9034_v3 = vld [vmem:[#allocation3 + $0x20] sm:$0xff] }
 0x49a   : > { %3984 = vmatpush1.bf16.msra.mxu0 %v2233_v16  ;;  %5091 = vmatpush1.bf16.msra.mxu1 %v2235_v37  ;;  %v2273_v16 = vunpack.c.l.s8.bf16 %v933_v15  ;;  %v2275_v37 = vunpack.c.l.s8.bf16 %v935_v24 }
 0x49b   : > { %3985 = vmatprep.subr.bf16.mxu0 %v2238_v17  ;;  %5092 = vmatprep.subr.bf16.mxu1 %v2240_v18  ;;  %v2278_v17 = vunpack.c.h.s8.bf16 %v934_v10  ;;  %v2280_v18 = vunpack.c.h.s8.bf16 %v936_v11  ;;  %v954_v10 = vld [vmem:[%s8317_s8 + $0x1008] sm:$0xff]  ;;  %v956_v11 = vld [vmem:[%s8317_s8 + $0x1018] sm:$0xff] }
 0x49e   : > { %3986 = vmatpush1.bf16.msra.mxu0 %v2237_v39  ;;  %5093 = vmatpush1.bf16.msra.mxu1 %v2239_v36  ;;  %v2277_v39 = vunpack.c.h.s8.bf16 %v933_v15  ;;  %v2279_v36 = vunpack.c.h.s8.bf16 %v935_v24  ;;  %v2316_v15 = vunpack.c.l.s8.bf16 %v956_v11  ;;  %v953_v24 = vld [vmem:[%s8317_s8 + $0x1000] sm:$0xff] }
 0x49f   : > { %3987 = vmatprep.subr.bf16.mxu0 %v2242_v25  ;;  %5094 = vmatprep.subr.bf16.mxu1 %v2244_v27  ;;  %v2282_v25 = vunpack.c.l.s8.bf16 %v938_v21  ;;  %v2284_v27 = vunpack.c.l.s8.bf16 %v940_v43 }
 0x4a2   : > { %3988 = vmatpush1.bf16.msra.mxu0 %v2241_v29  ;;  %5095 = vmatpush1.bf16.msra.mxu1 %v2243_v30  ;;  %v2281_v29 = vunpack.c.l.s8.bf16 %v937_v0  ;;  %v2283_v30 = vunpack.c.l.s8.bf16 %v939_v53 }
 0x4a3   : > { %3989 = vmatprep.subr.bf16.mxu0 %v2246_v31  ;;  %5096 = vmatprep.subr.bf16.mxu1 %v2248_v57  ;;  %v2286_v31 = vunpack.c.h.s8.bf16 %v938_v21  ;;  %v2288_v57 = vunpack.c.h.s8.bf16 %v940_v43  ;;  %v2318_v43 = vunpack.c.h.s8.bf16 %v954_v10 }
 0x4a6   : > { %3990 = vmatpush1.bf16.msra.mxu0 %v2245_v34  ;;  %5097 = vmatpush1.bf16.msra.mxu1 %v2247_v38  ;;  %v2285_v34 = vunpack.c.h.s8.bf16 %v937_v0  ;;  %v2287_v38 = vunpack.c.h.s8.bf16 %v939_v53 }
 0x4a7   : > { %4000 = vmatprep.subr.bf16.mxu0 %v2250_v40  ;;  %5107 = vmatprep.subr.bf16.mxu1 %v2252_v60  ;;  %v2290_v40 = vunpack.c.l.s8.bf16 %v942_v33  ;;  %v2292_v60 = vunpack.c.l.s8.bf16 %v944_v55 }
 0x4a9   : > { %3992 = vmatmul.mubr.bf16.vlgmr.msra.gmra.mrb[0].mxu0 %v9000_v45  ;;  %5099 = vmatmul.mubr.bf16.vlgmr.msra.gmra.mrb[0].mxu1 %v9000_v45 }
 0x4aa   : > { %4001 = vmatpush1.bf16.msra.mxu0 %v2249_v46  ;;  %5108 = vmatpush1.bf16.msra.mxu1 %v2251_v47  ;;  %v2289_v46 = vunpack.c.l.s8.bf16 %v941_v42  ;;  %v2291_v47 = vunpack.c.l.s8.bf16 %v943_v44 }
 0x4ab   : > { %4002 = vmatprep.subr.bf16.mxu0 %v2254_v58  ;;  %5109 = vmatprep.subr.bf16.mxu1 %v2256_v48  ;;  %v2294_v58 = vunpack.c.h.s8.bf16 %v942_v33  ;;  %v2296_v48 = vunpack.c.h.s8.bf16 %v944_v55 }
 0x4ac   : > { %4032 = vmatprep.mubr.bf16.mxu0 %v3194_v52  ;;  %5139 = vmatprep.mubr.bf16.mxu1 %v3194_v52  ;;  %v2293_v52 = vunpack.c.h.s8.bf16 %v941_v42 }
 0x4ae   : > { %4003 = vmatpush1.bf16.msra.mxu0 %v2253_v61  ;;  %5110 = vmatpush1.bf16.msra.mxu1 %v2255_v54  ;;  %v2295_v61 = vunpack.c.h.s8.bf16 %v943_v44  ;;  %v2298_v54 = vunpack.c.l.s8.bf16 %v946_v49 }
 0x4af   : > { %4004 = vmatprep.subr.bf16.mxu0 %v2258_v7  ;;  %5111 = vmatprep.subr.bf16.mxu1 %v2260_v4  ;;  %v2300_v7 = vunpack.c.l.s8.bf16 %v948_v50  ;;  %v945_v4 = vld [vmem:[%s8317_s8 + $0xfc0] sm:$0xff] }
 0x4b0   : > { %v2297_v59 = vunpack.c.l.s8.bf16 %v945_v4  ;;  %v2301_v63 = vunpack.c.h.s8.bf16 %v945_v4 }
 0x4b2   : > { %4005 = vmatpush1.bf16.msra.mxu0 %v2257_v20  ;;  %5112 = vmatpush1.bf16.msra.mxu1 %v2259_v9  ;;  %v2299_v20 = vunpack.c.l.s8.bf16 %v947_v56  ;;  %v2302_v9 = vunpack.c.h.s8.bf16 %v946_v49 }
 0x4b3   : > { %4006 = vmatprep.subr.bf16.mxu0 %v2262_v28  ;;  %5113 = vmatprep.subr.bf16.mxu1 %v2264_v41  ;;  %v2304_v28 = vunpack.c.h.s8.bf16 %v948_v50  ;;  %v950_v41 = vld [vmem:[%s8317_s8 + $0xfe8] sm:$0xff] }
 0x4b6   : > { %4007 = vmatpush1.bf16.msra.mxu0 %v2261_v32  ;;  %5114 = vmatpush1.bf16.msra.mxu1 %v2263_v19  ;;  %v2303_v32 = vunpack.c.h.s8.bf16 %v947_v56  ;;  %v2306_v19 = vunpack.c.l.s8.bf16 %v950_v41 }
 0x4b7   : > { %4008 = vmatprep.subr.bf16.mxu0 %v2266_v1  ;;  %5115 = vmatprep.subr.bf16.mxu1 %v2268_v51  ;;  %v2308_v1 = vunpack.c.l.s8.bf16 %v952_v62  ;;  %v949_v51 = vld [vmem:[%s8317_s8 + $0xfe0] sm:$0xff] }
 0x4ba   : > { %4009 = vmatpush1.bf16.msra.mxu0 %v2265_v5  ;;  %5116 = vmatpush1.bf16.msra.mxu1 %v2267_v22  ;;  %v2305_v5 = vunpack.c.l.s8.bf16 %v949_v51  ;;  %v2307_v22 = vunpack.c.l.s8.bf16 %v951_v2 }
 0x4bb   : > { %4010 = vmatprep.subr.bf16.mxu0 %v2270_v6  ;;  %5117 = vmatprep.subr.bf16.mxu1 %v2272_v8  ;;  %v2310_v6 = vunpack.c.h.s8.bf16 %v950_v41  ;;  %v2312_v8 = vunpack.c.h.s8.bf16 %v952_v62 }
 0x4be   : > { %4011 = vmatpush1.bf16.msra.mxu0 %v2269_v23  ;;  %5118 = vmatpush1.bf16.msra.mxu1 %v2271_v12  ;;  %v9040_v23 = vrot.slane %v9034_v3, %v8354_v35  ;;  %v2309_v12 = vunpack.c.h.s8.bf16 %v949_v51 }
 0x4bf   : > { %4012 = vmatprep.subr.bf16.mxu0 %v2274_v13  ;;  %5119 = vmatprep.subr.bf16.mxu1 %v2276_v14  ;;  %v2311_v13 = vunpack.c.h.s8.bf16 %v951_v2  ;;  %v2314_v14 = vunpack.c.l.s8.bf16 %v954_v10 }
 0x4c2   : > { %4013 = vmatpush1.bf16.msra.mxu0 %v2273_v16  ;;  %5120 = vmatpush1.bf16.msra.mxu1 %v2275_v37  ;;  %v955_v16 = vld [vmem:[%s8317_s8 + $0x1010] sm:$0xff]  ;;  %v3210_v37 = vcombine.high %v9040_v23, %v9040_v23 }
 0x4c3   : > { %4014 = vmatprep.subr.bf16.mxu0 %v2278_v17  ;;  %5121 = vmatprep.subr.bf16.mxu1 %v2280_v18  ;;  %v3192_v17 = vcombine.high %v9000_v45, %v9000_v45  ;;  %v2313_v18 = vunpack.c.l.s8.bf16 %v953_v24  ;;  %v2315_v21 = vunpack.c.l.s8.bf16 %v955_v16  ;;  %v2317_v45 = vunpack.c.h.s8.bf16 %v953_v24 }
 0x4c4   : > { %v2319_v0 = vunpack.c.h.s8.bf16 %v955_v16 }
 0x4c6   : > { %4015 = vmatpush1.bf16.msra.mxu0 %v2277_v39  ;;  %5122 = vmatpush1.bf16.msra.mxu1 %v2279_v36  ;;  %v2320_v39 = vunpack.c.h.s8.bf16 %v956_v11  ;;  %v958_v36 = vld [vmem:[%s8317_s8 + $0x1028] sm:$0xff] }
 0x4c7   : > { %4016 = vmatprep.subr.bf16.mxu0 %v2282_v25  ;;  %5123 = vmatprep.subr.bf16.mxu1 %v2284_v27  ;;  %v960_v25 = vld [vmem:[%s8317_s8 + $0x1038] sm:$0xff]  ;;  %v9051_v27 = vrot.slane %v3210_v37, %v8354_v35  ;;  %v2322_v53 = vunpack.c.l.s8.bf16 %v958_v36  ;;  %v2326_v55 = vunpack.c.h.s8.bf16 %v958_v36 }
 0x4ca   : > { %4017 = vmatpush1.bf16.msra.mxu0 %v2281_v29  ;;  %5124 = vmatpush1.bf16.msra.mxu1 %v2283_v30  ;;  %v2324_v29 = vunpack.c.l.s8.bf16 %v960_v25  ;;  %v957_v30 = vld [vmem:[%s8317_s8 + $0x1020] sm:$0xff] }
 0x4cb   : > { %4018 = vmatprep.subr.bf16.mxu0 %v2286_v31  ;;  %5125 = vmatprep.subr.bf16.mxu1 %v2288_v57  ;;  %v959_v31 = vld [vmem:[%s8317_s8 + $0x1030] sm:$0xff]  ;;  %v2321_v57 = vunpack.c.l.s8.bf16 %v957_v30 }
 0x4cc   : > { %v2323_v33 = vunpack.c.l.s8.bf16 %v959_v31  ;;  %v2327_v42 = vunpack.c.h.s8.bf16 %v959_v31  ;;  %v977_v31 = vld [vmem:[%s8317_s8 + $0x10c0] sm:$0xff] }
 0x4ce   : > { %4019 = vmatpush1.bf16.msra.mxu0 %v2285_v34  ;;  %5126 = vmatpush1.bf16.msra.mxu1 %v2287_v38  ;;  %v2328_v34 = vunpack.c.h.s8.bf16 %v960_v25  ;;  %v962_v38 = vld [vmem:[%s8317_s8 + $0x1048] sm:$0xff] }
 0x4cf   : > { %4020 = vmatprep.subr.bf16.mxu0 %v2290_v40  ;;  %5127 = vmatprep.subr.bf16.mxu1 %v2292_v60  ;;  %v964_v40 = vld [vmem:[%s8317_s8 + $0x1058] sm:$0xff]  ;;  %v2325_v60 = vunpack.c.h.s8.bf16 %v957_v30  ;;  %v2330_v44 = vunpack.c.l.s8.bf16 %v962_v38  ;;  %v2334_v50 = vunpack.c.h.s8.bf16 %v962_v38  ;;  %v978_v25 = vld [vmem:[%s8317_s8 + $0x10c8] sm:$0xff] }
 0x4d2   : > { %4021 = vmatpush1.bf16.msra.mxu0 %v2289_v46  ;;  %5128 = vmatpush1.bf16.msra.mxu1 %v2291_v47  ;;  %v2332_v46 = vunpack.c.l.s8.bf16 %v964_v40  ;;  %v961_v47 = vld [vmem:[%s8317_s8 + $0x1040] sm:$0xff] }
 0x4d3   : > { %4022 = vmatprep.subr.bf16.mxu0 %v2294_v58  ;;  %5129 = vmatprep.subr.bf16.mxu1 %v2296_v48  ;;  %v963_v58 = vld [vmem:[%s8317_s8 + $0x1050] sm:$0xff]  ;;  %v2329_v48 = vunpack.c.l.s8.bf16 %v961_v47 }
 0x4d4   : > { %v2331_v49 = vunpack.c.l.s8.bf16 %v963_v58  ;;  %v2335_v4 = vunpack.c.h.s8.bf16 %v963_v58  ;;  %v981_v58 = vld [vmem:[%s8317_s8 + $0x10e0] sm:$0xff] }
 0x4d6   : > { %4023 = vmatpush1.bf16.msra.mxu0 %v2293_v52  ;;  %5130 = vmatpush1.bf16.msra.mxu1 %v2295_v61  ;;  %v2336_v52 = vunpack.c.h.s8.bf16 %v964_v40  ;;  %v966_v61 = vld [vmem:[%s8317_s8 + $0x1068] sm:$0xff] }
 0x4d7   : > { %4024 = vmatprep.subr.bf16.mxu0 %v2298_v54  ;;  %5131 = vmatprep.subr.bf16.mxu1 %v2300_v7  ;;  %v968_v54 = vld [vmem:[%s8317_s8 + $0x1078] sm:$0xff]  ;;  %v2333_v7 = vunpack.c.h.s8.bf16 %v961_v47  ;;  %v2338_v56 = vunpack.c.l.s8.bf16 %v966_v61  ;;  %v2342_v62 = vunpack.c.h.s8.bf16 %v966_v61  ;;  %v982_v40 = vld [vmem:[%s8317_s8 + $0x10e8] sm:$0xff] }
 0x4da   : > { %4025 = vmatpush1.bf16.msra.mxu0 %v2297_v59  ;;  %5132 = vmatpush1.bf16.msra.mxu1 %v2299_v20  ;;  %v2340_v59 = vunpack.c.l.s8.bf16 %v968_v54  ;;  %v965_v20 = vld [vmem:[%s8317_s8 + $0x1060] sm:$0xff] }
 0x4db   : > { %4026 = vmatprep.subr.bf16.mxu0 %v2302_v9  ;;  %5133 = vmatprep.subr.bf16.mxu1 %v2304_v28  ;;  %v967_v9 = vld [vmem:[%s8317_s8 + $0x1070] sm:$0xff]  ;;  %v2337_v28 = vunpack.c.l.s8.bf16 %v965_v20 }
 0x4dc   : > { %v2339_v41 = vunpack.c.l.s8.bf16 %v967_v9  ;;  %v2343_v51 = vunpack.c.h.s8.bf16 %v967_v9  ;;  %v985_v9 = vld [vmem:[%s8317_s8 + $0x1100] sm:$0xff] }
 0x4de   : > { %4027 = vmatpush1.bf16.msra.mxu0 %v2301_v63  ;;  %5134 = vmatpush1.bf16.msra.mxu1 %v2303_v32  ;;  %v2344_v63 = vunpack.c.h.s8.bf16 %v968_v54  ;;  %v970_v32 = vld [vmem:[%s8317_s8 + $0x1088] sm:$0xff] }
 0x4df   : > { %4028 = vmatprep.subr.bf16.mxu0 %v2306_v19  ;;  %5135 = vmatprep.subr.bf16.mxu1 %v2308_v1  ;;  %v972_v19 = vld [vmem:[%s8317_s8 + $0x1098] sm:$0xff]  ;;  %v2341_v1 = vunpack.c.h.s8.bf16 %v965_v20  ;;  %v2346_v2 = vunpack.c.l.s8.bf16 %v970_v32  ;;  %v2350_v11 = vunpack.c.h.s8.bf16 %v970_v32  ;;  %v986_v54 = vld [vmem:[%s8317_s8 + $0x1108] sm:$0xff] }
 0x4e0   : > { %v2382_v32 = vunpack.c.h.s8.bf16 %v986_v54 }
 0x4e2   : > { %4029 = vmatpush1.bf16.msra.mxu0 %v2305_v5  ;;  %5136 = vmatpush1.bf16.msra.mxu1 %v2307_v22  ;;  %v2348_v5 = vunpack.c.l.s8.bf16 %v972_v19  ;;  %v969_v22 = vld [vmem:[%s8317_s8 + $0x1080] sm:$0xff] }
 0x4e3   : > { %4030 = vmatprep.subr.bf16.mxu0 %v2310_v6  ;;  %5137 = vmatprep.subr.bf16.mxu1 %v2312_v8  ;;  %v971_v6 = vld [vmem:[%s8317_s8 + $0x1090] sm:$0xff]  ;;  %v2345_v8 = vunpack.c.l.s8.bf16 %v969_v22 }
 0x4e4   : > { %v2347_v10 = vunpack.c.l.s8.bf16 %v971_v6  ;;  %v2351_v24 = vunpack.c.h.s8.bf16 %v971_v6 }
 0x4e6   : > { %4031 = vmatpush1.bf16.msra.mxu0 %v2309_v12  ;;  %5138 = vmatpush1.bf16.msra.mxu1 %v2311_v13  ;;  %v2352_v12 = vunpack.c.h.s8.bf16 %v972_v19  ;;  %v974_v13 = vld [vmem:[%s8317_s8 + $0x10a8] sm:$0xff] }
 0x4e7   : > { %4041 = vmatprep.subr.bf16.mxu0 %v2314_v14  ;;  %5148 = vmatprep.subr.bf16.mxu1 %v2316_v15  ;;  %v976_v14 = vld [vmem:[%s8317_s8 + $0x10b8] sm:$0xff]  ;;  %v2349_v15 = vunpack.c.h.s8.bf16 %v969_v22  ;;  %v2354_v16 = vunpack.c.l.s8.bf16 %v974_v13 }
 0x4e8   : > { %v2356_v37 = vunpack.c.l.s8.bf16 %v976_v14  ;;  %v2360_v36 = vunpack.c.h.s8.bf16 %v976_v14  ;;  %v994_v14 = vld [vmem:[%s8317_s8 + $0x1148] sm:$0xff] }
 0x4e9   : > { %4033 = vmatmul.mubr.bf16.vlgmr.msra.gmra.mrb[0].mxu0 %v3192_v17  ;;  %5140 = vmatmul.mubr.bf16.vlgmr.msra.gmra.mrb[0].mxu1 %v3192_v17  ;;  %v973_v17 = vld [vmem:[%s8317_s8 + $0x10a0] sm:$0xff] }
 0x4ea   : > { %4042 = vmatpush1.bf16.msra.mxu0 %v2313_v18  ;;  %5149 = vmatpush1.bf16.msra.mxu1 %v2315_v21  ;;  %v975_v18 = vld [vmem:[%s8317_s8 + $0x10b0] sm:$0xff]  ;;  %v2353_v21 = vunpack.c.l.s8.bf16 %v973_v17 }
 0x4eb   : > { %4043 = vmatprep.subr.bf16.mxu0 %v2318_v43  ;;  %5150 = vmatprep.subr.bf16.mxu1 %v2320_v39  ;;  %v2355_v43 = vunpack.c.l.s8.bf16 %v975_v18  ;;  %v2358_v39 = vunpack.c.h.s8.bf16 %v974_v13 }
 0x4ec   : > { %4073 = vmatprep.mubr.bf16.mxu0 %v9051_v27  ;;  %5180 = vmatprep.mubr.bf16.mxu1 %v9051_v27 }
 0x4ee   : > { %4044 = vmatpush1.bf16.msra.mxu0 %v2317_v45  ;;  %5151 = vmatpush1.bf16.msra.mxu1 %v2319_v0  ;;  %v980_v45 = vld [vmem:[%s8317_s8 + $0x10d8] sm:$0xff]  ;;  %v2357_v0 = vunpack.c.h.s8.bf16 %v973_v17 }
 0x4ef   : > { %4045 = vmatprep.subr.bf16.mxu0 %v2322_v53  ;;  %5152 = vmatprep.subr.bf16.mxu1 %v2324_v29  ;;  %v2359_v53 = vunpack.c.h.s8.bf16 %v975_v18  ;;  %v2362_v29 = vunpack.c.l.s8.bf16 %v978_v25  ;;  %v2364_v30 = vunpack.c.l.s8.bf16 %v980_v45  ;;  %v2368_v38 = vunpack.c.h.s8.bf16 %v980_v45  ;;  %v993_v18 = vld [vmem:[%s8317_s8 + $0x1140] sm:$0xff]  ;;  %v998_v45 = vld [vmem:[%s8317_s8 + $0x1168] sm:$0xff] }
 0x4f2   : > { %4046 = vmatpush1.bf16.msra.mxu0 %v2321_v57  ;;  %5153 = vmatpush1.bf16.msra.mxu1 %v2323_v33  ;;  %v979_v57 = vld [vmem:[%s8317_s8 + $0x10d0] sm:$0xff]  ;;  %v2361_v33 = vunpack.c.l.s8.bf16 %v977_v31 }
 0x4f3   : > { %4047 = vmatprep.subr.bf16.mxu0 %v2326_v55  ;;  %5154 = vmatprep.subr.bf16.mxu1 %v2328_v34  ;;  %v2363_v55 = vunpack.c.l.s8.bf16 %v979_v57  ;;  %v2366_v34 = vunpack.c.h.s8.bf16 %v978_v25 }
 0x4f6   : > { %4048 = vmatpush1.bf16.msra.mxu0 %v2325_v60  ;;  %5155 = vmatpush1.bf16.msra.mxu1 %v2327_v42  ;;  %v984_v60 = vld [vmem:[%s8317_s8 + $0x10f8] sm:$0xff]  ;;  %v2365_v42 = vunpack.c.h.s8.bf16 %v977_v31 }
 0x4f7   : > { %4049 = vmatprep.subr.bf16.mxu0 %v2330_v44  ;;  %5156 = vmatprep.subr.bf16.mxu1 %v2332_v46  ;;  %v2367_v44 = vunpack.c.h.s8.bf16 %v979_v57  ;;  %v2370_v46 = vunpack.c.l.s8.bf16 %v982_v40  ;;  %v2372_v47 = vunpack.c.l.s8.bf16 %v984_v60  ;;  %v2376_v61 = vunpack.c.h.s8.bf16 %v984_v60  ;;  %v997_v57 = vld [vmem:[%s8317_s8 + $0x1160] sm:$0xff]  ;;  %v1002_v60 = vld [vmem:[%s8317_s8 + $0x1188] sm:$0xff] }
 0x4fa   : > { %4050 = vmatpush1.bf16.msra.mxu0 %v2329_v48  ;;  %5157 = vmatpush1.bf16.msra.mxu1 %v2331_v49  ;;  %v983_v48 = vld [vmem:[%s8317_s8 + $0x10f0] sm:$0xff]  ;;  %v2369_v49 = vunpack.c.l.s8.bf16 %v981_v58 }
 0x4fb   : > { %4051 = vmatprep.subr.bf16.mxu0 %v2334_v50  ;;  %5158 = vmatprep.subr.bf16.mxu1 %v2336_v52  ;;  %v2371_v50 = vunpack.c.l.s8.bf16 %v983_v48  ;;  %v2374_v52 = vunpack.c.h.s8.bf16 %v982_v40 }
 0x4fe   : > { %4052 = vmatpush1.bf16.msra.mxu0 %v2333_v7  ;;  %5159 = vmatpush1.bf16.msra.mxu1 %v2335_v4  ;;  %v988_v7 = vld [vmem:[%s8317_s8 + $0x1118] sm:$0xff]  ;;  %v2373_v4 = vunpack.c.h.s8.bf16 %v981_v58 }
 0x4ff   : > { %4053 = vmatprep.subr.bf16.mxu0 %v2338_v56  ;;  %5160 = vmatprep.subr.bf16.mxu1 %v2340_v59  ;;  %v2375_v56 = vunpack.c.h.s8.bf16 %v983_v48  ;;  %v2378_v59 = vunpack.c.l.s8.bf16 %v986_v54  ;;  %v2380_v20 = vunpack.c.l.s8.bf16 %v988_v7  ;;  %v2384_v19 = vunpack.c.h.s8.bf16 %v988_v7  ;;  %v1001_v48 = vld [vmem:[%s8317_s8 + $0x1180] sm:$0xff]  ;;  %v1006_v7 = vld [vmem:[%s8317_s8 + $0x11a8] sm:$0xff] }
 0x502   : > { %4054 = vmatpush1.bf16.msra.mxu0 %v2337_v28  ;;  %5161 = vmatpush1.bf16.msra.mxu1 %v2339_v41  ;;  %v987_v28 = vld [vmem:[%s8317_s8 + $0x1110] sm:$0xff]  ;;  %v9087_v41 = vrot.slane %v9040_v23, %v8354_v35  ;;  %v2381_v23 = vunpack.c.h.s8.bf16 %v985_v9 }
 0x503   : > { %4055 = vmatprep.subr.bf16.mxu0 %v2342_v62  ;;  %5162 = vmatprep.subr.bf16.mxu1 %v2344_v63  ;;  %v2377_v62 = vunpack.c.l.s8.bf16 %v985_v9  ;;  %v2379_v63 = vunpack.c.l.s8.bf16 %v987_v28 }
 0x506   : > { %4056 = vmatpush1.bf16.msra.mxu0 %v2341_v1  ;;  %5163 = vmatpush1.bf16.msra.mxu1 %v2343_v51  ;;  %v990_v1 = vld [vmem:[%s8317_s8 + $0x1128] sm:$0xff]  ;;  %v992_v51 = vld [vmem:[%s8317_s8 + $0x1138] sm:$0xff] }
 0x507   : > { %4057 = vmatprep.subr.bf16.mxu0 %v2346_v2  ;;  %5164 = vmatprep.subr.bf16.mxu1 %v2348_v5  ;;  %v3242_v2 = vcombine.high %v9051_v27, %v9051_v27  ;;  %v2383_v5 = vunpack.c.h.s8.bf16 %v987_v28  ;;  %v2386_v22 = vunpack.c.l.s8.bf16 %v990_v1  ;;  %v2388_v6 = vunpack.c.l.s8.bf16 %v992_v51  ;;  %v1005_v28 = vld [vmem:[%s8317_s8 + $0x11a0] sm:$0xff] }
 0x508   : > { %v2392_v13 = vunpack.c.h.s8.bf16 %v992_v51  ;;  %v1010_v51 = vld [vmem:[%s8317_s8 + $0x11c8] sm:$0xff] }
 0x50a   : > { %4058 = vmatpush1.bf16.msra.mxu0 %v2345_v8  ;;  %5165 = vmatpush1.bf16.msra.mxu1 %v2347_v10  ;;  %v989_v8 = vld [vmem:[%s8317_s8 + $0x1120] sm:$0xff]  ;;  %v991_v10 = vld [vmem:[%s8317_s8 + $0x1130] sm:$0xff] }
 0x50b   : > { %4059 = vmatprep.subr.bf16.mxu0 %v2350_v11  ;;  %5166 = vmatprep.subr.bf16.mxu1 %v2352_v12  ;;  %v2385_v27 = vunpack.c.l.s8.bf16 %v989_v8  ;;  %v2387_v11 = vunpack.c.l.s8.bf16 %v991_v10  ;;  %v2390_v12 = vunpack.c.h.s8.bf16 %v990_v1 }
 0x50e   : > { %4060 = vmatpush1.bf16.msra.mxu0 %v2349_v15  ;;  %5167 = vmatpush1.bf16.msra.mxu1 %v2351_v24  ;;  %v996_v15 = vld [vmem:[%s8317_s8 + $0x1158] sm:$0xff]  ;;  %v2389_v24 = vunpack.c.h.s8.bf16 %v989_v8  ;;  %v1009_v8 = vld [vmem:[%s8317_s8 + $0x11c0] sm:$0xff] }
 0x50f   : > { %4061 = vmatprep.subr.bf16.mxu0 %v2354_v16  ;;  %5168 = vmatprep.subr.bf16.mxu1 %v2356_v37  ;;  %v2391_v16 = vunpack.c.h.s8.bf16 %v991_v10  ;;  %v2394_v37 = vunpack.c.l.s8.bf16 %v994_v14  ;;  %v2396_v17 = vunpack.c.l.s8.bf16 %v996_v15  ;;  %v2400_v25 = vunpack.c.h.s8.bf16 %v996_v15  ;;  %v1011_v10 = vld [vmem:[%s8317_s8 + $0x11d0] sm:$0xff]  ;;  %v1016_v15 = vld [vmem:[%s8317_s8 + $0x11f8] sm:$0xff] }
 0x512   : > { %4062 = vmatpush1.bf16.msra.mxu0 %v2353_v21  ;;  %5169 = vmatpush1.bf16.msra.mxu1 %v2355_v43  ;;  %v995_v21 = vld [vmem:[%s8317_s8 + $0x1150] sm:$0xff]  ;;  %v2393_v43 = vunpack.c.l.s8.bf16 %v993_v18 }
 0x513   : > { %4063 = vmatprep.subr.bf16.mxu0 %v2358_v39  ;;  %5170 = vmatprep.subr.bf16.mxu1 %v2360_v36  ;;  %v2395_v39 = vunpack.c.l.s8.bf16 %v995_v21  ;;  %v2398_v36 = vunpack.c.h.s8.bf16 %v994_v14  ;;  %v1014_v14 = vld [vmem:[%s8317_s8 + $0x11e8] sm:$0xff] }
 0x516   : > { %4064 = vmatpush1.bf16.msra.mxu0 %v2357_v0  ;;  %5171 = vmatpush1.bf16.msra.mxu1 %v2359_v53  ;;  %v1000_v0 = vld [vmem:[%s8317_s8 + $0x1178] sm:$0xff]  ;;  %v2397_v53 = vunpack.c.h.s8.bf16 %v993_v18  ;;  %v1013_v18 = vld [vmem:[%s8317_s8 + $0x11e0] sm:$0xff] }
 0x517   : > { %4065 = vmatprep.subr.bf16.mxu0 %v2362_v29  ;;  %5172 = vmatprep.subr.bf16.mxu1 %v2364_v30  ;;  %v2399_v29 = vunpack.c.h.s8.bf16 %v995_v21  ;;  %v2402_v30 = vunpack.c.l.s8.bf16 %v998_v45  ;;  %v2404_v31 = vunpack.c.l.s8.bf16 %v1000_v0  ;;  %v2408_v40 = vunpack.c.h.s8.bf16 %v1000_v0  ;;  %v1015_v21 = vld [vmem:[%s8317_s8 + $0x11f0] sm:$0xff]  ;;  %v1018_v0 = vld [vmem:[%s8317_s8 + $0x1208] sm:$0xff] }
 0x51a   : > { %4066 = vmatpush1.bf16.msra.mxu0 %v2361_v33  ;;  %5173 = vmatpush1.bf16.msra.mxu1 %v2363_v55  ;;  %v999_v33 = vld [vmem:[%s8317_s8 + $0x1170] sm:$0xff]  ;;  %v2401_v55 = vunpack.c.l.s8.bf16 %v997_v57 }
 0x51b   : > { %4067 = vmatprep.subr.bf16.mxu0 %v2366_v34  ;;  %5174 = vmatprep.subr.bf16.mxu1 %v2368_v38  ;;  %v2403_v34 = vunpack.c.l.s8.bf16 %v999_v33  ;;  %v2406_v38 = vunpack.c.h.s8.bf16 %v998_v45  ;;  %v2440_v45 = vunpack.c.h.s8.bf16 %v1016_v15 }
 0x51e   : > { %4068 = vmatpush1.bf16.msra.mxu0 %v2365_v42  ;;  %5175 = vmatpush1.bf16.msra.mxu1 %v2367_v44  ;;  %v1004_v42 = vld [vmem:[%s8317_s8 + $0x1198] sm:$0xff]  ;;  %v2405_v44 = vunpack.c.h.s8.bf16 %v997_v57 }
 0x51f   : > { %4069 = vmatprep.subr.bf16.mxu0 %v2370_v46  ;;  %5176 = vmatprep.subr.bf16.mxu1 %v2372_v47  ;;  %v2407_v46 = vunpack.c.h.s8.bf16 %v999_v33  ;;  %v2410_v47 = vunpack.c.l.s8.bf16 %v1002_v60  ;;  %v2412_v58 = vunpack.c.l.s8.bf16 %v1004_v42  ;;  %v2416_v54 = vunpack.c.h.s8.bf16 %v1004_v42  ;;  %v1017_v33 = vld [vmem:[%s8317_s8 + $0x1200] sm:$0xff] }
 0x520   : > { %v2446_v42 = vunpack.c.h.s8.bf16 %v1018_v0 }
 0x522   : > { %4070 = vmatpush1.bf16.msra.mxu0 %v2369_v49  ;;  %5177 = vmatpush1.bf16.msra.mxu1 %v2371_v50  ;;  %v1003_v49 = vld [vmem:[%s8317_s8 + $0x1190] sm:$0xff]  ;;  %v2409_v50 = vunpack.c.l.s8.bf16 %v1001_v48 }
 0x523   : > { %4071 = vmatprep.subr.bf16.mxu0 %v2374_v52  ;;  %5178 = vmatprep.subr.bf16.mxu1 %v2376_v61  ;;  %v2411_v52 = vunpack.c.l.s8.bf16 %v1003_v49  ;;  %v2414_v61 = vunpack.c.h.s8.bf16 %v1002_v60 }
 0x526   : > { %4072 = vmatpush1.bf16.msra.mxu0 %v2373_v4  ;;  %5179 = vmatpush1.bf16.msra.mxu1 %v2375_v56  ;;  %v1008_v4 = vld [vmem:[%s8317_s8 + $0x11b8] sm:$0xff]  ;;  %v2413_v56 = vunpack.c.h.s8.bf16 %v1001_v48 }
 0x527   : > { %4082 = vmatprep.subr.bf16.mxu0 %v2378_v59  ;;  %5189 = vmatprep.subr.bf16.mxu1 %v2380_v20  ;;  %v2415_v59 = vunpack.c.h.s8.bf16 %v1003_v49  ;;  %v2418_v20 = vunpack.c.l.s8.bf16 %v1006_v7  ;;  %v2420_v9 = vunpack.c.l.s8.bf16 %v1008_v4  ;;  %v2424_v1 = vunpack.c.h.s8.bf16 %v1008_v4 }
 0x529   : > { %4074 = vmatmul.mubr.bf16.vlgmr.msra.gmra.mrb[0].mxu0 %v9087_v41  ;;  %5181 = vmatmul.mubr.bf16.vlgmr.msra.gmra.mrb[0].mxu1 %v9087_v41 }
 0x52a   : > { %4083 = vmatpush1.bf16.msra.mxu0 %v2377_v62  ;;  %5190 = vmatpush1.bf16.msra.mxu1 %v2379_v63  ;;  %v1007_v62 = vld [vmem:[%s8317_s8 + $0x11b0] sm:$0xff]  ;;  %v2417_v63 = vunpack.c.l.s8.bf16 %v1005_v28 }
 0x52b   : > { %4084 = vmatprep.subr.bf16.mxu0 %v2382_v32  ;;  %5191 = vmatprep.subr.bf16.mxu1 %v2384_v19  ;;  %v2419_v32 = vunpack.c.l.s8.bf16 %v1007_v62  ;;  %v2422_v19 = vunpack.c.h.s8.bf16 %v1006_v7 }
 0x52c   : > { %4114 = vmatprep.mubr.bf16.mxu0 %v3242_v2  ;;  %5221 = vmatprep.mubr.bf16.mxu1 %v3242_v2  ;;  %v1012_v2 = vld [vmem:[%s8317_s8 + $0x11d8] sm:$0xff] }
 0x52e   : > { %4085 = vmatpush1.bf16.msra.mxu0 %v2381_v23  ;;  %5192 = vmatpush1.bf16.msra.mxu1 %v2383_v5  ;;  %v2421_v23 = vunpack.c.h.s8.bf16 %v1005_v28  ;;  %v2423_v5 = vunpack.c.h.s8.bf16 %v1007_v62 }
 0x52f   : > { %4086 = vmatprep.subr.bf16.mxu0 %v2386_v22  ;;  %5193 = vmatprep.subr.bf16.mxu1 %v2388_v6  ;;  %v2426_v22 = vunpack.c.l.s8.bf16 %v1010_v51  ;;  %v2428_v6 = vunpack.c.l.s8.bf16 %v1012_v2 }
 0x532   : > { %4087 = vmatpush1.bf16.msra.mxu0 %v2385_v27  ;;  %5194 = vmatpush1.bf16.msra.mxu1 %v2387_v11  ;;  %v2425_v27 = vunpack.c.l.s8.bf16 %v1009_v8  ;;  %v2427_v11 = vunpack.c.l.s8.bf16 %v1011_v10 }
 0x533   : > { %4088 = vmatprep.subr.bf16.mxu0 %v2390_v12  ;;  %5195 = vmatprep.subr.bf16.mxu1 %v2392_v13  ;;  %v2430_v12 = vunpack.c.h.s8.bf16 %v1010_v51  ;;  %v2432_v13 = vunpack.c.h.s8.bf16 %v1012_v2 }
 0x536   : > { %4089 = vmatpush1.bf16.msra.mxu0 %v2389_v24  ;;  %5196 = vmatpush1.bf16.msra.mxu1 %v2391_v16  ;;  %v2429_v24 = vunpack.c.h.s8.bf16 %v1009_v8  ;;  %v2431_v16 = vunpack.c.h.s8.bf16 %v1011_v10 }
 0x537   : > { %4090 = vmatprep.subr.bf16.mxu0 %v2394_v37  ;;  %5197 = vmatprep.subr.bf16.mxu1 %v2396_v17  ;;  %v2434_v37 = vunpack.c.l.s8.bf16 %v1014_v14  ;;  %v2436_v17 = vunpack.c.l.s8.bf16 %v1016_v15 }
 0x53a   : > { %4091 = vmatpush1.bf16.msra.mxu0 %v2393_v43  ;;  %5198 = vmatpush1.bf16.msra.mxu1 %v2395_v39  ;;  %v3195_v43 = vcombine.high %v9034_v3, %v9034_v3  ;;  %v2433_v39 = vunpack.c.l.s8.bf16 %v1013_v18  ;;  %v2442_v3 = vunpack.c.l.s8.bf16 %v1018_v0 }
 0x53b   : > { %4092 = vmatprep.subr.bf16.mxu0 %v2398_v36  ;;  %5199 = vmatprep.subr.bf16.mxu1 %v2400_v25  ;;  %v2435_v36 = vunpack.c.l.s8.bf16 %v1015_v21  ;;  %v2438_v25 = vunpack.c.h.s8.bf16 %v1014_v14 }
 0x53e   : > { %4093 = vmatpush1.bf16.msra.mxu0 %v2397_v53  ;;  %5200 = vmatpush1.bf16.msra.mxu1 %v2399_v29  ;;  %v1020_v53 = vld [vmem:[%s8317_s8 + $0x1218] sm:$0xff]  ;;  %v9126_v29 = vrot.slane %v3195_v43, %v8354_v35 }
 0x53f   : > { %4094 = vmatprep.subr.bf16.mxu0 %v2402_v30  ;;  %5201 = vmatprep.subr.bf16.mxu1 %v2404_v31  ;;  %v2437_v30 = vunpack.c.h.s8.bf16 %v1013_v18  ;;  %v2439_v31 = vunpack.c.h.s8.bf16 %v1015_v21  ;;  %v2444_v57 = vunpack.c.l.s8.bf16 %v1020_v53 }
 0x542   : > { %4095 = vmatpush1.bf16.msra.mxu0 %v2401_v55  ;;  %5202 = vmatpush1.bf16.msra.mxu1 %v2403_v34  ;;  %v1019_v55 = vld [vmem:[%s8317_s8 + $0x1210] sm:$0xff]  ;;  %v3211_v34 = vcombine.high %v9126_v29, %v9126_v29 }
 0x543   : > { %4096 = vmatprep.subr.bf16.mxu0 %v2406_v38  ;;  %5203 = vmatprep.subr.bf16.mxu1 %v2408_v40  ;;  %v3240_v38 = vcombine.high %v9087_v41, %v9087_v41  ;;  %v2441_v40 = vunpack.c.l.s8.bf16 %v1017_v33  ;;  %v2443_v60 = vunpack.c.l.s8.bf16 %v1019_v55  ;;  %v2445_v41 = vunpack.c.h.s8.bf16 %v1017_v33 }
 0x544   : > { %v2447_v48 = vunpack.c.h.s8.bf16 %v1019_v55 }
 0x546   : > { %4097 = vmatpush1.bf16.msra.mxu0 %v2405_v44  ;;  %5204 = vmatpush1.bf16.msra.mxu1 %v2407_v46  ;;  %v2448_v44 = vunpack.c.h.s8.bf16 %v1020_v53  ;;  %v1022_v46 = vld [vmem:[%s8317_s8 + $0x1228] sm:$0xff] }
 0x547   : > { %4098 = vmatprep.subr.bf16.mxu0 %v2410_v47  ;;  %5205 = vmatprep.subr.bf16.mxu1 %v2412_v58  ;;  %v1024_v47 = vld [vmem:[%s8317_s8 + $0x1238] sm:$0xff]  ;;  %v9137_v58 = vrot.slane %v3211_v34, %v8354_v35  ;;  %v2450_v49 = vunpack.c.l.s8.bf16 %v1022_v46  ;;  %v2454_v4 = vunpack.c.h.s8.bf16 %v1022_v46  ;;  %v1037_v34 = vld [vmem:[%s8317_s8 + $0x12a0] sm:$0xff]  ;;  %v1042_v46 = vld [vmem:[%s8317_s8 + $0x12c8] sm:$0xff] }
 0x54a   : > { %4099 = vmatpush1.bf16.msra.mxu0 %v2409_v50  ;;  %5206 = vmatpush1.bf16.msra.mxu1 %v2411_v52  ;;  %v2452_v50 = vunpack.c.l.s8.bf16 %v1024_v47  ;;  %v1021_v52 = vld [vmem:[%s8317_s8 + $0x1220] sm:$0xff] }
 0x54b   : > { %4100 = vmatprep.subr.bf16.mxu0 %v2414_v61  ;;  %5207 = vmatprep.subr.bf16.mxu1 %v2416_v54  ;;  %v1023_v61 = vld [vmem:[%s8317_s8 + $0x1230] sm:$0xff]  ;;  %v2449_v54 = vunpack.c.l.s8.bf16 %v1021_v52 }
 0x54c   : > { %v2451_v7 = vunpack.c.l.s8.bf16 %v1023_v61  ;;  %v2455_v28 = vunpack.c.h.s8.bf16 %v1023_v61  ;;  %v1043_v61 = vld [vmem:[%s8317_s8 + $0x12d0] sm:$0xff] }
 0x54e   : > { %4101 = vmatpush1.bf16.msra.mxu0 %v2413_v56  ;;  %5208 = vmatpush1.bf16.msra.mxu1 %v2415_v59  ;;  %v2456_v56 = vunpack.c.h.s8.bf16 %v1024_v47  ;;  %v1026_v59 = vld [vmem:[%s8317_s8 + $0x1248] sm:$0xff]  ;;  %v1044_v47 = vld [vmem:[%s8317_s8 + $0x12d8] sm:$0xff] }
 0x54f   : > { %4102 = vmatprep.subr.bf16.mxu0 %v2418_v20  ;;  %5209 = vmatprep.subr.bf16.mxu1 %v2420_v9  ;;  %v1028_v20 = vld [vmem:[%s8317_s8 + $0x1258] sm:$0xff]  ;;  %v2453_v9 = vunpack.c.h.s8.bf16 %v1021_v52  ;;  %v2458_v62 = vunpack.c.l.s8.bf16 %v1026_v59  ;;  %v2462_v2 = vunpack.c.h.s8.bf16 %v1026_v59  ;;  %v1041_v52 = vld [vmem:[%s8317_s8 + $0x12c0] sm:$0xff]  ;;  %v1046_v59 = vld [vmem:[%s8317_s8 + $0x12e8] sm:$0xff] }
 0x552   : > { %4103 = vmatpush1.bf16.msra.mxu0 %v2417_v63  ;;  %5210 = vmatpush1.bf16.msra.mxu1 %v2419_v32  ;;  %v2460_v63 = vunpack.c.l.s8.bf16 %v1028_v20  ;;  %v1025_v32 = vld [vmem:[%s8317_s8 + $0x1240] sm:$0xff] }
 0x553   : > { %4104 = vmatprep.subr.bf16.mxu0 %v2422_v19  ;;  %5211 = vmatprep.subr.bf16.mxu1 %v2424_v1  ;;  %v1027_v19 = vld [vmem:[%s8317_s8 + $0x1250] sm:$0xff]  ;;  %v2457_v1 = vunpack.c.l.s8.bf16 %v1025_v32 }
 0x554   : > { %v2459_v51 = vunpack.c.l.s8.bf16 %v1027_v19  ;;  %v2463_v8 = vunpack.c.h.s8.bf16 %v1027_v19  ;;  %v1047_v19 = vld [vmem:[%s8317_s8 + $0x12f0] sm:$0xff] }
 0x556   : > { %4105 = vmatpush1.bf16.msra.mxu0 %v2421_v23  ;;  %5212 = vmatpush1.bf16.msra.mxu1 %v2423_v5  ;;  %v2464_v23 = vunpack.c.h.s8.bf16 %v1028_v20  ;;  %v1030_v5 = vld [vmem:[%s8317_s8 + $0x1268] sm:$0xff]  ;;  %v1048_v20 = vld [vmem:[%s8317_s8 + $0x12f8] sm:$0xff] }
 0x557   : > { %4106 = vmatprep.subr.bf16.mxu0 %v2426_v22  ;;  %5213 = vmatprep.subr.bf16.mxu1 %v2428_v6  ;;  %v1032_v22 = vld [vmem:[%s8317_s8 + $0x1278] sm:$0xff]  ;;  %v2461_v6 = vunpack.c.h.s8.bf16 %v1025_v32  ;;  %v2466_v10 = vunpack.c.l.s8.bf16 %v1030_v5  ;;  %v2470_v15 = vunpack.c.h.s8.bf16 %v1030_v5  ;;  %v1045_v32 = vld [vmem:[%s8317_s8 + $0x12e0] sm:$0xff]  ;;  %v1050_v5 = vld [vmem:[%s8317_s8 + $0x1308] sm:$0xff] }
 0x55a   : > { %4107 = vmatpush1.bf16.msra.mxu0 %v2425_v27  ;;  %5214 = vmatpush1.bf16.msra.mxu1 %v2427_v11  ;;  %v2468_v27 = vunpack.c.l.s8.bf16 %v1032_v22  ;;  %v1029_v11 = vld [vmem:[%s8317_s8 + $0x1260] sm:$0xff] }
 0x55b   : > { %4108 = vmatprep.subr.bf16.mxu0 %v2430_v12  ;;  %5215 = vmatprep.subr.bf16.mxu1 %v2432_v13  ;;  %v1031_v12 = vld [vmem:[%s8317_s8 + $0x1270] sm:$0xff]  ;;  %v2465_v13 = vunpack.c.l.s8.bf16 %v1029_v11 }
 0x55c   : > { %v2467_v14 = vunpack.c.l.s8.bf16 %v1031_v12  ;;  %v2471_v18 = vunpack.c.h.s8.bf16 %v1031_v12  ;;  %v1051_v12 = vld [vmem:[%s8317_s8 + $0x1310] sm:$0xff] }
 0x55e   : > { %4109 = vmatpush1.bf16.msra.mxu0 %v2429_v24  ;;  %5216 = vmatpush1.bf16.msra.mxu1 %v2431_v16  ;;  %v2472_v24 = vunpack.c.h.s8.bf16 %v1032_v22  ;;  %v1034_v16 = vld [vmem:[%s8317_s8 + $0x1288] sm:$0xff]  ;;  %v1052_v22 = vld [vmem:[%s8317_s8 + $0x1318] sm:$0xff] }
 0x55f   : > { %4110 = vmatprep.subr.bf16.mxu0 %v2434_v37  ;;  %5217 = vmatprep.subr.bf16.mxu1 %v2436_v17  ;;  %v1036_v37 = vld [vmem:[%s8317_s8 + $0x1298] sm:$0xff]  ;;  %v2469_v17 = vunpack.c.h.s8.bf16 %v1029_v11  ;;  %v2474_v21 = vunpack.c.l.s8.bf16 %v1034_v16  ;;  %v2478_v0 = vunpack.c.h.s8.bf16 %v1034_v16  ;;  %v1049_v11 = vld [vmem:[%s8317_s8 + $0x1300] sm:$0xff]  ;;  %v2512_v16 = vunpack.c.h.s8.bf16 %v1052_v22 }
 0x560   : > { %v2476_v43 = vunpack.c.l.s8.bf16 %v1036_v37  ;;  %v2480_v53 = vunpack.c.h.s8.bf16 %v1036_v37  ;;  %v1054_v37 = vld [vmem:[%s8317_s8 + $0x1328] sm:$0xff] }
 0x562   : > { %4111 = vmatpush1.bf16.msra.mxu0 %v2433_v39  ;;  %5218 = vmatpush1.bf16.msra.mxu1 %v2435_v36  ;;  %v1033_v39 = vld [vmem:[%s8317_s8 + $0x1280] sm:$0xff]  ;;  %v1035_v36 = vld [vmem:[%s8317_s8 + $0x1290] sm:$0xff] }
 0x563   : > { %4112 = vmatprep.subr.bf16.mxu0 %v2438_v25  ;;  %5219 = vmatprep.subr.bf16.mxu1 %v2440_v45  ;;  %v2473_v25 = vunpack.c.l.s8.bf16 %v1033_v39  ;;  %v2475_v45 = vunpack.c.l.s8.bf16 %v1035_v36 }
 0x566   : > { %4113 = vmatpush1.bf16.msra.mxu0 %v2437_v30  ;;  %5220 = vmatpush1.bf16.msra.mxu1 %v2439_v31  ;;  %v1038_v30 = vld [vmem:[%s8317_s8 + $0x12a8] sm:$0xff]  ;;  %v1040_v31 = vld [vmem:[%s8317_s8 + $0x12b8] sm:$0xff] }
 0x567   : > { %4123 = vmatprep.subr.bf16.mxu0 %v2442_v3  ;;  %5230 = vmatprep.subr.bf16.mxu1 %v2444_v57  ;;  %v2477_v3 = vunpack.c.h.s8.bf16 %v1033_v39  ;;  %v2479_v57 = vunpack.c.h.s8.bf16 %v1035_v36  ;;  %v2482_v33 = vunpack.c.l.s8.bf16 %v1038_v30  ;;  %v2484_v55 = vunpack.c.l.s8.bf16 %v1040_v31  ;;  %v1053_v36 = vld [vmem:[%s8317_s8 + $0x1320] sm:$0xff] }
 0x569   : > { %4115 = vmatmul.mubr.bf16.vlgmr.msra.gmra.mrb[0].mxu0 %v3240_v38  ;;  %5222 = vmatmul.mubr.bf16.vlgmr.msra.gmra.mrb[0].mxu1 %v3240_v38  ;;  %v1039_v38 = vld [vmem:[%s8317_s8 + $0x12b0] sm:$0xff] }
 0x56a   : > { %4124 = vmatpush1.bf16.msra.mxu0 %v2441_v40  ;;  %5231 = vmatpush1.bf16.msra.mxu1 %v2443_v60  ;;  %v2481_v40 = vunpack.c.l.s8.bf16 %v1037_v34  ;;  %v2483_v60 = vunpack.c.l.s8.bf16 %v1039_v38 }
 0x56b   : > { %4125 = vmatprep.subr.bf16.mxu0 %v2446_v42  ;;  %5232 = vmatprep.subr.bf16.mxu1 %v2448_v44  ;;  %v2486_v42 = vunpack.c.h.s8.bf16 %v1038_v30  ;;  %v2488_v44 = vunpack.c.h.s8.bf16 %v1040_v31  ;;  %v1058_v30 = vld [vmem:[%s8317_s8 + $0x1348] sm:$0xff]  ;;  %v1060_v31 = vld [vmem:[%s8317_s8 + $0x1358] sm:$0xff] }
 0x56c   : > { %4155 = vmatprep.mubr.bf16.mxu0 %v9137_v58  ;;  %5262 = vmatprep.mubr.bf16.mxu1 %v9137_v58 }
 0x56e   : > { %4126 = vmatpush1.bf16.msra.mxu0 %v2445_v41  ;;  %5233 = vmatpush1.bf16.msra.mxu1 %v2447_v48  ;;  %v2485_v41 = vunpack.c.h.s8.bf16 %v1037_v34  ;;  %v2487_v48 = vunpack.c.h.s8.bf16 %v1039_v38  ;;  %v1057_v34 = vld [vmem:[%s8317_s8 + $0x1340] sm:$0xff]  ;;  %v1059_v38 = vld [vmem:[%s8317_s8 + $0x1350] sm:$0xff] }
 0x56f   : > { %4127 = vmatprep.subr.bf16.mxu0 %v2450_v49  ;;  %5234 = vmatprep.subr.bf16.mxu1 %v2452_v50  ;;  %v2490_v49 = vunpack.c.l.s8.bf16 %v1042_v46  ;;  %v2492_v50 = vunpack.c.l.s8.bf16 %v1044_v47 }
 0x572   : > { %4128 = vmatpush1.bf16.msra.mxu0 %v2449_v54  ;;  %5235 = vmatpush1.bf16.msra.mxu1 %v2451_v7  ;;  %v2489_v54 = vunpack.c.l.s8.bf16 %v1041_v52  ;;  %v2491_v7 = vunpack.c.l.s8.bf16 %v1043_v61 }
 0x573   : > { %4129 = vmatprep.subr.bf16.mxu0 %v2454_v4  ;;  %5236 = vmatprep.subr.bf16.mxu1 %v2456_v56  ;;  %v2494_v4 = vunpack.c.h.s8.bf16 %v1042_v46  ;;  %v2496_v56 = vunpack.c.h.s8.bf16 %v1044_v47  ;;  %v1062_v46 = vld [vmem:[%s8317_s8 + $0x1368] sm:$0xff]  ;;  %v1064_v47 = vld [vmem:[%s8317_s8 + $0x1378] sm:$0xff] }
 0x576   : > { %4130 = vmatpush1.bf16.msra.mxu0 %v2453_v9  ;;  %5237 = vmatpush1.bf16.msra.mxu1 %v2455_v28  ;;  %v2493_v9 = vunpack.c.h.s8.bf16 %v1041_v52  ;;  %v2495_v28 = vunpack.c.h.s8.bf16 %v1043_v61  ;;  %v1061_v52 = vld [vmem:[%s8317_s8 + $0x1360] sm:$0xff]  ;;  %v1063_v61 = vld [vmem:[%s8317_s8 + $0x1370] sm:$0xff] }
 0x577   : > { %4131 = vmatprep.subr.bf16.mxu0 %v2458_v62  ;;  %5238 = vmatprep.subr.bf16.mxu1 %v2460_v63  ;;  %v2498_v62 = vunpack.c.l.s8.bf16 %v1046_v59  ;;  %v2500_v63 = vunpack.c.l.s8.bf16 %v1048_v20 }
 0x57a   : > { %4132 = vmatpush1.bf16.msra.mxu0 %v2457_v1  ;;  %5239 = vmatpush1.bf16.msra.mxu1 %v2459_v51  ;;  %v2497_v1 = vunpack.c.l.s8.bf16 %v1045_v32  ;;  %v2499_v51 = vunpack.c.l.s8.bf16 %v1047_v19 }
 0x57b   : > { %4133 = vmatprep.subr.bf16.mxu0 %v2462_v2  ;;  %5240 = vmatprep.subr.bf16.mxu1 %v2464_v23  ;;  %v2502_v2 = vunpack.c.h.s8.bf16 %v1046_v59  ;;  %v2504_v23 = vunpack.c.h.s8.bf16 %v1048_v20  ;;  %v1066_v59 = vld [vmem:[%s8317_s8 + $0x1388] sm:$0xff]  ;;  %v1068_v20 = vld [vmem:[%s8317_s8 + $0x1398] sm:$0xff] }
 0x57e   : > { %4134 = vmatpush1.bf16.msra.mxu0 %v2461_v6  ;;  %5241 = vmatpush1.bf16.msra.mxu1 %v2463_v8  ;;  %v2501_v6 = vunpack.c.h.s8.bf16 %v1045_v32  ;;  %v2503_v8 = vunpack.c.h.s8.bf16 %v1047_v19  ;;  %v1065_v32 = vld [vmem:[%s8317_s8 + $0x1380] sm:$0xff]  ;;  %v1067_v19 = vld [vmem:[%s8317_s8 + $0x1390] sm:$0xff] }
 0x57f   : > { %4135 = vmatprep.subr.bf16.mxu0 %v2466_v10  ;;  %5242 = vmatprep.subr.bf16.mxu1 %v2468_v27  ;;  %v2506_v10 = vunpack.c.l.s8.bf16 %v1050_v5  ;;  %v2508_v27 = vunpack.c.l.s8.bf16 %v1052_v22  ;;  %v1072_v22 = vld [vmem:[%s8317_s8 + $0x13b8] sm:$0xff] }
 0x582   : > { %4136 = vmatpush1.bf16.msra.mxu0 %v2465_v13  ;;  %5243 = vmatpush1.bf16.msra.mxu1 %v2467_v14  ;;  %v9173_v13 = vrot.slane %v9126_v29, %v8354_v35  ;;  %v2505_v14 = vunpack.c.l.s8.bf16 %v1049_v11  ;;  %v2509_v29 = vunpack.c.h.s8.bf16 %v1049_v11  ;;  %v1069_v11 = vld [vmem:[%s8317_s8 + $0x13a0] sm:$0xff] }
 0x583   : > { %4137 = vmatprep.subr.bf16.mxu0 %v2470_v15  ;;  %5244 = vmatprep.subr.bf16.mxu1 %v2472_v24  ;;  %v2507_v15 = vunpack.c.l.s8.bf16 %v1051_v12  ;;  %v2510_v24 = vunpack.c.h.s8.bf16 %v1050_v5  ;;  %v1070_v5 = vld [vmem:[%s8317_s8 + $0x13a8] sm:$0xff] }
 0x586   : > { %4138 = vmatpush1.bf16.msra.mxu0 %v2469_v17  ;;  %5245 = vmatpush1.bf16.msra.mxu1 %v2471_v18  ;;  %v1056_v17 = vld [vmem:[%s8317_s8 + $0x1338] sm:$0xff]  ;;  %v3243_v18 = vcombine.high %v9137_v58, %v9137_v58  ;;  %v2513_v58 = vunpack.c.l.s8.bf16 %v1053_v36 }
 0x587   : > { %4139 = vmatprep.subr.bf16.mxu0 %v2474_v21  ;;  %5246 = vmatprep.subr.bf16.mxu1 %v2476_v43  ;;  %v2511_v21 = vunpack.c.h.s8.bf16 %v1051_v12  ;;  %v2514_v43 = vunpack.c.l.s8.bf16 %v1054_v37  ;;  %v2516_v39 = vunpack.c.l.s8.bf16 %v1056_v17  ;;  %v1071_v12 = vld [vmem:[%s8317_s8 + $0x13b0] sm:$0xff] }
 0x58a   : > { %4140 = vmatpush1.bf16.msra.mxu0 %v2473_v25  ;;  %5247 = vmatpush1.bf16.msra.mxu1 %v2475_v45  ;;  %v1055_v25 = vld [vmem:[%s8317_s8 + $0x1330] sm:$0xff] }
 0x58b   : > { %4141 = vmatprep.subr.bf16.mxu0 %v2478_v0  ;;  %5248 = vmatprep.subr.bf16.mxu1 %v2480_v53  ;;  %v2515_v45 = vunpack.c.l.s8.bf16 %v1055_v25  ;;  %v2518_v0 = vunpack.c.h.s8.bf16 %v1054_v37  ;;  %v2520_v53 = vunpack.c.h.s8.bf16 %v1056_v17  ;;  %v1074_v37 = vld [vmem:[%s8317_s8 + $0x13c8] sm:$0xff]  ;;  %v1076_v17 = vld [vmem:[%s8317_s8 + $0x13d8] sm:$0xff] }
 0x58e   : > { %4142 = vmatpush1.bf16.msra.mxu0 %v2477_v3  ;;  %5249 = vmatpush1.bf16.msra.mxu1 %v2479_v57  ;;  %v2517_v3 = vunpack.c.h.s8.bf16 %v1053_v36  ;;  %v2519_v57 = vunpack.c.h.s8.bf16 %v1055_v25  ;;  %v1075_v36 = vld [vmem:[%s8317_s8 + $0x13d0] sm:$0xff] }
 0x58f   : > { %4143 = vmatprep.subr.bf16.mxu0 %v2482_v33  ;;  %5250 = vmatprep.subr.bf16.mxu1 %v2484_v55  ;;  %v2522_v33 = vunpack.c.l.s8.bf16 %v1058_v30  ;;  %v2524_v55 = vunpack.c.l.s8.bf16 %v1060_v31 }
 0x592   : > { %4144 = vmatpush1.bf16.msra.mxu0 %v2481_v40  ;;  %5251 = vmatpush1.bf16.msra.mxu1 %v2483_v60  ;;  %v2521_v40 = vunpack.c.l.s8.bf16 %v1057_v34  ;;  %v2523_v60 = vunpack.c.l.s8.bf16 %v1059_v38 }
 0x593   : > { %4145 = vmatprep.subr.bf16.mxu0 %v2486_v42  ;;  %5252 = vmatprep.subr.bf16.mxu1 %v2488_v44  ;;  %v2526_v42 = vunpack.c.h.s8.bf16 %v1058_v30  ;;  %v2528_v44 = vunpack.c.h.s8.bf16 %v1060_v31  ;;  %v1080_v30 = vld [vmem:[%s8317_s8 + $0x13f8] sm:$0xff] }
 0x596   : > { %4146 = vmatpush1.bf16.msra.mxu0 %v2485_v41  ;;  %5253 = vmatpush1.bf16.msra.mxu1 %v2487_v48  ;;  %v2525_v41 = vunpack.c.h.s8.bf16 %v1057_v34  ;;  %v2527_v48 = vunpack.c.h.s8.bf16 %v1059_v38  ;;  %v1079_v34 = vld [vmem:[%s8317_s8 + $0x13f0] sm:$0xff] }
 0x597   : > { %4147 = vmatprep.subr.bf16.mxu0 %v2490_v49  ;;  %5254 = vmatprep.subr.bf16.mxu1 %v2492_v50  ;;  %v2530_v49 = vunpack.c.l.s8.bf16 %v1062_v46  ;;  %v2532_v50 = vunpack.c.l.s8.bf16 %v1064_v47  ;;  %v9207_v38 = vld [vmem:[#allocation3 + $0x28] sm:$0xff] }
 0x59a   : > { %4148 = vmatpush1.bf16.msra.mxu0 %v2489_v54  ;;  %5255 = vmatpush1.bf16.msra.mxu1 %v2491_v7  ;;  %v2529_v54 = vunpack.c.l.s8.bf16 %v1061_v52  ;;  %v2531_v7 = vunpack.c.l.s8.bf16 %v1063_v61 }
 0x59b   : > { %4149 = vmatprep.subr.bf16.mxu0 %v2494_v4  ;;  %5256 = vmatprep.subr.bf16.mxu1 %v2496_v56  ;;  %v2534_v4 = vunpack.c.h.s8.bf16 %v1062_v46  ;;  %v2536_v56 = vunpack.c.h.s8.bf16 %v1064_v47  ;;  %v1082_v46 = vld [vmem:[%s8317_s8 + $0x1408] sm:$0xff]  ;;  %v1084_v47 = vld [vmem:[%s8317_s8 + $0x1418] sm:$0xff] }
 0x59e   : > { %4150 = vmatpush1.bf16.msra.mxu0 %v2493_v9  ;;  %5257 = vmatpush1.bf16.msra.mxu1 %v2495_v28  ;;  %v2533_v9 = vunpack.c.h.s8.bf16 %v1061_v52  ;;  %v2535_v28 = vunpack.c.h.s8.bf16 %v1063_v61  ;;  %v2572_v52 = vunpack.c.l.s8.bf16 %v1084_v47  ;;  %v1081_v61 = vld [vmem:[%s8317_s8 + $0x1400] sm:$0xff] }
 0x59f   : > { %4151 = vmatprep.subr.bf16.mxu0 %v2498_v62  ;;  %5258 = vmatprep.subr.bf16.mxu1 %v2500_v63  ;;  %v2538_v62 = vunpack.c.l.s8.bf16 %v1066_v59  ;;  %v2540_v63 = vunpack.c.l.s8.bf16 %v1068_v20 }
 0x5a2   : > { %4152 = vmatpush1.bf16.msra.mxu0 %v2497_v1  ;;  %5259 = vmatpush1.bf16.msra.mxu1 %v2499_v51  ;;  %v2537_v1 = vunpack.c.l.s8.bf16 %v1065_v32  ;;  %v2539_v51 = vunpack.c.l.s8.bf16 %v1067_v19 }
 0x5a3   : > { %4153 = vmatprep.subr.bf16.mxu0 %v2502_v2  ;;  %5260 = vmatprep.subr.bf16.mxu1 %v2504_v23  ;;  %v2542_v2 = vunpack.c.h.s8.bf16 %v1066_v59  ;;  %v2544_v23 = vunpack.c.h.s8.bf16 %v1068_v20  ;;  %v2574_v20 = vunpack.c.h.s8.bf16 %v1082_v46 }
 0x5a6   : > { %4154 = vmatpush1.bf16.msra.mxu0 %v2501_v6  ;;  %5261 = vmatpush1.bf16.msra.mxu1 %v2503_v8  ;;  %v2541_v6 = vunpack.c.h.s8.bf16 %v1065_v32  ;;  %v2543_v8 = vunpack.c.h.s8.bf16 %v1067_v19 }
 0x5a7   : > { %4164 = vmatprep.subr.bf16.mxu0 %v2506_v10  ;;  %5271 = vmatprep.subr.bf16.mxu1 %v2508_v27  ;;  %v2546_v10 = vunpack.c.l.s8.bf16 %v1070_v5  ;;  %v2548_v27 = vunpack.c.l.s8.bf16 %v1072_v22 }
 0x5a9   : > { %4156 = vmatmul.mubr.bf16.vlgmr.msra.gmra.mrb[0].mxu0 %v9173_v13  ;;  %5263 = vmatmul.mubr.bf16.vlgmr.msra.gmra.mrb[0].mxu1 %v9173_v13 }
 0x5aa   : > { %4165 = vmatpush1.bf16.msra.mxu0 %v2505_v14  ;;  %5272 = vmatpush1.bf16.msra.mxu1 %v2507_v15  ;;  %v2545_v14 = vunpack.c.l.s8.bf16 %v1069_v11  ;;  %v2547_v15 = vunpack.c.l.s8.bf16 %v1071_v12 }
 0x5ab   : > { %4166 = vmatprep.subr.bf16.mxu0 %v2510_v24  ;;  %5273 = vmatprep.subr.bf16.mxu1 %v2512_v16  ;;  %v2550_v24 = vunpack.c.h.s8.bf16 %v1070_v5  ;;  %v2552_v16 = vunpack.c.h.s8.bf16 %v1072_v22 }
 0x5ac   : > { %4196 = vmatprep.mubr.bf16.mxu0 %v3243_v18  ;;  %5303 = vmatprep.mubr.bf16.mxu1 %v3243_v18  ;;  %v2549_v18 = vunpack.c.h.s8.bf16 %v1069_v11 }
 0x5ae   : > { %4167 = vmatpush1.bf16.msra.mxu0 %v2509_v29  ;;  %5274 = vmatpush1.bf16.msra.mxu1 %v2511_v21  ;;  %v2551_v29 = vunpack.c.h.s8.bf16 %v1071_v12  ;;  %v2554_v21 = vunpack.c.l.s8.bf16 %v1074_v37 }
 0x5af   : > { %4168 = vmatprep.subr.bf16.mxu0 %v2514_v43  ;;  %5275 = vmatprep.subr.bf16.mxu1 %v2516_v39  ;;  %v2556_v43 = vunpack.c.l.s8.bf16 %v1076_v17  ;;  %v1073_v39 = vld [vmem:[%s8317_s8 + $0x13c0] sm:$0xff] }
 0x5b0   : > { %v2553_v25 = vunpack.c.l.s8.bf16 %v1073_v39  ;;  %v2557_v31 = vunpack.c.h.s8.bf16 %v1073_v39 }
 0x5b2   : > { %4169 = vmatpush1.bf16.msra.mxu0 %v2513_v58  ;;  %5276 = vmatpush1.bf16.msra.mxu1 %v2515_v45  ;;  %v2555_v58 = vunpack.c.l.s8.bf16 %v1075_v36  ;;  %v2558_v45 = vunpack.c.h.s8.bf16 %v1074_v37 }
 0x5b3   : > { %4170 = vmatprep.subr.bf16.mxu0 %v2518_v0  ;;  %5277 = vmatprep.subr.bf16.mxu1 %v2520_v53  ;;  %v2560_v0 = vunpack.c.h.s8.bf16 %v1076_v17  ;;  %v1078_v53 = vld [vmem:[%s8317_s8 + $0x13e8] sm:$0xff] }
 0x5b6   : > { %4171 = vmatpush1.bf16.msra.mxu0 %v2517_v3  ;;  %5278 = vmatpush1.bf16.msra.mxu1 %v2519_v57  ;;  %v2559_v3 = vunpack.c.h.s8.bf16 %v1075_v36  ;;  %v2562_v57 = vunpack.c.l.s8.bf16 %v1078_v53 }
 0x5b7   : > { %4172 = vmatprep.subr.bf16.mxu0 %v2522_v33  ;;  %5279 = vmatprep.subr.bf16.mxu1 %v2524_v55  ;;  %v2564_v33 = vunpack.c.l.s8.bf16 %v1080_v30  ;;  %v1077_v55 = vld [vmem:[%s8317_s8 + $0x13e0] sm:$0xff] }
 0x5ba   : > { %4173 = vmatpush1.bf16.msra.mxu0 %v2521_v40  ;;  %5280 = vmatpush1.bf16.msra.mxu1 %v2523_v60  ;;  %v2561_v40 = vunpack.c.l.s8.bf16 %v1077_v55  ;;  %v2563_v60 = vunpack.c.l.s8.bf16 %v1079_v34 }
 0x5bb   : > { %4174 = vmatprep.subr.bf16.mxu0 %v2526_v42  ;;  %5281 = vmatprep.subr.bf16.mxu1 %v2528_v44  ;;  %v2566_v42 = vunpack.c.h.s8.bf16 %v1078_v53  ;;  %v2568_v44 = vunpack.c.h.s8.bf16 %v1080_v30 }
 0x5be   : > { %4175 = vmatpush1.bf16.msra.mxu0 %v2525_v41  ;;  %5282 = vmatpush1.bf16.msra.mxu1 %v2527_v48  ;;  %v9213_v41 = vrot.slane %v9207_v38, %v8354_v35  ;;  %v2565_v48 = vunpack.c.h.s8.bf16 %v1077_v55 }
 0x5bf   : > { %4176 = vmatprep.subr.bf16.mxu0 %v2530_v49  ;;  %5283 = vmatprep.subr.bf16.mxu1 %v2532_v50  ;;  %v2567_v49 = vunpack.c.h.s8.bf16 %v1079_v34  ;;  %v2570_v50 = vunpack.c.l.s8.bf16 %v1082_v46 }
 0x5c2   : > { %4177 = vmatpush1.bf16.msra.mxu0 %v2529_v54  ;;  %5284 = vmatpush1.bf16.msra.mxu1 %v2531_v7  ;;  %v1083_v54 = vld [vmem:[%s8317_s8 + $0x1410] sm:$0xff]  ;;  %v3259_v7 = vcombine.high %v9213_v41, %v9213_v41 }
 0x5c3   : > { %4178 = vmatprep.subr.bf16.mxu0 %v2534_v4  ;;  %5285 = vmatprep.subr.bf16.mxu1 %v2536_v56  ;;  %v3241_v4 = vcombine.high %v9173_v13, %v9173_v13  ;;  %v2569_v56 = vunpack.c.l.s8.bf16 %v1081_v61  ;;  %v2571_v59 = vunpack.c.l.s8.bf16 %v1083_v54  ;;  %v2573_v13 = vunpack.c.h.s8.bf16 %v1081_v61 }
 0x5c4   : > { %v2575_v32 = vunpack.c.h.s8.bf16 %v1083_v54 }
 0x5c6   : > { %4179 = vmatpush1.bf16.msra.mxu0 %v2533_v9  ;;  %5286 = vmatpush1.bf16.msra.mxu1 %v2535_v28  ;;  %v2576_v9 = vunpack.c.h.s8.bf16 %v1084_v47  ;;  %v1086_v28 = vld [vmem:[%s8317_s8 + $0x1428] sm:$0xff] }
 0x5c7   : > { %4180 = vmatprep.subr.bf16.mxu0 %v2538_v62  ;;  %5287 = vmatprep.subr.bf16.mxu1 %v2540_v63  ;;  %v1088_v62 = vld [vmem:[%s8317_s8 + $0x1438] sm:$0xff]  ;;  %v9224_v63 = vrot.slane %v3259_v7, %v8354_v35  ;;  %v2578_v19 = vunpack.c.l.s8.bf16 %v1086_v28  ;;  %v2582_v22 = vunpack.c.h.s8.bf16 %v1086_v28 }
 0x5ca   : > { %4181 = vmatpush1.bf16.msra.mxu0 %v2537_v1  ;;  %5288 = vmatpush1.bf16.msra.mxu1 %v2539_v51  ;;  %v2580_v1 = vunpack.c.l.s8.bf16 %v1088_v62  ;;  %v1085_v51 = vld [vmem:[%s8317_s8 + $0x1420] sm:$0xff] }
 0x5cb   : > { %4182 = vmatprep.subr.bf16.mxu0 %v2542_v2  ;;  %5289 = vmatprep.subr.bf16.mxu1 %v2544_v23  ;;  %v1087_v2 = vld [vmem:[%s8317_s8 + $0x1430] sm:$0xff]  ;;  %v2577_v23 = vunpack.c.l.s8.bf16 %v1085_v51 }
 0x5cc   : > { %v2579_v5 = vunpack.c.l.s8.bf16 %v1087_v2  ;;  %v2583_v11 = vunpack.c.h.s8.bf16 %v1087_v2  ;;  %v1105_v2 = vld [vmem:[%s8317_s8 + $0x14c0] sm:$0xff] }
 0x5ce   : > { %4183 = vmatpush1.bf16.msra.mxu0 %v2541_v6  ;;  %5290 = vmatpush1.bf16.msra.mxu1 %v2543_v8  ;;  %v2584_v6 = vunpack.c.h.s8.bf16 %v1088_v62  ;;  %v1090_v8 = vld [vmem:[%s8317_s8 + $0x1448] sm:$0xff] }
 0x5cf   : > { %4184 = vmatprep.subr.bf16.mxu0 %v2546_v10  ;;  %5291 = vmatprep.subr.bf16.mxu1 %v2548_v27  ;;  %v1092_v10 = vld [vmem:[%s8317_s8 + $0x1458] sm:$0xff]  ;;  %v2581_v27 = vunpack.c.h.s8.bf16 %v1085_v51  ;;  %v2586_v12 = vunpack.c.l.s8.bf16 %v1090_v8  ;;  %v2590_v17 = vunpack.c.h.s8.bf16 %v1090_v8  ;;  %v1106_v62 = vld [vmem:[%s8317_s8 + $0x14c8] sm:$0xff] }
 0x5d2   : > { %4185 = vmatpush1.bf16.msra.mxu0 %v2545_v14  ;;  %5292 = vmatpush1.bf16.msra.mxu1 %v2547_v15  ;;  %v2588_v14 = vunpack.c.l.s8.bf16 %v1092_v10  ;;  %v1089_v15 = vld [vmem:[%s8317_s8 + $0x1440] sm:$0xff] }
 0x5d3   : > { %4186 = vmatprep.subr.bf16.mxu0 %v2550_v24  ;;  %5293 = vmatprep.subr.bf16.mxu1 %v2552_v16  ;;  %v1091_v24 = vld [vmem:[%s8317_s8 + $0x1450] sm:$0xff]  ;;  %v2585_v16 = vunpack.c.l.s8.bf16 %v1089_v15 }
 0x5d4   : > { %v2587_v37 = vunpack.c.l.s8.bf16 %v1091_v24  ;;  %v2591_v39 = vunpack.c.h.s8.bf16 %v1091_v24  ;;  %v1109_v24 = vld [vmem:[%s8317_s8 + $0x14e0] sm:$0xff] }
 0x5d6   : > { %4187 = vmatpush1.bf16.msra.mxu0 %v2549_v18  ;;  %5294 = vmatpush1.bf16.msra.mxu1 %v2551_v29  ;;  %v2592_v18 = vunpack.c.h.s8.bf16 %v1092_v10  ;;  %v1094_v29 = vld [vmem:[%s8317_s8 + $0x1468] sm:$0xff] }
 0x5d7   : > { %4188 = vmatprep.subr.bf16.mxu0 %v2554_v21  ;;  %5295 = vmatprep.subr.bf16.mxu1 %v2556_v43  ;;  %v1096_v21 = vld [vmem:[%s8317_s8 + $0x1478] sm:$0xff]  ;;  %v2589_v43 = vunpack.c.h.s8.bf16 %v1089_v15  ;;  %v2594_v36 = vunpack.c.l.s8.bf16 %v1094_v29  ;;  %v2598_v30 = vunpack.c.h.s8.bf16 %v1094_v29  ;;  %v1110_v10 = vld [vmem:[%s8317_s8 + $0x14e8] sm:$0xff] }
 0x5da   : > { %4189 = vmatpush1.bf16.msra.mxu0 %v2553_v25  ;;  %5296 = vmatpush1.bf16.msra.mxu1 %v2555_v58  ;;  %v2596_v25 = vunpack.c.l.s8.bf16 %v1096_v21  ;;  %v1093_v58 = vld [vmem:[%s8317_s8 + $0x1460] sm:$0xff] }
 0x5db   : > { %4190 = vmatprep.subr.bf16.mxu0 %v2558_v45  ;;  %5297 = vmatprep.subr.bf16.mxu1 %v2560_v0  ;;  %v1095_v45 = vld [vmem:[%s8317_s8 + $0x1470] sm:$0xff]  ;;  %v2593_v0 = vunpack.c.l.s8.bf16 %v1093_v58 }
 0x5dc   : > { %v2595_v53 = vunpack.c.l.s8.bf16 %v1095_v45  ;;  %v2599_v55 = vunpack.c.h.s8.bf16 %v1095_v45  ;;  %v1113_v45 = vld [vmem:[%s8317_s8 + $0x1500] sm:$0xff] }
 0x5de   : > { %4191 = vmatpush1.bf16.msra.mxu0 %v2557_v31  ;;  %5298 = vmatpush1.bf16.msra.mxu1 %v2559_v3  ;;  %v2600_v31 = vunpack.c.h.s8.bf16 %v1096_v21  ;;  %v1098_v3 = vld [vmem:[%s8317_s8 + $0x1488] sm:$0xff] }
 0x5df   : > { %4192 = vmatprep.subr.bf16.mxu0 %v2562_v57  ;;  %5299 = vmatprep.subr.bf16.mxu1 %v2564_v33  ;;  %v1100_v57 = vld [vmem:[%s8317_s8 + $0x1498] sm:$0xff]  ;;  %v2597_v33 = vunpack.c.h.s8.bf16 %v1093_v58  ;;  %v2602_v34 = vunpack.c.l.s8.bf16 %v1098_v3  ;;  %v2606_v47 = vunpack.c.h.s8.bf16 %v1098_v3  ;;  %v1114_v21 = vld [vmem:[%s8317_s8 + $0x1508] sm:$0xff] }
 0x5e0   : > { %v2638_v3 = vunpack.c.h.s8.bf16 %v1114_v21 }
 0x5e2   : > { %4193 = vmatpush1.bf16.msra.mxu0 %v2561_v40  ;;  %5300 = vmatpush1.bf16.msra.mxu1 %v2563_v60  ;;  %v2604_v40 = vunpack.c.l.s8.bf16 %v1100_v57  ;;  %v1097_v60 = vld [vmem:[%s8317_s8 + $0x1480] sm:$0xff] }
 0x5e3   : > { %4194 = vmatprep.subr.bf16.mxu0 %v2566_v42  ;;  %5301 = vmatprep.subr.bf16.mxu1 %v2568_v44  ;;  %v1099_v42 = vld [vmem:[%s8317_s8 + $0x1490] sm:$0xff]  ;;  %v2601_v44 = vunpack.c.l.s8.bf16 %v1097_v60 }
 0x5e4   : > { %v2603_v46 = vunpack.c.l.s8.bf16 %v1099_v42  ;;  %v2607_v61 = vunpack.c.h.s8.bf16 %v1099_v42 }
 0x5e6   : > { %4195 = vmatpush1.bf16.msra.mxu0 %v2565_v48  ;;  %5302 = vmatpush1.bf16.msra.mxu1 %v2567_v49  ;;  %v2608_v48 = vunpack.c.h.s8.bf16 %v1100_v57  ;;  %v1102_v49 = vld [vmem:[%s8317_s8 + $0x14a8] sm:$0xff] }
 0x5e7   : > { %4205 = vmatprep.subr.bf16.mxu0 %v2570_v50  ;;  %5312 = vmatprep.subr.bf16.mxu1 %v2572_v52  ;;  %v1104_v50 = vld [vmem:[%s8317_s8 + $0x14b8] sm:$0xff]  ;;  %v2605_v52 = vunpack.c.h.s8.bf16 %v1097_v60  ;;  %v2610_v54 = vunpack.c.l.s8.bf16 %v1102_v49 }
 0x5e8   : > { %v2612_v7 = vunpack.c.l.s8.bf16 %v1104_v50  ;;  %v2616_v28 = vunpack.c.h.s8.bf16 %v1104_v50  ;;  %v1122_v50 = vld [vmem:[%s8317_s8 + $0x1548] sm:$0xff] }
 0x5e9   : > { %4197 = vmatmul.mubr.bf16.vlgmr.msra.gmra.mrb[0].mxu0 %v3241_v4  ;;  %5304 = vmatmul.mubr.bf16.vlgmr.msra.gmra.mrb[0].mxu1 %v3241_v4  ;;  %v1101_v4 = vld [vmem:[%s8317_s8 + $0x14a0] sm:$0xff] }
 0x5ea   : > { %4206 = vmatpush1.bf16.msra.mxu0 %v2569_v56  ;;  %5313 = vmatpush1.bf16.msra.mxu1 %v2571_v59  ;;  %v1103_v56 = vld [vmem:[%s8317_s8 + $0x14b0] sm:$0xff]  ;;  %v2609_v59 = vunpack.c.l.s8.bf16 %v1101_v4 }
 0x5eb   : > { %4207 = vmatprep.subr.bf16.mxu0 %v2574_v20  ;;  %5314 = vmatprep.subr.bf16.mxu1 %v2576_v9  ;;  %v2611_v20 = vunpack.c.l.s8.bf16 %v1103_v56  ;;  %v2614_v9 = vunpack.c.h.s8.bf16 %v1102_v49 }
 0x5ec   : > { %4237 = vmatprep.mubr.bf16.mxu0 %v9224_v63  ;;  %5344 = vmatprep.mubr.bf16.mxu1 %v9224_v63 }
 0x5ee   : > { %4208 = vmatpush1.bf16.msra.mxu0 %v2573_v13  ;;  %5315 = vmatpush1.bf16.msra.mxu1 %v2575_v32  ;;  %v1108_v13 = vld [vmem:[%s8317_s8 + $0x14d8] sm:$0xff]  ;;  %v2613_v32 = vunpack.c.h.s8.bf16 %v1101_v4 }
 0x5ef   : > { %4209 = vmatprep.subr.bf16.mxu0 %v2578_v19  ;;  %5316 = vmatprep.subr.bf16.mxu1 %v2580_v1  ;;  %v2615_v19 = vunpack.c.h.s8.bf16 %v1103_v56  ;;  %v2618_v1 = vunpack.c.l.s8.bf16 %v1106_v62  ;;  %v2620_v51 = vunpack.c.l.s8.bf16 %v1108_v13  ;;  %v2624_v8 = vunpack.c.h.s8.bf16 %v1108_v13  ;;  %v1121_v56 = vld [vmem:[%s8317_s8 + $0x1540] sm:$0xff]  ;;  %v1126_v13 = vld [vmem:[%s8317_s8 + $0x1568] sm:$0xff] }
 0x5f2   : > { %4210 = vmatpush1.bf16.msra.mxu0 %v2577_v23  ;;  %5317 = vmatpush1.bf16.msra.mxu1 %v2579_v5  ;;  %v1107_v23 = vld [vmem:[%s8317_s8 + $0x14d0] sm:$0xff]  ;;  %v2617_v5 = vunpack.c.l.s8.bf16 %v1105_v2 }
 0x5f3   : > { %4211 = vmatprep.subr.bf16.mxu0 %v2582_v22  ;;  %5318 = vmatprep.subr.bf16.mxu1 %v2584_v6  ;;  %v2619_v22 = vunpack.c.l.s8.bf16 %v1107_v23  ;;  %v2622_v6 = vunpack.c.h.s8.bf16 %v1106_v62 }
 0x5f6   : > { %4212 = vmatpush1.bf16.msra.mxu0 %v2581_v27  ;;  %5319 = vmatpush1.bf16.msra.mxu1 %v2583_v11  ;;  %v1112_v27 = vld [vmem:[%s8317_s8 + $0x14f8] sm:$0xff]  ;;  %v2621_v11 = vunpack.c.h.s8.bf16 %v1105_v2 }
 0x5f7   : > { %4213 = vmatprep.subr.bf16.mxu0 %v2586_v12  ;;  %5320 = vmatprep.subr.bf16.mxu1 %v2588_v14  ;;  %v2623_v12 = vunpack.c.h.s8.bf16 %v1107_v23  ;;  %v2626_v14 = vunpack.c.l.s8.bf16 %v1110_v10  ;;  %v2628_v15 = vunpack.c.l.s8.bf16 %v1112_v27  ;;  %v2632_v29 = vunpack.c.h.s8.bf16 %v1112_v27  ;;  %v1125_v23 = vld [vmem:[%s8317_s8 + $0x1560] sm:$0xff]  ;;  %v1130_v27 = vld [vmem:[%s8317_s8 + $0x1588] sm:$0xff] }
 0x5fa   : > { %4214 = vmatpush1.bf16.msra.mxu0 %v2585_v16  ;;  %5321 = vmatpush1.bf16.msra.mxu1 %v2587_v37  ;;  %v1111_v16 = vld [vmem:[%s8317_s8 + $0x14f0] sm:$0xff]  ;;  %v2625_v37 = vunpack.c.l.s8.bf16 %v1109_v24 }
 0x5fb   : > { %4215 = vmatprep.subr.bf16.mxu0 %v2590_v17  ;;  %5322 = vmatprep.subr.bf16.mxu1 %v2592_v18  ;;  %v2627_v17 = vunpack.c.l.s8.bf16 %v1111_v16  ;;  %v2630_v18 = vunpack.c.h.s8.bf16 %v1110_v10 }
 0x5fe   : > { %4216 = vmatpush1.bf16.msra.mxu0 %v2589_v43  ;;  %5323 = vmatpush1.bf16.msra.mxu1 %v2591_v39  ;;  %v1116_v43 = vld [vmem:[%s8317_s8 + $0x1518] sm:$0xff]  ;;  %v2629_v39 = vunpack.c.h.s8.bf16 %v1109_v24 }
 0x5ff   : > { %4217 = vmatprep.subr.bf16.mxu0 %v2594_v36  ;;  %5324 = vmatprep.subr.bf16.mxu1 %v2596_v25  ;;  %v2631_v36 = vunpack.c.h.s8.bf16 %v1111_v16  ;;  %v2634_v25 = vunpack.c.l.s8.bf16 %v1114_v21  ;;  %v2636_v58 = vunpack.c.l.s8.bf16 %v1116_v43  ;;  %v2640_v57 = vunpack.c.h.s8.bf16 %v1116_v43  ;;  %v1129_v16 = vld [vmem:[%s8317_s8 + $0x1580] sm:$0xff]  ;;  %v1134_v43 = vld [vmem:[%s8317_s8 + $0x15a8] sm:$0xff] }
 0x602   : > { %4218 = vmatpush1.bf16.msra.mxu0 %v2593_v0  ;;  %5325 = vmatpush1.bf16.msra.mxu1 %v2595_v53  ;;  %v1115_v0 = vld [vmem:[%s8317_s8 + $0x1510] sm:$0xff]  ;;  %v9260_v53 = vrot.slane %v9213_v41, %v8354_v35  ;;  %v2637_v41 = vunpack.c.h.s8.bf16 %v1113_v45 }
 0x603   : > { %4219 = vmatprep.subr.bf16.mxu0 %v2598_v30  ;;  %5326 = vmatprep.subr.bf16.mxu1 %v2600_v31  ;;  %v2633_v30 = vunpack.c.l.s8.bf16 %v1113_v45  ;;  %v2635_v31 = vunpack.c.l.s8.bf16 %v1115_v0 }
 0x606   : > { %4220 = vmatpush1.bf16.msra.mxu0 %v2597_v33  ;;  %5327 = vmatpush1.bf16.msra.mxu1 %v2599_v55  ;;  %v1118_v33 = vld [vmem:[%s8317_s8 + $0x1528] sm:$0xff]  ;;  %v1120_v55 = vld [vmem:[%s8317_s8 + $0x1538] sm:$0xff] }
 0x607   : > { %4221 = vmatprep.subr.bf16.mxu0 %v2602_v34  ;;  %5328 = vmatprep.subr.bf16.mxu1 %v2604_v40  ;;  %v3291_v34 = vcombine.high %v9224_v63, %v9224_v63  ;;  %v2639_v40 = vunpack.c.h.s8.bf16 %v1115_v0  ;;  %v2642_v60 = vunpack.c.l.s8.bf16 %v1118_v33  ;;  %v2644_v42 = vunpack.c.l.s8.bf16 %v1120_v55  ;;  %v1133_v0 = vld [vmem:[%s8317_s8 + $0x15a0] sm:$0xff] }
 0x608   : > { %v2648_v49 = vunpack.c.h.s8.bf16 %v1120_v55  ;;  %v1138_v55 = vld [vmem:[%s8317_s8 + $0x15c8] sm:$0xff] }
 0x60a   : > { %4222 = vmatpush1.bf16.msra.mxu0 %v2601_v44  ;;  %5329 = vmatpush1.bf16.msra.mxu1 %v2603_v46  ;;  %v1117_v44 = vld [vmem:[%s8317_s8 + $0x1520] sm:$0xff]  ;;  %v1119_v46 = vld [vmem:[%s8317_s8 + $0x1530] sm:$0xff] }
 0x60b   : > { %4223 = vmatprep.subr.bf16.mxu0 %v2606_v47  ;;  %5330 = vmatprep.subr.bf16.mxu1 %v2608_v48  ;;  %v2641_v63 = vunpack.c.l.s8.bf16 %v1117_v44  ;;  %v2643_v47 = vunpack.c.l.s8.bf16 %v1119_v46  ;;  %v2646_v48 = vunpack.c.h.s8.bf16 %v1118_v33 }
 0x60e   : > { %4224 = vmatpush1.bf16.msra.mxu0 %v2605_v52  ;;  %5331 = vmatpush1.bf16.msra.mxu1 %v2607_v61  ;;  %v1124_v52 = vld [vmem:[%s8317_s8 + $0x1558] sm:$0xff]  ;;  %v2645_v61 = vunpack.c.h.s8.bf16 %v1117_v44  ;;  %v1137_v44 = vld [vmem:[%s8317_s8 + $0x15c0] sm:$0xff] }
 0x60f   : > { %4225 = vmatprep.subr.bf16.mxu0 %v2610_v54  ;;  %5332 = vmatprep.subr.bf16.mxu1 %v2612_v7  ;;  %v2647_v54 = vunpack.c.h.s8.bf16 %v1119_v46  ;;  %v2650_v7 = vunpack.c.l.s8.bf16 %v1122_v50  ;;  %v2652_v4 = vunpack.c.l.s8.bf16 %v1124_v52  ;;  %v2656_v62 = vunpack.c.h.s8.bf16 %v1124_v52  ;;  %v1139_v46 = vld [vmem:[%s8317_s8 + $0x15d0] sm:$0xff]  ;;  %v1144_v52 = vld [vmem:[%s8317_s8 + $0x15f8] sm:$0xff] }
 0x612   : > { %4226 = vmatpush1.bf16.msra.mxu0 %v2609_v59  ;;  %5333 = vmatpush1.bf16.msra.mxu1 %v2611_v20  ;;  %v1123_v59 = vld [vmem:[%s8317_s8 + $0x1550] sm:$0xff]  ;;  %v2649_v20 = vunpack.c.l.s8.bf16 %v1121_v56 }
 0x613   : > { %4227 = vmatprep.subr.bf16.mxu0 %v2614_v9  ;;  %5334 = vmatprep.subr.bf16.mxu1 %v2616_v28  ;;  %v2651_v9 = vunpack.c.l.s8.bf16 %v1123_v59  ;;  %v2654_v28 = vunpack.c.h.s8.bf16 %v1122_v50  ;;  %v1142_v50 = vld [vmem:[%s8317_s8 + $0x15e8] sm:$0xff] }
 0x616   : > { %4228 = vmatpush1.bf16.msra.mxu0 %v2613_v32  ;;  %5335 = vmatpush1.bf16.msra.mxu1 %v2615_v19  ;;  %v1128_v32 = vld [vmem:[%s8317_s8 + $0x1578] sm:$0xff]  ;;  %v2653_v19 = vunpack.c.h.s8.bf16 %v1121_v56  ;;  %v1141_v56 = vld [vmem:[%s8317_s8 + $0x15e0] sm:$0xff] }
 0x617   : > { %4229 = vmatprep.subr.bf16.mxu0 %v2618_v1  ;;  %5336 = vmatprep.subr.bf16.mxu1 %v2620_v51  ;;  %v2655_v1 = vunpack.c.h.s8.bf16 %v1123_v59  ;;  %v2658_v51 = vunpack.c.l.s8.bf16 %v1126_v13  ;;  %v2660_v2 = vunpack.c.l.s8.bf16 %v1128_v32  ;;  %v2664_v10 = vunpack.c.h.s8.bf16 %v1128_v32  ;;  %v1143_v59 = vld [vmem:[%s8317_s8 + $0x15f0] sm:$0xff]  ;;  %v1146_v32 = vld [vmem:[%s8317_s8 + $0x1608] sm:$0xff] }
 0x61a   : > { %4230 = vmatpush1.bf16.msra.mxu0 %v2617_v5  ;;  %5337 = vmatpush1.bf16.msra.mxu1 %v2619_v22  ;;  %v1127_v5 = vld [vmem:[%s8317_s8 + $0x1570] sm:$0xff]  ;;  %v2657_v22 = vunpack.c.l.s8.bf16 %v1125_v23 }
 0x61b   : > { %4231 = vmatprep.subr.bf16.mxu0 %v2622_v6  ;;  %5338 = vmatprep.subr.bf16.mxu1 %v2624_v8  ;;  %v2659_v6 = vunpack.c.l.s8.bf16 %v1127_v5  ;;  %v2662_v8 = vunpack.c.h.s8.bf16 %v1126_v13  ;;  %v2696_v13 = vunpack.c.h.s8.bf16 %v1144_v52 }
 0x61e   : > { %4232 = vmatpush1.bf16.msra.mxu0 %v2621_v11  ;;  %5339 = vmatpush1.bf16.msra.mxu1 %v2623_v12  ;;  %v1132_v11 = vld [vmem:[%s8317_s8 + $0x1598] sm:$0xff]  ;;  %v2661_v12 = vunpack.c.h.s8.bf16 %v1125_v23 }
 0x61f   : > { %4233 = vmatprep.subr.bf16.mxu0 %v2626_v14  ;;  %5340 = vmatprep.subr.bf16.mxu1 %v2628_v15  ;;  %v2663_v14 = vunpack.c.h.s8.bf16 %v1127_v5  ;;  %v2666_v15 = vunpack.c.l.s8.bf16 %v1130_v27  ;;  %v2668_v24 = vunpack.c.l.s8.bf16 %v1132_v11  ;;  %v2672_v21 = vunpack.c.h.s8.bf16 %v1132_v11  ;;  %v1145_v5 = vld [vmem:[%s8317_s8 + $0x1600] sm:$0xff] }
 0x620   : > { %v2702_v11 = vunpack.c.h.s8.bf16 %v1146_v32 }
 0x622   : > { %4234 = vmatpush1.bf16.msra.mxu0 %v2625_v37  ;;  %5341 = vmatpush1.bf16.msra.mxu1 %v2627_v17  ;;  %v1131_v37 = vld [vmem:[%s8317_s8 + $0x1590] sm:$0xff]  ;;  %v2665_v17 = vunpack.c.l.s8.bf16 %v1129_v16 }
 0x623   : > { %4235 = vmatprep.subr.bf16.mxu0 %v2630_v18  ;;  %5342 = vmatprep.subr.bf16.mxu1 %v2632_v29  ;;  %v2667_v18 = vunpack.c.l.s8.bf16 %v1131_v37  ;;  %v2670_v29 = vunpack.c.h.s8.bf16 %v1130_v27 }
 0x626   : > { %4236 = vmatpush1.bf16.msra.mxu0 %v2629_v39  ;;  %5343 = vmatpush1.bf16.msra.mxu1 %v2631_v36  ;;  %v1136_v39 = vld [vmem:[%s8317_s8 + $0x15b8] sm:$0xff]  ;;  %v2669_v36 = vunpack.c.h.s8.bf16 %v1129_v16 }
 0x627   : > { %4246 = vmatprep.subr.bf16.mxu0 %v2634_v25  ;;  %5353 = vmatprep.subr.bf16.mxu1 %v2636_v58  ;;  %v2671_v25 = vunpack.c.h.s8.bf16 %v1131_v37  ;;  %v2674_v58 = vunpack.c.l.s8.bf16 %v1134_v43  ;;  %v2676_v45 = vunpack.c.l.s8.bf16 %v1136_v39  ;;  %v2680_v33 = vunpack.c.h.s8.bf16 %v1136_v39 }
 0x629   : > { %4238 = vmatmul.mubr.bf16.vlgmr.msra.gmra.mrb[0].mxu0 %v9260_v53  ;;  %5345 = vmatmul.mubr.bf16.vlgmr.msra.gmra.mrb[0].mxu1 %v9260_v53 }
 0x62a   : > { %4247 = vmatpush1.bf16.msra.mxu0 %v2633_v30  ;;  %5354 = vmatpush1.bf16.msra.mxu1 %v2635_v31  ;;  %v1135_v30 = vld [vmem:[%s8317_s8 + $0x15b0] sm:$0xff]  ;;  %v2673_v31 = vunpack.c.l.s8.bf16 %v1133_v0 }
 0x62b   : > { %4248 = vmatprep.subr.bf16.mxu0 %v2638_v3  ;;  %5355 = vmatprep.subr.bf16.mxu1 %v2640_v57  ;;  %v2675_v3 = vunpack.c.l.s8.bf16 %v1135_v30  ;;  %v2678_v57 = vunpack.c.h.s8.bf16 %v1134_v43 }
 0x62c   : > { %4278 = vmatprep.mubr.bf16.mxu0 %v3291_v34  ;;  %5385 = vmatprep.mubr.bf16.mxu1 %v3291_v34  ;;  %v1140_v34 = vld [vmem:[%s8317_s8 + $0x15d8] sm:$0xff] }
 0x62e   : > { %4249 = vmatpush1.bf16.msra.mxu0 %v2637_v41  ;;  %5356 = vmatpush1.bf16.msra.mxu1 %v2639_v40  ;;  %v2677_v41 = vunpack.c.h.s8.bf16 %v1133_v0  ;;  %v2679_v40 = vunpack.c.h.s8.bf16 %v1135_v30 }
 0x62f   : > { %4250 = vmatprep.subr.bf16.mxu0 %v2642_v60  ;;  %5357 = vmatprep.subr.bf16.mxu1 %v2644_v42  ;;  %v2682_v60 = vunpack.c.l.s8.bf16 %v1138_v55  ;;  %v2684_v42 = vunpack.c.l.s8.bf16 %v1140_v34 }
 0x632   : > { %4251 = vmatpush1.bf16.msra.mxu0 %v2641_v63  ;;  %5358 = vmatpush1.bf16.msra.mxu1 %v2643_v47  ;;  %v2681_v63 = vunpack.c.l.s8.bf16 %v1137_v44  ;;  %v2683_v47 = vunpack.c.l.s8.bf16 %v1139_v46 }
 0x633   : > { %4252 = vmatprep.subr.bf16.mxu0 %v2646_v48  ;;  %5359 = vmatprep.subr.bf16.mxu1 %v2648_v49  ;;  %v2686_v48 = vunpack.c.h.s8.bf16 %v1138_v55  ;;  %v2688_v49 = vunpack.c.h.s8.bf16 %v1140_v34 }
 0x636   : > { %4253 = vmatpush1.bf16.msra.mxu0 %v2645_v61  ;;  %5360 = vmatpush1.bf16.msra.mxu1 %v2647_v54  ;;  %v2685_v61 = vunpack.c.h.s8.bf16 %v1137_v44  ;;  %v2687_v54 = vunpack.c.h.s8.bf16 %v1139_v46 }
 0x637   : > { %4254 = vmatprep.subr.bf16.mxu0 %v2650_v7  ;;  %5361 = vmatprep.subr.bf16.mxu1 %v2652_v4  ;;  %v2690_v7 = vunpack.c.l.s8.bf16 %v1142_v50  ;;  %v2692_v4 = vunpack.c.l.s8.bf16 %v1144_v52 }
 0x63a   : > { %4255 = vmatpush1.bf16.msra.mxu0 %v2649_v20  ;;  %5362 = vmatpush1.bf16.msra.mxu1 %v2651_v9  ;;  %v3244_v20 = vcombine.high %v9207_v38, %v9207_v38  ;;  %v2689_v9 = vunpack.c.l.s8.bf16 %v1141_v56  ;;  %v2698_v38 = vunpack.c.l.s8.bf16 %v1146_v32 }
 0x63b   : > { %4256 = vmatprep.subr.bf16.mxu0 %v2654_v28  ;;  %5363 = vmatprep.subr.bf16.mxu1 %v2656_v62  ;;  %v2691_v28 = vunpack.c.l.s8.bf16 %v1143_v59  ;;  %v2694_v62 = vunpack.c.h.s8.bf16 %v1142_v50 }
 0x63e   : > { %4257 = vmatpush1.bf16.msra.mxu0 %v2653_v19  ;;  %5364 = vmatpush1.bf16.msra.mxu1 %v2655_v1  ;;  %v1148_v19 = vld [vmem:[%s8317_s8 + $0x1618] sm:$0xff]  ;;  %v9299_v1 = vrot.slane %v3244_v20, %v8354_v35 }
 0x63f   : > { %4258 = vmatprep.subr.bf16.mxu0 %v2658_v51  ;;  %5365 = vmatprep.subr.bf16.mxu1 %v2660_v2  ;;  %v2693_v51 = vunpack.c.h.s8.bf16 %v1141_v56  ;;  %v2695_v2 = vunpack.c.h.s8.bf16 %v1143_v59  ;;  %v2700_v23 = vunpack.c.l.s8.bf16 %v1148_v19 }
 0x642   : > { %4259 = vmatpush1.bf16.msra.mxu0 %v2657_v22  ;;  %5366 = vmatpush1.bf16.msra.mxu1 %v2659_v6  ;;  %v1147_v22 = vld [vmem:[%s8317_s8 + $0x1610] sm:$0xff]  ;;  %v3260_v6 = vcombine.high %v9299_v1, %v9299_v1 }
 0x643   : > { %4260 = vmatprep.subr.bf16.mxu0 %v2662_v8  ;;  %5367 = vmatprep.subr.bf16.mxu1 %v2664_v10  ;;  %v3289_v8 = vcombine.high %v9260_v53, %v9260_v53  ;;  %v2697_v10 = vunpack.c.l.s8.bf16 %v1145_v5  ;;  %v2699_v27 = vunpack.c.l.s8.bf16 %v1147_v22  ;;  %v2701_v53 = vunpack.c.h.s8.bf16 %v1145_v5 }
 0x644   : > { %v2703_v16 = vunpack.c.h.s8.bf16 %v1147_v22 }
 0x646   : > { %4261 = vmatpush1.bf16.msra.mxu0 %v2661_v12  ;;  %5368 = vmatpush1.bf16.msra.mxu1 %v2663_v14  ;;  %v2704_v12 = vunpack.c.h.s8.bf16 %v1148_v19  ;;  %v1150_v14 = vld [vmem:[%s8317_s8 + $0x1628] sm:$0xff] }
 0x647   : > { %4262 = vmatprep.subr.bf16.mxu0 %v2666_v15  ;;  %5369 = vmatprep.subr.bf16.mxu1 %v2668_v24  ;;  %v1152_v15 = vld [vmem:[%s8317_s8 + $0x1638] sm:$0xff]  ;;  %v9310_v24 = vrot.slane %v3260_v6, %v8354_v35  ;;  %v2706_v37 = vunpack.c.l.s8.bf16 %v1150_v14  ;;  %v2710_v39 = vunpack.c.h.s8.bf16 %v1150_v14  ;;  %v1165_v6 = vld [vmem:[%s8317_s8 + $0x16a0] sm:$0xff]  ;;  %v1170_v14 = vld [vmem:[%s8317_s8 + $0x16c8] sm:$0xff] }
 0x64a   : > { %4263 = vmatpush1.bf16.msra.mxu0 %v2665_v17  ;;  %5370 = vmatpush1.bf16.msra.mxu1 %v2667_v18  ;;  %v2708_v17 = vunpack.c.l.s8.bf16 %v1152_v15  ;;  %v1149_v18 = vld [vmem:[%s8317_s8 + $0x1620] sm:$0xff] }
 0x64b   : > { %4264 = vmatprep.subr.bf16.mxu0 %v2670_v29  ;;  %5371 = vmatprep.subr.bf16.mxu1 %v2672_v21  ;;  %v1151_v29 = vld [vmem:[%s8317_s8 + $0x1630] sm:$0xff]  ;;  %v2705_v21 = vunpack.c.l.s8.bf16 %v1149_v18 }
 0x64c   : > { %v2707_v43 = vunpack.c.l.s8.bf16 %v1151_v29  ;;  %v2711_v0 = vunpack.c.h.s8.bf16 %v1151_v29  ;;  %v1171_v29 = vld [vmem:[%s8317_s8 + $0x16d0] sm:$0xff] }
 0x64e   : > { %4265 = vmatpush1.bf16.msra.mxu0 %v2669_v36  ;;  %5372 = vmatpush1.bf16.msra.mxu1 %v2671_v25  ;;  %v2712_v36 = vunpack.c.h.s8.bf16 %v1152_v15  ;;  %v1154_v25 = vld [vmem:[%s8317_s8 + $0x1648] sm:$0xff]  ;;  %v1172_v15 = vld [vmem:[%s8317_s8 + $0x16d8] sm:$0xff] }
 0x64f   : > { %4266 = vmatprep.subr.bf16.mxu0 %v2674_v58  ;;  %5373 = vmatprep.subr.bf16.mxu1 %v2676_v45  ;;  %v1156_v58 = vld [vmem:[%s8317_s8 + $0x1658] sm:$0xff]  ;;  %v2709_v45 = vunpack.c.h.s8.bf16 %v1149_v18  ;;  %v2714_v30 = vunpack.c.l.s8.bf16 %v1154_v25  ;;  %v2718_v34 = vunpack.c.h.s8.bf16 %v1154_v25  ;;  %v1169_v18 = vld [vmem:[%s8317_s8 + $0x16c0] sm:$0xff]  ;;  %v1174_v25 = vld [vmem:[%s8317_s8 + $0x16e8] sm:$0xff] }
 0x652   : > { %4267 = vmatpush1.bf16.msra.mxu0 %v2673_v31  ;;  %5374 = vmatpush1.bf16.msra.mxu1 %v2675_v3  ;;  %v2716_v31 = vunpack.c.l.s8.bf16 %v1156_v58  ;;  %v1153_v3 = vld [vmem:[%s8317_s8 + $0x1640] sm:$0xff] }
 0x653   : > { %4268 = vmatprep.subr.bf16.mxu0 %v2678_v57  ;;  %5375 = vmatprep.subr.bf16.mxu1 %v2680_v33  ;;  %v1155_v57 = vld [vmem:[%s8317_s8 + $0x1650] sm:$0xff]  ;;  %v2713_v33 = vunpack.c.l.s8.bf16 %v1153_v3 }
 0x654   : > { %v2715_v55 = vunpack.c.l.s8.bf16 %v1155_v57  ;;  %v2719_v44 = vunpack.c.h.s8.bf16 %v1155_v57  ;;  %v1175_v57 = vld [vmem:[%s8317_s8 + $0x16f0] sm:$0xff] }
 0x656   : > { %4269 = vmatpush1.bf16.msra.mxu0 %v2677_v41  ;;  %5376 = vmatpush1.bf16.msra.mxu1 %v2679_v40  ;;  %v2720_v41 = vunpack.c.h.s8.bf16 %v1156_v58  ;;  %v1158_v40 = vld [vmem:[%s8317_s8 + $0x1668] sm:$0xff]  ;;  %v1176_v58 = vld [vmem:[%s8317_s8 + $0x16f8] sm:$0xff] }
 0x657   : > { %4270 = vmatprep.subr.bf16.mxu0 %v2682_v60  ;;  %5377 = vmatprep.subr.bf16.mxu1 %v2684_v42  ;;  %v1160_v60 = vld [vmem:[%s8317_s8 + $0x1678] sm:$0xff]  ;;  %v2717_v42 = vunpack.c.h.s8.bf16 %v1153_v3  ;;  %v2722_v46 = vunpack.c.l.s8.bf16 %v1158_v40  ;;  %v2726_v52 = vunpack.c.h.s8.bf16 %v1158_v40  ;;  %v1173_v3 = vld [vmem:[%s8317_s8 + $0x16e0] sm:$0xff]  ;;  %v1178_v40 = vld [vmem:[%s8317_s8 + $0x1708] sm:$0xff] }
 0x65a   : > { %4271 = vmatpush1.bf16.msra.mxu0 %v2681_v63  ;;  %5378 = vmatpush1.bf16.msra.mxu1 %v2683_v47  ;;  %v2724_v63 = vunpack.c.l.s8.bf16 %v1160_v60  ;;  %v1157_v47 = vld [vmem:[%s8317_s8 + $0x1660] sm:$0xff] }
 0x65b   : > { %4272 = vmatprep.subr.bf16.mxu0 %v2686_v48  ;;  %5379 = vmatprep.subr.bf16.mxu1 %v2688_v49  ;;  %v1159_v48 = vld [vmem:[%s8317_s8 + $0x1670] sm:$0xff]  ;;  %v2721_v49 = vunpack.c.l.s8.bf16 %v1157_v47 }
 0x65c   : > { %v2723_v50 = vunpack.c.l.s8.bf16 %v1159_v48  ;;  %v2727_v56 = vunpack.c.h.s8.bf16 %v1159_v48  ;;  %v1179_v48 = vld [vmem:[%s8317_s8 + $0x1710] sm:$0xff] }
 0x65e   : > { %4273 = vmatpush1.bf16.msra.mxu0 %v2685_v61  ;;  %5380 = vmatpush1.bf16.msra.mxu1 %v2687_v54  ;;  %v2728_v61 = vunpack.c.h.s8.bf16 %v1160_v60  ;;  %v1162_v54 = vld [vmem:[%s8317_s8 + $0x1688] sm:$0xff]  ;;  %v1180_v60 = vld [vmem:[%s8317_s8 + $0x1718] sm:$0xff] }
 0x65f   : > { %4274 = vmatprep.subr.bf16.mxu0 %v2690_v7  ;;  %5381 = vmatprep.subr.bf16.mxu1 %v2692_v4  ;;  %v1164_v7 = vld [vmem:[%s8317_s8 + $0x1698] sm:$0xff]  ;;  %v2725_v4 = vunpack.c.h.s8.bf16 %v1157_v47  ;;  %v2730_v59 = vunpack.c.l.s8.bf16 %v1162_v54  ;;  %v2734_v32 = vunpack.c.h.s8.bf16 %v1162_v54  ;;  %v1177_v47 = vld [vmem:[%s8317_s8 + $0x1700] sm:$0xff]  ;;  %v2768_v54 = vunpack.c.h.s8.bf16 %v1180_v60 }
 0x660   : > { %v2732_v20 = vunpack.c.l.s8.bf16 %v1164_v7  ;;  %v2736_v19 = vunpack.c.h.s8.bf16 %v1164_v7  ;;  %v1182_v7 = vld [vmem:[%s8317_s8 + $0x1728] sm:$0xff] }
 0x662   : > { %4275 = vmatpush1.bf16.msra.mxu0 %v2689_v9  ;;  %5382 = vmatpush1.bf16.msra.mxu1 %v2691_v28  ;;  %v1161_v9 = vld [vmem:[%s8317_s8 + $0x1680] sm:$0xff]  ;;  %v1163_v28 = vld [vmem:[%s8317_s8 + $0x1690] sm:$0xff] }
 0x663   : > { %4276 = vmatprep.subr.bf16.mxu0 %v2694_v62  ;;  %5383 = vmatprep.subr.bf16.mxu1 %v2696_v13  ;;  %v2729_v62 = vunpack.c.l.s8.bf16 %v1161_v9  ;;  %v2731_v13 = vunpack.c.l.s8.bf16 %v1163_v28 }
 0x666   : > { %4277 = vmatpush1.bf16.msra.mxu0 %v2693_v51  ;;  %5384 = vmatpush1.bf16.msra.mxu1 %v2695_v2  ;;  %v1166_v51 = vld [vmem:[%s8317_s8 + $0x16a8] sm:$0xff]  ;;  %v1168_v2 = vld [vmem:[%s8317_s8 + $0x16b8] sm:$0xff] }
 0x667   : > { %4287 = vmatprep.subr.bf16.mxu0 %v2698_v38  ;;  %5394 = vmatprep.subr.bf16.mxu1 %v2700_v23  ;;  %v2733_v38 = vunpack.c.h.s8.bf16 %v1161_v9  ;;  %v2735_v23 = vunpack.c.h.s8.bf16 %v1163_v28  ;;  %v2738_v5 = vunpack.c.l.s8.bf16 %v1166_v51  ;;  %v2740_v22 = vunpack.c.l.s8.bf16 %v1168_v2  ;;  %v1181_v28 = vld [vmem:[%s8317_s8 + $0x1720] sm:$0xff] }
 0x669   : > { %4279 = vmatmul.mubr.bf16.vlgmr.msra.gmra.mrb[0].mxu0 %v3289_v8  ;;  %5386 = vmatmul.mubr.bf16.vlgmr.msra.gmra.mrb[0].mxu1 %v3289_v8  ;;  %v1167_v8 = vld [vmem:[%s8317_s8 + $0x16b0] sm:$0xff] }
 0x66a   : > { %4288 = vmatpush1.bf16.msra.mxu0 %v2697_v10  ;;  %5395 = vmatpush1.bf16.msra.mxu1 %v2699_v27  ;;  %v2737_v10 = vunpack.c.l.s8.bf16 %v1165_v6  ;;  %v2739_v27 = vunpack.c.l.s8.bf16 %v1167_v8 }
 0x66b   : > { %4289 = vmatprep.subr.bf16.mxu0 %v2702_v11  ;;  %5396 = vmatprep.subr.bf16.mxu1 %v2704_v12  ;;  %v2742_v11 = vunpack.c.h.s8.bf16 %v1166_v51  ;;  %v2744_v12 = vunpack.c.h.s8.bf16 %v1168_v2  ;;  %v1186_v51 = vld [vmem:[%s8317_s8 + $0x1748] sm:$0xff]  ;;  %v1188_v2 = vld [vmem:[%s8317_s8 + $0x1758] sm:$0xff] }
 0x66c   : > { %4319 = vmatprep.mubr.bf16.mxu0 %v9310_v24  ;;  %5426 = vmatprep.mubr.bf16.mxu1 %v9310_v24 }
 0x66e   : > { %4290 = vmatpush1.bf16.msra.mxu0 %v2701_v53  ;;  %5397 = vmatpush1.bf16.msra.mxu1 %v2703_v16  ;;  %v2741_v53 = vunpack.c.h.s8.bf16 %v1165_v6  ;;  %v2743_v16 = vunpack.c.h.s8.bf16 %v1167_v8  ;;  %v1185_v6 = vld [vmem:[%s8317_s8 + $0x1740] sm:$0xff]  ;;  %v1187_v8 = vld [vmem:[%s8317_s8 + $0x1750] sm:$0xff] }
 0x66f   : > { %4291 = vmatprep.subr.bf16.mxu0 %v2706_v37  ;;  %5398 = vmatprep.subr.bf16.mxu1 %v2708_v17  ;;  %v2746_v37 = vunpack.c.l.s8.bf16 %v1170_v14  ;;  %v2748_v17 = vunpack.c.l.s8.bf16 %v1172_v15 }
 0x672   : > { %4292 = vmatpush1.bf16.msra.mxu0 %v2705_v21  ;;  %5399 = vmatpush1.bf16.msra.mxu1 %v2707_v43  ;;  %v2745_v21 = vunpack.c.l.s8.bf16 %v1169_v18  ;;  %v2747_v43 = vunpack.c.l.s8.bf16 %v1171_v29 }
 0x673   : > { %4293 = vmatprep.subr.bf16.mxu0 %v2710_v39  ;;  %5400 = vmatprep.subr.bf16.mxu1 %v2712_v36  ;;  %v2750_v39 = vunpack.c.h.s8.bf16 %v1170_v14  ;;  %v2752_v36 = vunpack.c.h.s8.bf16 %v1172_v15  ;;  %v1190_v14 = vld [vmem:[%s8317_s8 + $0x1768] sm:$0xff]  ;;  %v1192_v15 = vld [vmem:[%s8317_s8 + $0x1778] sm:$0xff] }
 0x676   : > { %4294 = vmatpush1.bf16.msra.mxu0 %v2709_v45  ;;  %5401 = vmatpush1.bf16.msra.mxu1 %v2711_v0  ;;  %v2749_v45 = vunpack.c.h.s8.bf16 %v1169_v18  ;;  %v2751_v0 = vunpack.c.h.s8.bf16 %v1171_v29  ;;  %v1189_v18 = vld [vmem:[%s8317_s8 + $0x1760] sm:$0xff]  ;;  %v1191_v29 = vld [vmem:[%s8317_s8 + $0x1770] sm:$0xff] }
 0x677   : > { %4295 = vmatprep.subr.bf16.mxu0 %v2714_v30  ;;  %5402 = vmatprep.subr.bf16.mxu1 %v2716_v31  ;;  %v2754_v30 = vunpack.c.l.s8.bf16 %v1174_v25  ;;  %v2756_v31 = vunpack.c.l.s8.bf16 %v1176_v58 }
 0x67a   : > { %4296 = vmatpush1.bf16.msra.mxu0 %v2713_v33  ;;  %5403 = vmatpush1.bf16.msra.mxu1 %v2715_v55  ;;  %v2753_v33 = vunpack.c.l.s8.bf16 %v1173_v3  ;;  %v2755_v55 = vunpack.c.l.s8.bf16 %v1175_v57 }
 0x67b   : > { %4297 = vmatprep.subr.bf16.mxu0 %v2718_v34  ;;  %5404 = vmatprep.subr.bf16.mxu1 %v2720_v41  ;;  %v2758_v34 = vunpack.c.h.s8.bf16 %v1174_v25  ;;  %v2760_v41 = vunpack.c.h.s8.bf16 %v1176_v58  ;;  %v1194_v25 = vld [vmem:[%s8317_s8 + $0x1788] sm:$0xff]  ;;  %v1196_v58 = vld [vmem:[%s8317_s8 + $0x1798] sm:$0xff] }
 0x67e   : > { %4298 = vmatpush1.bf16.msra.mxu0 %v2717_v42  ;;  %5405 = vmatpush1.bf16.msra.mxu1 %v2719_v44  ;;  %v2757_v42 = vunpack.c.h.s8.bf16 %v1173_v3  ;;  %v2759_v44 = vunpack.c.h.s8.bf16 %v1175_v57  ;;  %v1193_v3 = vld [vmem:[%s8317_s8 + $0x1780] sm:$0xff]  ;;  %v1195_v57 = vld [vmem:[%s8317_s8 + $0x1790] sm:$0xff] }
 0x67f   : > { %4299 = vmatprep.subr.bf16.mxu0 %v2722_v46  ;;  %5406 = vmatprep.subr.bf16.mxu1 %v2724_v63  ;;  %v2762_v46 = vunpack.c.l.s8.bf16 %v1178_v40  ;;  %v2764_v63 = vunpack.c.l.s8.bf16 %v1180_v60  ;;  %v1200_v60 = vld [vmem:[%s8317_s8 + $0x17b8] sm:$0xff] }
 0x682   : > { %4300 = vmatpush1.bf16.msra.mxu0 %v2721_v49  ;;  %5407 = vmatpush1.bf16.msra.mxu1 %v2723_v50  ;;  %v9346_v49 = vrot.slane %v9299_v1, %v8354_v35  ;;  %v2761_v50 = vunpack.c.l.s8.bf16 %v1177_v47  ;;  %v2765_v1 = vunpack.c.h.s8.bf16 %v1177_v47  ;;  %v1197_v47 = vld [vmem:[%s8317_s8 + $0x17a0] sm:$0xff] }
 0x683   : > { %4301 = vmatprep.subr.bf16.mxu0 %v2726_v52  ;;  %5408 = vmatprep.subr.bf16.mxu1 %v2728_v61  ;;  %v2763_v52 = vunpack.c.l.s8.bf16 %v1179_v48  ;;  %v2766_v61 = vunpack.c.h.s8.bf16 %v1178_v40  ;;  %v1198_v40 = vld [vmem:[%s8317_s8 + $0x17a8] sm:$0xff] }
 0x686   : > { %4302 = vmatpush1.bf16.msra.mxu0 %v2725_v4  ;;  %5409 = vmatpush1.bf16.msra.mxu1 %v2727_v56  ;;  %v1184_v4 = vld [vmem:[%s8317_s8 + $0x1738] sm:$0xff]  ;;  %v3292_v56 = vcombine.high %v9310_v24, %v9310_v24  ;;  %v2769_v24 = vunpack.c.l.s8.bf16 %v1181_v28 }
 0x687   : > { %4303 = vmatprep.subr.bf16.mxu0 %v2730_v59  ;;  %5410 = vmatprep.subr.bf16.mxu1 %v2732_v20  ;;  %v2767_v59 = vunpack.c.h.s8.bf16 %v1179_v48  ;;  %v2770_v20 = vunpack.c.l.s8.bf16 %v1182_v7  ;;  %v2772_v9 = vunpack.c.l.s8.bf16 %v1184_v4  ;;  %v1199_v48 = vld [vmem:[%s8317_s8 + $0x17b0] sm:$0xff] }
 0x68a   : > { %4304 = vmatpush1.bf16.msra.mxu0 %v2729_v62  ;;  %5411 = vmatpush1.bf16.msra.mxu1 %v2731_v13  ;;  %v1183_v62 = vld [vmem:[%s8317_s8 + $0x1730] sm:$0xff] }
 0x68b   : > { %4305 = vmatprep.subr.bf16.mxu0 %v2734_v32  ;;  %5412 = vmatprep.subr.bf16.mxu1 %v2736_v19  ;;  %v2771_v13 = vunpack.c.l.s8.bf16 %v1183_v62  ;;  %v2774_v32 = vunpack.c.h.s8.bf16 %v1182_v7  ;;  %v2776_v19 = vunpack.c.h.s8.bf16 %v1184_v4  ;;  %v1202_v7 = vld [vmem:[%s8317_s8 + $0x17c8] sm:$0xff]  ;;  %v1204_v4 = vld [vmem:[%s8317_s8 + $0x17d8] sm:$0xff] }
 0x68e   : > { %4306 = vmatpush1.bf16.msra.mxu0 %v2733_v38  ;;  %5413 = vmatpush1.bf16.msra.mxu1 %v2735_v23  ;;  %v2773_v38 = vunpack.c.h.s8.bf16 %v1181_v28  ;;  %v2775_v23 = vunpack.c.h.s8.bf16 %v1183_v62  ;;  %v1203_v28 = vld [vmem:[%s8317_s8 + $0x17d0] sm:$0xff] }
 0x68f   : > { %4307 = vmatprep.subr.bf16.mxu0 %v2738_v5  ;;  %5414 = vmatprep.subr.bf16.mxu1 %v2740_v22  ;;  %v2778_v5 = vunpack.c.l.s8.bf16 %v1186_v51  ;;  %v2780_v22 = vunpack.c.l.s8.bf16 %v1188_v2 }
 0x692   : > { %4308 = vmatpush1.bf16.msra.mxu0 %v2737_v10  ;;  %5415 = vmatpush1.bf16.msra.mxu1 %v2739_v27  ;;  %v2777_v10 = vunpack.c.l.s8.bf16 %v1185_v6  ;;  %v2779_v27 = vunpack.c.l.s8.bf16 %v1187_v8 }
 0x693   : > { %4309 = vmatprep.subr.bf16.mxu0 %v2742_v11  ;;  %5416 = vmatprep.subr.bf16.mxu1 %v2744_v12  ;;  %v2782_v11 = vunpack.c.h.s8.bf16 %v1186_v51  ;;  %v2784_v12 = vunpack.c.h.s8.bf16 %v1188_v2  ;;  %v1208_v51 = vld [vmem:[%s8317_s8 + $0x17f8] sm:$0xff] }
 0x696   : > { %4310 = vmatpush1.bf16.msra.mxu0 %v2741_v53  ;;  %5417 = vmatpush1.bf16.msra.mxu1 %v2743_v16  ;;  %v2781_v53 = vunpack.c.h.s8.bf16 %v1185_v6  ;;  %v2783_v16 = vunpack.c.h.s8.bf16 %v1187_v8  ;;  %v1207_v6 = vld [vmem:[%s8317_s8 + $0x17f0] sm:$0xff]  ;;  %v9380_v8 = vld [vmem:[#allocation3 + $0x30] sm:$0x1f] }
 0x697   : > { %4311 = vmatprep.subr.bf16.mxu0 %v2746_v37  ;;  %5418 = vmatprep.subr.bf16.mxu1 %v2748_v17  ;;  %v2786_v37 = vunpack.c.l.s8.bf16 %v1190_v14  ;;  %v2788_v17 = vunpack.c.l.s8.bf16 %v1192_v15 }
 0x69a   : > { %4312 = vmatpush1.bf16.msra.mxu0 %v2745_v21  ;;  %5419 = vmatpush1.bf16.msra.mxu1 %v2747_v43  ;;  %v2785_v21 = vunpack.c.l.s8.bf16 %v1189_v18  ;;  %v2787_v43 = vunpack.c.l.s8.bf16 %v1191_v29 }
 0x69b   : > { %4313 = vmatprep.subr.bf16.mxu0 %v2750_v39  ;;  %5420 = vmatprep.subr.bf16.mxu1 %v2752_v36  ;;  %v2790_v39 = vunpack.c.h.s8.bf16 %v1190_v14  ;;  %v2792_v36 = vunpack.c.h.s8.bf16 %v1192_v15  ;;  %v1210_v14 = vld [vmem:[%s8317_s8 + $0x1808] sm:$0xff]  ;;  %v1212_v15 = vld [vmem:[%s8317_s8 + $0x1818] sm:$0xff] }
 0x69e   : > { %4314 = vmatpush1.bf16.msra.mxu0 %v2749_v45  ;;  %5421 = vmatpush1.bf16.msra.mxu1 %v2751_v0  ;;  %v2789_v45 = vunpack.c.h.s8.bf16 %v1189_v18  ;;  %v2791_v0 = vunpack.c.h.s8.bf16 %v1191_v29  ;;  %v2828_v18 = vunpack.c.l.s8.bf16 %v1212_v15  ;;  %v1209_v29 = vld [vmem:[%s8317_s8 + $0x1800] sm:$0xff] }
 0x69f   : > { %4315 = vmatprep.subr.bf16.mxu0 %v2754_v30  ;;  %5422 = vmatprep.subr.bf16.mxu1 %v2756_v31  ;;  %v2794_v30 = vunpack.c.l.s8.bf16 %v1194_v25  ;;  %v2796_v31 = vunpack.c.l.s8.bf16 %v1196_v58 }
 0x6a2   : > { %4316 = vmatpush1.bf16.msra.mxu0 %v2753_v33  ;;  %5423 = vmatpush1.bf16.msra.mxu1 %v2755_v55  ;;  %v2793_v33 = vunpack.c.l.s8.bf16 %v1193_v3  ;;  %v2795_v55 = vunpack.c.l.s8.bf16 %v1195_v57 }
 0x6a3   : > { %4317 = vmatprep.subr.bf16.mxu0 %v2758_v34  ;;  %5424 = vmatprep.subr.bf16.mxu1 %v2760_v41  ;;  %v2798_v34 = vunpack.c.h.s8.bf16 %v1194_v25  ;;  %v2800_v41 = vunpack.c.h.s8.bf16 %v1196_v58  ;;  %v2830_v58 = vunpack.c.h.s8.bf16 %v1210_v14 }
 0x6a6   : > { %4318 = vmatpush1.bf16.msra.mxu0 %v2757_v42  ;;  %5425 = vmatpush1.bf16.msra.mxu1 %v2759_v44  ;;  %v2797_v42 = vunpack.c.h.s8.bf16 %v1193_v3  ;;  %v2799_v44 = vunpack.c.h.s8.bf16 %v1195_v57 }
 0x6a7   : > { %4328 = vmatprep.subr.bf16.mxu0 %v2762_v46  ;;  %5435 = vmatprep.subr.bf16.mxu1 %v2764_v63  ;;  %v2802_v46 = vunpack.c.l.s8.bf16 %v1198_v40  ;;  %v2804_v63 = vunpack.c.l.s8.bf16 %v1200_v60 }
 0x6a9   : > { %4320 = vmatmul.mubr.bf16.vlgmr.msra.gmra.mrb[0].mxu0 %v9346_v49  ;;  %5427 = vmatmul.mubr.bf16.vlgmr.msra.gmra.mrb[0].mxu1 %v9346_v49 }
 0x6aa   : > { %4329 = vmatpush1.bf16.msra.mxu0 %v2761_v50  ;;  %5436 = vmatpush1.bf16.msra.mxu1 %v2763_v52  ;;  %v2801_v50 = vunpack.c.l.s8.bf16 %v1197_v47  ;;  %v2803_v52 = vunpack.c.l.s8.bf16 %v1199_v48 }
 0x6ab   : > { %4330 = vmatprep.subr.bf16.mxu0 %v2766_v61  ;;  %5437 = vmatprep.subr.bf16.mxu1 %v2768_v54  ;;  %v2806_v61 = vunpack.c.h.s8.bf16 %v1198_v40  ;;  %v2808_v54 = vunpack.c.h.s8.bf16 %v1200_v60 }
 0x6ac   : > { %4360 = vmatprep.mubr.bf16.mxu0 %v3292_v56  ;;  %5467 = vmatprep.mubr.bf16.mxu1 %v3292_v56  ;;  %v2805_v56 = vunpack.c.h.s8.bf16 %v1197_v47 }
 0x6ae   : > { %4331 = vmatpush1.bf16.msra.mxu0 %v2765_v1  ;;  %5438 = vmatpush1.bf16.msra.mxu1 %v2767_v59  ;;  %v2807_v1 = vunpack.c.h.s8.bf16 %v1199_v48  ;;  %v2810_v59 = vunpack.c.l.s8.bf16 %v1202_v7 }
 0x6af   : > { %4332 = vmatprep.subr.bf16.mxu0 %v2770_v20  ;;  %5439 = vmatprep.subr.bf16.mxu1 %v2772_v9  ;;  %v2812_v20 = vunpack.c.l.s8.bf16 %v1204_v4  ;;  %v1201_v9 = vld [vmem:[%s8317_s8 + $0x17c0] sm:$0xff] }
 0x6b0   : > { %v2809_v62 = vunpack.c.l.s8.bf16 %v1201_v9  ;;  %v2813_v2 = vunpack.c.h.s8.bf16 %v1201_v9 }
 0x6b2   : > { %4333 = vmatpush1.bf16.msra.mxu0 %v2769_v24  ;;  %5440 = vmatpush1.bf16.msra.mxu1 %v2771_v13  ;;  %v2811_v24 = vunpack.c.l.s8.bf16 %v1203_v28  ;;  %v2814_v13 = vunpack.c.h.s8.bf16 %v1202_v7 }
 0x6b3   : > { %4334 = vmatprep.subr.bf16.mxu0 %v2774_v32  ;;  %5441 = vmatprep.subr.bf16.mxu1 %v2776_v19  ;;  %v2816_v32 = vunpack.c.h.s8.bf16 %v1204_v4  ;;  %v1206_v19 = vld [vmem:[%s8317_s8 + $0x17e8] sm:$0xff] }
 0x6b6   : > { %4335 = vmatpush1.bf16.msra.mxu0 %v2773_v38  ;;  %5442 = vmatpush1.bf16.msra.mxu1 %v2775_v23  ;;  %v2815_v38 = vunpack.c.h.s8.bf16 %v1203_v28  ;;  %v2818_v23 = vunpack.c.l.s8.bf16 %v1206_v19 }
 0x6b7   : > { %4336 = vmatprep.subr.bf16.mxu0 %v2778_v5  ;;  %5443 = vmatprep.subr.bf16.mxu1 %v2780_v22  ;;  %v2820_v5 = vunpack.c.l.s8.bf16 %v1208_v51  ;;  %v1205_v22 = vld [vmem:[%s8317_s8 + $0x17e0] sm:$0xff] }
 0x6ba   : > { %4337 = vmatpush1.bf16.msra.mxu0 %v2777_v10  ;;  %5444 = vmatpush1.bf16.msra.mxu1 %v2779_v27  ;;  %v2817_v10 = vunpack.c.l.s8.bf16 %v1205_v22  ;;  %v2819_v27 = vunpack.c.l.s8.bf16 %v1207_v6 }
 0x6bb   : > { %4338 = vmatprep.subr.bf16.mxu0 %v2782_v11  ;;  %5445 = vmatprep.subr.bf16.mxu1 %v2784_v12  ;;  %v2822_v11 = vunpack.c.h.s8.bf16 %v1206_v19  ;;  %v2824_v12 = vunpack.c.h.s8.bf16 %v1208_v51 }
 0x6be   : > { %4339 = vmatpush1.bf16.msra.mxu0 %v2781_v53  ;;  %5446 = vmatpush1.bf16.msra.mxu1 %v2783_v16  ;;  %v9386_v53 = vrot.slane %v9380_v8, %v8354_v35  ;;  %v2821_v16 = vunpack.c.h.s8.bf16 %v1205_v22 }
 0x6bf   : > { %4340 = vmatprep.subr.bf16.mxu0 %v2786_v37  ;;  %5447 = vmatprep.subr.bf16.mxu1 %v2788_v17  ;;  %v2823_v37 = vunpack.c.h.s8.bf16 %v1207_v6  ;;  %v2826_v17 = vunpack.c.l.s8.bf16 %v1210_v14 }
 0x6c2   : > { %4341 = vmatpush1.bf16.msra.mxu0 %v2785_v21  ;;  %5448 = vmatpush1.bf16.msra.mxu1 %v2787_v43  ;;  %v1211_v21 = vld [vmem:[%s8317_s8 + $0x1810] sm:$0xff]  ;;  %v3308_v43 = vcombine.high %v9386_v53, %v9386_v53 }
 0x6c3   : > { %4342 = vmatprep.subr.bf16.mxu0 %v2790_v39  ;;  %5449 = vmatprep.subr.bf16.mxu1 %v2792_v36  ;;  %v3290_v39 = vcombine.high %v9346_v49, %v9346_v49  ;;  %v2825_v36 = vunpack.c.l.s8.bf16 %v1209_v29  ;;  %v2827_v25 = vunpack.c.l.s8.bf16 %v1211_v21  ;;  %v2829_v49 = vunpack.c.h.s8.bf16 %v1209_v29 }
 0x6c4   : > { %v2831_v3 = vunpack.c.h.s8.bf16 %v1211_v21 }
 0x6c6   : > { %4343 = vmatpush1.bf16.msra.mxu0 %v2789_v45  ;;  %5450 = vmatpush1.bf16.msra.mxu1 %v2791_v0  ;;  %v2832_v45 = vunpack.c.h.s8.bf16 %v1212_v15  ;;  %v1214_v0 = vld [vmem:[%s8317_s8 + $0x1828] sm:$0xff] }
 0x6c7   : > { %4344 = vmatprep.subr.bf16.mxu0 %v2794_v30  ;;  %5451 = vmatprep.subr.bf16.mxu1 %v2796_v31  ;;  %v1216_v30 = vld [vmem:[%s8317_s8 + $0x1838] sm:$0xff]  ;;  %v9397_v31 = vrot.slane %v3308_v43, %v8354_v35  ;;  %v2834_v57 = vunpack.c.l.s8.bf16 %v1214_v0  ;;  %v2838_v60 = vunpack.c.h.s8.bf16 %v1214_v0 }
 0x6ca   : > { %4345 = vmatpush1.bf16.msra.mxu0 %v2793_v33  ;;  %5452 = vmatpush1.bf16.msra.mxu1 %v2795_v55  ;;  %v2836_v33 = vunpack.c.l.s8.bf16 %v1216_v30  ;;  %v1213_v55 = vld [vmem:[%s8317_s8 + $0x1820] sm:$0xff] }
 0x6cb   : > { %4346 = vmatprep.subr.bf16.mxu0 %v2798_v34  ;;  %5453 = vmatprep.subr.bf16.mxu1 %v2800_v41  ;;  %v1215_v34 = vld [vmem:[%s8317_s8 + $0x1830] sm:$0xff]  ;;  %v2833_v41 = vunpack.c.l.s8.bf16 %v1213_v55 }
 0x6cc   : > { %v2835_v40 = vunpack.c.l.s8.bf16 %v1215_v34  ;;  %v2839_v47 = vunpack.c.h.s8.bf16 %v1215_v34  ;;  %v1233_v34 = vld [vmem:[%s8317_s8 + $0x18c0] sm:$0xff] }
 0x6ce   : > { %4347 = vmatpush1.bf16.msra.mxu0 %v2797_v42  ;;  %5454 = vmatpush1.bf16.msra.mxu1 %v2799_v44  ;;  %v2840_v42 = vunpack.c.h.s8.bf16 %v1216_v30  ;;  %v1218_v44 = vld [vmem:[%s8317_s8 + $0x1848] sm:$0xff] }
 0x6cf   : > { %4348 = vmatprep.subr.bf16.mxu0 %v2802_v46  ;;  %5455 = vmatprep.subr.bf16.mxu1 %v2804_v63  ;;  %v1220_v46 = vld [vmem:[%s8317_s8 + $0x1858] sm:$0xff]  ;;  %v2837_v63 = vunpack.c.h.s8.bf16 %v1213_v55  ;;  %v2842_v48 = vunpack.c.l.s8.bf16 %v1218_v44  ;;  %v2846_v4 = vunpack.c.h.s8.bf16 %v1218_v44  ;;  %v1234_v30 = vld [vmem:[%s8317_s8 + $0x18c8] sm:$0xff] }
 0x6d2   : > { %4349 = vmatpush1.bf16.msra.mxu0 %v2801_v50  ;;  %5456 = vmatpush1.bf16.msra.mxu1 %v2803_v52  ;;  %v2844_v50 = vunpack.c.l.s8.bf16 %v1220_v46  ;;  %v1217_v52 = vld [vmem:[%s8317_s8 + $0x1840] sm:$0xff] }
 0x6d3   : > { %4350 = vmatprep.subr.bf16.mxu0 %v2806_v61  ;;  %5457 = vmatprep.subr.bf16.mxu1 %v2808_v54  ;;  %v1219_v61 = vld [vmem:[%s8317_s8 + $0x1850] sm:$0xff]  ;;  %v2841_v54 = vunpack.c.l.s8.bf16 %v1217_v52 }
 0x6d4   : > { %v2843_v7 = vunpack.c.l.s8.bf16 %v1219_v61  ;;  %v2847_v9 = vunpack.c.h.s8.bf16 %v1219_v61  ;;  %v1237_v61 = vld [vmem:[%s8317_s8 + $0x18e0] sm:$0xff] }
 0x6d6   : > { %4351 = vmatpush1.bf16.msra.mxu0 %v2805_v56  ;;  %5458 = vmatpush1.bf16.msra.mxu1 %v2807_v1  ;;  %v2848_v56 = vunpack.c.h.s8.bf16 %v1220_v46  ;;  %v1222_v1 = vld [vmem:[%s8317_s8 + $0x1868] sm:$0xff] }
 0x6d7   : > { %4352 = vmatprep.subr.bf16.mxu0 %v2810_v59  ;;  %5459 = vmatprep.subr.bf16.mxu1 %v2812_v20  ;;  %v1224_v59 = vld [vmem:[%s8317_s8 + $0x1878] sm:$0xff]  ;;  %v2845_v20 = vunpack.c.h.s8.bf16 %v1217_v52  ;;  %v2850_v28 = vunpack.c.l.s8.bf16 %v1222_v1  ;;  %v2854_v51 = vunpack.c.h.s8.bf16 %v1222_v1  ;;  %v1238_v46 = vld [vmem:[%s8317_s8 + $0x18e8] sm:$0xff] }
 0x6da   : > { %4353 = vmatpush1.bf16.msra.mxu0 %v2809_v62  ;;  %5460 = vmatpush1.bf16.msra.mxu1 %v2811_v24  ;;  %v2852_v62 = vunpack.c.l.s8.bf16 %v1224_v59  ;;  %v1221_v24 = vld [vmem:[%s8317_s8 + $0x1860] sm:$0xff] }
 0x6db   : > { %4354 = vmatprep.subr.bf16.mxu0 %v2814_v13  ;;  %5461 = vmatprep.subr.bf16.mxu1 %v2816_v32  ;;  %v1223_v13 = vld [vmem:[%s8317_s8 + $0x1870] sm:$0xff]  ;;  %v2849_v32 = vunpack.c.l.s8.bf16 %v1221_v24 }
 0x6dc   : > { %v2851_v19 = vunpack.c.l.s8.bf16 %v1223_v13  ;;  %v2855_v22 = vunpack.c.h.s8.bf16 %v1223_v13  ;;  %v1241_v13 = vld [vmem:[%s8317_s8 + $0x1900] sm:$0xff] }
 0x6de   : > { %4355 = vmatpush1.bf16.msra.mxu0 %v2813_v2  ;;  %5462 = vmatpush1.bf16.msra.mxu1 %v2815_v38  ;;  %v2856_v2 = vunpack.c.h.s8.bf16 %v1224_v59  ;;  %v1226_v38 = vld [vmem:[%s8317_s8 + $0x1888] sm:$0xff] }
 0x6df   : > { %4356 = vmatprep.subr.bf16.mxu0 %v2818_v23  ;;  %5463 = vmatprep.subr.bf16.mxu1 %v2820_v5  ;;  %v1228_v23 = vld [vmem:[%s8317_s8 + $0x1898] sm:$0xff]  ;;  %v2853_v5 = vunpack.c.h.s8.bf16 %v1221_v24  ;;  %v2858_v6 = vunpack.c.l.s8.bf16 %v1226_v38  ;;  %v2862_v15 = vunpack.c.h.s8.bf16 %v1226_v38  ;;  %v1242_v59 = vld [vmem:[%s8317_s8 + $0x1908] sm:$0xff] }
 0x6e0   : > { %v2894_v38 = vunpack.c.h.s8.bf16 %v1242_v59 }
 0x6e2   : > { %4357 = vmatpush1.bf16.msra.mxu0 %v2817_v10  ;;  %5464 = vmatpush1.bf16.msra.mxu1 %v2819_v27  ;;  %v2860_v10 = vunpack.c.l.s8.bf16 %v1228_v23  ;;  %v1225_v27 = vld [vmem:[%s8317_s8 + $0x1880] sm:$0xff] }
 0x6e3   : > { %4358 = vmatprep.subr.bf16.mxu0 %v2822_v11  ;;  %5465 = vmatprep.subr.bf16.mxu1 %v2824_v12  ;;  %v1227_v11 = vld [vmem:[%s8317_s8 + $0x1890] sm:$0xff]  ;;  %v2857_v12 = vunpack.c.l.s8.bf16 %v1225_v27 }
 0x6e4   : > { %v2859_v14 = vunpack.c.l.s8.bf16 %v1227_v11  ;;  %v2863_v29 = vunpack.c.h.s8.bf16 %v1227_v11 }
 0x6e6   : > { %4359 = vmatpush1.bf16.msra.mxu0 %v2821_v16  ;;  %5466 = vmatpush1.bf16.msra.mxu1 %v2823_v37  ;;  %v2864_v16 = vunpack.c.h.s8.bf16 %v1228_v23  ;;  %v1230_v37 = vld [vmem:[%s8317_s8 + $0x18a8] sm:$0xff] }
 0x6e7   : > { %4369 = vmatprep.subr.bf16.mxu0 %v2826_v17  ;;  %5476 = vmatprep.subr.bf16.mxu1 %v2828_v18  ;;  %v1232_v17 = vld [vmem:[%s8317_s8 + $0x18b8] sm:$0xff]  ;;  %v2861_v18 = vunpack.c.h.s8.bf16 %v1225_v27  ;;  %v2866_v21 = vunpack.c.l.s8.bf16 %v1230_v37 }
 0x6e8   : > { %v2868_v43 = vunpack.c.l.s8.bf16 %v1232_v17  ;;  %v2872_v0 = vunpack.c.h.s8.bf16 %v1232_v17  ;;  %v1250_v17 = vld [vmem:[%s8317_s8 + $0x1948] sm:$0xff] }
 0x6e9   : > { %4361 = vmatmul.mubr.bf16.vlgmr.msra.gmra.mrb[0].mxu0 %v3290_v39  ;;  %5468 = vmatmul.mubr.bf16.vlgmr.msra.gmra.mrb[0].mxu1 %v3290_v39  ;;  %v1229_v39 = vld [vmem:[%s8317_s8 + $0x18a0] sm:$0xff] }
 0x6ea   : > { %4370 = vmatpush1.bf16.msra.mxu0 %v2825_v36  ;;  %5477 = vmatpush1.bf16.msra.mxu1 %v2827_v25  ;;  %v1231_v36 = vld [vmem:[%s8317_s8 + $0x18b0] sm:$0xff]  ;;  %v2865_v25 = vunpack.c.l.s8.bf16 %v1229_v39 }
 0x6eb   : > { %4371 = vmatprep.subr.bf16.mxu0 %v2830_v58  ;;  %5478 = vmatprep.subr.bf16.mxu1 %v2832_v45  ;;  %v2867_v58 = vunpack.c.l.s8.bf16 %v1231_v36  ;;  %v2870_v45 = vunpack.c.h.s8.bf16 %v1230_v37 }
 0x6ec   : > { %4401 = vmatprep.mubr.bf16.mxu0 %v9397_v31  ;;  %5508 = vmatprep.mubr.bf16.mxu1 %v9397_v31 }
 0x6ee   : > { %4372 = vmatpush1.bf16.msra.mxu0 %v2829_v49  ;;  %5479 = vmatpush1.bf16.msra.mxu1 %v2831_v3  ;;  %v1236_v49 = vld [vmem:[%s8317_s8 + $0x18d8] sm:$0xff]  ;;  %v2869_v3 = vunpack.c.h.s8.bf16 %v1229_v39 }
 0x6ef   : > { %4373 = vmatprep.subr.bf16.mxu0 %v2834_v57  ;;  %5480 = vmatprep.subr.bf16.mxu1 %v2836_v33  ;;  %v2871_v57 = vunpack.c.h.s8.bf16 %v1231_v36  ;;  %v2874_v33 = vunpack.c.l.s8.bf16 %v1234_v30  ;;  %v2876_v55 = vunpack.c.l.s8.bf16 %v1236_v49  ;;  %v2880_v44 = vunpack.c.h.s8.bf16 %v1236_v49  ;;  %v1249_v36 = vld [vmem:[%s8317_s8 + $0x1940] sm:$0xff]  ;;  %v1254_v49 = vld [vmem:[%s8317_s8 + $0x1968] sm:$0xff] }
 0x6f2   : > { %4374 = vmatpush1.bf16.msra.mxu0 %v2833_v41  ;;  %5481 = vmatpush1.bf16.msra.mxu1 %v2835_v40  ;;  %v1235_v41 = vld [vmem:[%s8317_s8 + $0x18d0] sm:$0xff]  ;;  %v2873_v40 = vunpack.c.l.s8.bf16 %v1233_v34 }
 0x6f3   : > { %4375 = vmatprep.subr.bf16.mxu0 %v2838_v60  ;;  %5482 = vmatprep.subr.bf16.mxu1 %v2840_v42  ;;  %v2875_v60 = vunpack.c.l.s8.bf16 %v1235_v41  ;;  %v2878_v42 = vunpack.c.h.s8.bf16 %v1234_v30 }
 0x6f6   : > { %4376 = vmatpush1.bf16.msra.mxu0 %v2837_v63  ;;  %5483 = vmatpush1.bf16.msra.mxu1 %v2839_v47  ;;  %v1240_v63 = vld [vmem:[%s8317_s8 + $0x18f8] sm:$0xff]  ;;  %v2877_v47 = vunpack.c.h.s8.bf16 %v1233_v34 }
 0x6f7   : > { %4377 = vmatprep.subr.bf16.mxu0 %v2842_v48  ;;  %5484 = vmatprep.subr.bf16.mxu1 %v2844_v50  ;;  %v2879_v48 = vunpack.c.h.s8.bf16 %v1235_v41  ;;  %v2882_v50 = vunpack.c.l.s8.bf16 %v1238_v46  ;;  %v2884_v52 = vunpack.c.l.s8.bf16 %v1240_v63  ;;  %v2888_v1 = vunpack.c.h.s8.bf16 %v1240_v63  ;;  %v1253_v41 = vld [vmem:[%s8317_s8 + $0x1960] sm:$0xff]  ;;  %v1258_v63 = vld [vmem:[%s8317_s8 + $0x1988] sm:$0xff] }
 0x6fa   : > { %4378 = vmatpush1.bf16.msra.mxu0 %v2841_v54  ;;  %5485 = vmatpush1.bf16.msra.mxu1 %v2843_v7  ;;  %v1239_v54 = vld [vmem:[%s8317_s8 + $0x18f0] sm:$0xff]  ;;  %v2881_v7 = vunpack.c.l.s8.bf16 %v1237_v61 }
 0x6fb   : > { %4379 = vmatprep.subr.bf16.mxu0 %v2846_v4  ;;  %5486 = vmatprep.subr.bf16.mxu1 %v2848_v56  ;;  %v2883_v4 = vunpack.c.l.s8.bf16 %v1239_v54  ;;  %v2886_v56 = vunpack.c.h.s8.bf16 %v1238_v46 }
 0x6fe   : > { %4380 = vmatpush1.bf16.msra.mxu0 %v2845_v20  ;;  %5487 = vmatpush1.bf16.msra.mxu1 %v2847_v9  ;;  %v1244_v20 = vld [vmem:[%s8317_s8 + $0x1918] sm:$0xff]  ;;  %v2885_v9 = vunpack.c.h.s8.bf16 %v1237_v61 }
 0x6ff   : > { %4381 = vmatprep.subr.bf16.mxu0 %v2850_v28  ;;  %5488 = vmatprep.subr.bf16.mxu1 %v2852_v62  ;;  %v2887_v28 = vunpack.c.h.s8.bf16 %v1239_v54  ;;  %v2890_v62 = vunpack.c.l.s8.bf16 %v1242_v59  ;;  %v2892_v24 = vunpack.c.l.s8.bf16 %v1244_v20  ;;  %v2896_v23 = vunpack.c.h.s8.bf16 %v1244_v20  ;;  %v1257_v54 = vld [vmem:[%s8317_s8 + $0x1980] sm:$0xff]  ;;  %v1262_v20 = vld [vmem:[%s8317_s8 + $0x19a8] sm:$0xff] }
 0x702   : > { %4382 = vmatpush1.bf16.msra.mxu0 %v2849_v32  ;;  %5489 = vmatpush1.bf16.msra.mxu1 %v2851_v19  ;;  %v1243_v32 = vld [vmem:[%s8317_s8 + $0x1910] sm:$0xff]  ;;  %v9433_v19 = vrot.slane %v9386_v53, %v8354_v35  ;;  %v2893_v53 = vunpack.c.h.s8.bf16 %v1241_v13 }
 0x703   : > { %4383 = vmatprep.subr.bf16.mxu0 %v2854_v51  ;;  %5490 = vmatprep.subr.bf16.mxu1 %v2856_v2  ;;  %v2889_v51 = vunpack.c.l.s8.bf16 %v1241_v13  ;;  %v2891_v2 = vunpack.c.l.s8.bf16 %v1243_v32 }
 0x706   : > { %4384 = vmatpush1.bf16.msra.mxu0 %v2853_v5  ;;  %5491 = vmatpush1.bf16.msra.mxu1 %v2855_v22  ;;  %v1246_v5 = vld [vmem:[%s8317_s8 + $0x1928] sm:$0xff]  ;;  %v1248_v22 = vld [vmem:[%s8317_s8 + $0x1938] sm:$0xff] }
 0x707   : > { %4385 = vmatprep.subr.bf16.mxu0 %v2858_v6  ;;  %5492 = vmatprep.subr.bf16.mxu1 %v2860_v10  ;;  %v3331_v6 = vcombine.high %v9397_v31, %v9397_v31  ;;  %v2895_v10 = vunpack.c.h.s8.bf16 %v1243_v32  ;;  %v2898_v27 = vunpack.c.l.s8.bf16 %v1246_v5  ;;  %v2900_v11 = vunpack.c.l.s8.bf16 %v1248_v22  ;;  %v1261_v32 = vld [vmem:[%s8317_s8 + $0x19a0] sm:$0xff] }
 0x708   : > { %v2904_v37 = vunpack.c.h.s8.bf16 %v1248_v22  ;;  %v1266_v22 = vld [vmem:[%s8317_s8 + $0x19c8] sm:$0xff] }
 0x70a   : > { %4386 = vmatpush1.bf16.msra.mxu0 %v2857_v12  ;;  %5493 = vmatpush1.bf16.msra.mxu1 %v2859_v14  ;;  %v1245_v12 = vld [vmem:[%s8317_s8 + $0x1920] sm:$0xff]  ;;  %v1247_v14 = vld [vmem:[%s8317_s8 + $0x1930] sm:$0xff] }
 0x70b   : > { %4387 = vmatprep.subr.bf16.mxu0 %v2862_v15  ;;  %5494 = vmatprep.subr.bf16.mxu1 %v2864_v16  ;;  %v2897_v31 = vunpack.c.l.s8.bf16 %v1245_v12  ;;  %v2899_v15 = vunpack.c.l.s8.bf16 %v1247_v14  ;;  %v2902_v16 = vunpack.c.h.s8.bf16 %v1246_v5 }
 0x70e   : > { %4388 = vmatpush1.bf16.msra.mxu0 %v2861_v18  ;;  %5495 = vmatpush1.bf16.msra.mxu1 %v2863_v29  ;;  %v1252_v18 = vld [vmem:[%s8317_s8 + $0x1958] sm:$0xff]  ;;  %v2901_v29 = vunpack.c.h.s8.bf16 %v1245_v12  ;;  %v1265_v12 = vld [vmem:[%s8317_s8 + $0x19c0] sm:$0xff] }
 0x70f   : > { %4389 = vmatprep.subr.bf16.mxu0 %v2866_v21  ;;  %5496 = vmatprep.subr.bf16.mxu1 %v2868_v43  ;;  %v2903_v21 = vunpack.c.h.s8.bf16 %v1247_v14  ;;  %v2906_v43 = vunpack.c.l.s8.bf16 %v1250_v17  ;;  %v2908_v39 = vunpack.c.l.s8.bf16 %v1252_v18  ;;  %v2912_v30 = vunpack.c.h.s8.bf16 %v1252_v18  ;;  %v1267_v14 = vld [vmem:[%s8317_s8 + $0x19d0] sm:$0xff]  ;;  %v1272_v18 = vld [vmem:[%s8317_s8 + $0x19f8] sm:$0xff] }
 0x712   : > { %4390 = vmatpush1.bf16.msra.mxu0 %v2865_v25  ;;  %5497 = vmatpush1.bf16.msra.mxu1 %v2867_v58  ;;  %v1251_v25 = vld [vmem:[%s8317_s8 + $0x1950] sm:$0xff]  ;;  %v2905_v58 = vunpack.c.l.s8.bf16 %v1249_v36 }
 0x713   : > { %4391 = vmatprep.subr.bf16.mxu0 %v2870_v45  ;;  %5498 = vmatprep.subr.bf16.mxu1 %v2872_v0  ;;  %v2907_v45 = vunpack.c.l.s8.bf16 %v1251_v25  ;;  %v2910_v0 = vunpack.c.h.s8.bf16 %v1250_v17  ;;  %v1270_v17 = vld [vmem:[%s8317_s8 + $0x19e8] sm:$0xff] }
 0x716   : > { %4392 = vmatpush1.bf16.msra.mxu0 %v2869_v3  ;;  %5499 = vmatpush1.bf16.msra.mxu1 %v2871_v57  ;;  %v1256_v3 = vld [vmem:[%s8317_s8 + $0x1978] sm:$0xff]  ;;  %v2909_v57 = vunpack.c.h.s8.bf16 %v1249_v36  ;;  %v1269_v36 = vld [vmem:[%s8317_s8 + $0x19e0] sm:$0xff] }
 0x717   : > { %4393 = vmatprep.subr.bf16.mxu0 %v2874_v33  ;;  %5500 = vmatprep.subr.bf16.mxu1 %v2876_v55  ;;  %v2911_v33 = vunpack.c.h.s8.bf16 %v1251_v25  ;;  %v2914_v55 = vunpack.c.l.s8.bf16 %v1254_v49  ;;  %v2916_v34 = vunpack.c.l.s8.bf16 %v1256_v3  ;;  %v2920_v46 = vunpack.c.h.s8.bf16 %v1256_v3  ;;  %v1271_v25 = vld [vmem:[%s8317_s8 + $0x19f0] sm:$0xff]  ;;  %v1276_v3 = vld [vmem:[%s8317_s8 + $0x1a18] sm:$0xff] }
 0x71a   : > { %4394 = vmatpush1.bf16.msra.mxu0 %v2873_v40  ;;  %5501 = vmatpush1.bf16.msra.mxu1 %v2875_v60  ;;  %v1255_v40 = vld [vmem:[%s8317_s8 + $0x1970] sm:$0xff]  ;;  %v2913_v60 = vunpack.c.l.s8.bf16 %v1253_v41 }
 0x71b   : > { %4395 = vmatprep.subr.bf16.mxu0 %v2878_v42  ;;  %5502 = vmatprep.subr.bf16.mxu1 %v2880_v44  ;;  %v2915_v42 = vunpack.c.l.s8.bf16 %v1255_v40  ;;  %v2918_v44 = vunpack.c.h.s8.bf16 %v1254_v49  ;;  %v1274_v49 = vld [vmem:[%s8317_s8 + $0x1a08] sm:$0xff] }
 0x71e   : > { %4396 = vmatpush1.bf16.msra.mxu0 %v2877_v47  ;;  %5503 = vmatpush1.bf16.msra.mxu1 %v2879_v48  ;;  %v1260_v47 = vld [vmem:[%s8317_s8 + $0x1998] sm:$0xff]  ;;  %v2917_v48 = vunpack.c.h.s8.bf16 %v1253_v41  ;;  %v1273_v41 = vld [vmem:[%s8317_s8 + $0x1a00] sm:$0xff] }
 0x71f   : > { %4397 = vmatprep.subr.bf16.mxu0 %v2882_v50  ;;  %5504 = vmatprep.subr.bf16.mxu1 %v2884_v52  ;;  %v2919_v50 = vunpack.c.h.s8.bf16 %v1255_v40  ;;  %v2922_v52 = vunpack.c.l.s8.bf16 %v1258_v63  ;;  %v2924_v61 = vunpack.c.l.s8.bf16 %v1260_v47  ;;  %v2928_v59 = vunpack.c.h.s8.bf16 %v1260_v47  ;;  %v1275_v40 = vld [vmem:[%s8317_s8 + $0x1a10] sm:$0xff]  ;;  %v1278_v47 = vld [vmem:[%s8317_s8 + $0x1a28] sm:$0xff] }
 0x722   : > { %4398 = vmatpush1.bf16.msra.mxu0 %v2881_v7  ;;  %5505 = vmatpush1.bf16.msra.mxu1 %v2883_v4  ;;  %v1259_v7 = vld [vmem:[%s8317_s8 + $0x1990] sm:$0xff]  ;;  %v2921_v4 = vunpack.c.l.s8.bf16 %v1257_v54 }
 0x723   : > { %4399 = vmatprep.subr.bf16.mxu0 %v2886_v56  ;;  %5506 = vmatprep.subr.bf16.mxu1 %v2888_v1  ;;  %v2923_v56 = vunpack.c.l.s8.bf16 %v1259_v7  ;;  %v2926_v1 = vunpack.c.h.s8.bf16 %v1258_v63  ;;  %v2960_v63 = vunpack.c.h.s8.bf16 %v1276_v3 }
 0x726   : > { %4400 = vmatpush1.bf16.msra.mxu0 %v2885_v9  ;;  %5507 = vmatpush1.bf16.msra.mxu1 %v2887_v28  ;;  %v1264_v9 = vld [vmem:[%s8317_s8 + $0x19b8] sm:$0xff]  ;;  %v2925_v28 = vunpack.c.h.s8.bf16 %v1257_v54  ;;  %v1277_v54 = vld [vmem:[%s8317_s8 + $0x1a20] sm:$0xff] }
 0x727   : > { %4410 = vmatprep.subr.bf16.mxu0 %v2890_v62  ;;  %5517 = vmatprep.subr.bf16.mxu1 %v2892_v24  ;;  %v2927_v62 = vunpack.c.h.s8.bf16 %v1259_v7  ;;  %v2930_v24 = vunpack.c.l.s8.bf16 %v1262_v20  ;;  %v2932_v13 = vunpack.c.l.s8.bf16 %v1264_v9  ;;  %v2936_v5 = vunpack.c.h.s8.bf16 %v1264_v9  ;;  %v1279_v7 = vld [vmem:[%s8317_s8 + $0x1a30] sm:$0xff]  ;;  %v1282_v9 = vld [vmem:[%s8317_s8 + $0x1a48] sm:$0xff] }
 0x729   : > { %4402 = vmatmul.mubr.bf16.vlgmr.msra.gmra.mrb[0].mxu0 %v9433_v19  ;;  %5509 = vmatmul.mubr.bf16.vlgmr.msra.gmra.mrb[0].mxu1 %v9433_v19 }
 0x72a   : > { %4411 = vmatpush1.bf16.msra.mxu0 %v2889_v51  ;;  %5518 = vmatpush1.bf16.msra.mxu1 %v2891_v2  ;;  %v1263_v51 = vld [vmem:[%s8317_s8 + $0x19b0] sm:$0xff]  ;;  %v2929_v2 = vunpack.c.l.s8.bf16 %v1261_v32 }
 0x72b   : > { %4412 = vmatprep.subr.bf16.mxu0 %v2894_v38  ;;  %5519 = vmatprep.subr.bf16.mxu1 %v2896_v23  ;;  %v2931_v38 = vunpack.c.l.s8.bf16 %v1263_v51  ;;  %v2934_v23 = vunpack.c.h.s8.bf16 %v1262_v20 }
 0x72c   : > { %4442 = vmatprep.mubr.bf16.mxu0 %v3331_v6  ;;  %5549 = vmatprep.mubr.bf16.mxu1 %v3331_v6  ;;  %v1268_v6 = vld [vmem:[%s8317_s8 + $0x19d8] sm:$0xff] }
 0x72e   : > { %4413 = vmatpush1.bf16.msra.mxu0 %v2893_v53  ;;  %5520 = vmatpush1.bf16.msra.mxu1 %v2895_v10  ;;  %v2933_v53 = vunpack.c.h.s8.bf16 %v1261_v32  ;;  %v2935_v10 = vunpack.c.h.s8.bf16 %v1263_v51  ;;  %v1281_v51 = vld [vmem:[%s8317_s8 + $0x1a40] sm:$0xff] }
 0x72f   : > { %4414 = vmatprep.subr.bf16.mxu0 %v2898_v27  ;;  %5521 = vmatprep.subr.bf16.mxu1 %v2900_v11  ;;  %v2938_v27 = vunpack.c.l.s8.bf16 %v1266_v22  ;;  %v2940_v11 = vunpack.c.l.s8.bf16 %v1268_v6 }
 0x732   : > { %4415 = vmatpush1.bf16.msra.mxu0 %v2897_v31  ;;  %5522 = vmatpush1.bf16.msra.mxu1 %v2899_v15  ;;  %v2937_v31 = vunpack.c.l.s8.bf16 %v1265_v12  ;;  %v2939_v15 = vunpack.c.l.s8.bf16 %v1267_v14 }
 0x733   : > { %4416 = vmatprep.subr.bf16.mxu0 %v2902_v16  ;;  %5523 = vmatprep.subr.bf16.mxu1 %v2904_v37  ;;  %v2942_v16 = vunpack.c.h.s8.bf16 %v1266_v22  ;;  %v2944_v37 = vunpack.c.h.s8.bf16 %v1268_v6  ;;  %v1286_v6 = vld [vmem:[%s8317_s8 + $0x1a68] sm:$0xff] }
 0x736   : > { %4417 = vmatpush1.bf16.msra.mxu0 %v2901_v29  ;;  %5524 = vmatpush1.bf16.msra.mxu1 %v2903_v21  ;;  %v2941_v29 = vunpack.c.h.s8.bf16 %v1265_v12  ;;  %v2943_v21 = vunpack.c.h.s8.bf16 %v1267_v14  ;;  %v1285_v14 = vld [vmem:[%s8317_s8 + $0x1a60] sm:$0xff] }
 0x737   : > { %4418 = vmatprep.subr.bf16.mxu0 %v2906_v43  ;;  %5525 = vmatprep.subr.bf16.mxu1 %v2908_v39  ;;  %v2946_v43 = vunpack.c.l.s8.bf16 %v1270_v17  ;;  %v2948_v39 = vunpack.c.l.s8.bf16 %v1272_v18 }
 0x73a   : > { %4419 = vmatpush1.bf16.msra.mxu0 %v2905_v58  ;;  %5526 = vmatpush1.bf16.msra.mxu1 %v2907_v45  ;;  %v2945_v58 = vunpack.c.l.s8.bf16 %v1269_v36  ;;  %v2947_v45 = vunpack.c.l.s8.bf16 %v1271_v25 }
 0x73b   : > { %4420 = vmatprep.subr.bf16.mxu0 %v2910_v0  ;;  %5527 = vmatprep.subr.bf16.mxu1 %v2912_v30  ;;  %v2950_v0 = vunpack.c.h.s8.bf16 %v1270_v17  ;;  %v2952_v30 = vunpack.c.h.s8.bf16 %v1272_v18  ;;  %v2982_v17 = vunpack.c.h.s8.bf16 %v1286_v6 }
 0x73e   : > { %4421 = vmatpush1.bf16.msra.mxu0 %v2909_v57  ;;  %5528 = vmatpush1.bf16.msra.mxu1 %v2911_v33  ;;  %v2949_v57 = vunpack.c.h.s8.bf16 %v1269_v36  ;;  %v2951_v33 = vunpack.c.h.s8.bf16 %v1271_v25  ;;  %v5611_v36 = vsub.s32 2, %v8347_v26  ;;  %v5599_v25 = vld [vmem:[%s378_s13] sm:$0xf] }
 0x73f   : > { %4422 = vmatprep.subr.bf16.mxu0 %v2914_v55  ;;  %5529 = vmatprep.subr.bf16.mxu1 %v2916_v34  ;;  %v2954_v55 = vunpack.c.l.s8.bf16 %v1274_v49  ;;  %v2956_v34 = vunpack.c.l.s8.bf16 %v1276_v3 }
 0x742   : > { %4423 = vmatpush1.bf16.msra.mxu0 %v2913_v60  ;;  %5530 = vmatpush1.bf16.msra.mxu1 %v2915_v42  ;;  %v3330_v60 = vcombine.high %v9433_v19, %v9433_v19  ;;  %v2953_v42 = vunpack.c.l.s8.bf16 %v1273_v41  ;;  %v2962_v19 = vunpack.c.l.s8.bf16 %v1278_v47 }
 0x743   : > { %4424 = vmatprep.subr.bf16.mxu0 %v2918_v44  ;;  %5531 = vmatprep.subr.bf16.mxu1 %v2920_v46  ;;  %v2955_v44 = vunpack.c.l.s8.bf16 %v1275_v40  ;;  %v2958_v46 = vunpack.c.h.s8.bf16 %v1274_v49  ;;  %v5612_v49 = vrot.slane %v5599_v25, %v5611_v36 }
 0x746   : > { %4425 = vmatpush1.bf16.msra.mxu0 %v2917_v48  ;;  %5532 = vmatpush1.bf16.msra.mxu1 %v2919_v50  ;;  %v1280_v48 = vld [vmem:[%s8317_s8 + $0x1a38] sm:$0xff]  ;;  %v2957_v50 = vunpack.c.h.s8.bf16 %v1273_v41 }
 0x747   : > { %4426 = vmatprep.subr.bf16.mxu0 %v2922_v52  ;;  %5533 = vmatprep.subr.bf16.mxu1 %v2924_v61  ;;  %v2959_v52 = vunpack.c.h.s8.bf16 %v1275_v40  ;;  %v2964_v61 = vunpack.c.l.s8.bf16 %v1280_v48  ;;  %v2968_v20 = vunpack.c.h.s8.bf16 %v1280_v48 }
 0x74a   : > { %4427 = vmatpush1.bf16.msra.mxu0 %v2921_v4  ;;  %5534 = vmatpush1.bf16.msra.mxu1 %v2923_v56  ;;  %v8007_v4 = vmov 0   ;;  %v2961_v56 = vunpack.c.l.s8.bf16 %v1277_v54 }
 0x74b   : > { %4428 = vmatprep.subr.bf16.mxu0 %v2926_v1  ;;  %5535 = vmatprep.subr.bf16.mxu1 %v2928_v59  ;;  %v2963_v1 = vunpack.c.l.s8.bf16 %v1279_v7  ;;  %v2966_v59 = vunpack.c.h.s8.bf16 %v1278_v47 }
 0x74e   : > { %4429 = vmatpush1.bf16.msra.mxu0 %v2925_v28  ;;  %5536 = vmatpush1.bf16.msra.mxu1 %v2927_v62  ;;  %v1284_v28 = vld [vmem:[%s8317_s8 + $0x1a58] sm:$0xff]  ;;  %v2965_v62 = vunpack.c.h.s8.bf16 %v1277_v54 }
 0x74f   : > { %4430 = vmatprep.subr.bf16.mxu0 %v2930_v24  ;;  %5537 = vmatprep.subr.bf16.mxu1 %v2932_v13  ;;  %v2967_v24 = vunpack.c.h.s8.bf16 %v1279_v7  ;;  %v2970_v13 = vunpack.c.l.s8.bf16 %v1282_v9  ;;  %v2972_v32 = vunpack.c.l.s8.bf16 %v1284_v28  ;;  %v2976_v22 = vunpack.c.h.s8.bf16 %v1284_v28 }
 0x752   : > { %4431 = vmatpush1.bf16.msra.mxu0 %v2929_v2  ;;  %5538 = vmatpush1.bf16.msra.mxu1 %v2931_v38  ;;  %v1283_v2 = vld [vmem:[%s8317_s8 + $0x1a50] sm:$0xff]  ;;  %v2969_v38 = vunpack.c.l.s8.bf16 %v1281_v51 }
 0x753   : > { %4432 = vmatprep.subr.bf16.mxu0 %v2934_v23  ;;  %5539 = vmatprep.subr.bf16.mxu1 %v2936_v5  ;;  %v2971_v23 = vunpack.c.l.s8.bf16 %v1283_v2  ;;  %v2974_v5 = vunpack.c.h.s8.bf16 %v1282_v9 }
 0x756   : > { %4433 = vmatpush1.bf16.msra.mxu0 %v2933_v53  ;;  %5540 = vmatpush1.bf16.msra.mxu1 %v2935_v10  ;;  %v1288_v53 = vld [vmem:[%s8317_s8 + $0x1a78] sm:$0xff]  ;;  %v2973_v10 = vunpack.c.h.s8.bf16 %v1281_v51 }
 0x757   : > { %4434 = vmatprep.subr.bf16.mxu0 %v2938_v27  ;;  %5541 = vmatprep.subr.bf16.mxu1 %v2940_v11  ;;  %v2975_v27 = vunpack.c.h.s8.bf16 %v1283_v2  ;;  %v2978_v11 = vunpack.c.l.s8.bf16 %v1286_v6  ;;  %v2980_v12 = vunpack.c.l.s8.bf16 %v1288_v53  ;;  %v2984_v18 = vunpack.c.h.s8.bf16 %v1288_v53  ;;  %v7519_v51 = vld [vmem:[#allocation11 + $0x204] ss:$8 sps:$4 sm:$0xff] (!%p6980_p7)   ;;  %v7521_v2 = vld [vmem:[#allocation11] ss:$8 sps:$4 sm:$0xff] (!%p6980_p7)   ;;  %v7528_v6 = vld [vmem:[#allocation11 + $0x210] ss:$8 sps:$4 sm:$0xff] (!%p6980_p7)  }
 0x758   : > { %v7529_v53 = vld [vmem:[#allocation11 + $0x24] ss:$8 sps:$4 sm:$0xff] (!%p6980_p7)  }
 0x75a   : > { %4435 = vmatpush1.bf16.msra.mxu0 %v2937_v31  ;;  %5542 = vmatpush1.bf16.msra.mxu1 %v2939_v15  ;;  %v1287_v31 = vld [vmem:[%s8317_s8 + $0x1a70] sm:$0xff]  ;;  %v3293_v15 = vcombine.high %v9380_v8, %v9380_v8 }
 0x75b   : > { %4436 = vmatprep.subr.bf16.mxu0 %v2942_v16  ;;  %5543 = vmatprep.subr.bf16.mxu1 %v2944_v37  ;;  %v2977_v16 = vunpack.c.l.s8.bf16 %v1285_v14  ;;  %v2979_v37 = vunpack.c.l.s8.bf16 %v1287_v31 }
 0x75e   : > { %4437 = vmatpush1.bf16.msra.mxu0 %v2941_v29  ;;  %5544 = vmatpush1.bf16.msra.mxu1 %v2943_v21  ;;  %v3307_v29 = vrot.slane %v3293_v15, %v8354_v35  ;;  %v2981_v21 = vunpack.c.h.s8.bf16 %v1285_v14  ;;  %v7537_v14 = vld [vmem:[#allocation11 + $0x234] ss:$8 sps:$4 sm:$0xff] (!%p6980_p7)   ;;  %v7540_v15 = vld [vmem:[#allocation11 + $0x230] ss:$8 sps:$4 sm:$0xff] (!%p6980_p7)  }
 0x75f   : > { %4438 = vmatprep.subr.bf16.mxu0 %v2946_v43  ;;  %5545 = vmatprep.subr.bf16.mxu1 %v2948_v39  ;;  %v2983_v43 = vunpack.c.h.s8.bf16 %v1287_v31  ;;  %v9490_v39 = vsub.s32 0, %v8347_v26  ;;  %v7539_v31 = vld [vmem:[#allocation11 + $0x30] ss:$8 sps:$4 sm:$0xff] (!%p6980_p7)  }
 0x760   : > { %v3322_v8 = vrot.slane %v3307_v29, %v8354_v35  ;;  %v7547_v29 = vld [vmem:[#allocation11 + $0x54] ss:$8 sps:$4 sm:$0xff] (!%p6980_p7)  }
 0x762   : > { %4439 = vmatpush1.bf16.msra.mxu0 %v2945_v58  ;;  %5546 = vmatpush1.bf16.msra.mxu1 %v2947_v45  ;;  %v9496_v58 = vsub.s32 1, %v8347_v26  ;;  %v5615_v45 = vsub.s32 3, %v8347_v26 }
 0x763   : > { %4440 = vmatprep.subr.bf16.mxu0 %v2950_v0  ;;  %5547 = vmatprep.subr.bf16.mxu1 %v2952_v30  ;;  %v5625_v0 = vld [vmem:[%s387_s25] sm:$0xf]  ;;  %v5604_v30 = vrot.slane %v5599_v25, %v9490_v39 }
 0x764   : > { %v5608_v3 = vrot.slane %v5599_v25, %v9496_v58  ;;  %v5634_v40 = vrot.slane %v5625_v0, %v9496_v58 }
 0x766   : > { %4441 = vmatpush1.bf16.msra.mxu0 %v2949_v57  ;;  %5548 = vmatpush1.bf16.msra.mxu1 %v2951_v33  ;;  %v5616_v57 = vrot.slane %v5599_v25, %v5615_v45  ;;  %v5630_v33 = vrot.slane %v5625_v0, %v9490_v39  ;;  %v7555_v25 = vld [vmem:[#allocation11 + $0x264] ss:$8 sps:$4 sm:$0xff] (!%p6980_p7)  }
 0x767   : > { %4451 = vmatprep.subr.bf16.mxu0 %v2954_v55  ;;  %5558 = vmatprep.subr.bf16.mxu1 %v2956_v34  ;;  %v5638_v55 = vrot.slane %v5625_v0, %v5611_v36  ;;  %v7553_v36 = vld [vmem:[#allocation11 + $0x64] ss:$8 sps:$4 sm:$0xff] (!%p6980_p7)  }
 0x769   : > { %4443 = vmatmul.mubr.bf16.vlgmr.msra.gmra.mrb[0].mxu0 %v3330_v60  ;;  %5550 = vmatmul.mubr.bf16.vlgmr.msra.gmra.mrb[0].mxu1 %v3330_v60  ;;  %v5642_v60 = vrot.slane %v5625_v0, %v5615_v45  ;;  %v7557_v45 = vld [vmem:[#allocation11 + $0x60] ss:$8 sps:$4 sm:$0xff] (!%p6980_p7)  }
 0x76a   : > { %4452 = vmatpush1.bf16.msra.mxu0 %v2953_v42  ;;  %5559 = vmatpush1.bf16.msra.mxu1 %v2955_v44  ;;  %v7558_v0 = vld [vmem:[#allocation11 + $0x260] ss:$8 sps:$4 sm:$0xff] (!%p6980_p7)  }
 0x76b   : > { %4453 = vmatprep.subr.bf16.mxu0 %v2958_v46  ;;  %5560 = vmatprep.subr.bf16.mxu1 %v2960_v63 }
 0x76c   : > { %4483 = vmatprep.mubr.bf16.mxu0 %v8007_v4  ;;  %5590 = vmatprep.mubr.bf16.mxu1 %v8007_v4 }
 0x76e   : > { %4454 = vmatpush1.bf16.msra.mxu0 %v2957_v50  ;;  %5561 = vmatpush1.bf16.msra.mxu1 %v2959_v52 }
 0x76f   : > { %4455 = vmatprep.subr.bf16.mxu0 %v2962_v19  ;;  %5562 = vmatprep.subr.bf16.mxu1 %v2964_v61 }
 0x772   : > { %4456 = vmatpush1.bf16.msra.mxu0 %v2961_v56  ;;  %5563 = vmatpush1.bf16.msra.mxu1 %v2963_v1 }
 0x773   : > { %4457 = vmatprep.subr.bf16.mxu0 %v2966_v59  ;;  %5564 = vmatprep.subr.bf16.mxu1 %v2968_v20 }
 0x776   : > { %4458 = vmatpush1.bf16.msra.mxu0 %v2965_v62  ;;  %5565 = vmatpush1.bf16.msra.mxu1 %v2967_v24 }
 0x777   : > { %4459 = vmatprep.subr.bf16.mxu0 %v2970_v13  ;;  %5566 = vmatprep.subr.bf16.mxu1 %v2972_v32  ;;  %v7517_v32 = vld [vmem:[#allocation11 + $0x4] ss:$8 sps:$4 sm:$0xff] (!%p6980_p7)  }
 0x77a   : > { %4460 = vmatpush1.bf16.msra.mxu0 %v2969_v38  ;;  %5567 = vmatpush1.bf16.msra.mxu1 %v2971_v23  ;;  %v7522_v38 = vld [vmem:[#allocation11 + $0x200] ss:$8 sps:$4 sm:$0xff] (!%p6980_p7)   ;;  %v7523_v23 = vld [vmem:[#allocation11 + $0x14] ss:$8 sps:$4 sm:$0xff] (!%p6980_p7)  }
 0x77b   : > { %4461 = vmatprep.subr.bf16.mxu0 %v2974_v5  ;;  %5568 = vmatprep.subr.bf16.mxu1 %v2976_v22  ;;  %v7525_v5 = vld [vmem:[#allocation11 + $0x214] ss:$8 sps:$4 sm:$0xff] (!%p6980_p7)   ;;  %v7527_v22 = vld [vmem:[#allocation11 + $0x10] ss:$8 sps:$4 sm:$0xff] (!%p6980_p7)  }
 0x77e   : > { %4462 = vmatpush1.bf16.msra.mxu0 %v2973_v10  ;;  %5569 = vmatpush1.bf16.msra.mxu1 %v2975_v27  ;;  %v7531_v10 = vld [vmem:[#allocation11 + $0x224] ss:$8 sps:$4 sm:$0xff] (!%p6980_p7)   ;;  %v7533_v27 = vld [vmem:[#allocation11 + $0x20] ss:$8 sps:$4 sm:$0xff] (!%p6980_p7)  }
 0x77f   : > { %4463 = vmatprep.subr.bf16.mxu0 %v2978_v11  ;;  %5570 = vmatprep.subr.bf16.mxu1 %v2980_v12  ;;  %v7534_v11 = vld [vmem:[#allocation11 + $0x220] ss:$8 sps:$4 sm:$0xff] (!%p6980_p7)   ;;  %v7535_v12 = vld [vmem:[#allocation11 + $0x34] ss:$8 sps:$4 sm:$0xff] (!%p6980_p7)  }
 0x782   : > { %4464 = vmatpush1.bf16.msra.mxu0 %v2977_v16  ;;  %5571 = vmatpush1.bf16.msra.mxu1 %v2979_v37  ;;  %v7541_v16 = vld [vmem:[#allocation11 + $0x44] ss:$8 sps:$4 sm:$0xff] (!%p6980_p7)  }
 0x783   : > { %4465 = vmatprep.subr.bf16.mxu0 %v2982_v17  ;;  %5572 = vmatprep.subr.bf16.mxu1 %v2984_v18  ;;  %v7543_v37 = vld [vmem:[#allocation11 + $0x244] ss:$8 sps:$4 sm:$0xff] (!%p6980_p7)   ;;  %v7545_v17 = vld [vmem:[#allocation11 + $0x40] ss:$8 sps:$4 sm:$0xff] (!%p6980_p7)  }
 0x784   : > { %v7546_v18 = vld [vmem:[#allocation11 + $0x240] ss:$8 sps:$4 sm:$0xff] (!%p6980_p7)  }
 0x786   : > { %4466 = vmatpush1.bf16.msra.mxu0 %v2981_v21  ;;  %5573 = vmatpush1.bf16.msra.mxu1 %v2983_v43  ;;  %v7549_v21 = vld [vmem:[#allocation11 + $0x254] ss:$8 sps:$4 sm:$0xff] (!%p6980_p7)   ;;  %v7551_v43 = vld [vmem:[#allocation11 + $0x50] ss:$8 sps:$4 sm:$0xff] (!%p6980_p7)  }
 0x787   : > { %6536 = vmatprep.subr.bf16.mxu1 (!%p6980_p7), %v7517_v32  ;;  %6618 = vmatprep.subr.bf16.mxu0 (!%p6980_p7), %v7519_v51  ;;  %v7599_v51 = vld [vmem:[#allocation11 + $0xd0] ss:$8 sps:$4 sm:$0xff] (!%p6980_p7)  }
 0x789   : > { %4484 = vmatmul.mubr.bf16.vlgmr.msra.gmra.mrb[0].mxu0 %v3322_v8  ;;  %5591 = vmatmul.mubr.bf16.vlgmr.msra.gmra.mrb[0].mxu1 %v3322_v8  ;;  %v7552_v8 = vld [vmem:[#allocation11 + $0x250] ss:$8 sps:$4 sm:$0xff] (!%p6980_p7)  }
 0x78a   : > { %6537 = vmatpush1.bf16.msra.mxu1 (!%p6980_p7), %v7521_v2  ;;  %6619 = vmatpush1.bf16.msra.mxu0 (!%p6980_p7), %v7522_v38  ;;  %v7600_v2 = vld [vmem:[#allocation11 + $0x2d0] ss:$8 sps:$4 sm:$0xff] (!%p6980_p7)   ;;  %v7601_v38 = vld [vmem:[#allocation11 + $0xe4] ss:$8 sps:$4 sm:$0xff] (!%p6980_p7)  }
 0x78b   : > { %6538 = vmatprep.subr.bf16.mxu1 (!%p6980_p7), %v7523_v23  ;;  %6620 = vmatprep.subr.bf16.mxu0 (!%p6980_p7), %v7525_v5  ;;  %v7603_v23 = vld [vmem:[#allocation11 + $0x2e4] ss:$8 sps:$4 sm:$0xff] (!%p6980_p7)   ;;  %v7605_v5 = vld [vmem:[#allocation11 + $0xe0] ss:$8 sps:$4 sm:$0xff] (!%p6980_p7)  }
 0x78e   : > { %6539 = vmatpush1.bf16.msra.mxu1 (!%p6980_p7), %v7527_v22  ;;  %6621 = vmatpush1.bf16.msra.mxu0 (!%p6980_p7), %v7528_v6  ;;  %v7606_v22 = vld [vmem:[#allocation11 + $0x2e0] ss:$8 sps:$4 sm:$0xff] (!%p6980_p7)   ;;  %v7607_v6 = vld [vmem:[#allocation11 + $0xf4] ss:$8 sps:$4 sm:$0xff] (!%p6980_p7)  }
 0x78f   : > { %6540 = vmatprep.subr.bf16.mxu1 (!%p6980_p7), %v7529_v53  ;;  %6622 = vmatprep.subr.bf16.mxu0 (!%p6980_p7), %v7531_v10  ;;  %v7609_v53 = vld [vmem:[#allocation11 + $0x2f4] ss:$8 sps:$4 sm:$0xff] (!%p6980_p7)   ;;  %v7611_v10 = vld [vmem:[#allocation11 + $0xf0] ss:$8 sps:$4 sm:$0xff] (!%p6980_p7)  }
 0x792   : > { %6541 = vmatpush1.bf16.msra.mxu1 (!%p6980_p7), %v7533_v27  ;;  %6623 = vmatpush1.bf16.msra.mxu0 (!%p6980_p7), %v7534_v11  ;;  %v7612_v27 = vld [vmem:[#allocation11 + $0x2f0] ss:$8 sps:$4 sm:$0xff] (!%p6980_p7)   ;;  %v7615_v11 = vld [vmem:[#allocation11 + $0x104] ss:$8 sps:$4 sm:$0xff] (!%p6980_p7)  }
 0x793   : > { %6542 = vmatprep.subr.bf16.mxu1 (!%p6980_p7), %v7535_v12  ;;  %6624 = vmatprep.subr.bf16.mxu0 (!%p6980_p7), %v7537_v14  ;;  %v7619_v12 = vld [vmem:[#allocation11 + $0x304] ss:$8 sps:$4 sm:$0xff] (!%p6980_p7)   ;;  %v7613_v14 = vld [vmem:[#allocation11 + $0x100] ss:$8 sps:$4 sm:$0xff] (!%p6980_p7)  }
 0x796   : > { %6543 = vmatpush1.bf16.msra.mxu1 (!%p6980_p7), %v7539_v31  ;;  %6625 = vmatpush1.bf16.msra.mxu0 (!%p6980_p7), %v7540_v15 }
 0x797   : > { %6544 = vmatprep.subr.bf16.mxu1 (!%p6980_p7), %v7541_v16  ;;  %6626 = vmatprep.subr.bf16.mxu0 (!%p6980_p7), %v7543_v37  ;;  %v7617_v16 = vld [vmem:[#allocation11 + $0x300] ss:$8 sps:$4 sm:$0xff] (!%p6980_p7)   ;;  %v7622_v37 = vld [vmem:[#allocation11 + $0x114] ss:$8 sps:$4 sm:$0xff] (!%p6980_p7)  }
 0x79a   : > { %6545 = vmatpush1.bf16.msra.mxu1 (!%p6980_p7), %v7545_v17  ;;  %6627 = vmatpush1.bf16.msra.mxu0 (!%p6980_p7), %v7546_v18  ;;  %v7625_v17 = vld [vmem:[#allocation11 + $0x314] ss:$8 sps:$4 sm:$0xff] (!%p6980_p7)  }
 0x79b   : > { %6546 = vmatprep.subr.bf16.mxu1 (!%p6980_p7), %v7547_v29  ;;  %6628 = vmatprep.subr.bf16.mxu0 (!%p6980_p7), %v7549_v21  ;;  %v7620_v21 = vld [vmem:[#allocation11 + $0x110] ss:$8 sps:$4 sm:$0xff] (!%p6980_p7)  }
 0x79e   : > { %6547 = vmatpush1.bf16.msra.mxu1 (!%p6980_p7), %v7551_v43  ;;  %6629 = vmatpush1.bf16.msra.mxu0 (!%p6980_p7), %v7552_v8  ;;  %v7623_v43 = vld [vmem:[#allocation11 + $0x310] ss:$8 sps:$4 sm:$0xff] (!%p6980_p7)   ;;  %v7631_v8 = vld [vmem:[#allocation11 + $0x324] ss:$8 sps:$4 sm:$0xff] (!%p6980_p7)  }
 0x79f   : > { %6548 = vmatprep.subr.bf16.mxu1 (!%p6980_p7), %v7553_v36  ;;  %6630 = vmatprep.subr.bf16.mxu0 (!%p6980_p7), %v7555_v25  ;;  %v7626_v36 = vld [vmem:[#allocation11 + $0x120] ss:$8 sps:$4 sm:$0xff] (!%p6980_p7)  }
 0x7a0   : > { %v7629_v25 = vld [vmem:[#allocation11 + $0x320] ss:$8 sps:$4 sm:$0xff] (!%p6980_p7)  }
 0x7a2   : > { %6549 = vmatpush1.bf16.msra.mxu1 (!%p6980_p7), %v7557_v45  ;;  %6631 = vmatpush1.bf16.msra.mxu0 (!%p6980_p7), %v7558_v0  ;;  %v7634_v45 = vld [vmem:[#allocation11 + $0x134] ss:$8 sps:$4 sm:$0xff] (!%p6980_p7)  }
 0x7a3   : > { %v7637_v0 = vld [vmem:[#allocation11 + $0x334] ss:$8 sps:$4 sm:$0xff] (!%p6980_p7)  }
 0x85c   : > { %v4485_v34 = vpop.f32.mrb[0].mxu0  ;;  %v5592_v41 = vpop.f32.mrb[0].mxu1 }
 0x85d   : > { %v5621_v42 = vmul.f32 %v5604_v30, %v4485_v34  ;;  %v5623_v44 = vmul.f32 %v5612_v49, %v5592_v41  ;;  %v4487_v26 = vpop.f32.mrb[1].mxu0  ;;  %v5594_v46 = vpop.f32.mrb[1].mxu1  ;;  %v7559_v30 = vld [vmem:[#allocation11 + $0x74] ss:$8 sps:$4 sm:$0xff] (!%p6980_p7)   ;;  %v7569_v34 = vld [vmem:[#allocation11 + $0x80] ss:$8 sps:$4 sm:$0xff] (!%p6980_p7)  }
 0x85e   : > { %v5622_v63 = vmul.f32 %v5608_v3, %v4487_v26  ;;  %v5624_v47 = vmul.f32 %v5616_v57, %v5594_v46  ;;  %v4489_v48 = vpop.f32.mrb[2].mxu0  ;;  %v5596_v50 = vpop.f32.mrb[2].mxu1  ;;  %v7561_v49 = vld [vmem:[#allocation11 + $0x274] ss:$8 sps:$4 sm:$0xff] (!%p6980_p7)   ;;  %v7563_v3 = vld [vmem:[#allocation11 + $0x70] ss:$8 sps:$4 sm:$0xff] (!%p6980_p7)   ;;  %6550 = vmatprep.subr.bf16.mxu1 (!%p6980_p7), %v7559_v30 }
 0x85f   : > { %v5647_v52 = vadd.f32 %v5630_v33, %v5621_v42  ;;  %v5649_v19 = vadd.f32 %v5638_v55, %v5623_v44  ;;  %v4490_v61 = vpop.f32.mrb[3].mxu0  ;;  %v5597_v54 = vpop.f32.mrb[3].mxu1  ;;  %v7564_v57 = vld [vmem:[#allocation11 + $0x270] ss:$8 sps:$4 sm:$0xff] (!%p6980_p7)   ;;  %v7565_v33 = vld [vmem:[#allocation11 + $0x84] ss:$8 sps:$4 sm:$0xff] (!%p6980_p7)   ;;  %6632 = vmatprep.subr.bf16.mxu0 (!%p6980_p7), %v7561_v49  ;;  %6551 = vmatpush1.bf16.msra.mxu1 (!%p6980_p7), %v7563_v3 }
 0x860   : > { %v5648_v7 = vadd.f32 %v5634_v40, %v5622_v63  ;;  %v5650_v4 = vadd.f32 %v5642_v60, %v5624_v47  ;;  %v7567_v55 = vld [vmem:[#allocation11 + $0x284] ss:$8 sps:$4 sm:$0xff] (!%p6980_p7)   ;;  %v7570_v41 = vld [vmem:[#allocation11 + $0x280] ss:$8 sps:$4 sm:$0xff] (!%p6980_p7)   ;;  %6633 = vmatpush1.bf16.msra.mxu0 (!%p6980_p7), %v7564_v57  ;;  %v7571_v40 = vld [vmem:[#allocation11 + $0x94] ss:$8 sps:$4 sm:$0xff] (!%p6980_p7)   ;;  %6552 = vmatprep.subr.bf16.mxu1 (!%p6980_p7), %v7565_v33 }
 0x861   : > { %v5651_v56 = vmax.f32 %v5647_v52, 0.0  ;;  %v5653_v1 = vmax.f32 %v5649_v19, 0.0  ;;  %6634 = vmatprep.subr.bf16.mxu0 (!%p6980_p7), %v7567_v55  ;;  %v7573_v60 = vld [vmem:[#allocation11 + $0x294] ss:$8 sps:$4 sm:$0xff] (!%p6980_p7)   ;;  %v7575_v42 = vld [vmem:[#allocation11 + $0x90] ss:$8 sps:$4 sm:$0xff] (!%p6980_p7)  }
 0x862   : > { %v5652_v59 = vmax.f32 %v5648_v7, 0.0  ;;  %v5654_v20 = vmax.f32 %v5650_v4, 0.0  ;;  %v7576_v44 = vld [vmem:[#allocation11 + $0x290] ss:$8 sps:$4 sm:$0xff] (!%p6980_p7)   ;;  %v7577_v26 = vld [vmem:[#allocation11 + $0xa4] ss:$8 sps:$4 sm:$0xff] (!%p6980_p7)  }
 0x863   : > { %6553 = vmatpush1.bf16.msra.mxu1 (!%p6980_p7), %v7569_v34  ;;  %v7579_v46 = vld [vmem:[#allocation11 + $0x2a4] ss:$8 sps:$4 sm:$0xff] (!%p6980_p7)   ;;  %v7581_v63 = vld [vmem:[#allocation11 + $0xa0] ss:$8 sps:$4 sm:$0xff] (!%p6980_p7)   ;;  %v7583_v48 = vld [vmem:[#allocation11 + $0xb4] ss:$8 sps:$4 sm:$0xff] (!%p6980_p7)  }
 0x864   : > { %v6977_v9 = vpack.c.bf16 %v5652_v59, %v5651_v56  ;;  %v6978_v28 = vpack.c.bf16 %v5654_v20, %v5653_v1  ;;  %5696 = sbr.rel (%p6980_p7) target bundleno = 2680 (0xa78), region = 84  ;;  %6635 = vmatpush1.bf16.msra.mxu0 (!%p6980_p7), %v7570_v41  ;;  %6554 = vmatprep.subr.bf16.mxu1 (!%p6980_p7), %v7571_v40  ;;  %v7582_v47 = vld [vmem:[#allocation11 + $0x2a0] ss:$8 sps:$4 sm:$0xff] (!%p6980_p7)   ;;  %v7585_v50 = vld [vmem:[#allocation11 + $0x2b4] ss:$8 sps:$4 sm:$0xff] (!%p6980_p7)  }
 0x865   : > { %6636 = vmatprep.subr.bf16.mxu0 (!%p6980_p7), %v7573_v60  ;;  %v7587_v19 = vld [vmem:[#allocation11 + $0xb0] ss:$8 sps:$4 sm:$0xff] (!%p6980_p7)   ;;  %v7589_v4 = vld [vmem:[#allocation11 + $0xc4] ss:$8 sps:$4 sm:$0xff] (!%p6980_p7)   ;;  %v7593_v20 = vld [vmem:[#allocation11 + $0xc0] ss:$8 sps:$4 sm:$0xff] (!%p6980_p7)  }
 0x866   : > { %v5672_v62 = vrot.slane %v6977_v9, %v8354_v35  ;;  %v5679_v24 = vrot.slane %v6978_v28, %v8354_v35  ;;  %v7588_v7 = vld [vmem:[#allocation11 + $0x2b0] ss:$8 sps:$4 sm:$0xff] (!%p6980_p7)   ;;  %v7591_v56 = vld [vmem:[#allocation11 + $0x2c4] ss:$8 sps:$4 sm:$0xff] (!%p6980_p7)   ;;  %v7638_v33 = vld [vmem:[#allocation11 + $0x140] ss:$8 sps:$4 sm:$0xff] (!%p6980_p7)  }
 0x867   : > { %6555 = vmatpush1.bf16.msra.mxu1 (!%p6980_p7), %v7575_v42  ;;  %v7632_v30 = vld [vmem:[#allocation11 + $0x130] ss:$8 sps:$4 sm:$0xff] (!%p6980_p7)   ;;  %v7640_v3 = vld [vmem:[#allocation11 + $0x144] ss:$8 sps:$4 sm:$0xff] (!%p6980_p7)   ;;  %v7641_v55 = vld [vmem:[#allocation11 + $0x340] ss:$8 sps:$4 sm:$0xff] (!%p6980_p7)  }
 0x868   : > { %v5680_v13 = vcombine.low %v5672_v62, %v5679_v24  ;;  %6637 = vmatpush1.bf16.msra.mxu0 (!%p6980_p7), %v7576_v44  ;;  %6556 = vmatprep.subr.bf16.mxu1 (!%p6980_p7), %v7577_v26  ;;  %v7594_v62 = vld [vmem:[#allocation11 + $0x2c0] ss:$8 sps:$4 sm:$0xff] (!%p6980_p7)   ;;  %v7595_v24 = vld [vmem:[#allocation11 + $0xd4] ss:$8 sps:$4 sm:$0xff] (!%p6980_p7)   ;;  %v7635_v49 = vld [vmem:[#allocation11 + $0x330] ss:$8 sps:$4 sm:$0xff] (!%p6980_p7)  }
 0x869   : > { %6638 = vmatprep.subr.bf16.mxu0 (!%p6980_p7), %v7579_v46  ;;  %v7643_v57 = vld [vmem:[#allocation11 + $0x344] ss:$8 sps:$4 sm:$0xff] (!%p6980_p7)   ;;  %v7646_v34 = vld [vmem:[#allocation11 + $0x154] ss:$8 sps:$4 sm:$0xff] (!%p6980_p7)   ;;  %v7644_v40 = vld [vmem:[#allocation11 + $0x150] ss:$8 sps:$4 sm:$0xff] (!%p6980_p7)  }
 0x86a   : > { %6979 = vst.sshfl [vmem:[%s5691_s23] sm:$0x55 pattern:$0x73625140] %v5680_v13  ;;  %v7597_v13 = vld [vmem:[#allocation11 + $0x2d4] ss:$8 sps:$4 sm:$0xff] (!%p6980_p7)  }
 0x86b   : > { %6557 = vmatpush1.bf16.msra.mxu1 %v7581_v63  ;;  %v7649_v41 = vld [vmem:[#allocation11 + $0x354] ss:$8 sps:$4 sm:$0xff]   ;;  %v7647_v60 = vld [vmem:[#allocation11 + $0x350] ss:$8 sps:$4 sm:$0xff]   ;;  %v7652_v42 = vld [vmem:[#allocation11 + $0x164] ss:$8 sps:$4 sm:$0xff]  }
 0x86c   : > { %6639 = vmatpush1.bf16.msra.mxu0 %v7582_v47  ;;  %6558 = vmatprep.subr.bf16.mxu1 %v7583_v48  ;;  %v7655_v44 = vld [vmem:[#allocation11 + $0x364] ss:$8 sps:$4 sm:$0xff]   ;;  %v7650_v26 = vld [vmem:[#allocation11 + $0x160] ss:$8 sps:$4 sm:$0xff]   ;;  %v7658_v63 = vld [vmem:[#allocation11 + $0x174] ss:$8 sps:$4 sm:$0xff]  }
 0x86d   : > { %6640 = vmatprep.subr.bf16.mxu0 %v7585_v50  ;;  %v7653_v46 = vld [vmem:[#allocation11 + $0x360] ss:$8 sps:$4 sm:$0xff]   ;;  %v7661_v47 = vld [vmem:[#allocation11 + $0x374] ss:$8 sps:$4 sm:$0xff]   ;;  %v7656_v48 = vld [vmem:[#allocation11 + $0x170] ss:$8 sps:$4 sm:$0xff]  }
 0x86e   : > { %v7659_v50 = vld [vmem:[#allocation11 + $0x370] ss:$8 sps:$4 sm:$0xff]  }
 0x86f   : > { %6559 = vmatpush1.bf16.msra.mxu1 %v7587_v19  ;;  %v7667_v19 = vld [vmem:[#allocation11 + $0x384] ss:$8 sps:$4 sm:$0xff]  }
 0x870   : > { %6641 = vmatpush1.bf16.msra.mxu0 %v7588_v7  ;;  %6560 = vmatprep.subr.bf16.mxu1 %v7589_v4  ;;  %v7670_v7 = vld [vmem:[#allocation11 + $0x194] ss:$8 sps:$4 sm:$0xff]  }
 0x871   : > { %v5697_v52 = vld [vmem:[#allocation2] sm:$0xff]  ;;  %6642 = vmatprep.subr.bf16.mxu0 %v7591_v56 }
 0x872   : > { %v5846_v61 = vrot.slane %v5697_v52, %v8354_v35  ;;  %v5839_v54 = vcombine.high %v5697_v52, %v5697_v52  ;;  %v7664_v52 = vld [vmem:[#allocation11 + $0x184] ss:$8 sps:$4 sm:$0xff]   ;;  %v7673_v4 = vld [vmem:[#allocation11 + $0x394] ss:$8 sps:$4 sm:$0xff]   ;;  %v7668_v56 = vld [vmem:[#allocation11 + $0x190] ss:$8 sps:$4 sm:$0xff]  }
 0x873   : > { %6561 = vmatpush1.bf16.msra.mxu1 %v7593_v20  ;;  %v7679_v20 = vld [vmem:[#allocation11 + $0x3a4] ss:$8 sps:$4 sm:$0xff]  }
 0x874   : > { %v5854_v1 = vcombine.high %v5846_v61, %v5846_v61  ;;  %v5853_v59 = vrot.slane %v5839_v54, %v8354_v35  ;;  %6643 = vmatpush1.bf16.msra.mxu0 %v7594_v62  ;;  %6562 = vmatprep.subr.bf16.mxu1 %v7595_v24  ;;  %v9514_v31 = vrot.slane %v5846_v61, %v8354_v35  ;;  %v7662_v61 = vld [vmem:[#allocation11 + $0x180] ss:$8 sps:$4 sm:$0xff]   ;;  %v7682_v62 = vld [vmem:[#allocation11 + $0x1b4] ss:$8 sps:$4 sm:$0xff]  }
 0x875   : > { %6644 = vmatprep.subr.bf16.mxu0 %v7597_v13  ;;  %v7665_v54 = vld [vmem:[#allocation11 + $0x380] ss:$8 sps:$4 sm:$0xff]   ;;  %v7685_v24 = vld [vmem:[#allocation11 + $0x3b4] ss:$8 sps:$4 sm:$0xff]   ;;  %v7680_v13 = vld [vmem:[#allocation11 + $0x1b0] ss:$8 sps:$4 sm:$0xff]  }
 0x876   : > { %v5876_v9 = vrot.slane %v5854_v1, %v8354_v35  ;;  %v5855_v28 = vcombine.high %v5853_v59, %v5853_v59  ;;  %v9517_v15 = vrot.slane %v5853_v59, %v8354_v35  ;;  %v7671_v1 = vld [vmem:[#allocation11 + $0x390] ss:$8 sps:$4 sm:$0xff]   ;;  %v7676_v59 = vld [vmem:[#allocation11 + $0x1a4] ss:$8 sps:$4 sm:$0xff]  }
 0x877   : > { %6563 = vmatpush1.bf16.msra.mxu1 %v7599_v51  ;;  %v7688_v51 = vld [vmem:[#allocation11 + $0x1c4] ss:$8 sps:$4 sm:$0xff]  }
 0x878   : > { %v5883_v32 = vrot.slane %v5855_v28, %v8354_v35  ;;  %6568 = vmatprep.mubr.bf16.mxu1 %v5876_v9  ;;  %6645 = vmatpush1.bf16.msra.mxu0 %v7600_v2  ;;  %v5886_v18 = vcombine.high %v5876_v9, %v5876_v9  ;;  %v7628_v35 = vld [vmem:[#allocation11 + $0x124] ss:$8 sps:$4 sm:$0xff]   ;;  %v7674_v9 = vld [vmem:[#allocation11 + $0x1a0] ss:$8 sps:$4 sm:$0xff]  }
 0x879   : > { %6564 = vmatprep.subr.bf16.mxu1 %v7601_v38  ;;  %6646 = vmatprep.subr.bf16.mxu0 %v7603_v23  ;;  %v7677_v28 = vld [vmem:[#allocation11 + $0x3a0] ss:$8 sps:$4 sm:$0xff]   ;;  %v7691_v2 = vld [vmem:[#allocation11 + $0x3c4] ss:$8 sps:$4 sm:$0xff]  }
 0x87a   : > { %6650 = vmatprep.mubr.bf16.mxu0 %v5883_v32  ;;  %v5887_v29 = vcombine.high %v5883_v32, %v5883_v32  ;;  %v7683_v32 = vld [vmem:[#allocation11 + $0x3b0] ss:$8 sps:$4 sm:$0xff]   ;;  %v7686_v38 = vld [vmem:[#allocation11 + $0x1c0] ss:$8 sps:$4 sm:$0xff]  }
 0x87b   : > { %6565 = vmatpush1.bf16.msra.mxu1 %v7605_v5  ;;  %v7689_v23 = vld [vmem:[#allocation11 + $0x3c0] ss:$8 sps:$4 sm:$0xff]   ;;  %v7694_v5 = vld [vmem:[#allocation11 + $0x1d4] ss:$8 sps:$4 sm:$0xff]  }
 0x87c   : > { %6647 = vmatpush1.bf16.msra.mxu0 %v7606_v22  ;;  %6566 = vmatprep.subr.bf16.mxu1 %v7607_v6  ;;  %v7697_v22 = vld [vmem:[#allocation11 + $0x3d4] ss:$8 sps:$4 sm:$0xff]   ;;  %v7692_v6 = vld [vmem:[#allocation11 + $0x1d0] ss:$8 sps:$4 sm:$0xff]  }
 0x87d   : > { %6648 = vmatprep.subr.bf16.mxu0 %v7609_v53  ;;  %v7695_v53 = vld [vmem:[#allocation11 + $0x3d0] ss:$8 sps:$4 sm:$0xff]  }
 0x87f   : > { %6567 = vmatpush1.bf16.msra.mxu1 %v7611_v10  ;;  %v7700_v10 = vld [vmem:[#allocation11 + $0x1e4] ss:$8 sps:$4 sm:$0xff]  }
 0x880   : > { %6649 = vmatpush1.bf16.msra.mxu0 %v7612_v27  ;;  %6577 = vmatprep.subr.bf16.mxu1 %v7615_v11  ;;  %v7703_v27 = vld [vmem:[#allocation11 + $0x3e4] ss:$8 sps:$4 sm:$0xff]   ;;  %v7698_v11 = vld [vmem:[#allocation11 + $0x1e0] ss:$8 sps:$4 sm:$0xff]  }
 0x881   : > { %6659 = vmatprep.subr.bf16.mxu0 %v7619_v12  ;;  %v7701_v12 = vld [vmem:[#allocation11 + $0x3e0] ss:$8 sps:$4 sm:$0xff]  }
 0x882   : > { %6569 = vmatmul.mubr.bf16.vlgmr.msra.gmra.mrb[0].mxu1 %v9514_v31 }
 0x883   : > { %6651 = vmatmul.mubr.bf16.vlgmr.msra.gmra.mrb[0].mxu0 %v9517_v15  ;;  %6578 = vmatpush1.bf16.msra.mxu1 %v7613_v14  ;;  %v7706_v14 = vld [vmem:[#allocation11 + $0x1f4] ss:$8 sps:$4 sm:$0xff]  }
 0x884   : > { %6660 = vmatpush1.bf16.msra.mxu0 %v7617_v16  ;;  %6579 = vmatprep.subr.bf16.mxu1 %v7622_v37  ;;  %v7709_v16 = vld [vmem:[#allocation11 + $0x3f4] ss:$8 sps:$4 sm:$0xff]  }
 0x885   : > { %6661 = vmatprep.subr.bf16.mxu0 %v7625_v17  ;;  %6609 = vmatprep.mubr.bf16.mxu1 %v5886_v18  ;;  %v6718_v37 = vld [vmem:[%s9665_s6 + $0x80] sm:$0xff]  ;;  %v6719_v17 = vld [vmem:[%s9665_s6 + $0x88] sm:$0xff] }
 0x886   : > { %6691 = vmatprep.mubr.bf16.mxu0 %v5887_v29  ;;  %v7704_v18 = vld [vmem:[#allocation11 + $0x1f0] ss:$8 sps:$4 sm:$0xff]  }
 0x887   : > { %6580 = vmatpush1.bf16.msra.mxu1 %v7620_v21  ;;  %v7707_v29 = vld [vmem:[#allocation11 + $0x3f0] ss:$8 sps:$4 sm:$0xff]   ;;  %v7152_v21 = vpack.c.bf16 %v6719_v17, %v6718_v37 }
 0x888   : > { %6662 = vmatpush1.bf16.msra.mxu0 %v7623_v43  ;;  %6581 = vmatprep.subr.bf16.mxu1 %v7628_v35  ;;  %v6702_v43 = vld [vmem:[%s9665_s6] sm:$0xff]  ;;  %v6703_v35 = vld [vmem:[%s9665_s6 + $0x8] sm:$0xff] }
 0x889   : > { %6663 = vmatprep.subr.bf16.mxu0 %v7631_v8  ;;  %v6720_v8 = vld [vmem:[%s9665_s6 + $0x90] sm:$0xff] }
 0x88b   : > { %6582 = vmatpush1.bf16.msra.mxu1 %v7626_v36  ;;  %v6721_v36 = vld [vmem:[%s9665_s6 + $0x98] sm:$0xff] }
 0x88c   : > { %6664 = vmatpush1.bf16.msra.mxu0 %v7629_v25  ;;  %6583 = vmatprep.subr.bf16.mxu1 %v7634_v45  ;;  %v5884_v25 = vcombine.high %v9514_v31, %v9514_v31  ;;  %v5885_v45 = vcombine.high %v9517_v15, %v9517_v15  ;;  %v6722_v31 = vld [vmem:[%s9665_s6 + $0xa0] sm:$0xff]  ;;  %v6723_v15 = vld [vmem:[%s9665_s6 + $0xa8] sm:$0xff] }
 0x88d   : > { %6665 = vmatprep.subr.bf16.mxu0 %v7637_v0  ;;  %v7154_v0 = vpack.c.bf16 %v6703_v35, %v6702_v43 }
 0x88f   : > { %6584 = vmatpush1.bf16.msra.mxu1 %v7632_v30  ;;  %v7156_v30 = vpack.c.bf16 %v6721_v36, %v6720_v8 }
 0x890   : > { %6666 = vmatpush1.bf16.msra.mxu0 %v7635_v49  ;;  %6585 = vmatprep.subr.bf16.mxu1 %v7640_v3  ;;  %v6704_v49 = vld [vmem:[%s9665_s6 + $0x10] sm:$0xff]  ;;  %v6705_v3 = vld [vmem:[%s9665_s6 + $0x18] sm:$0xff] }
 0x891   : > { %6667 = vmatprep.subr.bf16.mxu0 %v7643_v57  ;;  %v7158_v57 = vpack.c.bf16 %v6705_v3, %v6704_v49 }
 0x893   : > { %6586 = vmatpush1.bf16.msra.mxu1 %v7638_v33  ;;  %v7160_v33 = vpack.c.bf16 %v6723_v15, %v6722_v31 }
 0x894   : > { %6668 = vmatpush1.bf16.msra.mxu0 %v7641_v55  ;;  %6587 = vmatprep.subr.bf16.mxu1 %v7646_v34  ;;  %v6706_v55 = vld [vmem:[%s9665_s6 + $0x20] sm:$0xff]  ;;  %v6707_v34 = vld [vmem:[%s9665_s6 + $0x28] sm:$0xff] }
 0x895   : > { %6669 = vmatprep.subr.bf16.mxu0 %v7649_v41  ;;  %v6724_v41 = vld [vmem:[%s9665_s6 + $0xb0] sm:$0xff] }
 0x897   : > { %6588 = vmatpush1.bf16.msra.mxu1 %v7644_v40  ;;  %v6725_v40 = vld [vmem:[%s9665_s6 + $0xb8] sm:$0xff] }
 0x898   : > { %6670 = vmatpush1.bf16.msra.mxu0 %v7647_v60  ;;  %6589 = vmatprep.subr.bf16.mxu1 %v7652_v42  ;;  %v7162_v60 = vpack.c.bf16 %v6707_v34, %v6706_v55  ;;  %v7164_v42 = vpack.c.bf16 %v6725_v40, %v6724_v41 }
 0x899   : > { %6671 = vmatprep.subr.bf16.mxu0 %v7655_v44  ;;  %v6708_v44 = vld [vmem:[%s9665_s6 + $0x30] sm:$0xff] }
 0x89b   : > { %6590 = vmatpush1.bf16.msra.mxu1 %v7650_v26  ;;  %v6709_v26 = vld [vmem:[%s9665_s6 + $0x38] sm:$0xff] }
 0x89c   : > { %6672 = vmatpush1.bf16.msra.mxu0 %v7653_v46  ;;  %6591 = vmatprep.subr.bf16.mxu1 %v7658_v63  ;;  %v6726_v46 = vld [vmem:[%s9665_s6 + $0xc0] sm:$0xff]  ;;  %v6727_v63 = vld [vmem:[%s9665_s6 + $0xc8] sm:$0xff] }
 0x89d   : > { %6673 = vmatprep.subr.bf16.mxu0 %v7661_v47  ;;  %v7166_v47 = vpack.c.bf16 %v6709_v26, %v6708_v44 }
 0x89f   : > { %6592 = vmatpush1.bf16.msra.mxu1 %v7656_v48  ;;  %v7168_v48 = vpack.c.bf16 %v6727_v63, %v6726_v46 }
 0x8a0   : > { %6674 = vmatpush1.bf16.msra.mxu0 %v7659_v50  ;;  %6593 = vmatprep.subr.bf16.mxu1 %v7664_v52  ;;  %v6710_v50 = vld [vmem:[%s9665_s6 + $0x40] sm:$0xff]  ;;  %v6711_v52 = vld [vmem:[%s9665_s6 + $0x48] sm:$0xff] }
 0x8a1   : > { %6675 = vmatprep.subr.bf16.mxu0 %v7667_v19  ;;  %v6728_v19 = vld [vmem:[%s9665_s6 + $0xd0] sm:$0xff] }
 0x8a3   : > { %6594 = vmatpush1.bf16.msra.mxu1 %v7662_v61  ;;  %v6729_v61 = vld [vmem:[%s9665_s6 + $0xd8] sm:$0xff] }
 0x8a4   : > { %6676 = vmatpush1.bf16.msra.mxu0 %v7665_v54  ;;  %6595 = vmatprep.subr.bf16.mxu1 %v7670_v7  ;;  %v7170_v54 = vpack.c.bf16 %v6711_v52, %v6710_v50  ;;  %v7172_v7 = vpack.c.bf16 %v6729_v61, %v6728_v19 }
 0x8a5   : > { %6677 = vmatprep.subr.bf16.mxu0 %v7673_v4  ;;  %v6712_v4 = vld [vmem:[%s9665_s6 + $0x50] sm:$0xff] }
 0x8a7   : > { %6596 = vmatpush1.bf16.msra.mxu1 %v7668_v56  ;;  %v6713_v56 = vld [vmem:[%s9665_s6 + $0x58] sm:$0xff] }
 0x8a8   : > { %6678 = vmatpush1.bf16.msra.mxu0 %v7671_v1  ;;  %6597 = vmatprep.subr.bf16.mxu1 %v7676_v59  ;;  %v7174_v1 = vpack.c.bf16 %v6713_v56, %v6712_v4  ;;  %v6730_v59 = vld [vmem:[%s9665_s6 + $0xe0] sm:$0xff] }
 0x8a9   : > { %6679 = vmatprep.subr.bf16.mxu0 %v7679_v20  ;;  %v6731_v20 = vld [vmem:[%s9665_s6 + $0xe8] sm:$0xff] }
 0x8ab   : > { %6598 = vmatpush1.bf16.msra.mxu1 %v7674_v9  ;;  %v7176_v9 = vpack.c.bf16 %v6731_v20, %v6730_v59 }
 0x8ac   : > { %6680 = vmatpush1.bf16.msra.mxu0 %v7677_v28  ;;  %6599 = vmatprep.subr.bf16.mxu1 %v7682_v62  ;;  %v6714_v28 = vld [vmem:[%s9665_s6 + $0x60] sm:$0xff]  ;;  %v6715_v62 = vld [vmem:[%s9665_s6 + $0x68] sm:$0xff] }
 0x8ad   : > { %6681 = vmatprep.subr.bf16.mxu0 %v7685_v24  ;;  %v7178_v24 = vpack.c.bf16 %v6715_v62, %v6714_v28 }
 0x8af   : > { %6600 = vmatpush1.bf16.msra.mxu1 %v7680_v13  ;;  %v6732_v13 = vld [vmem:[%s9665_s6 + $0xf0] sm:$0xff] }
 0x8b0   : > { %6682 = vmatpush1.bf16.msra.mxu0 %v7683_v32  ;;  %6601 = vmatprep.subr.bf16.mxu1 %v7688_v51  ;;  %v6733_v32 = vld [vmem:[%s9665_s6 + $0xf8] sm:$0xff] }
 0x8b1   : > { %6683 = vmatprep.subr.bf16.mxu0 %v7691_v2  ;;  %v7180_v51 = vpack.c.bf16 %v6733_v32, %v6732_v13  ;;  %v6716_v2 = vld [vmem:[%s9665_s6 + $0x70] sm:$0xff] }
 0x8b3   : > { %6602 = vmatpush1.bf16.msra.mxu1 %v7686_v38  ;;  %v6717_v38 = vld [vmem:[%s9665_s6 + $0x78] sm:$0xff] }
 0x8b4   : > { %6684 = vmatpush1.bf16.msra.mxu0 %v7689_v23  ;;  %6603 = vmatprep.subr.bf16.mxu1 %v7694_v5  ;;  %v7182_v23 = vpack.c.bf16 %v6717_v38, %v6716_v2  ;;  %v5826_v5 = vld [vmem:[#allocation12] sm:$0x3] }
 0x8b5   : > { %6685 = vmatprep.subr.bf16.mxu0 %v7697_v22  ;;  %v5831_v22 = vrot.slane %v5826_v5, %v9490_v39  ;;  %v7109_v39 = vld [vmem:[#allocation14] ss:$0 sm:$0xff] }
 0x8b7   : > { %6604 = vmatpush1.bf16.msra.mxu1 %v7692_v6  ;;  %v5835_v6 = vrot.slane %v5826_v5, %v9496_v58 }
 0x8b8   : > { %6686 = vmatpush1.bf16.msra.mxu0 %v7695_v53  ;;  %6605 = vmatprep.subr.bf16.mxu1 %v7700_v10 }
 0x8b9   : > { %6687 = vmatprep.subr.bf16.mxu0 %v7703_v27 }
 0x8bb   : > { %6606 = vmatpush1.bf16.msra.mxu1 %v7698_v11 }
 0x8bc   : > { %6688 = vmatpush1.bf16.msra.mxu0 %v7701_v12  ;;  %6607 = vmatprep.subr.bf16.mxu1 %v7706_v14 }
 0x8bd   : > { %6689 = vmatprep.subr.bf16.mxu0 %v7709_v16 }
 0x8bf   : > { %6608 = vmatpush1.bf16.msra.mxu1 %v7704_v18 }
 0x8c0   : > { %6690 = vmatpush1.bf16.msra.mxu0 %v7707_v29  ;;  %7153 = vmatprep.subr.bf16.mxu1 %v7152_v21 }
 0x8c2   : > { %6610 = vmatmul.mubr.bf16.vlgmr.msra.gmra.mrb[0].mxu1 %v5884_v25 }
 0x8c3   : > { %6692 = vmatmul.mubr.bf16.vlgmr.msra.gmra.mrb[0].mxu0 %v5885_v45  ;;  %7155 = vmatpush3.bf16.msra.mxu1 %v7154_v0 }
 0x8c4   : > { %7157 = vmatprep.subr.bf16.mxu1 %v7156_v30 }
 0x8c7   : > { %7159 = vmatpush3.bf16.msra.mxu1 %v7158_v57 }
 0x8c8   : > { %7161 = vmatprep.subr.bf16.mxu1 %v7160_v33 }
 0x8cb   : > { %7163 = vmatpush3.bf16.msra.mxu1 %v7162_v60 }
 0x8cc   : > { %7165 = vmatprep.subr.bf16.mxu1 %v7164_v42 }
 0x8cf   : > { %7167 = vmatpush3.bf16.msra.mxu1 %v7166_v47 }
 0x8d0   : > { %7169 = vmatprep.subr.bf16.mxu1 %v7168_v48 }
 0x8d3   : > { %7171 = vmatpush3.bf16.msra.mxu1 %v7170_v54 }
 0x8d4   : > { %7173 = vmatprep.subr.bf16.mxu1 %v7172_v7 }
 0x8d7   : > { %7175 = vmatpush3.bf16.msra.mxu1 %v7174_v1 }
 0x8d8   : > { %7177 = vmatprep.subr.bf16.mxu1 %v7176_v9 }
 0x8db   : > { %7179 = vmatpush3.bf16.msra.mxu1 %v7178_v24 }
 0x8dc   : > { %7181 = vmatprep.subr.bf16.mxu1 %v7180_v51 }
 0x8df   : > { %7183 = vmatpush3.bf16.msra.mxu1 %v7182_v23 }
 0x995   : > { %v6611_v53 = vpop.f32.mrb[0].mxu1 }
 0x996   : > { %v6693_v10 = vpop.f32.mrb[0].mxu0  ;;  %v7392_v27 = vadd.f32 %v6611_v53, %v5831_v22  ;;  %v6613_v11 = vpop.f32.mrb[1].mxu1 }
 0x997   : > { %v6695_v12 = vpop.f32.mrb[1].mxu0  ;;  %v7394_v14 = vadd.f32 %v6613_v11, %v5835_v6  ;;  %v6615_v16 = vpop.f32.mrb[2].mxu1 }
 0x998   : > { %v6697_v37 = vpop.f32.mrb[2].mxu0  ;;  %v7393_v17 = vadd.f32 %v7392_v27, %v6693_v10  ;;  %v6616_v18 = vpop.f32.mrb[3].mxu1 }
 0x999   : > { %v6698_v29 = vpop.f32.mrb[3].mxu0  ;;  %v7395_v21 = vadd.f32 %v7394_v14, %v6695_v12 }
 0x99a   : > { %v6700_v35 = vmax.f32 %v7393_v17, 0.0 }
 0x99b   : > { %v6701_v43 = vmax.f32 %v7395_v21, 0.0 }
 0x99d   : > { %6805 = vmatprep.mubr.f32.mxu1 %v6701_v43 }
 0x99e   : > { %6806 = vmatmul.mubr.f32.vlgmr.msra.gmra.mrb[4].mxu1 %v6700_v35 }
 0xa71   : > { %v7149_v8 = vpop.f32.mrb[4].mxu1 }
 0xa72   : > { %v7150_v36 = vpop.f32.mrb[5].mxu1 }
 0xa73   : > { %v7151_v58 = vadd.f32 %v7150_v36, %v7149_v8 }
 0xa75   : > { %v6808_v25 = vadd.f32 %v7151_v58, %v7109_v39 }
 0xa77   : > { %6812 = vst.msk [vmem:[#allocation15] sm:$0x3] %vm6811_vm0, %v6808_v25 }
 0xa78 PF: > { %p7464_p1 = scmp.eq.s32.totalorder %s8073_s9, 1  ;;  %s8008_s14 = smov [#allocation15]  }
 0xa79   : > { %s6820_s25 = sshll.u32 %s8008_s14, 4  ;;  %s6821_s25 = int_to_ptr.vmem [resolvable:$true] %s6820_s25 }
 0xa7a   : > { %s7912_s10 = scalar_lea.vmem %s6821_s25, 32  ;;  %p7919_p12 = scmp.lt.s32.totalorder %s6821_s25, %s6821_s25 }
 0xa7b   : > { %p7913_p8 = scmp.ne.s32.totalorder %s6821_s25, %s7912_s10  ;;  %p7920_p5 = scmp.lt.s32.totalorder %s7912_s10, %s7912_s10 }
 0xa7d   : > { %p7914_p4 = pnand %p7913_p8, %p7464_p1  ;;  %p7921_p0 = por %p7920_p5, %p7919_p12 }
 0xa7f   : > { %p7915_p10 = pneg %p7914_p4 }
 0xa81   : > { %p7922_p13 = pnand %p7921_p0, %p7915_p10 }
 0xa83   : > { %7925 = shalt.err (!%p7922_p13)
}
 0xa84   : > { %s9711_s17 = sld [smem:[#allocation27_spill]] }
 0xa8a   : > { %s7926_s16 = scalar_lea.hbm %s9711_s17, 32 }
 0xa8b   : > { %p7927_p11 = scmp.ne.s32.totalorder %s9711_s17, %s7926_s16  ;;  %p7932_p2 = scmp.lt.u32.totalorder %s7926_s16, %s9711_s17 }
 0xa8d   : > { %p7928_p3 = pnand %p7927_p11, %p7464_p1 }
 0xa8f   : > { %p7929_p6 = pneg %p7928_p3 }
 0xa91   : > { %p7934_p9 = pnand %p7932_p2, %p7929_p6 }
 0xa93   : > { %7937 = shalt.err (!%p7934_p9)
}
 0xa94   : > { %7429 = dma.vmem_to_hbm [thread:$0]  (%p7464_p1), %s6821_s25, 32, %s9711_s17, [#allocation5]  }
 0xa95   : > { %7975 = dma.done.wait (%p7464_p1), [#allocation5], 32  }
 0xa96   : > { %7977 = vsyncadd (%p7464_p1), [#allocation5], 4294967264 }
 0xa97 PF: > { %s9712_s30 = sld [smem:[#allocation22_spill]]  ;;  %s9713_s26 = sld [smem:[#allocation23_spill]] }
 0xa98   : > { %s9714_s27 = smov %s7984_s28  ;;  %s9715_s28 = smov %s7988_s29 }
 0xa9d   : > { %p24_p7 = scmp.ge.s32.totalorder %s9712_s30, 4   ;;  %s9716_s29 = smov %s9713_s26 }
 0xa9f   :  { %26 = sbr.rel (!%p24_p7) target bundleno = 13 (0xd), region = 135 }
 0xaa6   :  { %6833 = vsyncpa [#allocation4], 1 }
 0xaa7   :  { %6835 = vsyncpa [#allocation4 + $0x1], 1 }
 0xaa8   :  { %6836 = vsyncpa [#allocation7], 1 }
 0xaa9   :  { %6838 = vsyncpa [#allocation7 + $0x1], 1 }
 0xaaa   :  { %6839 = vsyncpa [#allocation10], 1 }
 0xaab   :  { %6841 = vsyncpa [#allocation10 + $0x1], 1 }
 0xaac   :  { %6842 = vsyncpa [#allocation13], 1 }
 0xaad   :  { %6843 = vsyncpa [#allocation5], 1 }
 0xaae   :  { %6845 = vsyncpa [#allocation5 + $0x1], 1 }

</bundles_post_ra>
